<compile_context>
chip_gen: v7x
topology: tpu7x:2x2x1
jax: 0.10.0
libtpu: 0.0.40
codegen_flags: <defaults>
</compile_context>

<pallas_src>
import jax
import jax.numpy as jnp
from jax.experimental import pallas as pl
from jax.experimental.pallas import tpu as pltpu

# ----------------------------- scaled-down BERT config --------------------------------
B = 32             # batch (raised so BS = 256 token rows per call)
S = 8              # sequence length
BS = B * S         # flattened token axis (256)
TILE = 128         # token rows per grid step (= 16 sequences); fills the MXU M dimension
H = 128            # hidden size   (768 in bert-base, scaled down)
NH = 4             # attention heads (12 in bert-base)
DH = H // NH       # head dim
FF = 4 * H         # FFN intermediate size
L = 2              # encoder layers (12 in bert-base)
VOCAB = 100
NUM_CLASSES = 3
OUT_PAD = 128      # lane-dense padded logits width
LN_EPS = 1e-12

WFUSED = 3 * H + H + FF          # fused per-layer weight slab width: [Wqkv | Wo | W1] = 1024
VECW = max(FF, 3 * H)            # 512: width of the packed f32 bias/LN slab
R_EMB_G, R_EMB_B, R_POOL_B, R_FC_B = 0, 1, 2, 3   # fixed rows in the slab
NVEC_RAW = 4 + 8 * L             # + per layer: bqkv, bo, b1, b2, ln1_g, ln1_b, ln2_g, ln2_b
NVEC = ((NVEC_RAW + 7) // 8) * 8 # pad rows to a sublane multiple (24)


def _layer_base(l):
    return 4 + 8 * l


# ----------------------------------- helpers ------------------------------------------
def _layernorm(x, gamma, beta):
    # parallel reductions off x; var clamped >= 0 (catastrophic cancellation guard)
    mean = jnp.mean(x, axis=-1, keepdims=True)
    ex2 = jnp.mean(x * x, axis=-1, keepdims=True)
    var = jnp.maximum(ex2 - mean * mean, 0.0)
    return (x - mean) * jax.lax.rsqrt(var + LN_EPS) * gamma + beta


# ------------------------------- fused Pallas kernel -----------------------------------
def fused_bert_kernel(x_ref, mask_ref, wf_ref, w2_ref, wh_ref, vec_ref, o_ref):
    scale = 1.0 / (DH ** 0.5)
    mask_bias = mask_ref[...]                                        # (TILE, TILE) f32

    def vrow(r, w=H):                                                # static row/width slice
        return vec_ref[r:r + 1, :w]                                  # (1, w) f32

    # per-head lane masks (loop invariant -> hoisted out of the layer loop)
    lane = jax.lax.broadcasted_iota(jnp.int32, (1, H), 1)
    head_mask = [(lane >= h * DH) & (lane < (h + 1) * DH) for h in range(NH)]

    x = x_ref[...].astype(jnp.float32)                               # (TILE, H)
    x = _layernorm(x, vrow(R_EMB_G), vrow(R_EMB_B))

    # encoder layers, statically unrolled (L = 2)
    for l in range(L):
        base = _layer_base(l)

        # fused QKV projection: one 128x384 MXU matmul, bias added once
        qkv = jnp.dot(x.astype(jnp.bfloat16), wf_ref[l, :, :3 * H],
                      preferred_element_type=jnp.float32) + vrow(base + 0, 3 * H)
        q = qkv[:, 0 * H:1 * H].astype(jnp.bfloat16)                 # 128-lane aligned slices
        k = qkv[:, 1 * H:2 * H].astype(jnp.bfloat16)
        v = qkv[:, 2 * H:3 * H].astype(jnp.bfloat16)

        # block-diagonal-by-head K / V operands: head h keeps only its DH lanes, stacked
        # along sublanes -> all heads' scores / contexts become ONE wide matmul each.
        kbd = jnp.concatenate([jnp.where(head_mask[h], k, 0.0) for h in range(NH)],
                              axis=0)                                # (NH*TILE, H) bf16
        vbd = jnp.concatenate([jnp.where(head_mask[h], v, 0.0) for h in range(NH)],
                              axis=0)                                # (NH*TILE, H) bf16

        s = jax.lax.dot_general(q, kbd, (((1,), (1,)), ((), ())),
                                preferred_element_type=jnp.float32) * scale   # (TILE, NH*TILE)

        # per-head softmax on vreg-aligned 128-lane column blocks
        p_blocks = []
        for h in range(NH):
            sh = s[:, h * TILE:(h + 1) * TILE] + mask_bias
            m = jnp.max(sh, axis=-1, keepdims=True)
            e = jnp.exp(sh - m)
            p_blocks.append(e * pl.reciprocal(jnp.sum(e, axis=-1, keepdims=True), approx=True))
        p = jnp.concatenate(p_blocks, axis=1).astype(jnp.bfloat16)   # (TILE, NH*TILE)

        # context: one (128, NH*128) x (NH*128, 128) matmul; heads land in their own lanes
        ctx = jnp.dot(p, vbd, preferred_element_type=jnp.float32)    # (TILE, H)

        # output projection + residual + LN
        attn = jnp.dot(ctx.astype(jnp.bfloat16), wf_ref[l, :, 3 * H:4 * H],
                       preferred_element_type=jnp.float32) + vrow(base + 1)
        x = _layernorm(x + attn, vrow(base + 4), vrow(base + 5))

        # feed-forward: 128x512 and 512x128 matmuls, GELU on the EUP
        hmid = jnp.dot(x.astype(jnp.bfloat16), wf_ref[l, :, 4 * H:4 * H + FF],
                       preferred_element_type=jnp.float32) + vrow(base + 2, FF)
        # TODO(synk): HF bert-base uses exact erf GELU; tanh approximation used here.
        hmid = jax.nn.gelu(hmid, approximate=True)
        ffn = jnp.dot(hmid.astype(jnp.bfloat16), w2_ref[l],
                      preferred_element_type=jnp.float32) + vrow(base + 3)
        x = _layernorm(x + ffn, vrow(base + 6), vrow(base + 7))

    # BERT pooler + classifier on the full (TILE, H) slab (no mid-kernel CLS gather);
    # the host selects the CLS rows and the first NUM_CLASSES columns.
    pooled = jnp.tanh(jnp.dot(x.astype(jnp.bfloat16), wh_ref[:, :H],
                              preferred_element_type=jnp.float32) + vrow(R_POOL_B))
    # nn.Dropout(0.1) is identity at inference time.
    # TODO(synk): training-mode dropout would need pltpu.prng_seed/prng_random_bits.
    logits = jnp.dot(pooled.astype(jnp.bfloat16), wh_ref[:, H:],
                     preferred_element_type=jnp.float32) + vrow(R_FC_B, OUT_PAD)
    o_ref[...] = logits.astype(o_ref.dtype)                          # (TILE, OUT_PAD) unmasked vst


# -------------------------------- model (glue + kernel) --------------------------------
def sentiment_analysis_forward(input_ids, attention_mask, params):
    B_, S_ = input_ids.shape
    BS_ = B_ * S_
    assert BS_ % TILE == 0 and TILE % S_ == 0, "sequences must not straddle row tiles"
    num_tiles = BS_ // TILE

    # embedding gather is plain-JAX glue (dynamic gather has no clean Pallas win here)
    we = jnp.take(params['word_emb'], input_ids, axis=0)             # (B, S, H)
    pe = params['pos_emb'][None, :, :]
    te = params['type_emb'][0][None, None, :]
    x_flat = (we + pe + te).reshape(BS_, H)                          # (BS, H) pre-LN embeddings

    # Block-diagonal additive mask over the flattened token axis: 0 for same-sequence &
    # non-padded keys, -10000 otherwise (matches BERT extended mask; cross-sequence entries
    # also get -10000, which zeroes out after exp()).  Only the diagonal (TILE, TILE)
    # blocks are DMA'd via the BlockSpec index_map.
    batch_ids = jnp.repeat(jnp.arange(B_, dtype=jnp.int32), S_)
    same_batch = batch_ids[:, None] == batch_ids[None, :]
    key_valid = attention_mask.reshape(-1).astype(bool)
    mask_full = jnp.where(same_batch & key_valid[None, :], 0.0, -10000.0).astype(jnp.float32)

    # advisory cost estimate (all static Python ints)
    flops_layer = (2 * TILE * H * (3 * H) + 2 * TILE * H * (NH * TILE)
                   + 2 * TILE * (NH * TILE) * H + 2 * TILE * H * H
                   + 2 * TILE * H * FF + 2 * TILE * FF * H)
    flops = num_tiles * (L * flops_layer + 2 * TILE * H * H + 2 * TILE * H * OUT_PAD)
    transc = num_tiles * (L * (NH * TILE * TILE + TILE * FF) + TILE * H)
    bytes_accessed = (x_flat.size * 4 + num_tiles * TILE * TILE * 4 + BS_ * OUT_PAD * 4
                      + params['w_fused'].size * 2 + params['w2'].size * 2
                      + params['w_head'].size * 2 + params['vec'].size * 4)

    vmem = pltpu.MemorySpace.VMEM
    logits_pad = pl.pallas_call(
        fused_bert_kernel,
        out_shape=jax.ShapeDtypeStruct((BS_, OUT_PAD), jnp.float32),
        grid=(num_tiles,),
        in_specs=[
            pl.BlockSpec((TILE, H), lambda t: (t, 0), memory_space=vmem),        # x
            pl.BlockSpec((TILE, TILE), lambda t: (t, t), memory_space=vmem),     # mask diag block
            pl.BlockSpec((L, H, WFUSED), lambda t: (0, 0, 0), memory_space=vmem),  # [Wqkv|Wo|W1]
            pl.BlockSpec((L, FF, H), lambda t: (0, 0, 0), memory_space=vmem),    # W2
            pl.BlockSpec((H, H + OUT_PAD), lambda t: (0, 0), memory_space=vmem),  # [Wpool|Wfc]
            pl.BlockSpec((NVEC, VECW), lambda t: (0, 0), memory_space=vmem),     # bias/LN slab
        ],
        out_specs=pl.BlockSpec((TILE, OUT_PAD), lambda t: (t, 0), memory_space=vmem),
        compiler_params=pltpu.CompilerParams(dimension_semantics=("parallel",)),
        cost_estimate=pl.CostEstimate(flops=flops, transcendentals=transc,
                                      bytes_accessed=bytes_accessed),
    )(x_flat, mask_full, params['w_fused'], params['w2'], params['w_head'], params['vec'])

    # host-side: pick CLS rows (token 0 of each sequence) and the real 3 class columns
    return logits_pad.reshape(B_, S_, OUT_PAD)[:, 0, :NUM_CLASSES]   # (B, 3) logits


# ----------------------------------- parameters ----------------------------------------
def init_params(key):
    kiter = iter(jax.random.split(key, 64))

    def nrm(shape):
        return jax.random.normal(next(kiter), shape, jnp.float32) * 0.02

    # packed f32 slab: biases (zeros) + LN gammas (ones) / betas (zeros)
    vec = jnp.zeros((NVEC, VECW), jnp.float32)
    vec = vec.at[R_EMB_G, :H].set(1.0)                               # embedding LN gamma

    w_fused_layers, w2_layers = [], []
    for l in range(L):
        wq, wk, wv = nrm((H, H)), nrm((H, H)), nrm((H, H))
        wo = nrm((H, H))
        w1 = nrm((H, FF))
        w_fused_layers.append(jnp.concatenate([wq, wk, wv, wo, w1], axis=1))  # (H, WFUSED)
        w2_layers.append(nrm((FF, H)))
        base = _layer_base(l)
        vec = vec.at[base + 4, :H].set(1.0)                          # ln1 gamma
        vec = vec.at[base + 6, :H].set(1.0)                          # ln2 gamma

    pool_w = nrm((H, H))
    fc_w = nrm((H, NUM_CLASSES))
    fc_w_pad = jnp.zeros((H, OUT_PAD), jnp.float32).at[:, :NUM_CLASSES].set(fc_w)
    w_head = jnp.concatenate([pool_w, fc_w_pad], axis=1)             # (H, H + OUT_PAD)

    return dict(
        word_emb=nrm((VOCAB, H)),
        pos_emb=nrm((S, H)),
        type_emb=nrm((2, H)),
        w_fused=jnp.stack(w_fused_layers).astype(jnp.bfloat16),      # (L, H, 1024) bf16
        w2=jnp.stack(w2_layers).astype(jnp.bfloat16),                # (L, FF, H)   bf16
        w_head=w_head.astype(jnp.bfloat16),                          # (H, 256)     bf16
        vec=vec,                                                     # (24, 512)    f32
    )


# -------------------------------------- main --------------------------------------------
if __name__ == "__main__":
    key = jax.random.PRNGKey(0)
    pkey, ikey = jax.random.split(key)
    params = init_params(pkey)

    input_ids = jax.random.randint(ikey, (B, S), 0, VOCAB, dtype=jnp.int32)
    attention_mask = jnp.ones((B, S), jnp.int32).at[:, -2:].set(0)   # last 2 tokens padded

    fwd = jax.jit(sentiment_analysis_forward)
    logits = fwd(input_ids, attention_mask, params)
    jax.block_until_ready(logits)

    assert logits.shape == (B, NUM_CLASSES) and logits.dtype == jnp.float32
    assert bool(jnp.all(jnp.isfinite(logits)))
    print("KERNEL_OK")
</pallas_src>

<mosaic_0001>
module attributes {stable_mosaic.version = 11 : i64} {
  func.func @fused_bert_kernel(%arg0: i32, %arg1: memref<128x128xf32, #tpu.memory_space<vmem>>, %arg2: memref<128x128xf32, #tpu.memory_space<vmem>>, %arg3: memref<2x128x1024xbf16, #tpu.memory_space<vmem>>, %arg4: memref<2x512x128xbf16, #tpu.memory_space<vmem>>, %arg5: memref<128x256xbf16, #tpu.memory_space<vmem>>, %arg6: memref<24x512xf32, #tpu.memory_space<vmem>>, %arg7: memref<128x128xf32, #tpu.memory_space<vmem>>) attributes {dimension_semantics = [#tpu.dimension_semantics<parallel>], iteration_bounds = array<i64: 2>, scalar_prefetch = 0 : i64, scratch_operands = 0 : i64, tpu.core_type = #tpu.core_type<tc>, window_params = [{transform_indices = @transform_0, window_bounds = array<i64: 128, 128>}, {transform_indices = @transform_1, window_bounds = array<i64: 128, 128>}, {pipeline_mode = #tpu.pipeline_mode<synchronous>, transform_indices = @transform_2, window_bounds = array<i64: 2, 128, 1024>}, {pipeline_mode = #tpu.pipeline_mode<synchronous>, transform_indices = @transform_3, window_bounds = array<i64: 2, 512, 128>}, {pipeline_mode = #tpu.pipeline_mode<synchronous>, transform_indices = @transform_4, window_bounds = array<i64: 128, 256>}, {pipeline_mode = #tpu.pipeline_mode<synchronous>, transform_indices = @transform_5, window_bounds = array<i64: 24, 512>}, {transform_indices = @transform_6, window_bounds = array<i64: 128, 128>}]} {
    %c0 = arith.constant 0 : index
    %c0_0 = arith.constant 0 : index
    %0 = vector.load %arg2[%c0, %c0_0] : memref<128x128xf32, #tpu.memory_space<vmem>>, vector<128x128xf32>
    %1 = tpu.iota {dimensions = array<i32: 1>} : vector<1x128xi32>
    %c0_i32 = arith.constant 0 : i32
    %2 = vector.broadcast %c0_i32 : i32 to vector<1x128xi32>
    %3 = arith.cmpi sge, %1, %2 : vector<1x128xi32>
    %c32_i32 = arith.constant 32 : i32
    %4 = vector.broadcast %c32_i32 : i32 to vector<1x128xi32>
    %5 = arith.cmpi slt, %1, %4 : vector<1x128xi32>
    %6 = arith.andi %3, %5 : vector<1x128xi1>
    %c32_i32_1 = arith.constant 32 : i32
    %7 = vector.broadcast %c32_i32_1 : i32 to vector<1x128xi32>
    %8 = arith.cmpi sge, %1, %7 : vector<1x128xi32>
    %c64_i32 = arith.constant 64 : i32
    %9 = vector.broadcast %c64_i32 : i32 to vector<1x128xi32>
    %10 = arith.cmpi slt, %1, %9 : vector<1x128xi32>
    %11 = arith.andi %8, %10 : vector<1x128xi1>
    %c64_i32_2 = arith.constant 64 : i32
    %12 = vector.broadcast %c64_i32_2 : i32 to vector<1x128xi32>
    %13 = arith.cmpi sge, %1, %12 : vector<1x128xi32>
    %c96_i32 = arith.constant 96 : i32
    %14 = vector.broadcast %c96_i32 : i32 to vector<1x128xi32>
    %15 = arith.cmpi slt, %1, %14 : vector<1x128xi32>
    %16 = arith.andi %13, %15 : vector<1x128xi1>
    %c96_i32_3 = arith.constant 96 : i32
    %17 = vector.broadcast %c96_i32_3 : i32 to vector<1x128xi32>
    %18 = arith.cmpi sge, %1, %17 : vector<1x128xi32>
    %c128_i32 = arith.constant 128 : i32
    %19 = vector.broadcast %c128_i32 : i32 to vector<1x128xi32>
    %20 = arith.cmpi slt, %1, %19 : vector<1x128xi32>
    %21 = arith.andi %18, %20 : vector<1x128xi1>
    %c0_4 = arith.constant 0 : index
    %c0_5 = arith.constant 0 : index
    %22 = vector.load %arg1[%c0_4, %c0_5] : memref<128x128xf32, #tpu.memory_space<vmem>>, vector<128x128xf32>
    %c0_6 = arith.constant 0 : index
    %c0_7 = arith.constant 0 : index
    %23 = vector.load %arg6[%c0_6, %c0_7] : memref<24x512xf32, #tpu.memory_space<vmem>>, vector<1x128xf32>
    %c1 = arith.constant 1 : index
    %c0_8 = arith.constant 0 : index
    %24 = vector.load %arg6[%c1, %c0_8] : memref<24x512xf32, #tpu.memory_space<vmem>>, vector<1x128xf32>
    %cst = arith.constant dense<0.000000e+00> : vector<128xf32>
    %25 = vector.multi_reduction <add>, %22, %cst [1] : vector<128x128xf32> to vector<128xf32>
    %26 = vector.shape_cast %25 : vector<128xf32> to vector<128x1xf32>
    %cst_9 = arith.constant 1.280000e+02 : f32
    %27 = vector.broadcast %cst_9 : f32 to vector<128x1xf32>
    %28 = arith.divf %26, %27 : vector<128x1xf32>
    %29 = arith.mulf %22, %22 : vector<128x128xf32>
    %cst_10 = arith.constant dense<0.000000e+00> : vector<128xf32>
    %30 = vector.multi_reduction <add>, %29, %cst_10 [1] : vector<128x128xf32> to vector<128xf32>
    %31 = vector.shape_cast %30 : vector<128xf32> to vector<128x1xf32>
    %cst_11 = arith.constant 1.280000e+02 : f32
    %32 = vector.broadcast %cst_11 : f32 to vector<128x1xf32>
    %33 = arith.divf %31, %32 : vector<128x1xf32>
    %34 = arith.mulf %28, %28 : vector<128x1xf32>
    %35 = arith.subf %33, %34 : vector<128x1xf32>
    %cst_12 = arith.constant 0.000000e+00 : f32
    %36 = vector.broadcast %cst_12 : f32 to vector<128x1xf32>
    %37 = arith.maximumf %35, %36 : vector<128x1xf32>
    %38 = vector.broadcast %28 : vector<128x1xf32> to vector<128x128xf32>
    %39 = arith.subf %22, %38 : vector<128x128xf32>
    %cst_13 = arith.constant 9.99999996E-13 : f32
    %40 = vector.broadcast %cst_13 : f32 to vector<128x1xf32>
    %41 = arith.addf %37, %40 : vector<128x1xf32>
    %42 = math.rsqrt %41 : vector<128x1xf32>
    %43 = vector.broadcast %42 : vector<128x1xf32> to vector<128x128xf32>
    %44 = arith.mulf %39, %43 : vector<128x128xf32>
    %45 = vector.broadcast %23 : vector<1x128xf32> to vector<128x128xf32>
    %46 = arith.mulf %44, %45 : vector<128x128xf32>
    %47 = vector.broadcast %24 : vector<1x128xf32> to vector<128x128xf32>
    %48 = arith.addf %46, %47 : vector<128x128xf32>
    %49 = arith.truncf %48 : vector<128x128xf32> to vector<128x128xbf16>
    %c0_14 = arith.constant 0 : index
    %c0_15 = arith.constant 0 : index
    %c0_16 = arith.constant 0 : index
    %50 = vector.load %arg3[%c0_14, %c0_15, %c0_16] : memref<2x128x1024xbf16, #tpu.memory_space<vmem>>, vector<1x128x384xbf16>
    %51 = vector.shape_cast %50 : vector<1x128x384xbf16> to vector<128x384xbf16>
    %cst_17 = arith.constant dense<0.000000e+00> : vector<128x384xf32>
    %52 = tpu.matmul %49, %51, %cst_17 {dimension_numbers = #tpu.dot_dimension_numbers<[1], [0], [0], [1], [0, 0, 1, 1], [], []>} : vector<128x128xbf16>, vector<128x384xbf16>, vector<128x384xf32> -> vector<128x384xf32>
    %c4 = arith.constant 4 : index
    %c0_18 = arith.constant 0 : index
    %53 = vector.load %arg6[%c4, %c0_18] : memref<24x512xf32, #tpu.memory_space<vmem>>, vector<1x384xf32>
    %54 = vector.broadcast %53 : vector<1x384xf32> to vector<128x384xf32>
    %55 = arith.addf %52, %54 : vector<128x384xf32>
    %56 = vector.extract_strided_slice %55 {offsets = [0, 0], sizes = [128, 128], strides = [1, 1]} : vector<128x384xf32> to vector<128x128xf32>
    %57 = arith.truncf %56 : vector<128x128xf32> to vector<128x128xbf16>
    %58 = vector.extract_strided_slice %55 {offsets = [0, 128], sizes = [128, 128], strides = [1, 1]} : vector<128x384xf32> to vector<128x128xf32>
    %59 = arith.truncf %58 : vector<128x128xf32> to vector<128x128xbf16>
    %60 = vector.extract_strided_slice %55 {offsets = [0, 256], sizes = [128, 128], strides = [1, 1]} : vector<128x384xf32> to vector<128x128xf32>
    %61 = arith.truncf %60 : vector<128x128xf32> to vector<128x128xbf16>
    %cst_19 = arith.constant 0.000000e+00 : f32
    %62 = arith.truncf %cst_19 : f32 to bf16
    %63 = vector.shape_cast %6 : vector<1x128xi1> to vector<1x128xi1>
    %64 = vector.broadcast %63 : vector<1x128xi1> to vector<128x128xi1>
    %65 = vector.broadcast %62 : bf16 to vector<128x128xbf16>
    %66 = arith.select %64, %59, %65 : vector<128x128xi1>, vector<128x128xbf16>
    %cst_20 = arith.constant 0.000000e+00 : f32
    %67 = arith.truncf %cst_20 : f32 to bf16
    %68 = vector.shape_cast %11 : vector<1x128xi1> to vector<1x128xi1>
    %69 = vector.broadcast %68 : vector<1x128xi1> to vector<128x128xi1>
    %70 = vector.broadcast %67 : bf16 to vector<128x128xbf16>
    %71 = arith.select %69, %59, %70 : vector<128x128xi1>, vector<128x128xbf16>
    %cst_21 = arith.constant 0.000000e+00 : f32
    %72 = arith.truncf %cst_21 : f32 to bf16
    %73 = vector.shape_cast %16 : vector<1x128xi1> to vector<1x128xi1>
    %74 = vector.broadcast %73 : vector<1x128xi1> to vector<128x128xi1>
    %75 = vector.broadcast %72 : bf16 to vector<128x128xbf16>
    %76 = arith.select %74, %59, %75 : vector<128x128xi1>, vector<128x128xbf16>
    %cst_22 = arith.constant 0.000000e+00 : f32
    %77 = arith.truncf %cst_22 : f32 to bf16
    %78 = vector.shape_cast %21 : vector<1x128xi1> to vector<1x128xi1>
    %79 = vector.broadcast %78 : vector<1x128xi1> to vector<128x128xi1>
    %80 = vector.broadcast %77 : bf16 to vector<128x128xbf16>
    %81 = arith.select %79, %59, %80 : vector<128x128xi1>, vector<128x128xbf16>
    %82 = tpu.concatenate %66, %71, %76, %81 in 0 : vector<128x128xbf16>, vector<128x128xbf16>, vector<128x128xbf16>, vector<128x128xbf16> -> vector<512x128xbf16>
    %cst_23 = arith.constant 0.000000e+00 : f32
    %83 = arith.truncf %cst_23 : f32 to bf16
    %84 = vector.shape_cast %6 : vector<1x128xi1> to vector<1x128xi1>
    %85 = vector.broadcast %84 : vector<1x128xi1> to vector<128x128xi1>
    %86 = vector.broadcast %83 : bf16 to vector<128x128xbf16>
    %87 = arith.select %85, %61, %86 : vector<128x128xi1>, vector<128x128xbf16>
    %cst_24 = arith.constant 0.000000e+00 : f32
    %88 = arith.truncf %cst_24 : f32 to bf16
    %89 = vector.shape_cast %11 : vector<1x128xi1> to vector<1x128xi1>
    %90 = vector.broadcast %89 : vector<1x128xi1> to vector<128x128xi1>
    %91 = vector.broadcast %88 : bf16 to vector<128x128xbf16>
    %92 = arith.select %90, %61, %91 : vector<128x128xi1>, vector<128x128xbf16>
    %cst_25 = arith.constant 0.000000e+00 : f32
    %93 = arith.truncf %cst_25 : f32 to bf16
    %94 = vector.shape_cast %16 : vector<1x128xi1> to vector<1x128xi1>
    %95 = vector.broadcast %94 : vector<1x128xi1> to vector<128x128xi1>
    %96 = vector.broadcast %93 : bf16 to vector<128x128xbf16>
    %97 = arith.select %95, %61, %96 : vector<128x128xi1>, vector<128x128xbf16>
    %cst_26 = arith.constant 0.000000e+00 : f32
    %98 = arith.truncf %cst_26 : f32 to bf16
    %99 = vector.shape_cast %21 : vector<1x128xi1> to vector<1x128xi1>
    %100 = vector.broadcast %99 : vector<1x128xi1> to vector<128x128xi1>
    %101 = vector.broadcast %98 : bf16 to vector<128x128xbf16>
    %102 = arith.select %100, %61, %101 : vector<128x128xi1>, vector<128x128xbf16>
    %103 = tpu.concatenate %87, %92, %97, %102 in 0 : vector<128x128xbf16>, vector<128x128xbf16>, vector<128x128xbf16>, vector<128x128xbf16> -> vector<512x128xbf16>
    %cst_27 = arith.constant dense<0.000000e+00> : vector<128x512xf32>
    %104 = tpu.matmul %57, %82, %cst_27 {dimension_numbers = #tpu.dot_dimension_numbers<[1], [1], [0], [0], [0, 0, 1, 0], [], []>} : vector<128x128xbf16>, vector<512x128xbf16>, vector<128x512xf32> -> vector<128x512xf32>
    %cst_28 = arith.constant 0.176776692 : f32
    %105 = vector.broadcast %cst_28 : f32 to vector<128x512xf32>
    %106 = arith.mulf %104, %105 : vector<128x512xf32>
    %107 = vector.extract_strided_slice %106 {offsets = [0, 0], sizes = [128, 128], strides = [1, 1]} : vector<128x512xf32> to vector<128x128xf32>
    %108 = arith.addf %107, %0 : vector<128x128xf32>
    %cst_29 = arith.constant dense<0xFF800000> : vector<128xf32>
    %109 = vector.multi_reduction <maximumf>, %108, %cst_29 [1] : vector<128x128xf32> to vector<128xf32>
    %110 = vector.shape_cast %109 : vector<128xf32> to vector<128x1xf32>
    %111 = vector.broadcast %110 : vector<128x1xf32> to vector<128x128xf32>
    %112 = arith.subf %108, %111 : vector<128x128xf32>
    %113 = math.exp %112 : vector<128x128xf32>
    %cst_30 = arith.constant dense<0.000000e+00> : vector<128xf32>
    %114 = vector.multi_reduction <add>, %113, %cst_30 [1] : vector<128x128xf32> to vector<128xf32>
    %115 = vector.shape_cast %114 : vector<128xf32> to vector<128x1xf32>
    %116 = tpu.reciprocal %115 {approx = true} : vector<128x1xf32> -> vector<128x1xf32>
    %117 = vector.broadcast %116 : vector<128x1xf32> to vector<128x128xf32>
    %118 = arith.mulf %113, %117 : vector<128x128xf32>
    %119 = vector.extract_strided_slice %106 {offsets = [0, 128], sizes = [128, 128], strides = [1, 1]} : vector<128x512xf32> to vector<128x128xf32>
    %120 = arith.addf %119, %0 : vector<128x128xf32>
    %cst_31 = arith.constant dense<0xFF800000> : vector<128xf32>
    %121 = vector.multi_reduction <maximumf>, %120, %cst_31 [1] : vector<128x128xf32> to vector<128xf32>
    %122 = vector.shape_cast %121 : vector<128xf32> to vector<128x1xf32>
    %123 = vector.broadcast %122 : vector<128x1xf32> to vector<128x128xf32>
    %124 = arith.subf %120, %123 : vector<128x128xf32>
    %125 = math.exp %124 : vector<128x128xf32>
    %cst_32 = arith.constant dense<0.000000e+00> : vector<128xf32>
    %126 = vector.multi_reduction <add>, %125, %cst_32 [1] : vector<128x128xf32> to vector<128xf32>
    %127 = vector.shape_cast %126 : vector<128xf32> to vector<128x1xf32>
    %128 = tpu.reciprocal %127 {approx = true} : vector<128x1xf32> -> vector<128x1xf32>
    %129 = vector.broadcast %128 : vector<128x1xf32> to vector<128x128xf32>
    %130 = arith.mulf %125, %129 : vector<128x128xf32>
    %131 = vector.extract_strided_slice %106 {offsets = [0, 256], sizes = [128, 128], strides = [1, 1]} : vector<128x512xf32> to vector<128x128xf32>
    %132 = arith.addf %131, %0 : vector<128x128xf32>
    %cst_33 = arith.constant dense<0xFF800000> : vector<128xf32>
    %133 = vector.multi_reduction <maximumf>, %132, %cst_33 [1] : vector<128x128xf32> to vector<128xf32>
    %134 = vector.shape_cast %133 : vector<128xf32> to vector<128x1xf32>
    %135 = vector.broadcast %134 : vector<128x1xf32> to vector<128x128xf32>
    %136 = arith.subf %132, %135 : vector<128x128xf32>
    %137 = math.exp %136 : vector<128x128xf32>
    %cst_34 = arith.constant dense<0.000000e+00> : vector<128xf32>
    %138 = vector.multi_reduction <add>, %137, %cst_34 [1] : vector<128x128xf32> to vector<128xf32>
    %139 = vector.shape_cast %138 : vector<128xf32> to vector<128x1xf32>
    %140 = tpu.reciprocal %139 {approx = true} : vector<128x1xf32> -> vector<128x1xf32>
    %141 = vector.broadcast %140 : vector<128x1xf32> to vector<128x128xf32>
    %142 = arith.mulf %137, %141 : vector<128x128xf32>
    %143 = vector.extract_strided_slice %106 {offsets = [0, 384], sizes = [128, 128], strides = [1, 1]} : vector<128x512xf32> to vector<128x128xf32>
    %144 = arith.addf %143, %0 : vector<128x128xf32>
    %cst_35 = arith.constant dense<0xFF800000> : vector<128xf32>
    %145 = vector.multi_reduction <maximumf>, %144, %cst_35 [1] : vector<128x128xf32> to vector<128xf32>
    %146 = vector.shape_cast %145 : vector<128xf32> to vector<128x1xf32>
    %147 = vector.broadcast %146 : vector<128x1xf32> to vector<128x128xf32>
    %148 = arith.subf %144, %147 : vector<128x128xf32>
    %149 = math.exp %148 : vector<128x128xf32>
    %cst_36 = arith.constant dense<0.000000e+00> : vector<128xf32>
    %150 = vector.multi_reduction <add>, %149, %cst_36 [1] : vector<128x128xf32> to vector<128xf32>
    %151 = vector.shape_cast %150 : vector<128xf32> to vector<128x1xf32>
    %152 = tpu.reciprocal %151 {approx = true} : vector<128x1xf32> -> vector<128x1xf32>
    %153 = vector.broadcast %152 : vector<128x1xf32> to vector<128x128xf32>
    %154 = arith.mulf %149, %153 : vector<128x128xf32>
    %155 = tpu.concatenate %118, %130, %142, %154 in 1 : vector<128x128xf32>, vector<128x128xf32>, vector<128x128xf32>, vector<128x128xf32> -> vector<128x512xf32>
    %156 = arith.truncf %155 : vector<128x512xf32> to vector<128x512xbf16>
    %cst_37 = arith.constant dense<0.000000e+00> : vector<128x128xf32>
    %157 = tpu.matmul %156, %103, %cst_37 {dimension_numbers = #tpu.dot_dimension_numbers<[1], [0], [0], [1], [0, 0, 1, 1], [], []>} : vector<128x512xbf16>, vector<512x128xbf16>, vector<128x128xf32> -> vector<128x128xf32>
    %158 = arith.truncf %157 : vector<128x128xf32> to vector<128x128xbf16>
    %c0_38 = arith.constant 0 : index
    %c0_39 = arith.constant 0 : index
    %c384 = arith.constant 384 : index
    %159 = vector.load %arg3[%c0_38, %c0_39, %c384] : memref<2x128x1024xbf16, #tpu.memory_space<vmem>>, vector<1x128x128xbf16>
    %160 = vector.shape_cast %159 : vector<1x128x128xbf16> to vector<128x128xbf16>
    %cst_40 = arith.constant dense<0.000000e+00> : vector<128x128xf32>
    %161 = tpu.matmul %158, %160, %cst_40 {dimension_numbers = #tpu.dot_dimension_numbers<[1], [0], [0], [1], [0, 0, 1, 1], [], []>} : vector<128x128xbf16>, vector<128x128xbf16>, vector<128x128xf32> -> vector<128x128xf32>
    %c5 = arith.constant 5 : index
    %c0_41 = arith.constant 0 : index
    %162 = vector.load %arg6[%c5, %c0_41] : memref<24x512xf32, #tpu.memory_space<vmem>>, vector<1x128xf32>
    %163 = vector.broadcast %162 : vector<1x128xf32> to vector<128x128xf32>
    %164 = arith.addf %161, %163 : vector<128x128xf32>
    %165 = arith.addf %48, %164 : vector<128x128xf32>
    %c8 = arith.constant 8 : index
    %c0_42 = arith.constant 0 : index
    %166 = vector.load %arg6[%c8, %c0_42] : memref<24x512xf32, #tpu.memory_space<vmem>>, vector<1x128xf32>
    %c9 = arith.constant 9 : index
    %c0_43 = arith.constant 0 : index
    %167 = vector.load %arg6[%c9, %c0_43] : memref<24x512xf32, #tpu.memory_space<vmem>>, vector<1x128xf32>
    %cst_44 = arith.constant dense<0.000000e+00> : vector<128xf32>
    %168 = vector.multi_reduction <add>, %165, %cst_44 [1] : vector<128x128xf32> to vector<128xf32>
    %169 = vector.shape_cast %168 : vector<128xf32> to vector<128x1xf32>
    %cst_45 = arith.constant 1.280000e+02 : f32
    %170 = vector.broadcast %cst_45 : f32 to vector<128x1xf32>
    %171 = arith.divf %169, %170 : vector<128x1xf32>
    %172 = arith.mulf %165, %165 : vector<128x128xf32>
    %cst_46 = arith.constant dense<0.000000e+00> : vector<128xf32>
    %173 = vector.multi_reduction <add>, %172, %cst_46 [1] : vector<128x128xf32> to vector<128xf32>
    %174 = vector.shape_cast %173 : vector<128xf32> to vector<128x1xf32>
    %cst_47 = arith.constant 1.280000e+02 : f32
    %175 = vector.broadcast %cst_47 : f32 to vector<128x1xf32>
    %176 = arith.divf %174, %175 : vector<128x1xf32>
    %177 = arith.mulf %171, %171 : vector<128x1xf32>
    %178 = arith.subf %176, %177 : vector<128x1xf32>
    %cst_48 = arith.constant 0.000000e+00 : f32
    %179 = vector.broadcast %cst_48 : f32 to vector<128x1xf32>
    %180 = arith.maximumf %178, %179 : vector<128x1xf32>
    %181 = vector.broadcast %171 : vector<128x1xf32> to vector<128x128xf32>
    %182 = arith.subf %165, %181 : vector<128x128xf32>
    %cst_49 = arith.constant 9.99999996E-13 : f32
    %183 = vector.broadcast %cst_49 : f32 to vector<128x1xf32>
    %184 = arith.addf %180, %183 : vector<128x1xf32>
    %185 = math.rsqrt %184 : vector<128x1xf32>
    %186 = vector.broadcast %185 : vector<128x1xf32> to vector<128x128xf32>
    %187 = arith.mulf %182, %186 : vector<128x128xf32>
    %188 = vector.broadcast %166 : vector<1x128xf32> to vector<128x128xf32>
    %189 = arith.mulf %187, %188 : vector<128x128xf32>
    %190 = vector.broadcast %167 : vector<1x128xf32> to vector<128x128xf32>
    %191 = arith.addf %189, %190 : vector<128x128xf32>
    %192 = arith.truncf %191 : vector<128x128xf32> to vector<128x128xbf16>
    %c0_50 = arith.constant 0 : index
    %c0_51 = arith.constant 0 : index
    %c512 = arith.constant 512 : index
    %193 = vector.load %arg3[%c0_50, %c0_51, %c512] : memref<2x128x1024xbf16, #tpu.memory_space<vmem>>, vector<1x128x512xbf16>
    %194 = vector.shape_cast %193 : vector<1x128x512xbf16> to vector<128x512xbf16>
    %cst_52 = arith.constant dense<0.000000e+00> : vector<128x512xf32>
    %195 = tpu.matmul %192, %194, %cst_52 {dimension_numbers = #tpu.dot_dimension_numbers<[1], [0], [0], [1], [0, 0, 1, 1], [], []>} : vector<128x128xbf16>, vector<128x512xbf16>, vector<128x512xf32> -> vector<128x512xf32>
    %c6 = arith.constant 6 : index
    %c0_53 = arith.constant 0 : index
    %196 = vector.load %arg6[%c6, %c0_53] : memref<24x512xf32, #tpu.memory_space<vmem>>, vector<1x512xf32>
    %197 = vector.broadcast %196 : vector<1x512xf32> to vector<128x512xf32>
    %198 = arith.addf %195, %197 : vector<128x512xf32>
    %199 = arith.mulf %198, %198 : vector<128x512xf32>
    %200 = arith.mulf %198, %199 : vector<128x512xf32>
    %cst_54 = arith.constant 4.471500e-02 : f32
    %201 = vector.broadcast %cst_54 : f32 to vector<128x512xf32>
    %202 = arith.mulf %201, %200 : vector<128x512xf32>
    %203 = arith.addf %198, %202 : vector<128x512xf32>
    %cst_55 = arith.constant 0.797884583 : f32
    %204 = vector.broadcast %cst_55 : f32 to vector<128x512xf32>
    %205 = arith.mulf %204, %203 : vector<128x512xf32>
    %206 = math.tanh %205 : vector<128x512xf32>
    %cst_56 = arith.constant 1.000000e+00 : f32
    %207 = vector.broadcast %cst_56 : f32 to vector<128x512xf32>
    %208 = arith.addf %207, %206 : vector<128x512xf32>
    %cst_57 = arith.constant 5.000000e-01 : f32
    %209 = vector.broadcast %cst_57 : f32 to vector<128x512xf32>
    %210 = arith.mulf %209, %208 : vector<128x512xf32>
    %211 = arith.mulf %198, %210 : vector<128x512xf32>
    %212 = arith.truncf %211 : vector<128x512xf32> to vector<128x512xbf16>
    %c0_58 = arith.constant 0 : index
    %c0_59 = arith.constant 0 : index
    %c0_60 = arith.constant 0 : index
    %213 = vector.load %arg4[%c0_58, %c0_59, %c0_60] : memref<2x512x128xbf16, #tpu.memory_space<vmem>>, vector<1x512x128xbf16>
    %214 = vector.shape_cast %213 : vector<1x512x128xbf16> to vector<512x128xbf16>
    %cst_61 = arith.constant dense<0.000000e+00> : vector<128x128xf32>
    %215 = tpu.matmul %212, %214, %cst_61 {dimension_numbers = #tpu.dot_dimension_numbers<[1], [0], [0], [1], [0, 0, 1, 1], [], []>} : vector<128x512xbf16>, vector<512x128xbf16>, vector<128x128xf32> -> vector<128x128xf32>
    %c7 = arith.constant 7 : index
    %c0_62 = arith.constant 0 : index
    %216 = vector.load %arg6[%c7, %c0_62] : memref<24x512xf32, #tpu.memory_space<vmem>>, vector<1x128xf32>
    %217 = vector.broadcast %216 : vector<1x128xf32> to vector<128x128xf32>
    %218 = arith.addf %215, %217 : vector<128x128xf32>
    %219 = arith.addf %191, %218 : vector<128x128xf32>
    %c10 = arith.constant 10 : index
    %c0_63 = arith.constant 0 : index
    %220 = vector.load %arg6[%c10, %c0_63] : memref<24x512xf32, #tpu.memory_space<vmem>>, vector<1x128xf32>
    %c11 = arith.constant 11 : index
    %c0_64 = arith.constant 0 : index
    %221 = vector.load %arg6[%c11, %c0_64] : memref<24x512xf32, #tpu.memory_space<vmem>>, vector<1x128xf32>
    %cst_65 = arith.constant dense<0.000000e+00> : vector<128xf32>
    %222 = vector.multi_reduction <add>, %219, %cst_65 [1] : vector<128x128xf32> to vector<128xf32>
    %223 = vector.shape_cast %222 : vector<128xf32> to vector<128x1xf32>
    %cst_66 = arith.constant 1.280000e+02 : f32
    %224 = vector.broadcast %cst_66 : f32 to vector<128x1xf32>
    %225 = arith.divf %223, %224 : vector<128x1xf32>
    %226 = arith.mulf %219, %219 : vector<128x128xf32>
    %cst_67 = arith.constant dense<0.000000e+00> : vector<128xf32>
    %227 = vector.multi_reduction <add>, %226, %cst_67 [1] : vector<128x128xf32> to vector<128xf32>
    %228 = vector.shape_cast %227 : vector<128xf32> to vector<128x1xf32>
    %cst_68 = arith.constant 1.280000e+02 : f32
    %229 = vector.broadcast %cst_68 : f32 to vector<128x1xf32>
    %230 = arith.divf %228, %229 : vector<128x1xf32>
    %231 = arith.mulf %225, %225 : vector<128x1xf32>
    %232 = arith.subf %230, %231 : vector<128x1xf32>
    %cst_69 = arith.constant 0.000000e+00 : f32
    %233 = vector.broadcast %cst_69 : f32 to vector<128x1xf32>
    %234 = arith.maximumf %232, %233 : vector<128x1xf32>
    %235 = vector.broadcast %225 : vector<128x1xf32> to vector<128x128xf32>
    %236 = arith.subf %219, %235 : vector<128x128xf32>
    %cst_70 = arith.constant 9.99999996E-13 : f32
    %237 = vector.broadcast %cst_70 : f32 to vector<128x1xf32>
    %238 = arith.addf %234, %237 : vector<128x1xf32>
    %239 = math.rsqrt %238 : vector<128x1xf32>
    %240 = vector.broadcast %239 : vector<128x1xf32> to vector<128x128xf32>
    %241 = arith.mulf %236, %240 : vector<128x128xf32>
    %242 = vector.broadcast %220 : vector<1x128xf32> to vector<128x128xf32>
    %243 = arith.mulf %241, %242 : vector<128x128xf32>
    %244 = vector.broadcast %221 : vector<1x128xf32> to vector<128x128xf32>
    %245 = arith.addf %243, %244 : vector<128x128xf32>
    %246 = arith.truncf %245 : vector<128x128xf32> to vector<128x128xbf16>
    %c1_71 = arith.constant 1 : index
    %c0_72 = arith.constant 0 : index
    %c0_73 = arith.constant 0 : index
    %247 = vector.load %arg3[%c1_71, %c0_72, %c0_73] : memref<2x128x1024xbf16, #tpu.memory_space<vmem>>, vector<1x128x384xbf16>
    %248 = vector.shape_cast %247 : vector<1x128x384xbf16> to vector<128x384xbf16>
    %cst_74 = arith.constant dense<0.000000e+00> : vector<128x384xf32>
    %249 = tpu.matmul %246, %248, %cst_74 {dimension_numbers = #tpu.dot_dimension_numbers<[1], [0], [0], [1], [0, 0, 1, 1], [], []>} : vector<128x128xbf16>, vector<128x384xbf16>, vector<128x384xf32> -> vector<128x384xf32>
    %c12 = arith.constant 12 : index
    %c0_75 = arith.constant 0 : index
    %250 = vector.load %arg6[%c12, %c0_75] : memref<24x512xf32, #tpu.memory_space<vmem>>, vector<1x384xf32>
    %251 = vector.broadcast %250 : vector<1x384xf32> to vector<128x384xf32>
    %252 = arith.addf %249, %251 : vector<128x384xf32>
    %253 = vector.extract_strided_slice %252 {offsets = [0, 0], sizes = [128, 128], strides = [1, 1]} : vector<128x384xf32> to vector<128x128xf32>
    %254 = arith.truncf %253 : vector<128x128xf32> to vector<128x128xbf16>
    %255 = vector.extract_strided_slice %252 {offsets = [0, 128], sizes = [128, 128], strides = [1, 1]} : vector<128x384xf32> to vector<128x128xf32>
    %256 = arith.truncf %255 : vector<128x128xf32> to vector<128x128xbf16>
    %257 = vector.extract_strided_slice %252 {offsets = [0, 256], sizes = [128, 128], strides = [1, 1]} : vector<128x384xf32> to vector<128x128xf32>
    %258 = arith.truncf %257 : vector<128x128xf32> to vector<128x128xbf16>
    %cst_76 = arith.constant 0.000000e+00 : f32
    %259 = arith.truncf %cst_76 : f32 to bf16
    %260 = vector.shape_cast %6 : vector<1x128xi1> to vector<1x128xi1>
    %261 = vector.broadcast %260 : vector<1x128xi1> to vector<128x128xi1>
    %262 = vector.broadcast %259 : bf16 to vector<128x128xbf16>
    %263 = arith.select %261, %256, %262 : vector<128x128xi1>, vector<128x128xbf16>
    %cst_77 = arith.constant 0.000000e+00 : f32
    %264 = arith.truncf %cst_77 : f32 to bf16
    %265 = vector.shape_cast %11 : vector<1x128xi1> to vector<1x128xi1>
    %266 = vector.broadcast %265 : vector<1x128xi1> to vector<128x128xi1>
    %267 = vector.broadcast %264 : bf16 to vector<128x128xbf16>
    %268 = arith.select %266, %256, %267 : vector<128x128xi1>, vector<128x128xbf16>
    %cst_78 = arith.constant 0.000000e+00 : f32
    %269 = arith.truncf %cst_78 : f32 to bf16
    %270 = vector.shape_cast %16 : vector<1x128xi1> to vector<1x128xi1>
    %271 = vector.broadcast %270 : vector<1x128xi1> to vector<128x128xi1>
    %272 = vector.broadcast %269 : bf16 to vector<128x128xbf16>
    %273 = arith.select %271, %256, %272 : vector<128x128xi1>, vector<128x128xbf16>
    %cst_79 = arith.constant 0.000000e+00 : f32
    %274 = arith.truncf %cst_79 : f32 to bf16
    %275 = vector.shape_cast %21 : vector<1x128xi1> to vector<1x128xi1>
    %276 = vector.broadcast %275 : vector<1x128xi1> to vector<128x128xi1>
    %277 = vector.broadcast %274 : bf16 to vector<128x128xbf16>
    %278 = arith.select %276, %256, %277 : vector<128x128xi1>, vector<128x128xbf16>
    %279 = tpu.concatenate %263, %268, %273, %278 in 0 : vector<128x128xbf16>, vector<128x128xbf16>, vector<128x128xbf16>, vector<128x128xbf16> -> vector<512x128xbf16>
    %cst_80 = arith.constant 0.000000e+00 : f32
    %280 = arith.truncf %cst_80 : f32 to bf16
    %281 = vector.shape_cast %6 : vector<1x128xi1> to vector<1x128xi1>
    %282 = vector.broadcast %281 : vector<1x128xi1> to vector<128x128xi1>
    %283 = vector.broadcast %280 : bf16 to vector<128x128xbf16>
    %284 = arith.select %282, %258, %283 : vector<128x128xi1>, vector<128x128xbf16>
    %cst_81 = arith.constant 0.000000e+00 : f32
    %285 = arith.truncf %cst_81 : f32 to bf16
    %286 = vector.shape_cast %11 : vector<1x128xi1> to vector<1x128xi1>
    %287 = vector.broadcast %286 : vector<1x128xi1> to vector<128x128xi1>
    %288 = vector.broadcast %285 : bf16 to vector<128x128xbf16>
    %289 = arith.select %287, %258, %288 : vector<128x128xi1>, vector<128x128xbf16>
    %cst_82 = arith.constant 0.000000e+00 : f32
    %290 = arith.truncf %cst_82 : f32 to bf16
    %291 = vector.shape_cast %16 : vector<1x128xi1> to vector<1x128xi1>
    %292 = vector.broadcast %291 : vector<1x128xi1> to vector<128x128xi1>
    %293 = vector.broadcast %290 : bf16 to vector<128x128xbf16>
    %294 = arith.select %292, %258, %293 : vector<128x128xi1>, vector<128x128xbf16>
    %cst_83 = arith.constant 0.000000e+00 : f32
    %295 = arith.truncf %cst_83 : f32 to bf16
    %296 = vector.shape_cast %21 : vector<1x128xi1> to vector<1x128xi1>
    %297 = vector.broadcast %296 : vector<1x128xi1> to vector<128x128xi1>
    %298 = vector.broadcast %295 : bf16 to vector<128x128xbf16>
    %299 = arith.select %297, %258, %298 : vector<128x128xi1>, vector<128x128xbf16>
    %300 = tpu.concatenate %284, %289, %294, %299 in 0 : vector<128x128xbf16>, vector<128x128xbf16>, vector<128x128xbf16>, vector<128x128xbf16> -> vector<512x128xbf16>
    %cst_84 = arith.constant dense<0.000000e+00> : vector<128x512xf32>
    %301 = tpu.matmul %254, %279, %cst_84 {dimension_numbers = #tpu.dot_dimension_numbers<[1], [1], [0], [0], [0, 0, 1, 0], [], []>} : vector<128x128xbf16>, vector<512x128xbf16>, vector<128x512xf32> -> vector<128x512xf32>
    %cst_85 = arith.constant 0.176776692 : f32
    %302 = vector.broadcast %cst_85 : f32 to vector<128x512xf32>
    %303 = arith.mulf %301, %302 : vector<128x512xf32>
    %304 = vector.extract_strided_slice %303 {offsets = [0, 0], sizes = [128, 128], strides = [1, 1]} : vector<128x512xf32> to vector<128x128xf32>
    %305 = arith.addf %304, %0 : vector<128x128xf32>
    %cst_86 = arith.constant dense<0xFF800000> : vector<128xf32>
    %306 = vector.multi_reduction <maximumf>, %305, %cst_86 [1] : vector<128x128xf32> to vector<128xf32>
    %307 = vector.shape_cast %306 : vector<128xf32> to vector<128x1xf32>
    %308 = vector.broadcast %307 : vector<128x1xf32> to vector<128x128xf32>
    %309 = arith.subf %305, %308 : vector<128x128xf32>
    %310 = math.exp %309 : vector<128x128xf32>
    %cst_87 = arith.constant dense<0.000000e+00> : vector<128xf32>
    %311 = vector.multi_reduction <add>, %310, %cst_87 [1] : vector<128x128xf32> to vector<128xf32>
    %312 = vector.shape_cast %311 : vector<128xf32> to vector<128x1xf32>
    %313 = tpu.reciprocal %312 {approx = true} : vector<128x1xf32> -> vector<128x1xf32>
    %314 = vector.broadcast %313 : vector<128x1xf32> to vector<128x128xf32>
    %315 = arith.mulf %310, %314 : vector<128x128xf32>
    %316 = vector.extract_strided_slice %303 {offsets = [0, 128], sizes = [128, 128], strides = [1, 1]} : vector<128x512xf32> to vector<128x128xf32>
    %317 = arith.addf %316, %0 : vector<128x128xf32>
    %cst_88 = arith.constant dense<0xFF800000> : vector<128xf32>
    %318 = vector.multi_reduction <maximumf>, %317, %cst_88 [1] : vector<128x128xf32> to vector<128xf32>
    %319 = vector.shape_cast %318 : vector<128xf32> to vector<128x1xf32>
    %320 = vector.broadcast %319 : vector<128x1xf32> to vector<128x128xf32>
    %321 = arith.subf %317, %320 : vector<128x128xf32>
    %322 = math.exp %321 : vector<128x128xf32>
    %cst_89 = arith.constant dense<0.000000e+00> : vector<128xf32>
    %323 = vector.multi_reduction <add>, %322, %cst_89 [1] : vector<128x128xf32> to vector<128xf32>
    %324 = vector.shape_cast %323 : vector<128xf32> to vector<128x1xf32>
    %325 = tpu.reciprocal %324 {approx = true} : vector<128x1xf32> -> vector<128x1xf32>
    %326 = vector.broadcast %325 : vector<128x1xf32> to vector<128x128xf32>
    %327 = arith.mulf %322, %326 : vector<128x128xf32>
    %328 = vector.extract_strided_slice %303 {offsets = [0, 256], sizes = [128, 128], strides = [1, 1]} : vector<128x512xf32> to vector<128x128xf32>
    %329 = arith.addf %328, %0 : vector<128x128xf32>
    %cst_90 = arith.constant dense<0xFF800000> : vector<128xf32>
    %330 = vector.multi_reduction <maximumf>, %329, %cst_90 [1] : vector<128x128xf32> to vector<128xf32>
    %331 = vector.shape_cast %330 : vector<128xf32> to vector<128x1xf32>
    %332 = vector.broadcast %331 : vector<128x1xf32> to vector<128x128xf32>
    %333 = arith.subf %329, %332 : vector<128x128xf32>
    %334 = math.exp %333 : vector<128x128xf32>
    %cst_91 = arith.constant dense<0.000000e+00> : vector<128xf32>
    %335 = vector.multi_reduction <add>, %334, %cst_91 [1] : vector<128x128xf32> to vector<128xf32>
    %336 = vector.shape_cast %335 : vector<128xf32> to vector<128x1xf32>
    %337 = tpu.reciprocal %336 {approx = true} : vector<128x1xf32> -> vector<128x1xf32>
    %338 = vector.broadcast %337 : vector<128x1xf32> to vector<128x128xf32>
    %339 = arith.mulf %334, %338 : vector<128x128xf32>
    %340 = vector.extract_strided_slice %303 {offsets = [0, 384], sizes = [128, 128], strides = [1, 1]} : vector<128x512xf32> to vector<128x128xf32>
    %341 = arith.addf %340, %0 : vector<128x128xf32>
    %cst_92 = arith.constant dense<0xFF800000> : vector<128xf32>
    %342 = vector.multi_reduction <maximumf>, %341, %cst_92 [1] : vector<128x128xf32> to vector<128xf32>
    %343 = vector.shape_cast %342 : vector<128xf32> to vector<128x1xf32>
    %344 = vector.broadcast %343 : vector<128x1xf32> to vector<128x128xf32>
    %345 = arith.subf %341, %344 : vector<128x128xf32>
    %346 = math.exp %345 : vector<128x128xf32>
    %cst_93 = arith.constant dense<0.000000e+00> : vector<128xf32>
    %347 = vector.multi_reduction <add>, %346, %cst_93 [1] : vector<128x128xf32> to vector<128xf32>
    %348 = vector.shape_cast %347 : vector<128xf32> to vector<128x1xf32>
    %349 = tpu.reciprocal %348 {approx = true} : vector<128x1xf32> -> vector<128x1xf32>
    %350 = vector.broadcast %349 : vector<128x1xf32> to vector<128x128xf32>
    %351 = arith.mulf %346, %350 : vector<128x128xf32>
    %352 = tpu.concatenate %315, %327, %339, %351 in 1 : vector<128x128xf32>, vector<128x128xf32>, vector<128x128xf32>, vector<128x128xf32> -> vector<128x512xf32>
    %353 = arith.truncf %352 : vector<128x512xf32> to vector<128x512xbf16>
    %cst_94 = arith.constant dense<0.000000e+00> : vector<128x128xf32>
    %354 = tpu.matmul %353, %300, %cst_94 {dimension_numbers = #tpu.dot_dimension_numbers<[1], [0], [0], [1], [0, 0, 1, 1], [], []>} : vector<128x512xbf16>, vector<512x128xbf16>, vector<128x128xf32> -> vector<128x128xf32>
    %355 = arith.truncf %354 : vector<128x128xf32> to vector<128x128xbf16>
    %c1_95 = arith.constant 1 : index
    %c0_96 = arith.constant 0 : index
    %c384_97 = arith.constant 384 : index
    %356 = vector.load %arg3[%c1_95, %c0_96, %c384_97] : memref<2x128x1024xbf16, #tpu.memory_space<vmem>>, vector<1x128x128xbf16>
    %357 = vector.shape_cast %356 : vector<1x128x128xbf16> to vector<128x128xbf16>
    %cst_98 = arith.constant dense<0.000000e+00> : vector<128x128xf32>
    %358 = tpu.matmul %355, %357, %cst_98 {dimension_numbers = #tpu.dot_dimension_numbers<[1], [0], [0], [1], [0, 0, 1, 1], [], []>} : vector<128x128xbf16>, vector<128x128xbf16>, vector<128x128xf32> -> vector<128x128xf32>
    %c13 = arith.constant 13 : index
    %c0_99 = arith.constant 0 : index
    %359 = vector.load %arg6[%c13, %c0_99] : memref<24x512xf32, #tpu.memory_space<vmem>>, vector<1x128xf32>
    %360 = vector.broadcast %359 : vector<1x128xf32> to vector<128x128xf32>
    %361 = arith.addf %358, %360 : vector<128x128xf32>
    %362 = arith.addf %245, %361 : vector<128x128xf32>
    %c16 = arith.constant 16 : index
    %c0_100 = arith.constant 0 : index
    %363 = vector.load %arg6[%c16, %c0_100] : memref<24x512xf32, #tpu.memory_space<vmem>>, vector<1x128xf32>
    %c17 = arith.constant 17 : index
    %c0_101 = arith.constant 0 : index
    %364 = vector.load %arg6[%c17, %c0_101] : memref<24x512xf32, #tpu.memory_space<vmem>>, vector<1x128xf32>
    %cst_102 = arith.constant dense<0.000000e+00> : vector<128xf32>
    %365 = vector.multi_reduction <add>, %362, %cst_102 [1] : vector<128x128xf32> to vector<128xf32>
    %366 = vector.shape_cast %365 : vector<128xf32> to vector<128x1xf32>
    %cst_103 = arith.constant 1.280000e+02 : f32
    %367 = vector.broadcast %cst_103 : f32 to vector<128x1xf32>
    %368 = arith.divf %366, %367 : vector<128x1xf32>
    %369 = arith.mulf %362, %362 : vector<128x128xf32>
    %cst_104 = arith.constant dense<0.000000e+00> : vector<128xf32>
    %370 = vector.multi_reduction <add>, %369, %cst_104 [1] : vector<128x128xf32> to vector<128xf32>
    %371 = vector.shape_cast %370 : vector<128xf32> to vector<128x1xf32>
    %cst_105 = arith.constant 1.280000e+02 : f32
    %372 = vector.broadcast %cst_105 : f32 to vector<128x1xf32>
    %373 = arith.divf %371, %372 : vector<128x1xf32>
    %374 = arith.mulf %368, %368 : vector<128x1xf32>
    %375 = arith.subf %373, %374 : vector<128x1xf32>
    %cst_106 = arith.constant 0.000000e+00 : f32
    %376 = vector.broadcast %cst_106 : f32 to vector<128x1xf32>
    %377 = arith.maximumf %375, %376 : vector<128x1xf32>
    %378 = vector.broadcast %368 : vector<128x1xf32> to vector<128x128xf32>
    %379 = arith.subf %362, %378 : vector<128x128xf32>
    %cst_107 = arith.constant 9.99999996E-13 : f32
    %380 = vector.broadcast %cst_107 : f32 to vector<128x1xf32>
    %381 = arith.addf %377, %380 : vector<128x1xf32>
    %382 = math.rsqrt %381 : vector<128x1xf32>
    %383 = vector.broadcast %382 : vector<128x1xf32> to vector<128x128xf32>
    %384 = arith.mulf %379, %383 : vector<128x128xf32>
    %385 = vector.broadcast %363 : vector<1x128xf32> to vector<128x128xf32>
    %386 = arith.mulf %384, %385 : vector<128x128xf32>
    %387 = vector.broadcast %364 : vector<1x128xf32> to vector<128x128xf32>
    %388 = arith.addf %386, %387 : vector<128x128xf32>
    %389 = arith.truncf %388 : vector<128x128xf32> to vector<128x128xbf16>
    %c1_108 = arith.constant 1 : index
    %c0_109 = arith.constant 0 : index
    %c512_110 = arith.constant 512 : index
    %390 = vector.load %arg3[%c1_108, %c0_109, %c512_110] : memref<2x128x1024xbf16, #tpu.memory_space<vmem>>, vector<1x128x512xbf16>
    %391 = vector.shape_cast %390 : vector<1x128x512xbf16> to vector<128x512xbf16>
    %cst_111 = arith.constant dense<0.000000e+00> : vector<128x512xf32>
    %392 = tpu.matmul %389, %391, %cst_111 {dimension_numbers = #tpu.dot_dimension_numbers<[1], [0], [0], [1], [0, 0, 1, 1], [], []>} : vector<128x128xbf16>, vector<128x512xbf16>, vector<128x512xf32> -> vector<128x512xf32>
    %c14 = arith.constant 14 : index
    %c0_112 = arith.constant 0 : index
    %393 = vector.load %arg6[%c14, %c0_112] : memref<24x512xf32, #tpu.memory_space<vmem>>, vector<1x512xf32>
    %394 = vector.broadcast %393 : vector<1x512xf32> to vector<128x512xf32>
    %395 = arith.addf %392, %394 : vector<128x512xf32>
    %396 = arith.mulf %395, %395 : vector<128x512xf32>
    %397 = arith.mulf %395, %396 : vector<128x512xf32>
    %cst_113 = arith.constant 4.471500e-02 : f32
    %398 = vector.broadcast %cst_113 : f32 to vector<128x512xf32>
    %399 = arith.mulf %398, %397 : vector<128x512xf32>
    %400 = arith.addf %395, %399 : vector<128x512xf32>
    %cst_114 = arith.constant 0.797884583 : f32
    %401 = vector.broadcast %cst_114 : f32 to vector<128x512xf32>
    %402 = arith.mulf %401, %400 : vector<128x512xf32>
    %403 = math.tanh %402 : vector<128x512xf32>
    %cst_115 = arith.constant 1.000000e+00 : f32
    %404 = vector.broadcast %cst_115 : f32 to vector<128x512xf32>
    %405 = arith.addf %404, %403 : vector<128x512xf32>
    %cst_116 = arith.constant 5.000000e-01 : f32
    %406 = vector.broadcast %cst_116 : f32 to vector<128x512xf32>
    %407 = arith.mulf %406, %405 : vector<128x512xf32>
    %408 = arith.mulf %395, %407 : vector<128x512xf32>
    %409 = arith.truncf %408 : vector<128x512xf32> to vector<128x512xbf16>
    %c1_117 = arith.constant 1 : index
    %c0_118 = arith.constant 0 : index
    %c0_119 = arith.constant 0 : index
    %410 = vector.load %arg4[%c1_117, %c0_118, %c0_119] : memref<2x512x128xbf16, #tpu.memory_space<vmem>>, vector<1x512x128xbf16>
    %411 = vector.shape_cast %410 : vector<1x512x128xbf16> to vector<512x128xbf16>
    %cst_120 = arith.constant dense<0.000000e+00> : vector<128x128xf32>
    %412 = tpu.matmul %409, %411, %cst_120 {dimension_numbers = #tpu.dot_dimension_numbers<[1], [0], [0], [1], [0, 0, 1, 1], [], []>} : vector<128x512xbf16>, vector<512x128xbf16>, vector<128x128xf32> -> vector<128x128xf32>
    %c15 = arith.constant 15 : index
    %c0_121 = arith.constant 0 : index
    %413 = vector.load %arg6[%c15, %c0_121] : memref<24x512xf32, #tpu.memory_space<vmem>>, vector<1x128xf32>
    %414 = vector.broadcast %413 : vector<1x128xf32> to vector<128x128xf32>
    %415 = arith.addf %412, %414 : vector<128x128xf32>
    %416 = arith.addf %388, %415 : vector<128x128xf32>
    %c18 = arith.constant 18 : index
    %c0_122 = arith.constant 0 : index
    %417 = vector.load %arg6[%c18, %c0_122] : memref<24x512xf32, #tpu.memory_space<vmem>>, vector<1x128xf32>
    %c19 = arith.constant 19 : index
    %c0_123 = arith.constant 0 : index
    %418 = vector.load %arg6[%c19, %c0_123] : memref<24x512xf32, #tpu.memory_space<vmem>>, vector<1x128xf32>
    %cst_124 = arith.constant dense<0.000000e+00> : vector<128xf32>
    %419 = vector.multi_reduction <add>, %416, %cst_124 [1] : vector<128x128xf32> to vector<128xf32>
    %420 = vector.shape_cast %419 : vector<128xf32> to vector<128x1xf32>
    %cst_125 = arith.constant 1.280000e+02 : f32
    %421 = vector.broadcast %cst_125 : f32 to vector<128x1xf32>
    %422 = arith.divf %420, %421 : vector<128x1xf32>
    %423 = arith.mulf %416, %416 : vector<128x128xf32>
    %cst_126 = arith.constant dense<0.000000e+00> : vector<128xf32>
    %424 = vector.multi_reduction <add>, %423, %cst_126 [1] : vector<128x128xf32> to vector<128xf32>
    %425 = vector.shape_cast %424 : vector<128xf32> to vector<128x1xf32>
    %cst_127 = arith.constant 1.280000e+02 : f32
    %426 = vector.broadcast %cst_127 : f32 to vector<128x1xf32>
    %427 = arith.divf %425, %426 : vector<128x1xf32>
    %428 = arith.mulf %422, %422 : vector<128x1xf32>
    %429 = arith.subf %427, %428 : vector<128x1xf32>
    %cst_128 = arith.constant 0.000000e+00 : f32
    %430 = vector.broadcast %cst_128 : f32 to vector<128x1xf32>
    %431 = arith.maximumf %429, %430 : vector<128x1xf32>
    %432 = vector.broadcast %422 : vector<128x1xf32> to vector<128x128xf32>
    %433 = arith.subf %416, %432 : vector<128x128xf32>
    %cst_129 = arith.constant 9.99999996E-13 : f32
    %434 = vector.broadcast %cst_129 : f32 to vector<128x1xf32>
    %435 = arith.addf %431, %434 : vector<128x1xf32>
    %436 = math.rsqrt %435 : vector<128x1xf32>
    %437 = vector.broadcast %436 : vector<128x1xf32> to vector<128x128xf32>
    %438 = arith.mulf %433, %437 : vector<128x128xf32>
    %439 = vector.broadcast %417 : vector<1x128xf32> to vector<128x128xf32>
    %440 = arith.mulf %438, %439 : vector<128x128xf32>
    %441 = vector.broadcast %418 : vector<1x128xf32> to vector<128x128xf32>
    %442 = arith.addf %440, %441 : vector<128x128xf32>
    %443 = arith.truncf %442 : vector<128x128xf32> to vector<128x128xbf16>
    %c0_130 = arith.constant 0 : index
    %c0_131 = arith.constant 0 : index
    %444 = vector.load %arg5[%c0_130, %c0_131] : memref<128x256xbf16, #tpu.memory_space<vmem>>, vector<128x128xbf16>
    %cst_132 = arith.constant dense<0.000000e+00> : vector<128x128xf32>
    %445 = tpu.matmul %443, %444, %cst_132 {dimension_numbers = #tpu.dot_dimension_numbers<[1], [0], [0], [1], [0, 0, 1, 1], [], []>} : vector<128x128xbf16>, vector<128x128xbf16>, vector<128x128xf32> -> vector<128x128xf32>
    %c2 = arith.constant 2 : index
    %c0_133 = arith.constant 0 : index
    %446 = vector.load %arg6[%c2, %c0_133] : memref<24x512xf32, #tpu.memory_space<vmem>>, vector<1x128xf32>
    %447 = vector.broadcast %446 : vector<1x128xf32> to vector<128x128xf32>
    %448 = arith.addf %445, %447 : vector<128x128xf32>
    %449 = math.tanh %448 : vector<128x128xf32>
    %450 = arith.truncf %449 : vector<128x128xf32> to vector<128x128xbf16>
    %c0_134 = arith.constant 0 : index
    %c128 = arith.constant 128 : index
    %451 = vector.load %arg5[%c0_134, %c128] : memref<128x256xbf16, #tpu.memory_space<vmem>>, vector<128x128xbf16>
    %cst_135 = arith.constant dense<0.000000e+00> : vector<128x128xf32>
    %452 = tpu.matmul %450, %451, %cst_135 {dimension_numbers = #tpu.dot_dimension_numbers<[1], [0], [0], [1], [0, 0, 1, 1], [], []>} : vector<128x128xbf16>, vector<128x128xbf16>, vector<128x128xf32> -> vector<128x128xf32>
    %c3 = arith.constant 3 : index
    %c0_136 = arith.constant 0 : index
    %453 = vector.load %arg6[%c3, %c0_136] : memref<24x512xf32, #tpu.memory_space<vmem>>, vector<1x128xf32>
    %454 = vector.broadcast %453 : vector<1x128xf32> to vector<128x128xf32>
    %455 = arith.addf %452, %454 : vector<128x128xf32>
    %c0_137 = arith.constant 0 : index
    %c0_138 = arith.constant 0 : index
    %456 = vector.load %arg7[%c0_137, %c0_138] : memref<128x128xf32, #tpu.memory_space<vmem>>, vector<128x128xf32>
    tpu.vector_store %arg7[%c0_137, %c0_138], %455 {strides = array<i32>} : memref<128x128xf32, #tpu.memory_space<vmem>>, vector<128x128xf32>,
    return
  }
  func.func @transform_0(%arg0: i32) -> (i32, i32) {
    %c0_i32 = arith.constant 0 : i32
    %c0_i32_0 = arith.constant 0 : i32
    return %arg0, %c0_i32 : i32, i32
  }
  func.func @transform_1(%arg0: i32) -> (i32, i32) {
    %c0_i32 = arith.constant 0 : i32
    return %arg0, %arg0 : i32, i32
  }
  func.func @transform_2(%arg0: i32) -> (i32, i32, i32) {
    %c0_i32 = arith.constant 0 : i32
    %c0_i32_0 = arith.constant 0 : i32
    %c0_i32_1 = arith.constant 0 : i32
    %c0_i32_2 = arith.constant 0 : i32
    return %c0_i32, %c0_i32_0, %c0_i32_1 : i32, i32, i32
  }
  func.func @transform_3(%arg0: i32) -> (i32, i32, i32) {
    %c0_i32 = arith.constant 0 : i32
    %c0_i32_0 = arith.constant 0 : i32
    %c0_i32_1 = arith.constant 0 : i32
    %c0_i32_2 = arith.constant 0 : i32
    return %c0_i32, %c0_i32_0, %c0_i32_1 : i32, i32, i32
  }
  func.func @transform_4(%arg0: i32) -> (i32, i32) {
    %c0_i32 = arith.constant 0 : i32
    %c0_i32_0 = arith.constant 0 : i32
    %c0_i32_1 = arith.constant 0 : i32
    return %c0_i32, %c0_i32_0 : i32, i32
  }
  func.func @transform_5(%arg0: i32) -> (i32, i32) {
    %c0_i32 = arith.constant 0 : i32
    %c0_i32_0 = arith.constant 0 : i32
    %c0_i32_1 = arith.constant 0 : i32
    return %c0_i32, %c0_i32_0 : i32, i32
  }
  func.func @transform_6(%arg0: i32) -> (i32, i32) {
    %c0_i32 = arith.constant 0 : i32
    %c0_i32_0 = arith.constant 0 : i32
    return %arg0, %c0_i32 : i32, i32
  }
}

</mosaic_0001>

<bundles_post_ra>
// kernel: sentiment_analysis_forward.1
= control target key start
LH: loop header
LB: loop body
LE: loop exit
PB: predicated region body
PF: predicated region fallthrough
CT: control target
= control target key end

     0   :  { %s11407_s21 = smov 0   ;;  %s11409_s22 = smov 0   ;;  %s16882_s0 = inlined_call_operand.vmem [shape: f32[256,128], index: 0, kind: input, shape index: {}]   ;;  %s16883_s1 = inlined_call_operand.vmem [shape: f32[256,256], index: 1, kind: input, shape index: {}]   ;;  %s16884_s2 = inlined_call_operand.vmem [shape: bf16[2,128,1024], index: 2, kind: input, shape index: {}]   ;;  %s16885_s3 = inlined_call_operand.vmem [shape: bf16[2,512,128], index: 3, kind: input, shape index: {}]   ;;  %s16886_s4 = inlined_call_operand.vmem [shape: bf16[128,256], index: 4, kind: input, shape index: {}]   ;;  %s16887_s5 = inlined_call_operand.vmem [shape: f32[24,512], index: 5, kind: input, shape index: {}]   ;;  %s16888_s6 = inlined_call_operand.vmem [shape: f32[256,128], index: 6, kind: output, shape index: {}]  }
   0x1   :  { %s11411_s23 = smov 0  }
   0x2 LB: > { %s8901_s24 = sadd.s32 4294967295, %s11369_s23   ;;  %s11424_s25 = sadd.s32 1, %s11369_s23   ;;  %s11369_s23 = sphi %s11411_s23, %s17394_s23   ;;  %s11365_s22 = sphi %s11409_s22, %s17393_s22   ;;  %s11361_s21 = sphi %s11407_s21, %s17392_s21  }
   0x3   : > { %s46_s26 = ssub.s32 %s11369_s23, %s11424_s25  ;;  %s51_s27 = sadd.s32 1, %s11365_s22 }
   0x4   : > { %s48_s28 = sor.u32 %s46_s26, %s46_s26  ;;  %p58_p0 = scmp.ne.s32.totalorder %s11365_s22, %s11361_s21 }
   0x5   : > { %p49_p1 = scmp.eq.s32.totalorder %s48_s28, 0  ;;  %p59_p2 = scmp.eq.s32.totalorder %s11369_s23, 0 }
   0x6   : > { %p8904_p4 = scmp.ge.s32.totalorder %s11369_s23, 2 }
   0x7   : > { %s11433_s29 = scalar_select %p49_p1, %s11365_s22, %s51_s27  }
   0x8   : > { %p60_p3 = por %p59_p2, %p58_p0  ;;  %206 = sbr.rel (%p8904_p4) target bundleno = 29 (0x1d), region = 32 }
   0xf   : > { %218 = sbr.rel (!%p60_p3) target bundleno = 29 (0x1d), region = 40  ;;  %s220_s30 = sand.u32 (%p60_p3), 1, %s11365_s22  }
  0x10   : > { %s9273_s7 = sshll.u32 (%p60_p3), %s11369_s23, 5  ;;  %s8905_s8 = sshll.u32 (%p60_p3), %s220_s30, 7 }
  0x11   : > { %s225_s9 = sadd.s32 (%p60_p3), %s11369_s23, %s9273_s7  ;;  %s222_s14 = scalar_lea.vmem (%p60_p3), [#allocation2], %s8905_s8 }
  0x12   : > { %s8908_s10 = sshll.u32 (%p60_p3), %s225_s9, 3 }
  0x13   : > { %s11442_s13 = scalar_lea.vmem (%p60_p3), %s16883_s1, %s8908_s10 }
  0x14   : > { %v285_v0 = vld [vmem:[%s11442_s13] sm:$0xff] (%p60_p3)  ;;  %v287_v1 = vld [vmem:[%s11442_s13 + $0x10] sm:$0xff] (%p60_p3) }
  0x15   : > { %v289_v2 = vld [vmem:[%s11442_s13 + $0x20] sm:$0xff] (%p60_p3)  ;;  %286 = vst [vmem:[%s222_s14] sm:$0xff] (%p60_p3), %v285_v0  ;;  %288 = vst [vmem:[%s222_s14 + $0x8] sm:$0xff] (%p60_p3), %v287_v1  ;;  %v291_v3 = vld [vmem:[%s11442_s13 + $0x30] sm:$0xff] (%p60_p3) }
  0x16   : > { %290 = vst [vmem:[%s222_s14 + $0x10] sm:$0xff] %v289_v2  ;;  %v293_v4 = vld [vmem:[%s11442_s13 + $0x40] sm:$0xff]  ;;  %v295_v5 = vld [vmem:[%s11442_s13 + $0x50] sm:$0xff]  ;;  %292 = vst [vmem:[%s222_s14 + $0x18] sm:$0xff] %v291_v3 }
  0x17   : > { %294 = vst [vmem:[%s222_s14 + $0x20] sm:$0xff] %v293_v4  ;;  %296 = vst [vmem:[%s222_s14 + $0x28] sm:$0xff] %v295_v5  ;;  %v297_v6 = vld [vmem:[%s11442_s13 + $0x60] sm:$0xff]  ;;  %v299_v7 = vld [vmem:[%s11442_s13 + $0x70] sm:$0xff] }
  0x18   : > { %v301_v8 = vld [vmem:[%s11442_s13 + $0x80] sm:$0xff]  ;;  %298 = vst [vmem:[%s222_s14 + $0x30] sm:$0xff] %v297_v6  ;;  %300 = vst [vmem:[%s222_s14 + $0x38] sm:$0xff] %v299_v7  ;;  %v303_v9 = vld [vmem:[%s11442_s13 + $0x90] sm:$0xff] }
  0x19   : > { %302 = vst [vmem:[%s222_s14 + $0x40] sm:$0xff] %v301_v8  ;;  %v305_v10 = vld [vmem:[%s11442_s13 + $0xa0] sm:$0xff]  ;;  %v307_v11 = vld [vmem:[%s11442_s13 + $0xb0] sm:$0xff]  ;;  %304 = vst [vmem:[%s222_s14 + $0x48] sm:$0xff] %v303_v9 }
  0x1a   : > { %306 = vst [vmem:[%s222_s14 + $0x50] sm:$0xff] %v305_v10  ;;  %308 = vst [vmem:[%s222_s14 + $0x58] sm:$0xff] %v307_v11  ;;  %v309_v12 = vld [vmem:[%s11442_s13 + $0xc0] sm:$0xff]  ;;  %v311_v13 = vld [vmem:[%s11442_s13 + $0xd0] sm:$0xff] }
  0x1b   : > { %v313_v14 = vld [vmem:[%s11442_s13 + $0xe0] sm:$0xff]  ;;  %310 = vst [vmem:[%s222_s14 + $0x60] sm:$0xff] %v309_v12  ;;  %312 = vst [vmem:[%s222_s14 + $0x68] sm:$0xff] %v311_v13  ;;  %v315_v15 = vld [vmem:[%s11442_s13 + $0xf0] sm:$0xff] }
  0x1c   : > { %314 = vst [vmem:[%s222_s14 + $0x70] sm:$0xff] %v313_v14  ;;  %316 = vst [vmem:[%s222_s14 + $0x78] sm:$0xff] %v315_v15 }
  0x1d PF: > { %p8909_p5 = scmp.ge.s32.totalorder %s11369_s23, 1  ;;  %p321_p6 = scmp.lt.s32.totalorder %s11369_s23, 3 }
  0x1f   : > { %p322_p7 = pnand %p8909_p5, %p321_p6 }
  0x21   : > { %325 = sbr.rel (%p322_p7) target bundleno = 5104 (0x13f0), region = 78 }
  0x28   : > { %s8911_s15 = sshll.u32 %s8901_s24, 4  ;;  %v691_v25 = vld [vmem:[%s16884_s2] sm:$0xff]  ;;  %v692_v39 = vld [vmem:[%s16884_s2 + $0x8] sm:$0xf]  ;;  %s328_s23 = sand.u32 1, %s11361_s21  }
  0x29   : > { %p363_p8 = scmp.lt.s32.totalorder %s8911_s15, 31  ;;  %v693_v26 = vld [vmem:[%s16884_s2 + $0x20] sm:$0xff]  ;;  %v694_v42 = vld [vmem:[%s16884_s2 + $0x28] sm:$0xf]  ;;  %s8910_s24 = sshll.u32 %s328_s23, 7 }
  0x2a   : > { %v8917_v28 = vcombine.high %v691_v25, %v693_v26  ;;  %v8916_v29 = vcombine.low %v691_v25, %v693_v26  ;;  %v695_v31 = vld [vmem:[%s16884_s2 + $0x40] sm:$0xff]  ;;  %v8918_v43 = vcombine.low %v692_v39, %v694_v42  ;;  %v696_v48 = vld [vmem:[%s16884_s2 + $0x48] sm:$0xf]  ;;  %s12165_s26 = scalar_lea.vmem [#allocation2], %s8910_s24 }
  0x2b   : > { %s17396_s15 = smov (!%p363_p8, %s8911_s15), 31  ;;  %v697_v32 = vld [vmem:[%s16884_s2 + $0x60] sm:$0xff]  ;;  %v698_v51 = vld [vmem:[%s16884_s2 + $0x68] sm:$0xf] }
  0x2c   : > { %s8912_s16 = sshll.u32 %s17396_s15, 3  ;;  %869 = vmatprep.subr.bf16.mxu0 %v8917_v28  ;;  %v8920_v33 = vcombine.high %v695_v31, %v697_v32  ;;  %v8919_v35 = vcombine.low %v695_v31, %v697_v32  ;;  %v699_v37 = vld [vmem:[%s16884_s2 + $0x80] sm:$0xff]  ;;  %10010 = vmatprep.subr.bf16.mxu1 %v8918_v43  ;;  %v8921_v53 = vcombine.low %v696_v48, %v698_v51  ;;  %v700_v58 = vld [vmem:[%s16884_s2 + $0x88] sm:$0xf] }
  0x2d   : > { %s11472_s19 = scalar_lea.vmem %s16882_s0, %s8912_s16  ;;  %870 = vmatpush1.bf16.msra.mxu0 %v8916_v29  ;;  %v701_v38 = vld [vmem:[%s16884_s2 + $0xa0] sm:$0xff]  ;;  %10011 = vmatpush3.bf16.msra.mxu1 %v8918_v43  ;;  %v702_v60 = vld [vmem:[%s16884_s2 + $0xa8] sm:$0xf]  ;;  %s16854_s11 = scalar_lea.vmem %s16888_s6, %s8912_s16 }
  0x2e   : > { %v11475_v16 = vld [vmem:[%s11472_s19] sm:$0xff]  ;;  %v11478_v17 = vld [vmem:[%s11472_s19 + $0x8] sm:$0xff]  ;;  %v11487_v20 = vld [vmem:[%s11472_s19 + $0x10] sm:$0xff]  ;;  %871 = vmatprep.subr.bf16.mxu0 %v8920_v33  ;;  %v8923_v41 = vcombine.high %v699_v37, %v701_v38  ;;  %v8922_v44 = vcombine.low %v699_v37, %v701_v38  ;;  %10012 = vmatprep.subr.bf16.mxu1 %v8921_v53  ;;  %v8924_v61 = vcombine.low %v700_v58, %v702_v60  ;;  %v16889_v38 = vmov 0  }
  0x2f   : > { %426 = vadd.xlane.f32.xlu0 %v11475_v16  ;;  %v475_v18 = vmul.f32 %v11475_v16, %v11475_v16  ;;  %v476_v19 = vmul.f32 %v11478_v17, %v11478_v17  ;;  %v11490_v21 = vld [vmem:[%s11472_s19 + $0x18] sm:$0xff]  ;;  %v477_v22 = vmul.f32 %v11487_v20, %v11487_v20  ;;  %v11499_v24 = vld [vmem:[%s11472_s19 + $0x20] sm:$0xff]  ;;  %v11508_v27 = vld [vmem:[%s11472_s19 + $0x28] sm:$0xff]  ;;  %901 = vmatprep.mubr.bf16.mxu0 %v16889_v38 }
  0x30   : > { %v478_v23 = vmul.f32 %v11490_v21, %v11490_v21  ;;  %v479_v30 = vmul.f32 %v11499_v24, %v11499_v24  ;;  %v480_v34 = vmul.f32 %v11508_v27, %v11508_v27  ;;  %v11523_v36 = vld [vmem:[%s11472_s19 + $0x30] sm:$0xff]  ;;  %v11535_v40 = vld [vmem:[%s11472_s19 + $0x38] sm:$0xff]  ;;  %v703_v46 = vld [vmem:[%s16884_s2 + $0xc0] sm:$0xff] }
  0x31   : > { %491 = vadd.xlane.f32.xlu1 %v475_v18  ;;  %872 = vmatpush1.bf16.msra.mxu0 %v8919_v35  ;;  %v481_v45 = vmul.f32 %v11523_v36, %v11523_v36  ;;  %v705_v47 = vld [vmem:[%s16884_s2 + $0xe0] sm:$0xff]  ;;  %v482_v49 = vmul.f32 %v11535_v40, %v11535_v40  ;;  %v11562_v55 = vld [vmem:[%s11472_s19 + $0x48] sm:$0xff]  ;;  %v11595_v6 = vld [vmem:[%s11472_s19 + $0x50] sm:$0xff] }
  0x32   : > { %873 = vmatprep.subr.bf16.mxu0 %v8923_v41  ;;  %v8926_v50 = vcombine.high %v703_v46, %v705_v47  ;;  %v11559_v52 = vld [vmem:[%s11472_s19 + $0x40] sm:$0xff]  ;;  %v8925_v54 = vcombine.low %v703_v46, %v705_v47  ;;  %10013 = vmatpush3.bf16.msra.mxu1 %v8921_v53  ;;  %v704_v2 = vld [vmem:[%s16884_s2 + $0xc8] sm:$0xf]  ;;  %v484_v3 = vmul.f32 %v11562_v55, %v11562_v55  ;;  %v11610_v14 = vld [vmem:[%s11472_s19 + $0x58] sm:$0xff] }
  0x33   : > { %428 = vadd.xlane.f32.xlu0 %v11478_v17  ;;  %v707_v56 = vld [vmem:[%s16884_s2 + $0x100] sm:$0xff]  ;;  %v483_v63 = vmul.f32 %v11559_v52, %v11559_v52  ;;  %10014 = vmatprep.subr.bf16.mxu1 %v8924_v61  ;;  %v706_v5 = vld [vmem:[%s16884_s2 + $0xe8] sm:$0xf]  ;;  %v486_v26 = vmul.f32 %v11610_v14, %v11610_v14  ;;  %v11659_v46 = vld [vmem:[%s11472_s19 + $0x78] sm:$0xff] }
  0x34   : > { %v709_v57 = vld [vmem:[%s16884_s2 + $0x120] sm:$0xff]  ;;  %v8927_v7 = vcombine.low %v704_v2, %v706_v5  ;;  %v708_v11 = vld [vmem:[%s16884_s2 + $0x108] sm:$0xf]  ;;  %v490_v48 = vmul.f32 %v11659_v46, %v11659_v46 }
  0x35   : > { %493 = vadd.xlane.f32.xlu1 %v476_v19  ;;  %874 = vmatpush1.bf16.msra.mxu0 %v8922_v44  ;;  %v8929_v59 = vcombine.high %v707_v56, %v709_v57  ;;  %v8928_v62 = vcombine.low %v707_v56, %v709_v57  ;;  %v711_v0 = vld [vmem:[%s16884_s2 + $0x140] sm:$0xff]  ;;  %v710_v13 = vld [vmem:[%s16884_s2 + $0x128] sm:$0xf]  ;;  %v485_v19 = vmul.f32 %v11595_v6, %v11595_v6 }
  0x36   : > { %875 = vmatprep.subr.bf16.mxu0 %v8926_v50  ;;  %v713_v1 = vld [vmem:[%s16884_s2 + $0x160] sm:$0xff]  ;;  %10015 = vmatpush3.bf16.msra.mxu1 %v8924_v61  ;;  %v8930_v15 = vcombine.low %v708_v11, %v710_v13  ;;  %v712_v25 = vld [vmem:[%s16884_s2 + $0x148] sm:$0xf] }
  0x37   : > { %430 = vadd.xlane.f32.xlu0 %v11487_v20  ;;  %v8932_v4 = vcombine.high %v711_v0, %v713_v1  ;;  %v8931_v8 = vcombine.low %v711_v0, %v713_v1  ;;  %10016 = vmatprep.subr.bf16.mxu1 %v8927_v7  ;;  %v715_v9 = vld [vmem:[%s16884_s2 + $0x180] sm:$0xff]  ;;  %v714_v29 = vld [vmem:[%s16884_s2 + $0x168] sm:$0xf] }
  0x38   : > { %v717_v10 = vld [vmem:[%s16884_s2 + $0x1a0] sm:$0xff]  ;;  %v8933_v31 = vcombine.low %v712_v25, %v714_v29  ;;  %v716_v33 = vld [vmem:[%s16884_s2 + $0x188] sm:$0xf] }
  0x39   : > { %432 = vadd.xlane.f32.xlu1 %v11490_v21  ;;  %876 = vmatpush1.bf16.msra.mxu0 %v8925_v54  ;;  %v8935_v12 = vcombine.high %v715_v9, %v717_v10  ;;  %v8934_v18 = vcombine.low %v715_v9, %v717_v10  ;;  %v11640_v35 = vld [vmem:[%s11472_s19 + $0x68] sm:$0xff] }
  0x3a   : > { %877 = vmatprep.subr.bf16.mxu0 %v8929_v59  ;;  %10017 = vmatpush3.bf16.msra.mxu1 %v8927_v7  ;;  %v720_v41 = vld [vmem:[%s16884_s2 + $0x1c8] sm:$0xf]  ;;  %v488_v43 = vmul.f32 %v11640_v35, %v11640_v35 }
  0x3b   : > { %495 = vadd.xlane.f32.xlu0 %v477_v22  ;;  %10018 = vmatprep.subr.bf16.mxu1 %v8930_v15  ;;  %v719_v22 = vld [vmem:[%s16884_s2 + $0x1c0] sm:$0xff]  ;;  %v722_v42 = vld [vmem:[%s16884_s2 + $0x1e8] sm:$0xf] }
  0x3c   : > { %v8939_v44 = vcombine.low %v720_v41, %v722_v42 }
  0x3d   : > { %497 = vadd.xlane.f32.xlu1 %v478_v23  ;;  %878 = vmatpush1.bf16.msra.mxu0 %v8928_v62  ;;  %v721_v23 = vld [vmem:[%s16884_s2 + $0x1e0] sm:$0xff] }
  0x3e   : > { %879 = vmatprep.subr.bf16.mxu0 %v8932_v4  ;;  %10019 = vmatpush3.bf16.msra.mxu1 %v8930_v15  ;;  %v8938_v28 = vcombine.high %v719_v22, %v721_v23  ;;  %v8937_v32 = vcombine.low %v719_v22, %v721_v23 }
  0x3f   : > { %434 = vadd.xlane.f32.xlu0 %v11499_v24  ;;  %10020 = vmatprep.subr.bf16.mxu1 %v8933_v31 }
  0x41   : > { %436 = vadd.xlane.f32.xlu1 %v11508_v27  ;;  %880 = vmatpush1.bf16.msra.mxu0 %v8931_v8 }
  0x42   : > { %881 = vmatprep.subr.bf16.mxu0 %v8935_v12  ;;  %10021 = vmatpush3.bf16.msra.mxu1 %v8933_v31 }
  0x43   : > { %499 = vadd.xlane.f32.xlu0 %v479_v30  ;;  %v11631_v30 = vld [vmem:[%s11472_s19 + $0x60] sm:$0xff] }
  0x44   : > { %v487_v39 = vmul.f32 %v11631_v30, %v11631_v30 }
  0x45   : > { %501 = vadd.xlane.f32.xlu1 %v480_v34  ;;  %882 = vmatpush1.bf16.msra.mxu0 %v8934_v18  ;;  %v718_v34 = vld [vmem:[%s16884_s2 + $0x1a8] sm:$0xf] }
  0x46   : > { %883 = vmatprep.subr.bf16.mxu0 %v8938_v28  ;;  %v8936_v37 = vcombine.low %v716_v33, %v718_v34 }
  0x47   : > { %438 = vadd.xlane.f32.xlu0 %v11523_v36 }
  0x48   : > { %10022 = vmatprep.subr.bf16.mxu1 %v8936_v37 }
  0x49   : > { %440 = vadd.xlane.f32.xlu1 %v11535_v40  ;;  %884 = vmatpush1.bf16.msra.mxu0 %v8937_v32 }
  0x4a   : > { %10023 = vmatpush3.bf16.msra.mxu1 %v8936_v37 }
  0x4b   : > { %503 = vadd.xlane.f32.xlu0 %v481_v45  ;;  %v11656_v45 = vld [vmem:[%s11472_s19 + $0x70] sm:$0xff]  ;;  %10024 = vmatprep.subr.bf16.mxu1 %v8939_v44 }
  0x4c   : > { %v489_v47 = vmul.f32 %v11656_v45, %v11656_v45 }
  0x4d   : > { %505 = vadd.xlane.f32.xlu1 %v482_v49 }
  0x4e   : > { %10025 = vmatpush3.bf16.msra.mxu1 %v8939_v44 }
  0x4f   : > { %442 = vadd.xlane.f32.xlu0 %v11559_v52 }
  0x51   : > { %444 = vadd.xlane.f32.xlu1 %v11562_v55 }
  0x53   : > { %507 = vadd.xlane.f32.xlu0 %v483_v63 }
  0x55   : > { %509 = vadd.xlane.f32.xlu1 %v484_v3 }
  0x57   : > { %446 = vadd.xlane.f32.xlu0 %v11595_v6 }
  0x59   : > { %448 = vadd.xlane.f32.xlu1 %v11610_v14 }
  0x5b   : > { %511 = vadd.xlane.f32.xlu0 %v485_v19 }
  0x5d   : > { %513 = vadd.xlane.f32.xlu1 %v486_v26 }
  0x5f   : > { %450 = vadd.xlane.f32.xlu0 %v11631_v30 }
  0x61   : > { %452 = vadd.xlane.f32.xlu1 %v11640_v35 }
  0x63   : > { %515 = vadd.xlane.f32.xlu0 %v487_v39 }
  0x65   : > { %517 = vadd.xlane.f32.xlu1 %v488_v43 }
  0x67   : > { %454 = vadd.xlane.f32.xlu0 %v11656_v45 }
  0x69   : > { %456 = vadd.xlane.f32.xlu1 %v11659_v46 }
  0x6b   : > { %519 = vadd.xlane.f32.xlu0 %v489_v47 }
  0x6d   : > { %521 = vadd.xlane.f32.xlu1 %v490_v48  ;;  %v11687_v48 = vld [vmem:[%s16887_s5] ss:$0 sm:$0xff] }
  0xbc   : > { %v427_v49 = vpop.xlane.xlu0 %426 }
  0xbd   : > { %v459_v50 = vmul.f32 0.0078125, %v427_v49 }
  0xbe   : > { %v492_v51 = vpop.xlane.xlu1 %491 }
  0xbf   : > { %v539_v53 = vmul.f32 %v459_v50, %v459_v50  ;;  %v523_v54 = vmul.f32 0.0078125, %v492_v51  ;;  %v587_v31 = vsub.f32 %v11475_v16, %v459_v50 }
  0xc0   : > { %v429_v56 = vpop.xlane.xlu0 %428 }
  0xc1   : > { %v555_v57 = vsub.f32 %v523_v54, %v539_v53  ;;  %v460_v58 = vmul.f32 0.0078125, %v429_v56 }
  0xc2   : > { %v494_v59 = vpop.xlane.xlu1 %493 }
  0xc3   : > { %v571_v60 = vmax.f32 %v555_v57, 0.0  ;;  %v540_v61 = vmul.f32 %v460_v58, %v460_v58  ;;  %v524_v62 = vmul.f32 0.0078125, %v494_v59  ;;  %v588_v16 = vsub.f32 %v11478_v17, %v460_v58 }
  0xc4   : > { %v431_v63 = vpop.xlane.xlu0 %430 }
  0xc5   : > { %v603_v0 = vadd.f32 1e-12, %v571_v60  ;;  %v556_v1 = vsub.f32 %v524_v62, %v540_v61  ;;  %v11667_v2 = vmul.f32 0.0078125, %v431_v63  ;;  %v11698_v63 = vld [vmem:[%s16887_s5 + $0x1] ss:$0 sm:$0xff] }
  0xc6   : > { %v433_v3 = vpop.xlane.xlu1 %432 }
  0xc7   : > { %10371 = vrsqrt.f32 %v603_v0  ;;  %v572_v4 = vmax.f32 %v556_v1, 0.0  ;;  %v541_v5 = vmul.f32 %v11667_v2, %v11667_v2  ;;  %v11671_v7 = vmul.f32 0.0078125, %v433_v3 }
  0xc8   : > { %v496_v8 = vpop.xlane.xlu0 %495 }
  0xc9   : > { %v604_v9 = vadd.f32 1e-12, %v572_v4  ;;  %v525_v10 = vmul.f32 0.0078125, %v496_v8  ;;  %v542_v12 = vmul.f32 %v11671_v7, %v11671_v7  ;;  %v589_v4 = vsub.f32 %v11487_v20, %v11667_v2 }
  0xca   : > { %v498_v11 = vpop.xlane.xlu1 %497 }
  0xcb   : > { %10373 = vrsqrt.f32 %v604_v9  ;;  %v557_v13 = vsub.f32 %v525_v10, %v541_v5  ;;  %v526_v15 = vmul.f32 0.0078125, %v498_v11 }
  0xcc   : > { %v435_v18 = vpop.xlane.xlu0 %434 }
  0xcd   : > { %v573_v19 = vmax.f32 %v557_v13, 0.0  ;;  %v558_v22 = vsub.f32 %v526_v15, %v542_v12  ;;  %v11675_v23 = vmul.f32 0.0078125, %v435_v18  ;;  %v590_v15 = vsub.f32 %v11490_v21, %v11671_v7 }
  0xce   : > { %v437_v25 = vpop.xlane.xlu1 %436 }
  0xcf   : > { %v605_v26 = vadd.f32 1e-12, %v573_v19  ;;  %v574_v28 = vmax.f32 %v558_v22, 0.0  ;;  %v543_v29 = vmul.f32 %v11675_v23, %v11675_v23  ;;  %v11680_v32 = vmul.f32 0.0078125, %v437_v25 }
  0xd0   : > { %v500_v33 = vpop.xlane.xlu0 %499 }
  0xd1   : > { %v10372_v34 = vpop.eup %10371  ;;  %10375 = vrsqrt.f32 %v605_v26  ;;  %v606_v37 = vadd.f32 1e-12, %v574_v28  ;;  %v527_v39 = vmul.f32 0.0078125, %v500_v33  ;;  %v544_v43 = vmul.f32 %v11680_v32, %v11680_v32 }
  0xd2   : > { %v502_v41 = vpop.xlane.xlu1 %501  ;;  %v635_v42 = vmul.f32 %v10372_v34, %v587_v31 }
  0xd3   : > { %10377 = vrsqrt.f32 %v606_v37  ;;  %v559_v44 = vsub.f32 %v527_v39, %v543_v29  ;;  %v528_v47 = vmul.f32 0.0078125, %v502_v41 }
  0xd4   : > { %v439_v49 = vpop.xlane.xlu0 %438  ;;  %v651_v59 = vmul.f32 %v635_v42, %v11687_v48 }
  0xd5   : > { %v10374_v50 = vpop.eup %10373  ;;  %v575_v51 = vmax.f32 %v559_v44, 0.0  ;;  %v560_v53 = vsub.f32 %v528_v47, %v544_v43  ;;  %v11690_v54 = vmul.f32 0.0078125, %v439_v49  ;;  %v591_v43 = vsub.f32 %v11499_v24, %v11675_v23 }
  0xd6   : > { %v441_v56 = vpop.xlane.xlu1 %440  ;;  %v636_v57 = vmul.f32 %v10374_v50, %v588_v16  ;;  %v11706_v8 = vadd.f32 %v651_v59, %v11698_v63 }
  0xd7   : > { %v607_v60 = vadd.f32 1e-12, %v575_v51  ;;  %v576_v61 = vmax.f32 %v560_v53, 0.0  ;;  %v545_v62 = vmul.f32 %v11690_v54, %v11690_v54  ;;  %v11700_v17 = vmul.f32 0.0078125, %v441_v56 }
  0xd8   : > { %v504_v58 = vpop.xlane.xlu0 %503  ;;  %v652_v0 = vmul.f32 %v636_v57, %v11687_v48  ;;  %17051 = vst [vmem:[#allocation3_spill] sm:$0xff] %v11706_v8  ;;  %v592_v56 = vsub.f32 %v11508_v27, %v11680_v32 }
  0xd9   : > { %10379 = vrsqrt.f32 %v607_v60  ;;  %v608_v1 = vadd.f32 1e-12, %v576_v61  ;;  %v529_v3 = vmul.f32 0.0078125, %v504_v58  ;;  %v546_v11 = vmul.f32 %v11700_v17, %v11700_v17 }
  0xda   : > { %v506_v5 = vpop.xlane.xlu1 %505  ;;  %v11709_v9 = vadd.f32 %v652_v0, %v11698_v63 }
  0xdb   : > { %v10376_v10 = vpop.eup %10375  ;;  %10381 = vrsqrt.f32 %v608_v1  ;;  %v561_v12 = vsub.f32 %v529_v3, %v545_v62  ;;  %v530_v13 = vmul.f32 0.0078125, %v506_v5 }
  0xdc   : > { %17052 = vst [vmem:[#allocation4_spill] sm:$0xff] %v11709_v9  ;;  %v443_v18 = vpop.xlane.xlu0 %442  ;;  %v683_v20 = vpack.c.bf16 %v11709_v9, %v11706_v8  ;;  %v637_v2 = vmul.f32 %v10376_v10, %v589_v4 }
  0xdd   : > { %v10378_v19 = vpop.eup %10377  ;;  %v577_v22 = vmax.f32 %v561_v12, 0.0  ;;  %v562_v25 = vsub.f32 %v530_v13, %v546_v11  ;;  %v11717_v26 = vmul.f32 0.0078125, %v443_v18  ;;  %v593_v13 = vsub.f32 %v11523_v36, %v11690_v54 }
  0xde   : > { %902 = vmatmul.mubr.bf16.vlgmr.msra.gmra.mrb[0].mxu0 %v683_v20  ;;  %10026 = vmatprep.mubr.bf16.mxu1 %v683_v20  ;;  %v445_v28 = vpop.xlane.xlu1 %444  ;;  %v638_v29 = vmul.f32 %v10378_v19, %v590_v15  ;;  %v653_v31 = vmul.f32 %v637_v2, %v11687_v48 }
  0xdf   : > { %v609_v33 = vadd.f32 1e-12, %v577_v22  ;;  %v578_v34 = vmax.f32 %v562_v25, 0.0  ;;  %v547_v21 = vmul.f32 %v11717_v26, %v11717_v26  ;;  %911 = vmatprep.mubr.bf16.mxu0 %v16889_v38  ;;  %v11723_v7 = vmul.f32 0.0078125, %v445_v28 }
  0xe0   : > { %v508_v37 = vpop.xlane.xlu0 %507  ;;  %v654_v39 = vmul.f32 %v638_v29, %v11687_v48  ;;  %v11729_v47 = vadd.f32 %v653_v31, %v11698_v63  ;;  %v594_v28 = vsub.f32 %v11535_v40, %v11700_v17 }
  0xe1   : > { %10383 = vrsqrt.f32 %v609_v33  ;;  %v610_v41 = vadd.f32 1e-12, %v578_v34  ;;  %v531_v42 = vmul.f32 0.0078125, %v508_v37  ;;  %v548_v50 = vmul.f32 %v11723_v7, %v11723_v7 }
  0xe2   : > { %v510_v44 = vpop.xlane.xlu1 %509  ;;  %17053 = vst [vmem:[#allocation5_spill] sm:$0xff] %v11729_v47  ;;  %v11732_v16 = vadd.f32 %v654_v39, %v11698_v63 }
  0xe3   : > { %v10380_v49 = vpop.eup %10379  ;;  %10385 = vrsqrt.f32 %v610_v41  ;;  %v563_v51 = vsub.f32 %v531_v42, %v547_v21  ;;  %v532_v53 = vmul.f32 0.0078125, %v510_v44 }
  0xe4   : > { %17054 = vst [vmem:[#allocation6_spill] sm:$0xff] %v11732_v16  ;;  %v447_v57 = vpop.xlane.xlu0 %446  ;;  %v684_v24 = vpack.c.bf16 %v11732_v16, %v11729_v47  ;;  %v639_v23 = vmul.f32 %v10380_v49, %v591_v43 }
  0xe5   : > { %v10382_v59 = vpop.eup %10381  ;;  %v579_v60 = vmax.f32 %v563_v51, 0.0  ;;  %v564_v61 = vsub.f32 %v532_v53, %v548_v50  ;;  %v11740_v62 = vmul.f32 0.0078125, %v447_v57  ;;  %v595_v53 = vsub.f32 %v11559_v52, %v11717_v26 }
  0xe6   : > { %912 = vmatmul.mubr.bf16.gmra.mrb[4].mxu0 %v684_v24  ;;  %10027 = vmatmul.mubr.bf16.vlgmr.msra.gmra.mrb[0].mxu1 %v684_v24  ;;  %v449_v58 = vpop.xlane.xlu1 %448  ;;  %v640_v0 = vmul.f32 %v10382_v59, %v592_v56  ;;  %v655_v1 = vmul.f32 %v639_v23, %v11687_v48 }
  0xe7   : > { %v611_v3 = vadd.f32 1e-12, %v579_v60  ;;  %v580_v4 = vmax.f32 %v564_v61, 0.0  ;;  %v549_v27 = vmul.f32 %v11740_v62, %v11740_v62  ;;  %921 = vmatprep.mubr.bf16.mxu0 %v16889_v38  ;;  %v11746_v32 = vmul.f32 0.0078125, %v449_v58 }
  0xe8   : > { %v512_v5 = vpop.xlane.xlu0 %511  ;;  %v656_v10 = vmul.f32 %v640_v0, %v11687_v48  ;;  %v11752_v18 = vadd.f32 %v655_v1, %v11698_v63  ;;  %v596_v58 = vsub.f32 %v11562_v55, %v11723_v7 }
  0xe9   : > { %10387 = vrsqrt.f32 %v611_v3  ;;  %v612_v11 = vadd.f32 1e-12, %v580_v4  ;;  %v533_v12 = vmul.f32 0.0078125, %v512_v5  ;;  %v550_v19 = vmul.f32 %v11746_v32, %v11746_v32 }
  0xea   : > { %v514_v15 = vpop.xlane.xlu1 %513  ;;  %17055 = vst [vmem:[#allocation7_spill] sm:$0xff] %v11752_v18  ;;  %v11755_v20 = vadd.f32 %v656_v10, %v11698_v63 }
  0xeb   : > { %v10384_v2 = vpop.eup %10383  ;;  %10389 = vrsqrt.f32 %v612_v11  ;;  %v565_v22 = vsub.f32 %v533_v12, %v549_v27  ;;  %v534_v25 = vmul.f32 0.0078125, %v514_v15 }
  0xec   : > { %17056 = vst [vmem:[#allocation8_spill] sm:$0xff] %v11755_v20  ;;  %v451_v29 = vpop.xlane.xlu0 %450  ;;  %v685_v36 = vpack.c.bf16 %v11755_v20, %v11752_v18  ;;  %v641_v54 = vmul.f32 %v10384_v2, %v593_v13 }
  0xed   : > { %v10386_v31 = vpop.eup %10385  ;;  %v581_v33 = vmax.f32 %v565_v22, 0.0  ;;  %v566_v34 = vsub.f32 %v534_v25, %v550_v19  ;;  %v11763_v21 = vmul.f32 0.0078125, %v451_v29  ;;  %v597_v25 = vsub.f32 %v11595_v6, %v11740_v62 }
  0xee   : > { %922 = vmatmul.mubr.bf16.gmra.mrb[8].mxu0 %v685_v36  ;;  %10030 = vmatprep.mubr.bf16.mxu1 %v685_v36  ;;  %v453_v37 = vpop.xlane.xlu1 %452  ;;  %v642_v39 = vmul.f32 %v10386_v31, %v594_v28  ;;  %v657_v41 = vmul.f32 %v641_v54, %v11687_v48 }
  0xef   : > { %v613_v42 = vadd.f32 1e-12, %v581_v33  ;;  %v582_v43 = vmax.f32 %v566_v34, 0.0  ;;  %v551_v40 = vmul.f32 %v11763_v21, %v11763_v21  ;;  %931 = vmatprep.mubr.bf16.mxu0 %v16889_v38  ;;  %v11769_v17 = vmul.f32 0.0078125, %v453_v37 }
  0xf0   : > { %v516_v44 = vpop.xlane.xlu0 %515  ;;  %v658_v49 = vmul.f32 %v642_v39, %v11687_v48  ;;  %v11775_v57 = vadd.f32 %v657_v41, %v11698_v63  ;;  %v598_v37 = vsub.f32 %v11610_v14, %v11746_v32  ;;  %v599_v32 = vsub.f32 %v11631_v30, %v11763_v21 }
  0xf1   : > { %10391 = vrsqrt.f32 %v613_v42  ;;  %v614_v50 = vadd.f32 1e-12, %v582_v43  ;;  %v535_v51 = vmul.f32 0.0078125, %v516_v44  ;;  %v552_v59 = vmul.f32 %v11769_v17, %v11769_v17 }
  0xf2   : > { %v518_v56 = vpop.xlane.xlu1 %517  ;;  %17057 = vst [vmem:[#allocation9_spill] sm:$0xff] %v11775_v57  ;;  %v11778_v24 = vadd.f32 %v658_v49, %v11698_v63 }
  0xf3   : > { %v10388_v23 = vpop.eup %10387  ;;  %10393 = vrsqrt.f32 %v614_v50  ;;  %v567_v60 = vsub.f32 %v535_v51, %v551_v40  ;;  %v536_v61 = vmul.f32 0.0078125, %v518_v56 }
  0xf4   : > { %17058 = vst [vmem:[#allocation10_spill] sm:$0xff] %v11778_v24  ;;  %v455_v0 = vpop.xlane.xlu0 %454  ;;  %v686_v52 = vpack.c.bf16 %v11778_v24, %v11775_v57  ;;  %v643_v26 = vmul.f32 %v10388_v23, %v595_v53  ;;  %v600_v23 = vsub.f32 %v11640_v35, %v11769_v17 }
  0xf5   : > { %v10390_v1 = vpop.eup %10389  ;;  %v583_v3 = vmax.f32 %v567_v60, 0.0  ;;  %v568_v4 = vsub.f32 %v536_v61, %v552_v59  ;;  %v11786_v27 = vmul.f32 0.0078125, %v455_v0 }
  0xf6   : > { %932 = vmatmul.mubr.bf16.gmra.mrb[12].mxu0 %v686_v52  ;;  %10031 = vmatmul.mubr.bf16.gmra.mrb[4].mxu1 %v686_v52  ;;  %v457_v5 = vpop.xlane.xlu1 %456  ;;  %v644_v10 = vmul.f32 %v10390_v1, %v596_v58  ;;  %v659_v11 = vmul.f32 %v643_v26, %v11687_v48 }
  0xf7   : > { %v615_v12 = vadd.f32 1e-12, %v583_v3  ;;  %v584_v13 = vmax.f32 %v568_v4, 0.0  ;;  %v553_v55 = vmul.f32 %v11786_v27, %v11786_v27  ;;  %941 = vmatprep.mubr.bf16.mxu0 %v16889_v38  ;;  %v474_v7 = vmul.f32 0.0078125, %v457_v5 }
  0xf8   : > { %v520_v15 = vpop.xlane.xlu0 %519  ;;  %v660_v2 = vmul.f32 %v644_v10, %v11687_v48  ;;  %v11796_v29 = vadd.f32 %v659_v11, %v11698_v63  ;;  %v601_v0 = vsub.f32 %v11656_v45, %v11786_v27 }
  0xf9   : > { %10395 = vrsqrt.f32 %v615_v12  ;;  %v616_v19 = vadd.f32 1e-12, %v584_v13  ;;  %v537_v22 = vmul.f32 0.0078125, %v520_v15  ;;  %v554_v31 = vmul.f32 %v474_v7, %v474_v7 }
  0xfa   : > { %v522_v28 = vpop.xlane.xlu1 %521  ;;  %17059 = vst [vmem:[#allocation11_spill] sm:$0xff] %v11796_v29  ;;  %v11799_v36 = vadd.f32 %v660_v2, %v11698_v63  ;;  %v602_v26 = vsub.f32 %v11659_v46, %v474_v7  ;;  %v394_v12 = vlaneseq }
  0xfb   : > { %v10392_v54 = vpop.eup %10391  ;;  %10397 = vrsqrt.f32 %v616_v19  ;;  %v569_v33 = vsub.f32 %v537_v22, %v553_v55  ;;  %v538_v34 = vmul.f32 0.0078125, %v522_v28  ;;  %v8915_v55 = vld [vmem:[%s16887_s5 + $0x4] ss:$8 sm:$0x7] }
  0xfc   : > { %17060 = vst [vmem:[#allocation12_spill] sm:$0xff] %v11799_v36  ;;  %v687_v39 = vpack.c.bf16 %v11799_v36, %v11796_v29  ;;  %v645_v41 = vmul.f32 %v10392_v54, %v597_v25  ;;  %v395_v13 = vand.u32 127, %v394_v12 }
  0xfd   : > { %v10394_v6 = vpop.eup %10393  ;;  %v585_v62 = vmax.f32 %v569_v33, 0.0  ;;  %v570_v42 = vsub.f32 %v538_v34, %v554_v31 }
  0xfe   : > { %942 = vmatmul.mubr.bf16.gmra.mrb[16].mxu0 %v687_v39  ;;  %10034 = vmatprep.mubr.bf16.mxu1 %v687_v39  ;;  %v646_v43 = vmul.f32 %v10394_v6, %v598_v37  ;;  %v661_v40 = vmul.f32 %v645_v41, %v11687_v48  ;;  %vm399_vm0 = vcmp.ge.s32.totalorder %v395_v13, 32  ;;  %vm400_vm1 = vcmp.lt.s32.totalorder %v395_v13, 64 }
  0xff   : > { %v617_v44 = vadd.f32 1e-12, %v585_v62  ;;  %v586_v49 = vmax.f32 %v570_v42, 0.0  ;;  %951 = vmatprep.mubr.bf16.mxu0 %v16889_v38  ;;  %vm402_vm2 = vcmp.ge.s32.totalorder %v395_v13, 64  ;;  %vm403_vm3 = vcmp.lt.s32.totalorder %v395_v13, 96  ;;  %vm401_vm5 = vmand %vm399_vm0, %vm400_vm1 }
 0x100   : > { %v662_v50 = vmul.f32 %v646_v43, %v11687_v48  ;;  %v11811_v51 = vadd.f32 %v661_v40, %v11698_v63  ;;  %vm397_vm4 = vcmp.lt.s32.totalorder %v395_v13, 32  ;;  %vm404_vm6 = vmand %vm402_vm2, %vm403_vm3  ;;  %vm405_vm7 = vcmp.ge.s32.totalorder %v395_v13, 96 }
 0x101   : > { %10399 = vrsqrt.f32 %v617_v44  ;;  %v618_v14 = vadd.f32 1e-12, %v586_v49  ;;  %vm1105_vm8 = vmpackc.low %vm397_vm4, %vm397_vm4  ;;  %v17071_v40 = vmov 0 }
 0x102   : > { %17061 = vst [vmem:[#allocation13_spill] sm:$0xff] %v11811_v51  ;;  %v11814_v53 = vadd.f32 %v662_v50, %v11698_v63  ;;  %vm1122_vm9 = vmpackc.low %vm401_vm5, %vm401_vm5  ;;  %v1106_v15 = vsel %vm1105_vm8, 65537, %v16889_v38  ;;  %v17074_v50 = vmov 0 }
 0x103   : > { %v10396_v56 = vpop.eup %10395  ;;  %10401 = vrsqrt.f32 %v618_v14  ;;  %vm1139_vm10 = vmpackc.low %vm404_vm6, %vm404_vm6  ;;  %v1123_v2 = vsel %vm1122_vm9, 65537, %v16889_v38  ;;  %v17077_v14 = vmov 0 }
 0x104   : > { %17062 = vst [vmem:[#allocation14_spill] sm:$0xff] %v11814_v53  ;;  %v688_v59 = vpack.c.bf16 %v11814_v53, %v11811_v51  ;;  %v647_v60 = vmul.f32 %v10396_v56, %v599_v32  ;;  %vm1156_vm11 = vmpackc.low %vm405_vm7, %vm405_vm7  ;;  %v1140_v19 = vsel %vm1139_vm10, 65537, %v16889_v38  ;;  %v17080_v32 = vmov 0 }
 0x105   : > { %v10398_v61 = vpop.eup %10397  ;;  %v1157_v22 = vsel %vm1156_vm11, 65537, %v16889_v38 }
 0x106   : > { %952 = vmatmul.mubr.bf16.gmra.mrb[20].mxu0 %v688_v59  ;;  %10035 = vmatmul.mubr.bf16.gmra.mrb[8].mxu1 %v688_v59  ;;  %v648_v58 = vmul.f32 %v10398_v61, %v600_v23  ;;  %v663_v30 = vmul.f32 %v647_v60, %v11687_v48 }
 0x107   : > { %961 = vmatprep.mubr.bf16.mxu0 %v16889_v38 }
 0x108   : > { %v664_v21 = vmul.f32 %v648_v58, %v11687_v48  ;;  %v11826_v52 = vadd.f32 %v663_v30, %v11698_v63 }
 0x10a   : > { %17063 = vst [vmem:[#allocation15_spill] sm:$0xff] %v11826_v52  ;;  %v11829_v35 = vadd.f32 %v664_v21, %v11698_v63 }
 0x10b   : > { %v10400_v17 = vpop.eup %10399 }
 0x10c   : > { %17064 = vst [vmem:[#allocation16_spill] sm:$0xff] %v11829_v35  ;;  %v689_v1 = vpack.c.bf16 %v11829_v35, %v11826_v52  ;;  %v649_v3 = vmul.f32 %v10400_v17, %v601_v0 }
 0x10d   : > { %v10402_v4 = vpop.eup %10401 }
 0x10e   : > { %962 = vmatmul.mubr.bf16.gmra.mrb[24].mxu0 %v689_v1  ;;  %10038 = vmatprep.mubr.bf16.mxu1 %v689_v1  ;;  %v650_v5 = vmul.f32 %v10402_v4, %v602_v26  ;;  %v665_v10 = vmul.f32 %v649_v3, %v11687_v48 }
 0x10f   : > { %971 = vmatprep.mubr.bf16.mxu0 %v16889_v38 }
 0x110   : > { %v666_v45 = vmul.f32 %v650_v5, %v11687_v48  ;;  %v11838_v27 = vadd.f32 %v665_v10, %v11698_v63  ;;  %v11845_v48 = vshrl.u32 %v394_v12, 7 }
 0x112   : > { %17065 = vst [vmem:[#allocation17_spill] sm:$0xff] %v11838_v27  ;;  %v11841_v11 = vadd.f32 %v666_v45, %v11698_v63  ;;  %17067 = vst [vmem:[#allocation19_spill] sm:$0xff] %v11845_v48  ;;  %v11848_v63 = vsub.s32 0, %v11845_v48  ;;  %v11854_v7 = vsub.s32 1, %v11845_v48  ;;  %v11873_v43 = vsub.s32 2, %v11845_v48 }
 0x114   : > { %17066 = vst [vmem:[#allocation18_spill] sm:$0xff] %v11841_v11  ;;  %v690_v46 = vpack.c.bf16 %v11841_v11, %v11838_v27  ;;  %17068 = vst [vmem:[#allocation20_spill] sm:$0xff] %v11848_v63  ;;  %v11861_v25 = vrot.slane %v8915_v55, %v11848_v63  ;;  %v1110_v54 = vrot.slane %v1106_v15, %v11848_v63 }
 0x115   : > { %17069 = vst [vmem:[#allocation21_spill] sm:$0xff] %v11854_v7  ;;  %v11865_v31 = vrot.slane %v8915_v55, %v11854_v7  ;;  %v1127_v33 = vrot.slane %v1123_v2, %v11848_v63  ;;  %v1144_v34 = vrot.slane %v1140_v19, %v11848_v63  ;;  %v1161_v37 = vrot.slane %v1157_v22, %v11848_v63 }
 0x116   : > { %972 = vmatmul.mubr.bf16.gmra.mrb[28].mxu0 %v690_v46  ;;  %10039 = vmatmul.mubr.bf16.gmra.mrb[12].mxu1 %v690_v46  ;;  %17070 = vst [vmem:[#allocation22_spill] sm:$0xff] %v11873_v43  ;;  %vm11875_vm12 = vcmp.ne.s16.totalorder %v1110_v54, 0  ;;  %v11898_v59 = vrot.slane %v8915_v55, %v11873_v43 }
 0x117   : > { %v17072_v40 = vsel %vm11875_vm12, 4294967295, %v17071_v40  ;;  %vm11881_vm13 = vcmp.ne.s16.totalorder %v1127_v33, 0  ;;  %vm11885_vm14 = vcmp.ne.s16.totalorder %v1144_v34, 0  ;;  %vm11889_vm15 = vcmp.ne.s16.totalorder %v1161_v37, 0 }
 0x118   : > { %17073 = vst [vmem:[#allocation23_spill] sm:$0xff] %v17072_v40  ;;  %v17075_v50 = vsel %vm11881_vm13, 4294967295, %v17074_v50  ;;  %v17078_v14 = vsel %vm11885_vm14, 4294967295, %v17077_v14  ;;  %v17081_v32 = vsel %vm11889_vm15, 4294967295, %v17080_v32 }
 0x119   : > { %17076 = vst [vmem:[#allocation24_spill] sm:$0xff] %v17075_v50  ;;  %17079 = vst [vmem:[#allocation25_spill] sm:$0xff] %v17078_v14 }
 0x11a   : > { %17082 = vst [vmem:[#allocation26_spill] sm:$0xff] %v17081_v32  ;;  %v382_v32 = vld [vmem:[%s12165_s26 + $0x20] sm:$0xff] }
 0x1b1   : > { %v903_v28 = vpop.f32.mrb[0].mxu0 }
 0x1b2   : > { %v905_v39 = vpop.f32.mrb[1].mxu0  ;;  %v904_v6 = vadd.f32 %v903_v28, %v11861_v25 }
 0x1b3   : > { %v907_v41 = vpop.f32.mrb[2].mxu0  ;;  %v906_v44 = vadd.f32 %v905_v39, %v11865_v31 }
 0x1b4   : > { %v908_v62 = vadd.f32 %v907_v41, %v11861_v25  ;;  %v909_v42 = vpop.f32.mrb[3].mxu0 }
 0x1b5   : > { %v910_v49 = vadd.f32 %v909_v42, %v11865_v31 }
 0x1b6   : > { %v11893_v56 = vpack.c.bf16 %v908_v62, %v904_v6 }
 0x1b7   : > { %v1087_v23 = vpack.c.bf16 %v910_v49, %v906_v44 }
 0x1b8   : > { %9306 = vmatprep.mubr.bf16.mxu0 %v11893_v56  ;;  %9338 = vmatprep.mubr.bf16.mxu1 %v11893_v56 }
 0x1b9   : > { %v913_v60 = vpop.f32.mrb[4].mxu0  ;;  %v10028_v61 = vpop.f32.mrb[0].mxu1  ;;  %10202 = vmatprep.subr.msk.bf16.mxu0 %vm11881_vm13, %v1087_v23  ;;  %10210 = vmatprep.subr.msk.bf16.mxu1 %vm11889_vm15, %v1087_v23  ;;  %v1112_v58 = vsel %vm11875_vm12, %v1087_v23, 0  ;;  %v1146_v30 = vsel %vm11885_vm14, %v1087_v23, 0 }
 0x1ba   : > { %v914_v21 = vadd.f32 %v913_v60, %v11861_v25  ;;  %v915_v0 = vpop.f32.mrb[5].mxu0  ;;  %v1016_v17 = vpop.f32.mrb[1].mxu1  ;;  %9291 = vmatpush3.bf16.xpose.msra.mxu0 %v1112_v58  ;;  %9323 = vmatpush3.bf16.xpose.msra.mxu1 %v1146_v30  ;;  %v1025_v3 = vadd.f32 %v10028_v61, %v11898_v59 }
 0x1bb   : > { %v917_v26 = vpop.f32.mrb[6].mxu0  ;;  %v10029_v1 = vpop.f32.mrb[2].mxu1  ;;  %v916_v46 = vadd.f32 %v915_v0, %v11865_v31  ;;  %v1017_v12 = vadd.f32 %v1016_v17, %v11898_v59 }
 0x1bc   : > { %v918_v4 = vadd.f32 %v917_v26, %v11861_v25  ;;  %v1028_v5 = vadd.f32 %v10029_v1, %v11898_v59  ;;  %v919_v10 = vpop.f32.mrb[7].mxu0  ;;  %v1019_v45 = vpop.f32.mrb[3].mxu1 }
 0x1bd   : > { %v920_v13 = vadd.f32 %v919_v10, %v11865_v31  ;;  %v1020_v55 = vadd.f32 %v1019_v45, %v11898_v59 }
 0x1be   : > { %v11916_v15 = vpack.c.bf16 %v918_v4, %v914_v21  ;;  %v11918_v2 = vpack.c.bf16 %v1028_v5, %v1025_v3 }
 0x1bf   : > { %v1088_v19 = vpack.c.bf16 %v920_v13, %v916_v46  ;;  %v11920_v22 = vpack.c.bf16 %v1020_v55, %v1017_v12 }
 0x1c1   : > { %v923_v28 = vpop.f32.mrb[8].mxu0  ;;  %10203 = vmatprep.subr.msk.bf16.mxu0 %vm11881_vm13, %v1088_v19  ;;  %10211 = vmatprep.subr.msk.bf16.mxu1 %vm11889_vm15, %v1088_v19  ;;  %v1113_v54 = vsel %vm11875_vm12, %v1088_v19, 0  ;;  %v1147_v33 = vsel %vm11885_vm14, %v1088_v19, 0 }
 0x1c2   : > { %v924_v34 = vadd.f32 %v923_v28, %v11861_v25  ;;  %v925_v37 = vpop.f32.mrb[9].mxu0  ;;  %9293 = vmatpush3.bf16.xpose.msra.mxu0 %v1113_v54  ;;  %9325 = vmatpush3.bf16.xpose.msra.mxu1 %v1147_v33 }
 0x1c3   : > { %v927_v39 = vpop.f32.mrb[10].mxu0  ;;  %v926_v62 = vadd.f32 %v925_v37, %v11865_v31 }
 0x1c4   : > { %v928_v41 = vadd.f32 %v927_v39, %v11861_v25  ;;  %v929_v6 = vpop.f32.mrb[11].mxu0 }
 0x1c5   : > { %v930_v42 = vadd.f32 %v929_v6, %v11865_v31 }
 0x1c6   : > { %v11934_v44 = vpack.c.bf16 %v928_v41, %v924_v34 }
 0x1c7   : > { %v1089_v49 = vpack.c.bf16 %v930_v42, %v926_v62 }
 0x1c9   : > { %v933_v23 = vpop.f32.mrb[12].mxu0  ;;  %v10032_v60 = vpop.f32.mrb[4].mxu1  ;;  %10204 = vmatprep.subr.msk.bf16.mxu0 %vm11881_vm13, %v1089_v49  ;;  %10212 = vmatprep.subr.msk.bf16.mxu1 %vm11889_vm15, %v1089_v49  ;;  %v1114_v61 = vsel %vm11875_vm12, %v1089_v49, 0  ;;  %v1148_v58 = vsel %vm11885_vm14, %v1089_v49, 0 }
 0x1ca   : > { %v934_v30 = vadd.f32 %v933_v23, %v11861_v25  ;;  %v935_v21 = vpop.f32.mrb[13].mxu0  ;;  %v1032_v0 = vpop.f32.mrb[5].mxu1  ;;  %9295 = vmatpush3.bf16.xpose.msra.mxu0 %v1114_v61  ;;  %9327 = vmatpush3.bf16.xpose.msra.mxu1 %v1148_v58  ;;  %v1041_v1 = vadd.f32 %v10032_v60, %v11898_v59 }
 0x1cb   : > { %v937_v17 = vpop.f32.mrb[14].mxu0  ;;  %v10033_v26 = vpop.f32.mrb[6].mxu1  ;;  %v936_v45 = vadd.f32 %v935_v21, %v11865_v31  ;;  %v1033_v46 = vadd.f32 %v1032_v0, %v11898_v59 }
 0x1cc   : > { %v938_v3 = vadd.f32 %v937_v17, %v11861_v25  ;;  %v1044_v4 = vadd.f32 %v10033_v26, %v11898_v59  ;;  %v939_v5 = vpop.f32.mrb[15].mxu0  ;;  %v1035_v10 = vpop.f32.mrb[7].mxu1 }
 0x1cd   : > { %v940_v12 = vadd.f32 %v939_v5, %v11865_v31  ;;  %v1036_v13 = vadd.f32 %v1035_v10, %v11898_v59 }
 0x1ce   : > { %v11952_v55 = vpack.c.bf16 %v938_v3, %v934_v30  ;;  %v11954_v19 = vpack.c.bf16 %v1044_v4, %v1041_v1 }
 0x1cf   : > { %v1090_v28 = vpack.c.bf16 %v940_v12, %v936_v45  ;;  %v11956_v54 = vpack.c.bf16 %v1036_v13, %v1033_v46 }
 0x1d1   : > { %v943_v33 = vpop.f32.mrb[16].mxu0  ;;  %10205 = vmatprep.subr.msk.bf16.mxu0 %vm11881_vm13, %v1090_v28  ;;  %10213 = vmatprep.subr.msk.bf16.mxu1 %vm11889_vm15, %v1090_v28  ;;  %v1115_v34 = vsel %vm11875_vm12, %v1090_v28, 0  ;;  %v1149_v37 = vsel %vm11885_vm14, %v1090_v28, 0 }
 0x1d2   : > { %v944_v39 = vadd.f32 %v943_v33, %v11861_v25  ;;  %v945_v41 = vpop.f32.mrb[17].mxu0  ;;  %9297 = vmatpush3.bf16.xpose.msra.mxu0 %v1115_v34  ;;  %9329 = vmatpush3.bf16.xpose.msra.mxu1 %v1149_v37 }
 0x1d3   : > { %v947_v6 = vpop.f32.mrb[18].mxu0  ;;  %v946_v49 = vadd.f32 %v945_v41, %v11865_v31 }
 0x1d4   : > { %v948_v62 = vadd.f32 %v947_v6, %v11861_v25  ;;  %v949_v42 = vpop.f32.mrb[19].mxu0 }
 0x1d5   : > { %v950_v23 = vadd.f32 %v949_v42, %v11865_v31 }
 0x1d6   : > { %v11970_v60 = vpack.c.bf16 %v948_v62, %v944_v39 }
 0x1d7   : > { %v1091_v61 = vpack.c.bf16 %v950_v23, %v946_v49 }
 0x1d9   : > { %v953_v58 = vpop.f32.mrb[20].mxu0  ;;  %v10036_v30 = vpop.f32.mrb[8].mxu1  ;;  %10206 = vmatprep.subr.msk.bf16.mxu0 %vm11881_vm13, %v1091_v61  ;;  %10214 = vmatprep.subr.msk.bf16.mxu1 %vm11889_vm15, %v1091_v61  ;;  %v1116_v21 = vsel %vm11875_vm12, %v1091_v61, 0  ;;  %v1150_v0 = vsel %vm11885_vm14, %v1091_v61, 0 }
 0x1da   : > { %v954_v17 = vadd.f32 %v953_v58, %v11861_v25  ;;  %v955_v26 = vpop.f32.mrb[21].mxu0  ;;  %v1048_v1 = vpop.f32.mrb[9].mxu1  ;;  %9299 = vmatpush3.bf16.xpose.msra.mxu0 %v1116_v21  ;;  %9331 = vmatpush3.bf16.xpose.msra.mxu1 %v1150_v0  ;;  %v1057_v5 = vadd.f32 %v10036_v30, %v11898_v59 }
 0x1db   : > { %v957_v3 = vpop.f32.mrb[22].mxu0  ;;  %v10037_v4 = vpop.f32.mrb[10].mxu1  ;;  %v956_v13 = vadd.f32 %v955_v26, %v11865_v31  ;;  %v1049_v28 = vadd.f32 %v1048_v1, %v11898_v59 }
 0x1dc   : > { %v958_v10 = vadd.f32 %v957_v3, %v11861_v25  ;;  %v1060_v45 = vadd.f32 %v10037_v4, %v11898_v59  ;;  %v959_v46 = vpop.f32.mrb[23].mxu0  ;;  %v1051_v12 = vpop.f32.mrb[11].mxu1 }
 0x1dd   : > { %v960_v33 = vadd.f32 %v959_v46, %v11865_v31  ;;  %v1052_v34 = vadd.f32 %v1051_v12, %v11898_v59 }
 0x1de   : > { %v11988_v37 = vpack.c.bf16 %v958_v10, %v954_v17  ;;  %v11990_v39 = vpack.c.bf16 %v1060_v45, %v1057_v5 }
 0x1df   : > { %v1092_v41 = vpack.c.bf16 %v960_v33, %v956_v13  ;;  %v11992_v6 = vpack.c.bf16 %v1052_v34, %v1049_v28 }
 0x1e1   : > { %v963_v62 = vpop.f32.mrb[24].mxu0  ;;  %10207 = vmatprep.subr.msk.bf16.mxu0 %vm11881_vm13, %v1092_v41  ;;  %10215 = vmatprep.subr.msk.bf16.mxu1 %vm11889_vm15, %v1092_v41  ;;  %v1117_v42 = vsel %vm11875_vm12, %v1092_v41, 0  ;;  %v1151_v49 = vsel %vm11885_vm14, %v1092_v41, 0 }
 0x1e2   : > { %v964_v23 = vadd.f32 %v963_v62, %v11861_v25  ;;  %v965_v61 = vpop.f32.mrb[25].mxu0  ;;  %9301 = vmatpush3.bf16.xpose.msra.mxu0 %v1117_v42  ;;  %9333 = vmatpush3.bf16.xpose.msra.mxu1 %v1151_v49 }
 0x1e3   : > { %v967_v58 = vpop.f32.mrb[26].mxu0  ;;  %v966_v0 = vadd.f32 %v965_v61, %v11865_v31 }
 0x1e4   : > { %v968_v30 = vadd.f32 %v967_v58, %v11861_v25  ;;  %v969_v21 = vpop.f32.mrb[27].mxu0 }
 0x1e5   : > { %v970_v17 = vadd.f32 %v969_v21, %v11865_v31 }
 0x1e6   : > { %v12006_v26 = vpack.c.bf16 %v968_v30, %v964_v23 }
 0x1e7   : > { %v1093_v1 = vpack.c.bf16 %v970_v17, %v966_v0 }
 0x1e9   : > { %v973_v3 = vpop.f32.mrb[28].mxu0  ;;  %v10040_v4 = vpop.f32.mrb[12].mxu1  ;;  %10208 = vmatprep.subr.msk.bf16.mxu0 %vm11881_vm13, %v1093_v1  ;;  %10216 = vmatprep.subr.msk.bf16.mxu1 %vm11889_vm15, %v1093_v1  ;;  %v1118_v5 = vsel %vm11875_vm12, %v1093_v1, 0  ;;  %v1152_v10 = vsel %vm11885_vm14, %v1093_v1, 0  ;;  %v1187_v1 = vsel %vm11885_vm14, %v11920_v22, 0 }
 0x1ea   : > { %v974_v45 = vadd.f32 %v973_v3, %v11861_v25  ;;  %v975_v46 = vpop.f32.mrb[29].mxu0  ;;  %v1064_v12 = vpop.f32.mrb[13].mxu1  ;;  %9303 = vmatpush3.bf16.xpose.msra.mxu0 %v1118_v5  ;;  %9335 = vmatpush3.bf16.xpose.msra.mxu1 %v1152_v10  ;;  %v1073_v33 = vadd.f32 %v10040_v4, %v11898_v59  ;;  %v1188_v3 = vsel %vm11885_vm14, %v11918_v2, 0  ;;  %v1190_v4 = vsel %vm11885_vm14, %v11954_v19, 0 }
 0x1eb   : > { %v977_v13 = vpop.f32.mrb[30].mxu0  ;;  %v10041_v28 = vpop.f32.mrb[14].mxu1  ;;  %v976_v49 = vadd.f32 %v975_v46, %v11865_v31  ;;  %v1065_v23 = vadd.f32 %v1064_v12, %v11898_v59  ;;  %v1192_v5 = vsel %vm11885_vm14, %v11990_v39, 0 }
 0x1ec   : > { %v978_v34 = vadd.f32 %v977_v13, %v11861_v25  ;;  %v1076_v41 = vadd.f32 %v10041_v28, %v11898_v59  ;;  %v979_v62 = vpop.f32.mrb[31].mxu0  ;;  %v1067_v42 = vpop.f32.mrb[15].mxu1 }
 0x1ed   : > { %v980_v61 = vadd.f32 %v979_v62, %v11865_v31  ;;  %v1068_v58 = vadd.f32 %v1067_v42, %v11898_v59  ;;  %v1171_v59 = vsel %vm11875_vm12, %v11920_v22, 0 }
 0x1ee   : > { %v12024_v30 = vpack.c.bf16 %v978_v34, %v974_v45  ;;  %v12026_v21 = vpack.c.bf16 %v1076_v41, %v1073_v33  ;;  %v378_v45 = vld [vmem:[%s12165_s26] sm:$0xff]  ;;  %v379_v33 = vld [vmem:[%s12165_s26 + $0x8] sm:$0xff] }
 0x1ef   : > { %v1094_v0 = vpack.c.bf16 %v980_v61, %v976_v49  ;;  %v12028_v17 = vpack.c.bf16 %v1068_v58, %v1065_v23 }
 0x1f0   : > { %v1194_v10 = vsel %vm11885_vm14, %v12026_v21, 0 }
 0x1f1   : > { %10209 = vmatprep.subr.msk.bf16.mxu0 %vm11881_vm13, %v1094_v0  ;;  %10217 = vmatprep.subr.msk.bf16.mxu1 %vm11889_vm15, %v1094_v0  ;;  %v1119_v25 = vsel %vm11875_vm12, %v1094_v0, 0  ;;  %v1153_v31 = vsel %vm11885_vm14, %v1094_v0, 0 }
 0x1f2   : > { %9305 = vmatpush3.bf16.xpose.msra.mxu0 %v1119_v25  ;;  %9337 = vmatpush3.bf16.xpose.msra.mxu1 %v1153_v31 }
 0x1f3   : > { %10218 = vmatprep.subr.msk.bf16.mxu0 %vm11881_vm13, %v11920_v22  ;;  %10226 = vmatprep.subr.msk.bf16.mxu1 %vm11889_vm15, %v11920_v22  ;;  %v1189_v22 = vsel %vm11885_vm14, %v11956_v54, 0 }
 0x1f9   : > { %9307 = vmatmul.mubr.bf16.vlgmr.msra.gmra.mrb[32].mxu0 %v11893_v56  ;;  %9339 = vmatmul.mubr.bf16.vlgmr.msra.gmra.mrb[16].mxu1 %v11893_v56  ;;  %v1172_v56 = vsel %vm11875_vm12, %v11918_v2, 0 }
 0x1fa   : > { %9308 = vmatprep.mubr.bf16.mxu0 %v11916_v15  ;;  %9340 = vmatprep.mubr.bf16.mxu1 %v11916_v15 }
 0x1fb   : > { %9355 = vmatpush3.bf16.msra.mxu0 %v1171_v59  ;;  %9419 = vmatpush3.bf16.msra.mxu1 %v1187_v1 }
 0x1fc   : > { %10219 = vmatprep.subr.msk.bf16.mxu0 %vm11881_vm13, %v11918_v2  ;;  %10227 = vmatprep.subr.msk.bf16.mxu1 %vm11889_vm15, %v11918_v2  ;;  %v1173_v2 = vsel %vm11875_vm12, %v11956_v54, 0 }
 0x1ff   : > { %9357 = vmatpush3.bf16.msra.mxu0 %v1172_v56  ;;  %9421 = vmatpush3.bf16.msra.mxu1 %v1188_v3 }
 0x200   : > { %10220 = vmatprep.subr.msk.bf16.mxu0 %vm11881_vm13, %v11956_v54  ;;  %10228 = vmatprep.subr.msk.bf16.mxu1 %vm11889_vm15, %v11956_v54  ;;  %v1191_v54 = vsel %vm11885_vm14, %v11992_v6, 0 }
 0x201   : > { %9309 = vmatmul.mubr.bf16.gmra.mrb[36].mxu0 %v11916_v15  ;;  %9341 = vmatmul.mubr.bf16.gmra.mrb[20].mxu1 %v11916_v15  ;;  %v1174_v15 = vsel %vm11875_vm12, %v11954_v19, 0 }
 0x202   : > { %9310 = vmatprep.mubr.bf16.mxu0 %v11934_v44  ;;  %9342 = vmatprep.mubr.bf16.mxu1 %v11934_v44 }
 0x203   : > { %9359 = vmatpush3.bf16.msra.mxu0 %v1173_v2  ;;  %9423 = vmatpush3.bf16.msra.mxu1 %v1189_v22 }
 0x204   : > { %10221 = vmatprep.subr.msk.bf16.mxu0 %vm11881_vm13, %v11954_v19  ;;  %10229 = vmatprep.subr.msk.bf16.mxu1 %vm11889_vm15, %v11954_v19  ;;  %v1175_v19 = vsel %vm11875_vm12, %v11992_v6, 0 }
 0x207   : > { %9361 = vmatpush3.bf16.msra.mxu0 %v1174_v15  ;;  %9425 = vmatpush3.bf16.msra.mxu1 %v1190_v4 }
 0x208   : > { %10222 = vmatprep.subr.msk.bf16.mxu0 %vm11881_vm13, %v11992_v6  ;;  %10230 = vmatprep.subr.msk.bf16.mxu1 %vm11889_vm15, %v11992_v6  ;;  %v1193_v6 = vsel %vm11885_vm14, %v12028_v17, 0 }
 0x209   : > { %9311 = vmatmul.mubr.bf16.gmra.mrb[40].mxu0 %v11934_v44  ;;  %9343 = vmatmul.mubr.bf16.gmra.mrb[24].mxu1 %v11934_v44  ;;  %v1176_v44 = vsel %vm11875_vm12, %v11990_v39, 0 }
 0x20a   : > { %9312 = vmatprep.mubr.bf16.mxu0 %v11952_v55  ;;  %9344 = vmatprep.mubr.bf16.mxu1 %v11952_v55 }
 0x20b   : > { %9363 = vmatpush3.bf16.msra.mxu0 %v1175_v19  ;;  %9427 = vmatpush3.bf16.msra.mxu1 %v1191_v54 }
 0x20c   : > { %10223 = vmatprep.subr.msk.bf16.mxu0 %vm11881_vm13, %v11990_v39  ;;  %10231 = vmatprep.subr.msk.bf16.mxu1 %vm11889_vm15, %v11990_v39  ;;  %v1177_v39 = vsel %vm11875_vm12, %v12028_v17, 0 }
 0x20f   : > { %9365 = vmatpush3.bf16.msra.mxu0 %v1176_v44  ;;  %9429 = vmatpush3.bf16.msra.mxu1 %v1192_v5 }
 0x210   : > { %10224 = vmatprep.subr.msk.bf16.mxu0 %vm11881_vm13, %v12028_v17  ;;  %10232 = vmatprep.subr.msk.bf16.mxu1 %vm11889_vm15, %v12028_v17 }
 0x211   : > { %9313 = vmatmul.mubr.bf16.gmra.mrb[44].mxu0 %v11952_v55  ;;  %9345 = vmatmul.mubr.bf16.gmra.mrb[28].mxu1 %v11952_v55  ;;  %v1178_v55 = vsel %vm11875_vm12, %v12026_v21, 0 }
 0x212   : > { %9314 = vmatprep.mubr.bf16.mxu0 %v11970_v60  ;;  %9346 = vmatprep.mubr.bf16.mxu1 %v11970_v60 }
 0x213   : > { %9367 = vmatpush3.bf16.msra.mxu0 %v1177_v39  ;;  %9431 = vmatpush3.bf16.msra.mxu1 %v1193_v6  ;;  %v380_v6 = vld [vmem:[%s12165_s26 + $0x10] sm:$0xff] }
 0x214   : > { %10225 = vmatprep.subr.msk.bf16.mxu0 %vm11881_vm13, %v12026_v21  ;;  %10233 = vmatprep.subr.msk.bf16.mxu1 %vm11889_vm15, %v12026_v21 }
 0x217   : > { %9369 = vmatpush3.bf16.msra.mxu0 %v1178_v55  ;;  %9433 = vmatpush3.bf16.msra.mxu1 %v1194_v10 }
 0x219   : > { %9315 = vmatmul.mubr.bf16.gmra.mrb[48].mxu0 %v11970_v60  ;;  %9347 = vmatmul.mubr.bf16.gmra.mrb[32].mxu1 %v11970_v60 }
 0x21a   : > { %9316 = vmatprep.mubr.bf16.mxu0 %v11988_v37  ;;  %9348 = vmatprep.mubr.bf16.mxu1 %v11988_v37 }
 0x221   : > { %9317 = vmatmul.mubr.bf16.gmra.mrb[52].mxu0 %v11988_v37  ;;  %9349 = vmatmul.mubr.bf16.gmra.mrb[36].mxu1 %v11988_v37 }
 0x222   : > { %9318 = vmatprep.mubr.bf16.mxu0 %v12006_v26  ;;  %9350 = vmatprep.mubr.bf16.mxu1 %v12006_v26 }
 0x229   : > { %9319 = vmatmul.mubr.bf16.gmra.mrb[56].mxu0 %v12006_v26  ;;  %9351 = vmatmul.mubr.bf16.gmra.mrb[40].mxu1 %v12006_v26 }
 0x22a   : > { %9320 = vmatprep.mubr.bf16.mxu0 %v12024_v30  ;;  %9352 = vmatprep.mubr.bf16.mxu1 %v12024_v30 }
 0x231   : > { %9321 = vmatmul.mubr.bf16.gmra.mrb[60].mxu0 %v12024_v30  ;;  %9353 = vmatmul.mubr.bf16.gmra.mrb[44].mxu1 %v12024_v30 }
 0x2cc   : > { %v1237_v60 = vpop.f32.mrb[32].mxu0  ;;  %v1350_v37 = vpop.f32.mrb[16].mxu1 }
 0x2cd   : > { %v1239_v46 = vpop.f32.mrb[33].mxu0  ;;  %v1352_v12 = vpop.f32.mrb[17].mxu1  ;;  %v1429_v26 = vmul.f32 0.17677669, %v1237_v60  ;;  %v1431_v49 = vmul.f32 0.17677669, %v1350_v37 }
 0x2ce   : > { %v1241_v13 = vpop.f32.mrb[34].mxu0  ;;  %v1354_v28 = vpop.f32.mrb[18].mxu1  ;;  %v1430_v30 = vmul.f32 0.17677669, %v1239_v46  ;;  %v1432_v15 = vmul.f32 0.17677669, %v1352_v12 }
 0x2cf   : > { %v1243_v34 = vpop.f32.mrb[35].mxu0  ;;  %v1356_v41 = vpop.f32.mrb[19].mxu1  ;;  %v12169_v62 = vadd.f32 %v1429_v26, %v378_v45  ;;  %v1433_v42 = vmul.f32 0.17677669, %v1241_v13  ;;  %v1435_v61 = vmul.f32 0.17677669, %v1354_v28  ;;  %v12175_v58 = vadd.f32 %v1431_v49, %v378_v45 }
 0x2d0   : > { %v1434_v59 = vmul.f32 0.17677669, %v1243_v34  ;;  %v12181_v22 = vadd.f32 %v1430_v30, %v378_v45  ;;  %v1436_v19 = vmul.f32 0.17677669, %v1356_v41  ;;  %v12187_v54 = vadd.f32 %v1432_v15, %v378_v45  ;;  %v381_v26 = vld [vmem:[%s12165_s26 + $0x18] sm:$0xff] }
 0x2d1   : > { %1509 = vmax.xlane.f32.xlu0 %v12169_v62  ;;  %v12172_v23 = vadd.f32 %v1433_v42, %v379_v33  ;;  %v12178_v31 = vadd.f32 %v1435_v61, %v379_v33 }
 0x2d2   : > { %v12184_v4 = vadd.f32 %v1434_v59, %v379_v33  ;;  %v12193_v60 = vadd.f32 %v1436_v19, %v379_v33 }
 0x2d3   : > { %1511 = vmax.xlane.f32.xlu1 %v12172_v23 }
 0x2d4   : > { %v1247_v21 = vpop.f32.mrb[36].mxu0  ;;  %v1360_v0 = vpop.f32.mrb[20].mxu1 }
 0x2d5   : > { %v1249_v17 = vpop.f32.mrb[37].mxu0  ;;  %v1362_v25 = vpop.f32.mrb[21].mxu1  ;;  %1829 = vmax.xlane.f32.xlu0 %v12175_v58  ;;  %v1437_v44 = vmul.f32 0.17677669, %v1247_v21  ;;  %v1439_v34 = vmul.f32 0.17677669, %v1360_v0 }
 0x2d6   : > { %v1251_v1 = vpop.f32.mrb[38].mxu0  ;;  %v1364_v56 = vpop.f32.mrb[22].mxu1  ;;  %v1438_v49 = vmul.f32 0.17677669, %v1249_v17 }
 0x2d7   : > { %v1253_v3 = vpop.f32.mrb[39].mxu0  ;;  %v1366_v2 = vpop.f32.mrb[23].mxu1  ;;  %1831 = vmax.xlane.f32.xlu1 %v12178_v31  ;;  %v1441_v37 = vmul.f32 0.17677669, %v1251_v1  ;;  %v12199_v45 = vadd.f32 %v1437_v44, %v380_v6  ;;  %v1443_v42 = vmul.f32 0.17677669, %v1364_v56  ;;  %v12205_v33 = vadd.f32 %v1439_v34, %v380_v6 }
 0x2d8   : > { %v1442_v1 = vmul.f32 0.17677669, %v1253_v3  ;;  %v12223_v17 = vadd.f32 %v1438_v49, %v380_v6 }
 0x2d9   : > { %1669 = vmax.xlane.f32.xlu0 %v12181_v22  ;;  %v12202_v41 = vadd.f32 %v1441_v37, %v381_v26  ;;  %v12214_v0 = vadd.f32 %v1443_v42, %v381_v26  ;;  %v1440_v37 = vmul.f32 0.17677669, %v1362_v25  ;;  %v1444_v42 = vmul.f32 0.17677669, %v1366_v2 }
 0x2da   : > { %v12226_v34 = vadd.f32 %v1442_v1, %v381_v26 }
 0x2db   : > { %1671 = vmax.xlane.f32.xlu1 %v12184_v4  ;;  %v12229_v3 = vadd.f32 %v1440_v37, %v380_v6  ;;  %v12241_v25 = vadd.f32 %v1444_v42, %v381_v26  ;;  %v383_v6 = vld [vmem:[%s12165_s26 + $0x28] sm:$0xff] }
 0x2dc   : > { %v1257_v5 = vpop.f32.mrb[40].mxu0  ;;  %v1370_v39 = vpop.f32.mrb[24].mxu1 }
 0x2dd   : > { %v1259_v55 = vpop.f32.mrb[41].mxu0  ;;  %v12190_v10 = vpop.f32.mrb[25].mxu1  ;;  %1989 = vmax.xlane.f32.xlu0 %v12187_v54  ;;  %v1445_v38 = vmul.f32 0.17677669, %v1257_v5  ;;  %v1447_v63 = vmul.f32 0.17677669, %v1370_v39 }
 0x2de   : > { %v1261_v46 = vpop.f32.mrb[42].mxu0  ;;  %v1374_v12 = vpop.f32.mrb[26].mxu1  ;;  %v1446_v42 = vmul.f32 0.17677669, %v1259_v55  ;;  %v1448_v51 = vmul.f32 0.17677669, %v12190_v10 }
 0x2df   : > { %v1263_v13 = vpop.f32.mrb[43].mxu0  ;;  %v12196_v28 = vpop.f32.mrb[27].mxu1  ;;  %1991 = vmax.xlane.f32.xlu1 %v12193_v60  ;;  %v1449_v1 = vmul.f32 0.17677669, %v1261_v46  ;;  %v12253_v43 = vadd.f32 %v1445_v38, %v382_v32  ;;  %v1451_v26 = vmul.f32 0.17677669, %v1374_v12  ;;  %v12259_v46 = vadd.f32 %v1447_v63, %v382_v32 }
 0x2e0   : > { %v1450_v39 = vmul.f32 0.17677669, %v1263_v13  ;;  %v12281_v53 = vadd.f32 %v1446_v42, %v382_v32  ;;  %v1452_v13 = vmul.f32 0.17677669, %v12196_v28  ;;  %v12289_v36 = vadd.f32 %v1448_v51, %v382_v32  ;;  %v384_v42 = vld [vmem:[%s12165_s26 + $0x30] sm:$0xff]  ;;  %v385_v51 = vld [vmem:[%s12165_s26 + $0x38] sm:$0xff] }
 0x2e1   : > { %1513 = vmax.xlane.f32.xlu0 %v12199_v45  ;;  %v12256_v48 = vadd.f32 %v1449_v1, %v383_v6  ;;  %17083 = vst [vmem:[#allocation27_spill] sm:$0xff] %v12259_v46  ;;  %v12270_v38 = vadd.f32 %v1451_v26, %v383_v6 }
 0x2e2   : > { %17085 = vst [vmem:[#allocation29_spill] sm:$0xff] %v12281_v53  ;;  %v12285_v26 = vadd.f32 %v1450_v39, %v383_v6  ;;  %17087 = vst [vmem:[#allocation31_spill] sm:$0xff] %v12289_v36  ;;  %v12301_v39 = vadd.f32 %v1452_v13, %v383_v6 }
 0x2e3   : > { %1515 = vmax.xlane.f32.xlu1 %v12202_v41  ;;  %17084 = vst [vmem:[#allocation28_spill] sm:$0xff] %v12270_v38 }
 0x2e4   : > { %v1267_v61 = vpop.f32.mrb[44].mxu0  ;;  %v12207_v30 = vpop.f32.mrb[28].mxu1  ;;  %17086 = vst [vmem:[#allocation30_spill] sm:$0xff] %v12285_v26  ;;  %17088 = vst [vmem:[#allocation32_spill] sm:$0xff] %v12301_v39 }
 0x2e5   : > { %v12209_v21 = vpop.f32.mrb[45].mxu0  ;;  %v12211_v59 = vpop.f32.mrb[29].mxu1  ;;  %1833 = vmax.xlane.f32.xlu0 %v12205_v33  ;;  %v1453_v29 = vmul.f32 0.17677669, %v1267_v61  ;;  %v1455_v9 = vmul.f32 0.17677669, %v12207_v30 }
 0x2e6   : > { %v1271_v15 = vpop.f32.mrb[46].mxu0  ;;  %v12216_v56 = vpop.f32.mrb[30].mxu1  ;;  %v1454_v8 = vmul.f32 0.17677669, %v12209_v21 }
 0x2e7   : > { %v12218_v19 = vpop.f32.mrb[47].mxu0  ;;  %v12220_v44 = vpop.f32.mrb[31].mxu1  ;;  %1835 = vmax.xlane.f32.xlu1 %v12214_v0  ;;  %v1457_v18 = vmul.f32 0.17677669, %v1271_v15  ;;  %v12313_v47 = vadd.f32 %v1453_v29, %v384_v42  ;;  %v1459_v15 = vmul.f32 0.17677669, %v12216_v56  ;;  %v12321_v13 = vadd.f32 %v1455_v9, %v384_v42 }
 0x2e8   : > { %v1458_v30 = vmul.f32 0.17677669, %v12218_v19  ;;  %v1460_v19 = vmul.f32 0.17677669, %v12220_v44 }
 0x2e9   : > { %1673 = vmax.xlane.f32.xlu0 %v12223_v17  ;;  %17089 = vst [vmem:[#allocation33_spill] sm:$0xff] %v12313_v47  ;;  %v12317_v6 = vadd.f32 %v1457_v18, %v385_v51  ;;  %17091 = vst [vmem:[#allocation35_spill] sm:$0xff] %v12321_v13  ;;  %v12333_v18 = vadd.f32 %v1459_v15, %v385_v51 }
 0x2ea   : > { %v12349_v15 = vadd.f32 %v1458_v30, %v385_v51 }
 0x2eb   : > { %1675 = vmax.xlane.f32.xlu1 %v12226_v34  ;;  %17090 = vst [vmem:[#allocation34_spill] sm:$0xff] %v12317_v6  ;;  %17092 = vst [vmem:[#allocation36_spill] sm:$0xff] %v12333_v18 }
 0x2ec   : > { %v12231_v14 = vpop.f32.mrb[48].mxu0  ;;  %v12233_v40 = vpop.f32.mrb[32].mxu1 }
 0x2ed   : > { %v12236_v50 = vpop.f32.mrb[49].mxu0  ;;  %v12238_v49 = vpop.f32.mrb[33].mxu1  ;;  %1993 = vmax.xlane.f32.xlu0 %v12229_v3  ;;  %v1463_v44 = vmul.f32 0.17677669, %v12233_v40 }
 0x2ee   : > { %v12243_v2 = vpop.f32.mrb[50].mxu0  ;;  %v12245_v7 = vpop.f32.mrb[34].mxu1 }
 0x2ef   : > { %v12248_v5 = vpop.f32.mrb[51].mxu0  ;;  %v12250_v37 = vpop.f32.mrb[35].mxu1  ;;  %1995 = vmax.xlane.f32.xlu1 %v12241_v25 }
 0x2f0   : > { %v1466_v40 = vmul.f32 0.17677669, %v12248_v5 }
 0x2f1   : > { %1517 = vmax.xlane.f32.xlu0 %v12253_v43 }
 0x2f3   : > { %1519 = vmax.xlane.f32.xlu1 %v12256_v48 }
 0x2f4   : > { %v12261_v11 = vpop.f32.mrb[52].mxu0  ;;  %v12263_v27 = vpop.f32.mrb[36].mxu1 }
 0x2f5   : > { %v12265_v35 = vpop.f32.mrb[53].mxu0  ;;  %v12267_v52 = vpop.f32.mrb[37].mxu1  ;;  %1837 = vmax.xlane.f32.xlu0 %v12259_v46  ;;  %v386_v46 = vld [vmem:[%s12165_s26 + $0x40] sm:$0xff] }
 0x2f6   : > { %v12272_v12 = vpop.f32.mrb[54].mxu0  ;;  %v12274_v1 = vpop.f32.mrb[38].mxu1 }
 0x2f7   : > { %v12276_v63 = vpop.f32.mrb[55].mxu0  ;;  %v12278_v55 = vpop.f32.mrb[39].mxu1  ;;  %1839 = vmax.xlane.f32.xlu1 %v12270_v38  ;;  %v1461_v38 = vmul.f32 0.17677669, %v12231_v14  ;;  %v1467_v14 = vmul.f32 0.17677669, %v12245_v7 }
 0x2f8   : > { %v1464_v7 = vmul.f32 0.17677669, %v12238_v49  ;;  %v389_v49 = vld [vmem:[%s12165_s26 + $0x58] sm:$0xff] }
 0x2f9   : > { %1677 = vmax.xlane.f32.xlu0 %v12281_v53  ;;  %v12363_v30 = vadd.f32 %v1461_v38, %v386_v46 }
 0x2fb   : > { %1679 = vmax.xlane.f32.xlu1 %v12285_v26 }
 0x2fc   : > { %v12291_v24 = vpop.f32.mrb[56].mxu0  ;;  %v12293_v57 = vpop.f32.mrb[40].mxu1 }
 0x2fd   : > { %v12296_v20 = vpop.f32.mrb[57].mxu0  ;;  %v12298_v10 = vpop.f32.mrb[41].mxu1  ;;  %1997 = vmax.xlane.f32.xlu0 %v12289_v36 }
 0x2fe   : > { %v12303_v28 = vpop.f32.mrb[58].mxu0  ;;  %v12305_v16 = vpop.f32.mrb[42].mxu1 }
 0x2ff   : > { %v12308_v32 = vpop.f32.mrb[59].mxu0  ;;  %v12310_v61 = vpop.f32.mrb[43].mxu1  ;;  %1999 = vmax.xlane.f32.xlu1 %v12301_v39 }
 0x301   : > { %1521 = vmax.xlane.f32.xlu0 %v12313_v47  ;;  %v12345_v47 = vadd.f32 %v1454_v8, %v384_v42  ;;  %v1465_v8 = vmul.f32 0.17677669, %v12243_v2  ;;  %v1462_v2 = vmul.f32 0.17677669, %v12236_v50  ;;  %v12387_v50 = vadd.f32 %v1464_v7, %v386_v46 }
 0x303   : > { %1523 = vmax.xlane.f32.xlu1 %v12317_v6 }
 0x304   : > { %v12324_v36 = vpop.f32.mrb[60].mxu0  ;;  %v12326_v26 = vpop.f32.mrb[44].mxu1 }
 0x305   : > { %v12328_v29 = vpop.f32.mrb[61].mxu0  ;;  %v12330_v39 = vpop.f32.mrb[45].mxu1  ;;  %1841 = vmax.xlane.f32.xlu0 %v12321_v13  ;;  %v1456_v13 = vmul.f32 0.17677669, %v12211_v59  ;;  %v387_v59 = vld [vmem:[%s12165_s26 + $0x48] sm:$0xff] }
 0x306   : > { %v12336_v56 = vpop.f32.mrb[62].mxu0  ;;  %v12338_v9 = vpop.f32.mrb[46].mxu1  ;;  %v12375_v38 = vadd.f32 %v1467_v14, %v387_v59  ;;  %v388_v14 = vld [vmem:[%s12165_s26 + $0x50] sm:$0xff] }
 0x307   : > { %v12340_v21 = vpop.f32.mrb[63].mxu0  ;;  %v12342_v6 = vpop.f32.mrb[47].mxu1  ;;  %1843 = vmax.xlane.f32.xlu1 %v12333_v18  ;;  %v12353_v53 = vadd.f32 %v1456_v13, %v384_v42  ;;  %v12358_v18 = vadd.f32 %v1460_v19, %v385_v51  ;;  %v12367_v42 = vadd.f32 %v1465_v8, %v387_v59  ;;  %v12371_v51 = vadd.f32 %v1463_v44, %v386_v46 }
 0x308   : > { %v12379_v13 = vadd.f32 %v1462_v2, %v386_v46  ;;  %v12383_v19 = vadd.f32 %v1466_v40, %v387_v59  ;;  %v1468_v8 = vmul.f32 0.17677669, %v12250_v37  ;;  %v1469_v44 = vmul.f32 0.17677669, %v12261_v11 }
 0x309   : > { %1681 = vmax.xlane.f32.xlu0 %v12345_v47  ;;  %v1473_v2 = vmul.f32 0.17677669, %v12272_v12  ;;  %v1471_v37 = vmul.f32 0.17677669, %v12263_v27  ;;  %v1475_v11 = vmul.f32 0.17677669, %v12274_v1 }
 0x30a   : > { %v12392_v5 = vadd.f32 %v1468_v8, %v387_v59  ;;  %v12397_v40 = vadd.f32 %v1469_v44, %v388_v14  ;;  %v1470_v12 = vmul.f32 0.17677669, %v12265_v35  ;;  %v1474_v27 = vmul.f32 0.17677669, %v12276_v63 }
 0x30b   : > { %1683 = vmax.xlane.f32.xlu1 %v12349_v15  ;;  %v12401_v46 = vadd.f32 %v1473_v2, %v389_v49  ;;  %v12405_v59 = vadd.f32 %v1471_v37, %v388_v14  ;;  %v12409_v7 = vadd.f32 %v1475_v11, %v389_v49  ;;  %v1472_v1 = vmul.f32 0.17677669, %v12267_v52  ;;  %v390_v11 = vld [vmem:[%s12165_s26 + $0x60] sm:$0xff]  ;;  %v391_v52 = vld [vmem:[%s12165_s26 + $0x68] sm:$0xff] }
 0x30c   : > { %v12413_v8 = vadd.f32 %v1470_v12, %v388_v14  ;;  %v12417_v44 = vadd.f32 %v1474_v27, %v389_v49  ;;  %v1476_v2 = vmul.f32 0.17677669, %v12278_v55  ;;  %v1477_v37 = vmul.f32 0.17677669, %v12291_v24 }
 0x30d   : > { %2001 = vmax.xlane.f32.xlu0 %v12353_v53  ;;  %v12421_v35 = vadd.f32 %v1472_v1, %v388_v14  ;;  %v1481_v12 = vmul.f32 0.17677669, %v12303_v28  ;;  %v1479_v55 = vmul.f32 0.17677669, %v12293_v57  ;;  %v1483_v24 = vmul.f32 0.17677669, %v12305_v16 }
 0x30e   : > { %v12426_v63 = vadd.f32 %v1476_v2, %v389_v49  ;;  %v12431_v27 = vadd.f32 %v1477_v37, %v390_v11  ;;  %v1478_v28 = vmul.f32 0.17677669, %v12296_v20  ;;  %v1482_v57 = vmul.f32 0.17677669, %v12308_v32 }
 0x30f   : > { %2003 = vmax.xlane.f32.xlu1 %v12358_v18  ;;  %v12435_v14 = vadd.f32 %v1481_v12, %v391_v52  ;;  %v12439_v49 = vadd.f32 %v1479_v55, %v390_v11  ;;  %v12443_v1 = vadd.f32 %v1483_v24, %v391_v52  ;;  %v1480_v16 = vmul.f32 0.17677669, %v12298_v10  ;;  %v392_v24 = vld [vmem:[%s12165_s26 + $0x70] sm:$0xff]  ;;  %v393_v10 = vld [vmem:[%s12165_s26 + $0x78] sm:$0xff] }
 0x310   : > { %v12447_v2 = vadd.f32 %v1478_v28, %v390_v11  ;;  %v12451_v37 = vadd.f32 %v1482_v57, %v391_v52  ;;  %v1484_v12 = vmul.f32 0.17677669, %v12310_v61  ;;  %v1485_v55 = vmul.f32 0.17677669, %v12324_v36 }
 0x311   : > { %1525 = vmax.xlane.f32.xlu0 %v12363_v30  ;;  %v12455_v20 = vadd.f32 %v1480_v16, %v390_v11  ;;  %v1489_v28 = vmul.f32 0.17677669, %v12336_v56  ;;  %v1487_v61 = vmul.f32 0.17677669, %v12326_v26  ;;  %v1491_v36 = vmul.f32 0.17677669, %v12338_v9 }
 0x312   : > { %v12460_v32 = vadd.f32 %v1484_v12, %v391_v52  ;;  %v12465_v57 = vadd.f32 %v1485_v55, %v392_v24  ;;  %v1486_v52 = vmul.f32 0.17677669, %v12328_v29  ;;  %v1490_v12 = vmul.f32 0.17677669, %v12340_v21 }
 0x313   : > { %1527 = vmax.xlane.f32.xlu1 %v12367_v42  ;;  %v12469_v11 = vadd.f32 %v1489_v28, %v393_v10  ;;  %v12473_v16 = vadd.f32 %v1487_v61, %v392_v24  ;;  %v12477_v56 = vadd.f32 %v1491_v36, %v393_v10  ;;  %v1488_v55 = vmul.f32 0.17677669, %v12330_v39 }
 0x314   : > { %v12481_v26 = vadd.f32 %v1486_v52, %v392_v24  ;;  %v12485_v9 = vadd.f32 %v1490_v12, %v393_v10  ;;  %v1492_v28 = vmul.f32 0.17677669, %v12342_v6 }
 0x315   : > { %1845 = vmax.xlane.f32.xlu0 %v12371_v51  ;;  %17093 = vst [vmem:[#allocation37_spill] sm:$0xff] %v12473_v16  ;;  %17094 = vst [vmem:[#allocation38_spill] sm:$0xff] %v12477_v56  ;;  %v12489_v29 = vadd.f32 %v1488_v55, %v392_v24 }
 0x316   : > { %v12492_v61 = vadd.f32 %v1492_v28, %v393_v10 }
 0x317   : > { %1847 = vmax.xlane.f32.xlu1 %v12375_v38  ;;  %17095 = vst [vmem:[#allocation39_spill] sm:$0xff] %v12489_v29 }
 0x318   : > { %17096 = vst [vmem:[#allocation40_spill] sm:$0xff] %v12492_v61 }
 0x319   : > { %1685 = vmax.xlane.f32.xlu0 %v12379_v13 }
 0x31b   : > { %1687 = vmax.xlane.f32.xlu1 %v12383_v19 }
 0x31d   : > { %2005 = vmax.xlane.f32.xlu0 %v12387_v50 }
 0x31f   : > { %2007 = vmax.xlane.f32.xlu1 %v12392_v5 }
 0x321   : > { %1529 = vmax.xlane.f32.xlu0 %v12397_v40 }
 0x323   : > { %1531 = vmax.xlane.f32.xlu1 %v12401_v46 }
 0x325   : > { %1849 = vmax.xlane.f32.xlu0 %v12405_v59 }
 0x327   : > { %1851 = vmax.xlane.f32.xlu1 %v12409_v7 }
 0x329   : > { %1689 = vmax.xlane.f32.xlu0 %v12413_v8 }
 0x32b   : > { %1691 = vmax.xlane.f32.xlu1 %v12417_v44 }
 0x32d   : > { %2009 = vmax.xlane.f32.xlu0 %v12421_v35 }
 0x32f   : > { %2011 = vmax.xlane.f32.xlu1 %v12426_v63 }
 0x331   : > { %1533 = vmax.xlane.f32.xlu0 %v12431_v27 }
 0x333   : > { %1535 = vmax.xlane.f32.xlu1 %v12435_v14 }
 0x335   : > { %1853 = vmax.xlane.f32.xlu0 %v12439_v49 }
 0x337   : > { %1855 = vmax.xlane.f32.xlu1 %v12443_v1 }
 0x339   : > { %1693 = vmax.xlane.f32.xlu0 %v12447_v2 }
 0x33b   : > { %1695 = vmax.xlane.f32.xlu1 %v12451_v37 }
 0x33d   : > { %2013 = vmax.xlane.f32.xlu0 %v12455_v20 }
 0x33f   : > { %2015 = vmax.xlane.f32.xlu1 %v12460_v32 }
 0x341   : > { %1537 = vmax.xlane.f32.xlu0 %v12465_v57 }
 0x343   : > { %1539 = vmax.xlane.f32.xlu1 %v12469_v11 }
 0x345   : > { %1857 = vmax.xlane.f32.xlu0 %v12473_v16 }
 0x347   : > { %1859 = vmax.xlane.f32.xlu1 %v12477_v56 }
 0x349   : > { %1697 = vmax.xlane.f32.xlu0 %v12481_v26 }
 0x34b   : > { %1699 = vmax.xlane.f32.xlu1 %v12485_v9 }
 0x34d   : > { %2017 = vmax.xlane.f32.xlu0 %v12489_v29 }
 0x34f   : > { %2019 = vmax.xlane.f32.xlu1 %v12492_v61 }
 0x35e   : > { %v1510_v21 = vpop.xlane.xlu0 %1509 }
 0x35f   : > { %v1541_v36 = vsub.f32 %v12169_v62, %v1510_v21 }
 0x360   : > { %v1512_v39 = vpop.xlane.xlu1 %1511 }
 0x361   : > { %v1557_v52 = vmul.f32 1.442695, %v1541_v36  ;;  %v1542_v12 = vsub.f32 %v12172_v23, %v1512_v39 }
 0x362   : > { %v1830_v56 = vpop.xlane.xlu0 %1829 }
 0x363   : > { %10403 = vpow2.f32 %v1557_v52  ;;  %v1559_v6 = vmul.f32 1.442695, %v1542_v12  ;;  %v1861_v16 = vsub.f32 %v12175_v58, %v1830_v56 }
 0x364   : > { %v1832_v24 = vpop.xlane.xlu1 %1831 }
 0x365   : > { %10405 = vpow2.f32 %v1559_v6  ;;  %v1877_v55 = vmul.f32 1.442695, %v1861_v16  ;;  %v1862_v10 = vsub.f32 %v12178_v31, %v1832_v24 }
 0x366   : > { %v1670_v28 = vpop.xlane.xlu0 %1669 }
 0x367   : > { %10407 = vpow2.f32 %v1877_v55  ;;  %v1879_v61 = vmul.f32 1.442695, %v1862_v10  ;;  %v1701_v29 = vsub.f32 %v12181_v22, %v1670_v28 }
 0x368   : > { %v1672_v62 = vpop.xlane.xlu1 %1671 }
 0x369   : > { %10409 = vpow2.f32 %v1879_v61  ;;  %v1717_v21 = vmul.f32 1.442695, %v1701_v29  ;;  %v1702_v23 = vsub.f32 %v12184_v4, %v1672_v62 }
 0x36a   : > { %v1990_v36 = vpop.xlane.xlu0 %1989 }
 0x36b   : > { %10411 = vpow2.f32 %v1717_v21  ;;  %v1719_v39 = vmul.f32 1.442695, %v1702_v23  ;;  %v2021_v58 = vsub.f32 %v12187_v54, %v1990_v36 }
 0x36c   : > { %v1992_v56 = vpop.xlane.xlu1 %1991 }
 0x36d   : > { %v12502_v52 = vpop.eup %10403  ;;  %10413 = vpow2.f32 %v1719_v39  ;;  %v2037_v31 = vmul.f32 1.442695, %v2021_v58  ;;  %v2022_v16 = vsub.f32 %v12193_v60, %v1992_v56 }
 0x36e   : > { %1589 = vadd.xlane.f32.xlu0 %v12502_v52  ;;  %v1514_v22 = vpop.xlane.xlu0 %1513 }
 0x36f   : > { %v12506_v12 = vpop.eup %10405  ;;  %10415 = vpow2.f32 %v2037_v31  ;;  %v2039_v29 = vmul.f32 1.442695, %v2022_v16  ;;  %v1543_v4 = vsub.f32 %v12199_v45, %v1514_v22 }
 0x370   : > { %1591 = vadd.xlane.f32.xlu1 %v12506_v12  ;;  %v1516_v61 = vpop.xlane.xlu1 %1515 }
 0x371   : > { %v12510_v54 = vpop.eup %10407  ;;  %10417 = vpow2.f32 %v2039_v29  ;;  %v1561_v6 = vmul.f32 1.442695, %v1543_v4  ;;  %v1544_v24 = vsub.f32 %v12202_v41, %v1516_v61 }
 0x372   : > { %1909 = vadd.xlane.f32.xlu0 %v12510_v54  ;;  %v1834_v60 = vpop.xlane.xlu0 %1833 }
 0x373   : > { %v12514_v55 = vpop.eup %10409  ;;  %10419 = vpow2.f32 %v1561_v6  ;;  %v1563_v10 = vmul.f32 1.442695, %v1544_v24  ;;  %v1863_v28 = vsub.f32 %v12205_v33, %v1834_v60 }
 0x374   : > { %1911 = vadd.xlane.f32.xlu1 %v12514_v55  ;;  %v1836_v45 = vpop.xlane.xlu1 %1835 }
 0x375   : > { %v12518_v62 = vpop.eup %10411  ;;  %10421 = vpow2.f32 %v1563_v10  ;;  %v1881_v21 = vmul.f32 1.442695, %v1863_v28  ;;  %v1864_v23 = vsub.f32 %v12214_v0, %v1836_v45 }
 0x376   : > { %1749 = vadd.xlane.f32.xlu0 %v12518_v62  ;;  %v1674_v41 = vpop.xlane.xlu0 %1673 }
 0x377   : > { %v12522_v36 = vpop.eup %10413  ;;  %10423 = vpow2.f32 %v1881_v21  ;;  %v1883_v39 = vmul.f32 1.442695, %v1864_v23  ;;  %v1703_v58 = vsub.f32 %v12223_v17, %v1674_v41 }
 0x378   : > { %1751 = vadd.xlane.f32.xlu1 %v12522_v36  ;;  %v1676_v33 = vpop.xlane.xlu1 %1675 }
 0x379   : > { %v12526_v56 = vpop.eup %10415  ;;  %10425 = vpow2.f32 %v1883_v39  ;;  %v1721_v31 = vmul.f32 1.442695, %v1703_v58  ;;  %v1704_v16 = vsub.f32 %v12226_v34, %v1676_v33  ;;  %v17097_v58 = vld [vmem:[#allocation27_spill] sm:$0xff] }
 0x37a   : > { %2069 = vadd.xlane.f32.xlu0 %v12526_v56  ;;  %v1994_v0 = vpop.xlane.xlu0 %1993 }
 0x37b   : > { %v12530_v22 = vpop.eup %10417  ;;  %10427 = vpow2.f32 %v1721_v31  ;;  %v1723_v29 = vmul.f32 1.442695, %v1704_v16  ;;  %v2023_v4 = vsub.f32 %v12229_v3, %v1994_v0  ;;  %v17098_v0 = vld [vmem:[#allocation28_spill] sm:$0xff] }
 0x37c   : > { %2071 = vadd.xlane.f32.xlu1 %v12530_v22  ;;  %v1996_v17 = vpop.xlane.xlu1 %1995 }
 0x37d   : > { %v12534_v61 = vpop.eup %10419  ;;  %10429 = vpow2.f32 %v1723_v29  ;;  %v2041_v6 = vmul.f32 1.442695, %v2023_v4  ;;  %v2024_v24 = vsub.f32 %v12241_v25, %v1996_v17 }
 0x37e   : > { %1593 = vadd.xlane.f32.xlu0 %v12534_v61  ;;  %v1518_v34 = vpop.xlane.xlu0 %1517 }
 0x37f   : > { %v12538_v60 = vpop.eup %10421  ;;  %10431 = vpow2.f32 %v2041_v6  ;;  %v2043_v10 = vmul.f32 1.442695, %v2024_v24  ;;  %v1545_v28 = vsub.f32 %v12253_v43, %v1518_v34  ;;  %v17099_v6 = vld [vmem:[#allocation29_spill] sm:$0xff] }
 0x380   : > { %1595 = vadd.xlane.f32.xlu1 %v12538_v60  ;;  %v1520_v3 = vpop.xlane.xlu1 %1519 }
 0x381   : > { %v12542_v45 = vpop.eup %10423  ;;  %10433 = vpow2.f32 %v2043_v10  ;;  %v1565_v21 = vmul.f32 1.442695, %v1545_v28  ;;  %v1546_v23 = vsub.f32 %v12256_v48, %v1520_v3  ;;  %v17100_v3 = vld [vmem:[#allocation30_spill] sm:$0xff] }
 0x382   : > { %1913 = vadd.xlane.f32.xlu0 %v12542_v45  ;;  %v1838_v25 = vpop.xlane.xlu0 %1837 }
 0x383   : > { %v12546_v41 = vpop.eup %10425  ;;  %10435 = vpow2.f32 %v1565_v21  ;;  %v1567_v39 = vmul.f32 1.442695, %v1546_v23  ;;  %v1865_v33 = vsub.f32 %v17097_v58, %v1838_v25  ;;  %v17101_v58 = vld [vmem:[#allocation31_spill] sm:$0xff] }
 0x384   : > { %1915 = vadd.xlane.f32.xlu1 %v12546_v41  ;;  %v1840_v43 = vpop.xlane.xlu1 %1839 }
 0x385   : > { %v12550_v31 = vpop.eup %10427  ;;  %10437 = vpow2.f32 %v1567_v39  ;;  %v1885_v16 = vmul.f32 1.442695, %v1865_v33  ;;  %v1866_v29 = vsub.f32 %v17098_v0, %v1840_v43 }
 0x386   : > { %1753 = vadd.xlane.f32.xlu0 %v12550_v31  ;;  %v1678_v48 = vpop.xlane.xlu0 %1677 }
 0x387   : > { %v12554_v4 = vpop.eup %10429  ;;  %10439 = vpow2.f32 %v1885_v16  ;;  %v1887_v17 = vmul.f32 1.442695, %v1866_v29  ;;  %v1705_v24 = vsub.f32 %v17099_v6, %v1678_v48  ;;  %v17103_v29 = vld [vmem:[#allocation32_spill] sm:$0xff] }
 0x388   : > { %1755 = vadd.xlane.f32.xlu1 %v12554_v4  ;;  %v1680_v34 = vpop.xlane.xlu1 %1679 }
 0x389   : > { %v12558_v10 = vpop.eup %10431  ;;  %10441 = vpow2.f32 %v1887_v17  ;;  %v1725_v28 = vmul.f32 1.442695, %v1705_v24  ;;  %v1706_v21 = vsub.f32 %v17100_v3, %v1680_v34  ;;  %v17104_v34 = vld [vmem:[#allocation33_spill] sm:$0xff] }
 0x38a   : > { %2073 = vadd.xlane.f32.xlu0 %v12558_v10  ;;  %v1998_v23 = vpop.xlane.xlu0 %1997 }
 0x38b   : > { %v12562_v25 = vpop.eup %10433  ;;  %10443 = vpow2.f32 %v1725_v28  ;;  %v1727_v39 = vmul.f32 1.442695, %v1706_v21  ;;  %v2025_v33 = vsub.f32 %v17101_v58, %v1998_v23 }
 0x38c   : > { %2075 = vadd.xlane.f32.xlu1 %v12562_v25  ;;  %v2000_v43 = vpop.xlane.xlu1 %1999 }
 0x38d   : > { %v12566_v16 = vpop.eup %10435  ;;  %10445 = vpow2.f32 %v1727_v39  ;;  %v2045_v0 = vmul.f32 1.442695, %v2025_v33  ;;  %v2026_v48 = vsub.f32 %v17103_v29, %v2000_v43  ;;  %v17106_v39 = vld [vmem:[#allocation34_spill] sm:$0xff] }
 0x38e   : > { %17102 = vst [vmem:[#allocation27_spill] sm:$0xff] %v12566_v16  ;;  %1597 = vadd.xlane.f32.xlu0 %v12566_v16  ;;  %v1522_v17 = vpop.xlane.xlu0 %1521 }
 0x38f   : > { %v12570_v6 = vpop.eup %10437  ;;  %10447 = vpow2.f32 %v2045_v0  ;;  %v2047_v24 = vmul.f32 1.442695, %v2026_v48  ;;  %v1547_v28 = vsub.f32 %v17104_v34, %v1522_v17  ;;  %v17107_v0 = vld [vmem:[#allocation35_spill] sm:$0xff] }
 0x390   : > { %1599 = vadd.xlane.f32.xlu1 %v12570_v6  ;;  %v1524_v3 = vpop.xlane.xlu1 %1523 }
 0x391   : > { %v12574_v21 = vpop.eup %10439  ;;  %10449 = vpow2.f32 %v2047_v24  ;;  %v1569_v23 = vmul.f32 1.442695, %v1547_v28  ;;  %v1548_v58 = vsub.f32 %v17106_v39, %v1524_v3  ;;  %v17108_v24 = vld [vmem:[#allocation36_spill] sm:$0xff] }
 0x392   : > { %17105 = vst [vmem:[#allocation28_spill] sm:$0xff] %v12574_v21  ;;  %1917 = vadd.xlane.f32.xlu0 %v12574_v21  ;;  %v1842_v33 = vpop.xlane.xlu0 %1841 }
 0x393   : > { %v12578_v43 = vpop.eup %10441  ;;  %10451 = vpow2.f32 %v1569_v23  ;;  %v1571_v29 = vmul.f32 1.442695, %v1548_v58  ;;  %v1867_v48 = vsub.f32 %v17107_v0, %v1842_v33 }
 0x394   : > { %1919 = vadd.xlane.f32.xlu1 %v12578_v43  ;;  %v1844_v17 = vpop.xlane.xlu1 %1843 }
 0x395   : > { %v12582_v34 = vpop.eup %10443  ;;  %10453 = vpow2.f32 %v1571_v29  ;;  %v1889_v16 = vmul.f32 1.442695, %v1867_v48  ;;  %v1868_v28 = vsub.f32 %v17108_v24, %v1844_v17 }
 0x396   : > { %1757 = vadd.xlane.f32.xlu0 %v12582_v34  ;;  %v1682_v3 = vpop.xlane.xlu0 %1681 }
 0x397   : > { %v12586_v39 = vpop.eup %10445  ;;  %10455 = vpow2.f32 %v1889_v16  ;;  %v1891_v21 = vmul.f32 1.442695, %v1868_v28  ;;  %v1707_v23 = vsub.f32 %v12345_v47, %v1682_v3 }
 0x398   : > { %1759 = vadd.xlane.f32.xlu1 %v12586_v39  ;;  %v1684_v58 = vpop.xlane.xlu1 %1683 }
 0x399   : > { %v12590_v33 = vpop.eup %10447  ;;  %10457 = vpow2.f32 %v1891_v21  ;;  %v1729_v0 = vmul.f32 1.442695, %v1707_v23  ;;  %v1708_v29 = vsub.f32 %v12349_v15, %v1684_v58 }
 0x39a   : > { %2077 = vadd.xlane.f32.xlu0 %v12590_v33  ;;  %v2002_v48 = vpop.xlane.xlu0 %2001 }
 0x39b   : > { %v12594_v17 = vpop.eup %10449  ;;  %10459 = vpow2.f32 %v1729_v0  ;;  %v1731_v24 = vmul.f32 1.442695, %v1708_v29  ;;  %v2027_v16 = vsub.f32 %v12353_v53, %v2002_v48 }
 0x39c   : > { %2079 = vadd.xlane.f32.xlu1 %v12594_v17  ;;  %v2004_v47 = vpop.xlane.xlu1 %2003 }
 0x39d   : > { %v12598_v28 = vpop.eup %10451  ;;  %10461 = vpow2.f32 %v1731_v24  ;;  %v2049_v3 = vmul.f32 1.442695, %v2027_v16  ;;  %v2028_v21 = vsub.f32 %v12358_v18, %v2004_v47 }
 0x39e   : > { %1601 = vadd.xlane.f32.xlu0 %v12598_v28  ;;  %v1526_v15 = vpop.xlane.xlu0 %1525 }
 0x39f   : > { %v12602_v23 = vpop.eup %10453  ;;  %10463 = vpow2.f32 %v2049_v3  ;;  %v2051_v58 = vmul.f32 1.442695, %v2028_v21  ;;  %v1549_v0 = vsub.f32 %v12363_v30, %v1526_v15 }
 0x3a0   : > { %1603 = vadd.xlane.f32.xlu1 %v12602_v23  ;;  %v1528_v53 = vpop.xlane.xlu1 %1527 }
 0x3a1   : > { %v12606_v29 = vpop.eup %10455  ;;  %10465 = vpow2.f32 %v2051_v58  ;;  %v1573_v48 = vmul.f32 1.442695, %v1549_v0  ;;  %v1550_v24 = vsub.f32 %v12367_v42, %v1528_v53 }
 0x3a2   : > { %1921 = vadd.xlane.f32.xlu0 %v12606_v29  ;;  %v1846_v18 = vpop.xlane.xlu0 %1845 }
 0x3a3   : > { %v12610_v16 = vpop.eup %10457  ;;  %10467 = vpow2.f32 %v1573_v48  ;;  %v1575_v47 = vmul.f32 1.442695, %v1550_v24  ;;  %v1869_v3 = vsub.f32 %v12371_v51, %v1846_v18 }
 0x3a4   : > { %1923 = vadd.xlane.f32.xlu1 %v12610_v16  ;;  %v1848_v30 = vpop.xlane.xlu1 %1847 }
 0x3a5   : > { %v12614_v21 = vpop.eup %10459  ;;  %10469 = vpow2.f32 %v1575_v47  ;;  %v1893_v15 = vmul.f32 1.442695, %v1869_v3  ;;  %v1870_v58 = vsub.f32 %v12375_v38, %v1848_v30 }
 0x3a6   : > { %1761 = vadd.xlane.f32.xlu0 %v12614_v21  ;;  %v1686_v42 = vpop.xlane.xlu0 %1685 }
 0x3a7   : > { %v12618_v0 = vpop.eup %10461  ;;  %10471 = vpow2.f32 %v1893_v15  ;;  %v1895_v53 = vmul.f32 1.442695, %v1870_v58  ;;  %v1709_v48 = vsub.f32 %v12379_v13, %v1686_v42 }
 0x3a8   : > { %1763 = vadd.xlane.f32.xlu1 %v12618_v0  ;;  %v1688_v51 = vpop.xlane.xlu1 %1687 }
 0x3a9   : > { %v12622_v24 = vpop.eup %10463  ;;  %10473 = vpow2.f32 %v1895_v53  ;;  %v1733_v18 = vmul.f32 1.442695, %v1709_v48  ;;  %v1710_v47 = vsub.f32 %v12383_v19, %v1688_v51 }
 0x3aa   : > { %2081 = vadd.xlane.f32.xlu0 %v12622_v24  ;;  %v2006_v38 = vpop.xlane.xlu0 %2005 }
 0x3ab   : > { %v12626_v3 = vpop.eup %10465  ;;  %10475 = vpow2.f32 %v1733_v18  ;;  %v1735_v30 = vmul.f32 1.442695, %v1710_v47  ;;  %v2029_v15 = vsub.f32 %v12387_v50, %v2006_v38 }
 0x3ac   : > { %2083 = vadd.xlane.f32.xlu1 %v12626_v3  ;;  %v2008_v13 = vpop.xlane.xlu1 %2007 }
 0x3ad   : > { %v12630_v58 = vpop.eup %10467  ;;  %10477 = vpow2.f32 %v1735_v30  ;;  %v2053_v42 = vmul.f32 1.442695, %v2029_v15  ;;  %v2030_v53 = vsub.f32 %v12392_v5, %v2008_v13 }
 0x3ae   : > { %1605 = vadd.xlane.f32.xlu0 %v12630_v58  ;;  %v1530_v19 = vpop.xlane.xlu0 %1529 }
 0x3af   : > { %v12634_v48 = vpop.eup %10469  ;;  %10479 = vpow2.f32 %v2053_v42  ;;  %v2055_v51 = vmul.f32 1.442695, %v2030_v53  ;;  %v1551_v18 = vsub.f32 %v12397_v40, %v1530_v19 }
 0x3b0   : > { %1607 = vadd.xlane.f32.xlu1 %v12634_v48  ;;  %v1532_v50 = vpop.xlane.xlu1 %1531 }
 0x3b1   : > { %v12638_v47 = vpop.eup %10471  ;;  %10481 = vpow2.f32 %v2055_v51  ;;  %v1577_v38 = vmul.f32 1.442695, %v1551_v18  ;;  %v1552_v30 = vsub.f32 %v12401_v46, %v1532_v50 }
 0x3b2   : > { %1925 = vadd.xlane.f32.xlu0 %v12638_v47  ;;  %v1850_v5 = vpop.xlane.xlu0 %1849 }
 0x3b3   : > { %v12642_v15 = vpop.eup %10473  ;;  %10483 = vpow2.f32 %v1577_v38  ;;  %v1579_v13 = vmul.f32 1.442695, %v1552_v30  ;;  %v1871_v42 = vsub.f32 %v12405_v59, %v1850_v5 }
 0x3b4   : > { %1927 = vadd.xlane.f32.xlu1 %v12642_v15  ;;  %v1852_v40 = vpop.xlane.xlu1 %1851 }
 0x3b5   : > { %v12646_v53 = vpop.eup %10475  ;;  %10485 = vpow2.f32 %v1579_v13  ;;  %v1897_v19 = vmul.f32 1.442695, %v1871_v42  ;;  %v1872_v51 = vsub.f32 %v12409_v7, %v1852_v40 }
 0x3b6   : > { %1765 = vadd.xlane.f32.xlu0 %v12646_v53  ;;  %v1690_v46 = vpop.xlane.xlu0 %1689 }
 0x3b7   : > { %v12650_v18 = vpop.eup %10477  ;;  %10487 = vpow2.f32 %v1897_v19  ;;  %v1899_v50 = vmul.f32 1.442695, %v1872_v51  ;;  %v1711_v38 = vsub.f32 %v12413_v8, %v1690_v46 }
 0x3b8   : > { %1767 = vadd.xlane.f32.xlu1 %v12650_v18  ;;  %v1692_v59 = vpop.xlane.xlu1 %1691 }
 0x3b9   : > { %v12654_v30 = vpop.eup %10479  ;;  %10489 = vpow2.f32 %v1899_v50  ;;  %v1737_v5 = vmul.f32 1.442695, %v1711_v38  ;;  %v1712_v13 = vsub.f32 %v12417_v44, %v1692_v59 }
 0x3ba   : > { %2085 = vadd.xlane.f32.xlu0 %v12654_v30  ;;  %v2010_v7 = vpop.xlane.xlu0 %2009 }
 0x3bb   : > { %v12658_v42 = vpop.eup %10481  ;;  %10491 = vpow2.f32 %v1737_v5  ;;  %v1739_v40 = vmul.f32 1.442695, %v1712_v13  ;;  %v2031_v19 = vsub.f32 %v12421_v35, %v2010_v7 }
 0x3bc   : > { %2087 = vadd.xlane.f32.xlu1 %v12658_v42  ;;  %v2012_v8 = vpop.xlane.xlu1 %2011 }
 0x3bd   : > { %v12662_v51 = vpop.eup %10483  ;;  %10493 = vpow2.f32 %v1739_v40  ;;  %v2057_v46 = vmul.f32 1.442695, %v2031_v19  ;;  %v2032_v50 = vsub.f32 %v12426_v63, %v2012_v8 }
 0x3be   : > { %1609 = vadd.xlane.f32.xlu0 %v12662_v51  ;;  %v1534_v44 = vpop.xlane.xlu0 %1533 }
 0x3bf   : > { %v12666_v38 = vpop.eup %10485  ;;  %10495 = vpow2.f32 %v2057_v46  ;;  %v2059_v59 = vmul.f32 1.442695, %v2032_v50  ;;  %v1553_v5 = vsub.f32 %v12431_v27, %v1534_v44 }
 0x3c0   : > { %1611 = vadd.xlane.f32.xlu1 %v12666_v38  ;;  %v1536_v35 = vpop.xlane.xlu1 %1535 }
 0x3c1   : > { %v12670_v13 = vpop.eup %10487  ;;  %10497 = vpow2.f32 %v2059_v59  ;;  %v1581_v7 = vmul.f32 1.442695, %v1553_v5  ;;  %v1554_v40 = vsub.f32 %v12435_v14, %v1536_v35 }
 0x3c2   : > { %17109 = vst [vmem:[#allocation29_spill] sm:$0xff] %v12670_v13  ;;  %1929 = vadd.xlane.f32.xlu0 %v12670_v13  ;;  %v1854_v63 = vpop.xlane.xlu0 %1853 }
 0x3c3   : > { %v12674_v19 = vpop.eup %10489  ;;  %10499 = vpow2.f32 %v1581_v7  ;;  %v1583_v8 = vmul.f32 1.442695, %v1554_v40  ;;  %v1873_v46 = vsub.f32 %v12439_v49, %v1854_v63 }
 0x3c4   : > { %1931 = vadd.xlane.f32.xlu1 %v12674_v19  ;;  %v1856_v27 = vpop.xlane.xlu1 %1855 }
 0x3c5   : > { %v12678_v50 = vpop.eup %10491  ;;  %10501 = vpow2.f32 %v1583_v8  ;;  %v1901_v44 = vmul.f32 1.442695, %v1873_v46  ;;  %v1874_v59 = vsub.f32 %v12443_v1, %v1856_v27 }
 0x3c6   : > { %1769 = vadd.xlane.f32.xlu0 %v12678_v50  ;;  %v1694_v14 = vpop.xlane.xlu0 %1693 }
 0x3c7   : > { %v12682_v5 = vpop.eup %10493  ;;  %10503 = vpow2.f32 %v1901_v44  ;;  %v1903_v35 = vmul.f32 1.442695, %v1874_v59  ;;  %v1713_v7 = vsub.f32 %v12447_v2, %v1694_v14 }
 0x3c8   : > { %1771 = vadd.xlane.f32.xlu1 %v12682_v5  ;;  %v1696_v49 = vpop.xlane.xlu1 %1695 }
 0x3c9   : > { %v12686_v40 = vpop.eup %10495  ;;  %10505 = vpow2.f32 %v1903_v35  ;;  %v1741_v63 = vmul.f32 1.442695, %v1713_v7  ;;  %v1714_v8 = vsub.f32 %v12451_v37, %v1696_v49 }
 0x3ca   : > { %17110 = vst [vmem:[#allocation30_spill] sm:$0xff] %v12686_v40  ;;  %2089 = vadd.xlane.f32.xlu0 %v12686_v40  ;;  %v2014_v1 = vpop.xlane.xlu0 %2013 }
 0x3cb   : > { %v12690_v46 = vpop.eup %10497  ;;  %10507 = vpow2.f32 %v1741_v63  ;;  %v1743_v27 = vmul.f32 1.442695, %v1714_v8  ;;  %v2033_v44 = vsub.f32 %v12455_v20, %v2014_v1 }
 0x3cc   : > { %17111 = vst [vmem:[#allocation31_spill] sm:$0xff] %v12690_v46  ;;  %2091 = vadd.xlane.f32.xlu1 %v12690_v46  ;;  %v2016_v2 = vpop.xlane.xlu1 %2015 }
 0x3cd   : > { %v12694_v59 = vpop.eup %10499  ;;  %10509 = vpow2.f32 %v1743_v27  ;;  %v2061_v14 = vmul.f32 1.442695, %v2033_v44  ;;  %v2034_v35 = vsub.f32 %v12460_v32, %v2016_v2 }
 0x3ce   : > { %17112 = vst [vmem:[#allocation32_spill] sm:$0xff] %v12694_v59  ;;  %1613 = vadd.xlane.f32.xlu0 %v12694_v59  ;;  %v1538_v37 = vpop.xlane.xlu0 %1537 }
 0x3cf   : > { %v12698_v7 = vpop.eup %10501  ;;  %10511 = vpow2.f32 %v2061_v14  ;;  %v2063_v49 = vmul.f32 1.442695, %v2034_v35  ;;  %v1555_v63 = vsub.f32 %v12465_v57, %v1538_v37 }
 0x3d0   : > { %17113 = vst [vmem:[#allocation33_spill] sm:$0xff] %v12698_v7  ;;  %1615 = vadd.xlane.f32.xlu1 %v12698_v7  ;;  %v1540_v20 = vpop.xlane.xlu1 %1539 }
 0x3d1   : > { %v12702_v8 = vpop.eup %10503  ;;  %10513 = vpow2.f32 %v2063_v49  ;;  %v1585_v1 = vmul.f32 1.442695, %v1555_v63  ;;  %v1556_v27 = vsub.f32 %v12469_v11, %v1540_v20 }
 0x3d2   : > { %17114 = vst [vmem:[#allocation34_spill] sm:$0xff] %v12702_v8  ;;  %1933 = vadd.xlane.f32.xlu0 %v12702_v8  ;;  %v1858_v32 = vpop.xlane.xlu0 %1857 }
 0x3d3   : > { %v12706_v44 = vpop.eup %10505  ;;  %10515 = vpow2.f32 %v1585_v1  ;;  %v1587_v2 = vmul.f32 1.442695, %v1556_v27 }
 0x3d4   : > { %17115 = vst [vmem:[#allocation35_spill] sm:$0xff] %v12706_v44  ;;  %1935 = vadd.xlane.f32.xlu1 %v12706_v44  ;;  %v1860_v14 = vpop.xlane.xlu1 %1859 }
 0x3d5   : > { %v12709_v57 = vpop.eup %10507  ;;  %10517 = vpow2.f32 %v1587_v2  ;;  %v17120_v2 = vld [vmem:[#allocation37_spill] sm:$0xff] }
 0x3d6   : > { %17116 = vst [vmem:[#allocation36_spill] sm:$0xff] %v12709_v57  ;;  %1773 = vadd.xlane.f32.xlu0 %v12709_v57  ;;  %v1698_v35 = vpop.xlane.xlu0 %1697  ;;  %v1875_v44 = vsub.f32 %v17120_v2, %v1858_v32  ;;  %v17121_v57 = vld [vmem:[#allocation39_spill] sm:$0xff] }
 0x3d7   : > { %v12712_v37 = vpop.eup %10509  ;;  %v1715_v11 = vsub.f32 %v12481_v26, %v1698_v35 }
 0x3d8   : > { %17117 = vst [vmem:[#allocation41_spill] sm:$0xff] %v12712_v37  ;;  %1775 = vadd.xlane.f32.xlu1 %v12712_v37  ;;  %v1700_v49 = vpop.xlane.xlu1 %1699  ;;  %v17123_v37 = vld [vmem:[#allocation38_spill] sm:$0xff]  ;;  %v1905_v32 = vmul.f32 1.442695, %v1875_v44 }
 0x3d9   : > { %v12716_v63 = vpop.eup %10511  ;;  %v1745_v20 = vmul.f32 1.442695, %v1715_v11  ;;  %v1716_v1 = vsub.f32 %v12485_v9, %v1700_v49  ;;  %v1876_v11 = vsub.f32 %v17123_v37, %v1860_v14  ;;  %v17124_v49 = vld [vmem:[#allocation40_spill] sm:$0xff] }
 0x3da   : > { %17118 = vst [vmem:[#allocation42_spill] sm:$0xff] %v12716_v63  ;;  %2093 = vadd.xlane.f32.xlu0 %v12716_v63  ;;  %v2018_v27 = vpop.xlane.xlu0 %2017 }
 0x3db   : > { %v12720_v8 = vpop.eup %10513  ;;  %10519 = vpow2.f32 %v1745_v20  ;;  %v1747_v59 = vmul.f32 1.442695, %v1716_v1  ;;  %v2035_v7 = vsub.f32 %v17121_v57, %v2018_v27  ;;  %v1907_v57 = vmul.f32 1.442695, %v1876_v11 }
 0x3dc   : > { %17119 = vst [vmem:[#allocation43_spill] sm:$0xff] %v12720_v8  ;;  %2095 = vadd.xlane.f32.xlu1 %v12720_v8  ;;  %v2020_v26 = vpop.xlane.xlu1 %2019 }
 0x3dd   : > { %v12725_v35 = vpop.eup %10515  ;;  %10521 = vpow2.f32 %v1747_v59  ;;  %v2065_v9 = vmul.f32 1.442695, %v2035_v7  ;;  %v2036_v63 = vsub.f32 %v17124_v49, %v2020_v26 }
 0x3de   : > { %17122 = vst [vmem:[#allocation37_spill] sm:$0xff] %v12725_v35  ;;  %1617 = vadd.xlane.f32.xlu0 %v12725_v35 }
 0x3df   : > { %v12730_v13 = vpop.eup %10517  ;;  %10523 = vpow2.f32 %v2065_v9  ;;  %v2067_v20 = vmul.f32 1.442695, %v2036_v63 }
 0x3e0   : > { %17125 = vst [vmem:[#allocation39_spill] sm:$0xff] %v12730_v13  ;;  %1619 = vadd.xlane.f32.xlu1 %v12730_v13 }
 0x3e1   : > { %10525 = vpow2.f32 %v2067_v20 }
 0x3e2   : > { %10527 = vpow2.f32 %v1905_v32 }
 0x3e3   : > { %10529 = vpow2.f32 %v1907_v57 }
 0x3e5   : > { %v12733_v1 = vpop.eup %10519 }
 0x3e6   : > { %17126 = vst [vmem:[#allocation38_spill] sm:$0xff] %v12733_v1  ;;  %1777 = vadd.xlane.f32.xlu0 %v12733_v1 }
 0x3e7   : > { %v12736_v59 = vpop.eup %10521 }
 0x3e8   : > { %17127 = vst [vmem:[#allocation40_spill] sm:$0xff] %v12736_v59  ;;  %1779 = vadd.xlane.f32.xlu1 %v12736_v59 }
 0x3e9   : > { %v12739_v7 = vpop.eup %10523 }
 0x3ea   : > { %17128 = vst [vmem:[#allocation44_spill] sm:$0xff] %v12739_v7  ;;  %2097 = vadd.xlane.f32.xlu0 %v12739_v7 }
 0x3eb   : > { %v12742_v44 = vpop.eup %10525 }
 0x3ec   : > { %17129 = vst [vmem:[#allocation45_spill] sm:$0xff] %v12742_v44  ;;  %2099 = vadd.xlane.f32.xlu1 %v12742_v44  ;;  %v12745_v14 = vpop.eup %10527 }
 0x3ed   : > { %17130 = vst [vmem:[#allocation46_spill] sm:$0xff] %v12745_v14  ;;  %v12748_v37 = vpop.eup %10529 }
 0x3ee   : > { %1937 = vadd.xlane.f32.xlu0 %v12745_v14  ;;  %17131 = vst [vmem:[#allocation47_spill] sm:$0xff] %v12748_v37 }
 0x3f0   : > { %1939 = vadd.xlane.f32.xlu1 %v12748_v37  ;;  %v2367_v37 = vld [vmem:[%s16884_s2 + $0xc] sm:$0xf] }
 0x3fb   : > { %v1590_v63 = vpop.xlane.xlu0 %1589 }
 0x3fd   : > { %v1592_v27 = vpop.xlane.xlu1 %1591 }
 0x3fe   : > { %10531 = vrcp.f32 %v1592_v27  ;;  %v2368_v27 = vld [vmem:[%s16884_s2 + $0x2c] sm:$0xf] }
 0x3ff   : > { %v1910_v2 = vpop.xlane.xlu0 %1909 }
 0x401   : > { %v1912_v26 = vpop.xlane.xlu1 %1911 }
 0x403   : > { %v1750_v11 = vpop.xlane.xlu0 %1749 }
 0x404   : > { %10533 = vrcp.f32 %v1750_v11  ;;  %v8940_v11 = vcombine.low %v2367_v37, %v2368_v27 }
 0x405   : > { %10535 = vrcp.f32 %v1590_v63  ;;  %v1752_v9 = vpop.xlane.xlu1 %1751 }
 0x406   : > { %10537 = vrcp.f32 %v1752_v9  ;;  %10042 = vmatprep.subr.bf16.mxu0 %v8940_v11 }
 0x407   : > { %10539 = vrcp.f32 %v1912_v26  ;;  %v2070_v49 = vpop.xlane.xlu0 %2069 }
 0x408   : > { %10541 = vrcp.f32 %v2070_v49  ;;  %v10532_v57 = vpop.eup %10531 }
 0x409   : > { %10543 = vrcp.f32 %v1910_v2  ;;  %v2072_v32 = vpop.xlane.xlu1 %2071  ;;  %v1638_v2 = vmul.f32 %v10532_v57, %v12506_v12 }
 0x40a   : > { %10545 = vrcp.f32 %v2072_v32 }
 0x40b   : > { %v1594_v20 = vpop.xlane.xlu0 %1593 }
 0x40d   : > { %v1596_v14 = vpop.xlane.xlu1 %1595 }
 0x40e   : > { %v10534_v63 = vpop.eup %10533  ;;  %10547 = vrcp.f32 %v1596_v14 }
 0x40f   : > { %v10536_v9 = vpop.eup %10535  ;;  %v1914_v26 = vpop.xlane.xlu0 %1913  ;;  %v1797_v7 = vmul.f32 %v10534_v63, %v12518_v62 }
 0x410   : > { %v10538_v44 = vpop.eup %10537  ;;  %v1637_v1 = vmul.f32 %v10536_v9, %v12502_v52 }
 0x411   : > { %v10540_v49 = vpop.eup %10539  ;;  %v1916_v32 = vpop.xlane.xlu1 %1915  ;;  %v1798_v35 = vmul.f32 %v10538_v44, %v12522_v36 }
 0x412   : > { %v10542_v59 = vpop.eup %10541  ;;  %v1958_v27 = vmul.f32 %v10540_v49, %v12514_v55  ;;  %v2133_v40 = vpack.c.bf16 %v1638_v2, %v1637_v1 }
 0x413   : > { %v10544_v13 = vpop.eup %10543  ;;  %v1754_v8 = vpop.xlane.xlu0 %1753  ;;  %v2134_v46 = vpack.c.bf16 %v1798_v35, %v1797_v7  ;;  %v2117_v57 = vmul.f32 %v10542_v59, %v12526_v56 }
 0x414   : > { %v10546_v37 = vpop.eup %10545  ;;  %10549 = vrcp.f32 %v1754_v8  ;;  %v1957_v36 = vmul.f32 %v10544_v13, %v12510_v54 }
 0x415   : > { %10551 = vrcp.f32 %v1594_v20  ;;  %v1756_v12 = vpop.xlane.xlu1 %1755  ;;  %2197 = vmatprep.mubr.bf16.mxu0 %v2134_v46  ;;  %v2118_v62 = vmul.f32 %v10546_v37, %v12530_v22 }
 0x416   : > { %10553 = vrcp.f32 %v1756_v12  ;;  %2198 = vmatmul.mubr.bf16.vlgmr.msra.gmra.mrb[64].mxu0 %v2133_v40  ;;  %v2135_v35 = vpack.c.bf16 %v1958_v27, %v1957_v36 }
 0x417   : > { %10555 = vrcp.f32 %v1916_v32  ;;  %v2074_v52 = vpop.xlane.xlu0 %2073  ;;  %v2136_v44 = vpack.c.bf16 %v2118_v62, %v2117_v57  ;;  %10043 = vmatpush3.bf16.msra.mxu0 %v8940_v11 }
 0x418   : > { %10557 = vrcp.f32 %v2074_v52  ;;  %v10548_v8 = vpop.eup %10547 }
 0x419   : > { %10559 = vrcp.f32 %v1914_v26  ;;  %v2076_v55 = vpop.xlane.xlu1 %2075  ;;  %2294 = vmatprep.mubr.bf16.mxu1 %v2136_v44  ;;  %v1640_v13 = vmul.f32 %v10548_v8, %v12538_v60 }
 0x41a   : > { %10561 = vrcp.f32 %v2076_v55  ;;  %2295 = vmatmul.mubr.bf16.vlgmr.msra.gmra.mrb[48].mxu1 %v2135_v35 }
 0x41b   : > { %v1598_v46 = vpop.xlane.xlu0 %1597 }
 0x41d   : > { %v1600_v56 = vpop.xlane.xlu1 %1599 }
 0x41e   : > { %v10550_v1 = vpop.eup %10549  ;;  %10563 = vrcp.f32 %v1600_v56 }
 0x41f   : > { %v10552_v22 = vpop.eup %10551  ;;  %v1918_v59 = vpop.xlane.xlu0 %1917  ;;  %v1799_v14 = vmul.f32 %v10550_v1, %v12550_v31 }
 0x420   : > { %v10554_v54 = vpop.eup %10553  ;;  %v1639_v11 = vmul.f32 %v10552_v22, %v12534_v61  ;;  %v17132_v22 = vld [vmem:[#allocation27_spill] sm:$0xff] }
 0x421   : > { %v10556_v40 = vpop.eup %10555  ;;  %v1920_v7 = vpop.xlane.xlu1 %1919  ;;  %v1800_v20 = vmul.f32 %v10554_v54, %v12554_v4 }
 0x422   : > { %v10558_v63 = vpop.eup %10557  ;;  %v2137_v32 = vpack.c.bf16 %v1640_v13, %v1639_v11  ;;  %v1960_v37 = vmul.f32 %v10556_v40, %v12546_v41 }
 0x423   : > { %v10560_v9 = vpop.eup %10559  ;;  %v1758_v26 = vpop.xlane.xlu0 %1757  ;;  %v2138_v2 = vpack.c.bf16 %v1800_v20, %v1799_v14  ;;  %v2119_v27 = vmul.f32 %v10558_v63, %v12558_v10 }
 0x424   : > { %v10562_v49 = vpop.eup %10561  ;;  %10565 = vrcp.f32 %v1758_v26  ;;  %v1959_v61 = vmul.f32 %v10560_v9, %v12542_v45 }
 0x425   : > { %10567 = vrcp.f32 %v1598_v46  ;;  %v1760_v60 = vpop.xlane.xlu1 %1759  ;;  %2205 = vmatprep.mubr.bf16.mxu0 %v2138_v2  ;;  %v2120_v31 = vmul.f32 %v10562_v49, %v12562_v25 }
 0x426   : > { %10569 = vrcp.f32 %v1760_v60  ;;  %2206 = vmatmul.mubr.bf16.gmra.mrb[68].mxu0 %v2137_v32  ;;  %v2139_v57 = vpack.c.bf16 %v1960_v37, %v1959_v61 }
 0x427   : > { %10571 = vrcp.f32 %v1920_v7  ;;  %v2078_v4 = vpop.xlane.xlu0 %2077  ;;  %v2140_v12 = vpack.c.bf16 %v2120_v31, %v2119_v27 }
 0x428   : > { %10573 = vrcp.f32 %v2078_v4  ;;  %v10564_v36 = vpop.eup %10563 }
 0x429   : > { %10575 = vrcp.f32 %v1918_v59  ;;  %v2080_v62 = vpop.xlane.xlu1 %2079  ;;  %2302 = vmatprep.mubr.bf16.mxu1 %v2140_v12  ;;  %v1642_v55 = vmul.f32 %v10564_v36, %v12570_v6 }
 0x42a   : > { %10577 = vrcp.f32 %v2080_v62  ;;  %2303 = vmatmul.mubr.bf16.gmra.mrb[52].mxu1 %v2139_v57 }
 0x42b   : > { %v1602_v41 = vpop.xlane.xlu0 %1601 }
 0x42d   : > { %v1604_v52 = vpop.xlane.xlu1 %1603 }
 0x42e   : > { %v10566_v10 = vpop.eup %10565  ;;  %10579 = vrcp.f32 %v1604_v52 }
 0x42f   : > { %v10568_v44 = vpop.eup %10567  ;;  %v1922_v25 = vpop.xlane.xlu0 %1921  ;;  %v1801_v8 = vmul.f32 %v10566_v10, %v12582_v34 }
 0x430   : > { %v10570_v35 = vpop.eup %10569  ;;  %v1641_v59 = vmul.f32 %v10568_v44, %v17132_v22 }
 0x431   : > { %v10572_v45 = vpop.eup %10571  ;;  %v1924_v46 = vpop.xlane.xlu1 %1923  ;;  %v1802_v56 = vmul.f32 %v10570_v35, %v12586_v39  ;;  %v17133_v39 = vld [vmem:[#allocation28_spill] sm:$0xff] }
 0x432   : > { %v10574_v1 = vpop.eup %10573  ;;  %v2141_v14 = vpack.c.bf16 %v1642_v55, %v1641_v59  ;;  %v1962_v20 = vmul.f32 %v10572_v45, %v12578_v43 }
 0x433   : > { %v10576_v54 = vpop.eup %10575  ;;  %v1762_v13 = vpop.xlane.xlu0 %1761  ;;  %v2142_v40 = vpack.c.bf16 %v1802_v56, %v1801_v8  ;;  %v2121_v63 = vmul.f32 %v10574_v1, %v12590_v33 }
 0x434   : > { %v10578_v7 = vpop.eup %10577  ;;  %10581 = vrcp.f32 %v1762_v13  ;;  %v1961_v11 = vmul.f32 %v10576_v54, %v17133_v39 }
 0x435   : > { %10583 = vrcp.f32 %v1602_v41  ;;  %v1764_v6 = vpop.xlane.xlu1 %1763  ;;  %2213 = vmatprep.mubr.bf16.mxu0 %v2142_v40  ;;  %v2122_v34 = vmul.f32 %v10578_v7, %v12594_v17 }
 0x436   : > { %10585 = vrcp.f32 %v1764_v6  ;;  %2214 = vmatmul.mubr.bf16.gmra.mrb[72].mxu0 %v2141_v14  ;;  %v2143_v2 = vpack.c.bf16 %v1962_v20, %v1961_v11 }
 0x437   : > { %10587 = vrcp.f32 %v1924_v46  ;;  %v2082_v9 = vpop.xlane.xlu0 %2081  ;;  %v2144_v26 = vpack.c.bf16 %v2122_v34, %v2121_v63 }
 0x438   : > { %10589 = vrcp.f32 %v2082_v9  ;;  %v10580_v32 = vpop.eup %10579 }
 0x439   : > { %10591 = vrcp.f32 %v1922_v25  ;;  %v2084_v49 = vpop.xlane.xlu1 %2083  ;;  %2310 = vmatprep.mubr.bf16.mxu1 %v2144_v26  ;;  %v1644_v31 = vmul.f32 %v10580_v32, %v12602_v23 }
 0x43a   : > { %10593 = vrcp.f32 %v2084_v49  ;;  %2311 = vmatmul.mubr.bf16.gmra.mrb[56].mxu1 %v2143_v2 }
 0x43b   : > { %v1606_v43 = vpop.xlane.xlu0 %1605 }
 0x43d   : > { %v1608_v37 = vpop.xlane.xlu1 %1607 }
 0x43e   : > { %v10582_v33 = vpop.eup %10581  ;;  %10595 = vrcp.f32 %v1608_v37 }
 0x43f   : > { %v10584_v60 = vpop.eup %10583  ;;  %v1926_v17 = vpop.xlane.xlu0 %1925  ;;  %v1803_v12 = vmul.f32 %v10582_v33, %v12614_v21 }
 0x440   : > { %v10586_v27 = vpop.eup %10585  ;;  %v1643_v41 = vmul.f32 %v10584_v60, %v12598_v28 }
 0x441   : > { %v10588_v61 = vpop.eup %10587  ;;  %v1928_v4 = vpop.xlane.xlu1 %1927  ;;  %v1804_v57 = vmul.f32 %v10586_v27, %v12618_v0 }
 0x442   : > { %v10590_v62 = vpop.eup %10589  ;;  %v2145_v25 = vpack.c.bf16 %v1644_v31, %v1643_v41  ;;  %v1964_v35 = vmul.f32 %v10588_v61, %v12610_v16 }
 0x443   : > { %v10592_v36 = vpop.eup %10591  ;;  %v1766_v52 = vpop.xlane.xlu0 %1765  ;;  %v2146_v10 = vpack.c.bf16 %v1804_v57, %v1803_v12  ;;  %v2123_v55 = vmul.f32 %v10590_v62, %v12622_v24 }
 0x444   : > { %v10594_v44 = vpop.eup %10593  ;;  %10597 = vrcp.f32 %v1766_v52  ;;  %v1963_v28 = vmul.f32 %v10592_v36, %v12606_v29 }
 0x445   : > { %10599 = vrcp.f32 %v1606_v43  ;;  %v1768_v23 = vpop.xlane.xlu1 %1767  ;;  %2221 = vmatprep.mubr.bf16.mxu0 %v2146_v10  ;;  %v2124_v21 = vmul.f32 %v10594_v44, %v12626_v3  ;;  %v17134_v44 = vld [vmem:[#allocation30_spill] sm:$0xff] }
 0x446   : > { %10601 = vrcp.f32 %v1768_v23  ;;  %2222 = vmatmul.mubr.bf16.gmra.mrb[76].mxu0 %v2145_v25  ;;  %v2147_v46 = vpack.c.bf16 %v1964_v35, %v1963_v28 }
 0x447   : > { %10603 = vrcp.f32 %v1928_v4  ;;  %v2086_v0 = vpop.xlane.xlu0 %2085  ;;  %v2148_v45 = vpack.c.bf16 %v2124_v21, %v2123_v55 }
 0x448   : > { %10605 = vrcp.f32 %v2086_v0  ;;  %v10596_v56 = vpop.eup %10595  ;;  %v2370_v0 = vld [vmem:[%s16884_s2 + $0x6c] sm:$0xf] }
 0x449   : > { %10607 = vrcp.f32 %v1926_v17  ;;  %v2088_v8 = vpop.xlane.xlu1 %2087  ;;  %2318 = vmatprep.mubr.bf16.mxu1 %v2148_v45  ;;  %v1646_v54 = vmul.f32 %v10596_v56, %v12634_v48 }
 0x44a   : > { %10609 = vrcp.f32 %v2088_v8  ;;  %2319 = vmatmul.mubr.bf16.gmra.mrb[60].mxu1 %v2147_v46  ;;  %v2371_v8 = vld [vmem:[%s16884_s2 + $0x8c] sm:$0xf] }
 0x44b   : > { %v1610_v16 = vpop.xlane.xlu0 %1609 }
 0x44d   : > { %v1612_v1 = vpop.xlane.xlu1 %1611 }
 0x44e   : > { %v10598_v24 = vpop.eup %10597  ;;  %10611 = vrcp.f32 %v1612_v1 }
 0x44f   : > { %v10600_v22 = vpop.eup %10599  ;;  %v1930_v3 = vpop.xlane.xlu0 %1929  ;;  %v1805_v40 = vmul.f32 %v10598_v24, %v12646_v53 }
 0x450   : > { %v10602_v59 = vpop.eup %10601  ;;  %v1645_v20 = vmul.f32 %v10600_v22, %v12630_v58 }
 0x451   : > { %v10604_v29 = vpop.eup %10603  ;;  %v1932_v13 = vpop.xlane.xlu1 %1931  ;;  %v1806_v7 = vmul.f32 %v10602_v59, %v12650_v18 }
 0x452   : > { %v10606_v14 = vpop.eup %10605  ;;  %v2149_v11 = vpack.c.bf16 %v1646_v54, %v1645_v20  ;;  %v1966_v9 = vmul.f32 %v10604_v29, %v12642_v15  ;;  %v17137_v54 = vld [vmem:[#allocation33_spill] sm:$0xff] }
 0x453   : > { %v10608_v6 = vpop.eup %10607  ;;  %v1770_v63 = vpop.xlane.xlu0 %1769  ;;  %v2150_v34 = vpack.c.bf16 %v1806_v7, %v1805_v40  ;;  %v2125_v26 = vmul.f32 %v10606_v14, %v12654_v30  ;;  %v17138_v40 = vld [vmem:[#allocation36_spill] sm:$0xff]  ;;  %v17139_v14 = vld [vmem:[#allocation41_spill] sm:$0xff] }
 0x454   : > { %v10610_v39 = vpop.eup %10609  ;;  %10613 = vrcp.f32 %v1770_v63  ;;  %v1965_v58 = vmul.f32 %v10608_v6, %v12638_v47  ;;  %v2373_v6 = vld [vmem:[%s16884_s2 + $0xcc] sm:$0xf] }
 0x455   : > { %10615 = vrcp.f32 %v1610_v16  ;;  %v1772_v48 = vpop.xlane.xlu1 %1771  ;;  %2229 = vmatprep.mubr.bf16.mxu0 %v2150_v34  ;;  %v2126_v53 = vmul.f32 %v10610_v39, %v12658_v42  ;;  %v2372_v16 = vld [vmem:[%s16884_s2 + $0xac] sm:$0xf] }
 0x456   : > { %10617 = vrcp.f32 %v1772_v48  ;;  %2230 = vmatmul.mubr.bf16.gmra.mrb[80].mxu0 %v2149_v11  ;;  %v2151_v49 = vpack.c.bf16 %v1966_v9, %v1965_v58  ;;  %v8942_v1 = vcombine.low %v2371_v8, %v2372_v16  ;;  %v2374_v63 = vld [vmem:[%s16884_s2 + $0xec] sm:$0xf] }
 0x457   : > { %10619 = vrcp.f32 %v1932_v13  ;;  %v2090_v18 = vpop.xlane.xlu0 %2089  ;;  %v2152_v2 = vpack.c.bf16 %v2126_v53, %v2125_v26  ;;  %v17140_v39 = vld [vmem:[#allocation32_spill] sm:$0xff]  ;;  %v8943_v9 = vcombine.low %v2373_v6, %v2374_v63 }
 0x458   : > { %10621 = vrcp.f32 %v2090_v18  ;;  %v10612_v32 = vpop.eup %10611  ;;  %v2375_v58 = vld [vmem:[%s16884_s2 + $0x10c] sm:$0xf] }
 0x459   : > { %10623 = vrcp.f32 %v1930_v3  ;;  %v2092_v43 = vpop.xlane.xlu1 %2091  ;;  %2326 = vmatprep.mubr.bf16.mxu1 %v2152_v2  ;;  %v1648_v17 = vmul.f32 %v10612_v32, %v12666_v38  ;;  %v2376_v18 = vld [vmem:[%s16884_s2 + $0x12c] sm:$0xf] }
 0x45a   : > { %10625 = vrcp.f32 %v2092_v43  ;;  %2327 = vmatmul.mubr.bf16.gmra.mrb[64].mxu1 %v2151_v49  ;;  %v17141_v43 = vld [vmem:[#allocation35_spill] sm:$0xff]  ;;  %v8944_v32 = vcombine.low %v2375_v58, %v2376_v18 }
 0x45b   : > { %v1614_v15 = vpop.xlane.xlu0 %1613 }
 0x45d   : > { %v1616_v37 = vpop.xlane.xlu1 %1615 }
 0x45e   : > { %v10614_v30 = vpop.eup %10613  ;;  %10627 = vrcp.f32 %v1616_v37 }
 0x45f   : > { %v10616_v33 = vpop.eup %10615  ;;  %v1934_v42 = vpop.xlane.xlu0 %1933  ;;  %v1807_v31 = vmul.f32 %v10614_v30, %v12678_v50  ;;  %v17135_v50 = vld [vmem:[#allocation31_spill] sm:$0xff]  ;;  %v17142_v30 = vld [vmem:[#allocation42_spill] sm:$0xff] }
 0x460   : > { %v10618_v60 = vpop.eup %10617  ;;  %v1647_v12 = vmul.f32 %v10616_v33, %v12662_v51 }
 0x461   : > { %v10620_v47 = vpop.eup %10619  ;;  %v1936_v27 = vpop.xlane.xlu1 %1935  ;;  %v1808_v61 = vmul.f32 %v10618_v60, %v12682_v5  ;;  %v17136_v5 = vld [vmem:[#allocation29_spill] sm:$0xff] }
 0x462   : > { %v10622_v4 = vpop.eup %10621  ;;  %v2153_v52 = vpack.c.bf16 %v1648_v17, %v1647_v12  ;;  %v1968_v10 = vmul.f32 %v10620_v47, %v12674_v19  ;;  %v2369_v19 = vld [vmem:[%s16884_s2 + $0x4c] sm:$0xf]  ;;  %v17144_v17 = vld [vmem:[#allocation34_spill] sm:$0xff] }
 0x463   : > { %v10624_v57 = vpop.eup %10623  ;;  %v1774_v62 = vpop.xlane.xlu0 %1773  ;;  %v2154_v41 = vpack.c.bf16 %v1808_v61, %v1807_v31  ;;  %v2127_v25 = vmul.f32 %v10622_v4, %v17134_v44  ;;  %v8941_v45 = vcombine.low %v2369_v19, %v2370_v0  ;;  %v2377_v12 = vld [vmem:[%s16884_s2 + $0x14c] sm:$0xf] }
 0x464   : > { %v10626_v36 = vpop.eup %10625  ;;  %10629 = vrcp.f32 %v1774_v62  ;;  %v1967_v51 = vmul.f32 %v10624_v57, %v17136_v5  ;;  %v2378_v57 = vld [vmem:[%s16884_s2 + $0x16c] sm:$0xf]  ;;  %v17145_v5 = vld [vmem:[#allocation39_spill] sm:$0xff] }
 0x465   : > { %10631 = vrcp.f32 %v1614_v15  ;;  %v1776_v38 = vpop.xlane.xlu1 %1775  ;;  %2237 = vmatprep.mubr.bf16.mxu0 %v2154_v41  ;;  %v2128_v35 = vmul.f32 %v10626_v36, %v17135_v50  ;;  %10044 = vmatprep.subr.bf16.mxu0 %v8941_v45  ;;  %v8945_v62 = vcombine.low %v2377_v12, %v2378_v57  ;;  %v2381_v19 = vld [vmem:[%s16884_s2 + $0x1cc] sm:$0xf] }
 0x466   : > { %10633 = vrcp.f32 %v1776_v38  ;;  %2238 = vmatmul.mubr.bf16.gmra.mrb[84].mxu0 %v2153_v52  ;;  %v2155_v21 = vpack.c.bf16 %v1968_v10, %v1967_v51  ;;  %v2379_v10 = vld [vmem:[%s16884_s2 + $0x18c] sm:$0xf] }
 0x467   : > { %10635 = vrcp.f32 %v1936_v27  ;;  %v2094_v23 = vpop.xlane.xlu0 %2093  ;;  %v2156_v55 = vpack.c.bf16 %v2128_v35, %v2127_v25  ;;  %10045 = vmatpush3.bf16.msra.mxu0 %v8941_v45  ;;  %v2380_v38 = vld [vmem:[%s16884_s2 + $0x1ac] sm:$0xf] }
 0x468   : > { %10637 = vrcp.f32 %v2094_v23  ;;  %v10628_v46 = vpop.eup %10627  ;;  %10046 = vmatprep.subr.bf16.mxu0 %v8942_v1  ;;  %v8946_v25 = vcombine.low %v2379_v10, %v2380_v38  ;;  %v17146_v23 = vld [vmem:[#allocation38_spill] sm:$0xff]  ;;  %v2382_v0 = vld [vmem:[%s16884_s2 + $0x1ec] sm:$0xf] }
 0x469   : > { %10639 = vrcp.f32 %v1934_v42  ;;  %v2096_v28 = vpop.xlane.xlu1 %2095  ;;  %2334 = vmatprep.mubr.bf16.mxu1 %v2156_v55  ;;  %v1650_v29 = vmul.f32 %v10628_v46, %v17137_v54  ;;  %v17143_v42 = vld [vmem:[#allocation43_spill] sm:$0xff]  ;;  %v17148_v46 = vld [vmem:[#allocation37_spill] sm:$0xff]  ;;  %v8947_v16 = vcombine.low %v2381_v19, %v2382_v0 }
 0x46a   : > { %10641 = vrcp.f32 %v2096_v28  ;;  %2335 = vmatmul.mubr.bf16.gmra.mrb[68].mxu1 %v2155_v21  ;;  %v17147_v21 = vld [vmem:[#allocation40_spill] sm:$0xff] }
 0x46b   : > { %v1618_v22 = vpop.xlane.xlu0 %1617  ;;  %10047 = vmatpush3.bf16.msra.mxu0 %v8942_v1 }
 0x46c   : > { %10048 = vmatprep.subr.bf16.mxu0 %v8943_v9 }
 0x46d   : > { %v1620_v59 = vpop.xlane.xlu1 %1619 }
 0x46e   : > { %v10630_v56 = vpop.eup %10629  ;;  %10643 = vrcp.f32 %v1620_v59  ;;  %v17150_v59 = vld [vmem:[#allocation45_spill] sm:$0xff] }
 0x46f   : > { %v10632_v24 = vpop.eup %10631  ;;  %v1809_v7 = vmul.f32 %v10630_v56, %v17138_v40  ;;  %10049 = vmatpush3.bf16.msra.mxu0 %v8943_v9 }
 0x470   : > { %v10634_v3 = vpop.eup %10633  ;;  %v1649_v11 = vmul.f32 %v10632_v24, %v17140_v39  ;;  %10050 = vmatprep.subr.bf16.mxu0 %v8944_v32 }
 0x471   : > { %v10636_v13 = vpop.eup %10635  ;;  %v1810_v20 = vmul.f32 %v10634_v3, %v17139_v14 }
 0x472   : > { %v10638_v34 = vpop.eup %10637  ;;  %v2157_v49 = vpack.c.bf16 %v1650_v29, %v1649_v11  ;;  %v1970_v15 = vmul.f32 %v10636_v13, %v17141_v43 }
 0x473   : > { %v10640_v48 = vpop.eup %10639  ;;  %v1778_v26 = vpop.xlane.xlu0 %1777  ;;  %v2158_v53 = vpack.c.bf16 %v1810_v20, %v1809_v7  ;;  %v2129_v33 = vmul.f32 %v10638_v34, %v17142_v30  ;;  %10051 = vmatpush3.bf16.msra.mxu0 %v8944_v32  ;;  %v17151_v7 = vld [vmem:[#allocation46_spill] sm:$0xff]  ;;  %v17152_v20 = vld [vmem:[#allocation47_spill] sm:$0xff]  ;;  %v17153_v34 = vmov 0  }
 0x474   : > { %v10642_v2 = vpop.eup %10641  ;;  %10645 = vrcp.f32 %v1778_v26  ;;  %v1969_v47 = vmul.f32 %v10640_v48, %v17144_v17  ;;  %10052 = vmatprep.subr.bf16.mxu0 %v8945_v62 }
 0x475   : > { %10647 = vrcp.f32 %v1618_v22  ;;  %v1780_v37 = vpop.xlane.xlu1 %1779  ;;  %2245 = vmatprep.mubr.bf16.mxu0 %v2158_v53  ;;  %v2130_v60 = vmul.f32 %v10642_v2, %v17143_v42  ;;  %v17149_v22 = vld [vmem:[#allocation44_spill] sm:$0xff] }
 0x476   : > { %10649 = vrcp.f32 %v1780_v37  ;;  %2246 = vmatmul.mubr.bf16.gmra.mrb[88].mxu0 %v2157_v49  ;;  %v2159_v61 = vpack.c.bf16 %v1970_v15, %v1969_v47 }
 0x477   : > { %v2098_v27 = vpop.xlane.xlu0 %2097  ;;  %v2160_v31 = vpack.c.bf16 %v2130_v60, %v2129_v33  ;;  %10053 = vmatpush3.bf16.msra.mxu0 %v8945_v62 }
 0x478   : > { %10651 = vrcp.f32 %v2098_v27  ;;  %v10644_v36 = vpop.eup %10643  ;;  %10054 = vmatprep.subr.bf16.mxu0 %v8946_v25 }
 0x479   : > { %v2100_v4 = vpop.xlane.xlu1 %2099  ;;  %2342 = vmatprep.mubr.bf16.mxu1 %v2160_v31  ;;  %v1652_v51 = vmul.f32 %v10644_v36, %v17145_v5 }
 0x47a   : > { %10653 = vrcp.f32 %v2100_v4  ;;  %2343 = vmatmul.mubr.bf16.gmra.mrb[72].mxu1 %v2159_v61 }
 0x47b   : > { %v1938_v41 = vpop.xlane.xlu0 %1937  ;;  %10055 = vmatpush3.bf16.msra.mxu0 %v8946_v25 }
 0x47c   : > { %10655 = vrcp.f32 %v1938_v41  ;;  %10056 = vmatprep.subr.bf16.mxu0 %v8947_v16 }
 0x47d   : > { %v1940_v52 = vpop.xlane.xlu1 %1939 }
 0x47e   : > { %v10646_v44 = vpop.eup %10645  ;;  %10657 = vrcp.f32 %v1940_v52 }
 0x47f   : > { %v10648_v50 = vpop.eup %10647  ;;  %v1811_v55 = vmul.f32 %v10646_v44, %v17146_v23  ;;  %10057 = vmatpush3.bf16.msra.mxu0 %v8947_v16 }
 0x480   : > { %v10650_v35 = vpop.eup %10649  ;;  %v1651_v8 = vmul.f32 %v10648_v50, %v17148_v46 }
 0x481   : > { %v1812_v28 = vmul.f32 %v10650_v35, %v17147_v21 }
 0x482   : > { %v10652_v45 = vpop.eup %10651  ;;  %v2161_v24 = vpack.c.bf16 %v1652_v51, %v1651_v8 }
 0x483   : > { %v2162_v56 = vpack.c.bf16 %v1812_v28, %v1811_v55  ;;  %v2131_v3 = vmul.f32 %v10652_v45, %v17149_v22 }
 0x484   : > { %v10654_v1 = vpop.eup %10653 }
 0x485   : > { %2253 = vmatprep.mubr.bf16.mxu0 %v2162_v56  ;;  %v2132_v54 = vmul.f32 %v10654_v1, %v17150_v59 }
 0x486   : > { %v10656_v29 = vpop.eup %10655  ;;  %2254 = vmatmul.mubr.bf16.gmra.mrb[92].mxu0 %v2161_v24 }
 0x487   : > { %v2164_v13 = vpack.c.bf16 %v2132_v54, %v2131_v3  ;;  %v1971_v14 = vmul.f32 %v10656_v29, %v17151_v7 }
 0x488   : > { %v10658_v40 = vpop.eup %10657 }
 0x489   : > { %2350 = vmatprep.mubr.bf16.mxu1 %v2164_v13  ;;  %v1972_v6 = vmul.f32 %v10658_v40, %v17152_v20 }
 0x48b   : > { %v2163_v63 = vpack.c.bf16 %v1972_v6, %v1971_v14 }
 0x48d   : > { %2351 = vmatmul.mubr.bf16.gmra.mrb[76].mxu1 %v2163_v63 }
 0x48e   : > { %3058 = vmatprep.mubr.bf16.mxu1 %v17153_v34 }
 0x4e9   : > { %v9370_v39 = vpop.f32.mrb[64].mxu0 }
 0x4ea   : > { %v9371_v11 = vpop.f32.mrb[65].mxu0 }
 0x4eb   : > { %v9372_v9 = vadd.f32 %v9371_v11, %v9370_v39  ;;  %v9373_v48 = vpop.f32.mrb[66].mxu0 }
 0x4ec   : > { %v9374_v26 = vpop.f32.mrb[67].mxu0 }
 0x4ed   : > { %v9375_v53 = vadd.f32 %v9374_v26, %v9373_v48  ;;  %v9434_v58 = vpop.f32.mrb[48].mxu1 }
 0x4ee   : > { %v9435_v18 = vpop.f32.mrb[49].mxu1 }
 0x4ef   : > { %v9436_v2 = vadd.f32 %v9435_v18, %v9434_v58  ;;  %v9437_v49 = vpop.f32.mrb[50].mxu1 }
 0x4f0   : > { %v9438_v43 = vpop.f32.mrb[51].mxu1 }
 0x4f1   : > { %v2297_v15 = vadd.f32 %v9436_v2, %v9372_v9  ;;  %v9439_v32 = vadd.f32 %v9438_v43, %v9437_v49 }
 0x4f3   : > { %v2300_v37 = vadd.f32 %v9439_v32, %v9375_v53 }
 0x4f5   : > { %v2359_v30 = vpack.c.bf16 %v2300_v37, %v2297_v15 }
 0x4f7   : > { %10058 = vmatprep.mubr.bf16.mxu0 %v2359_v30 }
 0x4f9   : > { %v9376_v33 = vpop.f32.mrb[68].mxu0 }
 0x4fa   : > { %v9377_v42 = vpop.f32.mrb[69].mxu0 }
 0x4fb   : > { %v9378_v60 = vadd.f32 %v9377_v42, %v9376_v33  ;;  %v9379_v17 = vpop.f32.mrb[70].mxu0 }
 0x4fc   : > { %v9380_v47 = vpop.f32.mrb[71].mxu0 }
 0x4fd   : > { %v9381_v27 = vadd.f32 %v9380_v47, %v9379_v17  ;;  %v9440_v31 = vpop.f32.mrb[52].mxu1 }
 0x4fe   : > { %v9441_v61 = vpop.f32.mrb[53].mxu1 }
 0x4ff   : > { %v9442_v4 = vadd.f32 %v9441_v61, %v9440_v31  ;;  %v9443_v12 = vpop.f32.mrb[54].mxu1 }
 0x500   : > { %v9444_v57 = vpop.f32.mrb[55].mxu1 }
 0x501   : > { %v2305_v62 = vadd.f32 %v9442_v4, %v9378_v60  ;;  %v9445_v41 = vadd.f32 %v9444_v57, %v9443_v12 }
 0x503   : > { %v2308_v36 = vadd.f32 %v9445_v41, %v9381_v27 }
 0x505   : > { %v2360_v52 = vpack.c.bf16 %v2308_v36, %v2305_v62 }
 0x507   : > { %10059 = vmatmul.mubr.bf16.vlgmr.msra.gmra.mrb[96].mxu0 %v2360_v52 }
 0x509   : > { %v9382_v10 = vpop.f32.mrb[72].mxu0 }
 0x50a   : > { %v9383_v38 = vpop.f32.mrb[73].mxu0 }
 0x50b   : > { %v9384_v44 = vadd.f32 %v9383_v38, %v9382_v10  ;;  %v9385_v25 = vpop.f32.mrb[74].mxu0 }
 0x50c   : > { %v9386_v50 = vpop.f32.mrb[75].mxu0 }
 0x50d   : > { %v9387_v35 = vadd.f32 %v9386_v50, %v9385_v25  ;;  %v9446_v5 = vpop.f32.mrb[56].mxu1 }
 0x50e   : > { %v9447_v51 = vpop.f32.mrb[57].mxu1 }
 0x50f   : > { %v9448_v23 = vadd.f32 %v9447_v51, %v9446_v5  ;;  %v9449_v55 = vpop.f32.mrb[58].mxu1 }
 0x510   : > { %v9450_v21 = vpop.f32.mrb[59].mxu1 }
 0x511   : > { %v2313_v28 = vadd.f32 %v9448_v23, %v9384_v44  ;;  %v9451_v19 = vadd.f32 %v9450_v21, %v9449_v55 }
 0x513   : > { %v2316_v0 = vadd.f32 %v9451_v19, %v9387_v35 }
 0x515   : > { %v2361_v45 = vpack.c.bf16 %v2316_v0, %v2313_v28 }
 0x517   : > { %10062 = vmatprep.mubr.bf16.mxu0 %v2361_v45 }
 0x519   : > { %v9388_v46 = vpop.f32.mrb[76].mxu0 }
 0x51a   : > { %v9389_v8 = vpop.f32.mrb[77].mxu0 }
 0x51b   : > { %v9390_v16 = vadd.f32 %v9389_v8, %v9388_v46  ;;  %v9391_v56 = vpop.f32.mrb[78].mxu0 }
 0x51c   : > { %v9392_v1 = vpop.f32.mrb[79].mxu0 }
 0x51d   : > { %v9393_v24 = vadd.f32 %v9392_v1, %v9391_v56  ;;  %v9452_v22 = vpop.f32.mrb[60].mxu1 }
 0x51e   : > { %v9453_v3 = vpop.f32.mrb[61].mxu1 }
 0x51f   : > { %v9454_v59 = vadd.f32 %v9453_v3, %v9452_v22  ;;  %v9455_v54 = vpop.f32.mrb[62].mxu1 }
 0x520   : > { %v9456_v29 = vpop.f32.mrb[63].mxu1 }
 0x521   : > { %v2321_v13 = vadd.f32 %v9454_v59, %v9390_v16  ;;  %v9457_v40 = vadd.f32 %v9456_v29, %v9455_v54 }
 0x523   : > { %v2324_v7 = vadd.f32 %v9457_v40, %v9393_v24  ;;  %v12868_v40 = vld [vmem:[%s16887_s5 + $0x5] ss:$0 sm:$0xff] }
 0x525   : > { %v2362_v14 = vpack.c.bf16 %v2324_v7, %v2321_v13 }
 0x527   : > { %10063 = vmatmul.mubr.bf16.gmra.mrb[100].mxu0 %v2362_v14 }
 0x529   : > { %v9394_v20 = vpop.f32.mrb[80].mxu0 }
 0x52a   : > { %v9395_v6 = vpop.f32.mrb[81].mxu0 }
 0x52b   : > { %v9396_v63 = vadd.f32 %v9395_v6, %v9394_v20  ;;  %v9397_v39 = vpop.f32.mrb[82].mxu0 }
 0x52c   : > { %v9398_v11 = vpop.f32.mrb[83].mxu0 }
 0x52d   : > { %v9399_v9 = vadd.f32 %v9398_v11, %v9397_v39  ;;  %v9458_v48 = vpop.f32.mrb[64].mxu1  ;;  %v17154_v39 = vld [vmem:[#allocation3_spill] sm:$0xff] }
 0x52e   : > { %v9459_v26 = vpop.f32.mrb[65].mxu1 }
 0x52f   : > { %v9460_v53 = vadd.f32 %v9459_v26, %v9458_v48  ;;  %v9461_v58 = vpop.f32.mrb[66].mxu1  ;;  %v17155_v48 = vld [vmem:[#allocation4_spill] sm:$0xff] }
 0x530   : > { %v9462_v18 = vpop.f32.mrb[67].mxu1 }
 0x531   : > { %v2329_v2 = vadd.f32 %v9460_v53, %v9396_v63  ;;  %v9463_v49 = vadd.f32 %v9462_v18, %v9461_v58 }
 0x533   : > { %v2332_v43 = vadd.f32 %v9463_v49, %v9399_v9  ;;  %v17156_v49 = vld [vmem:[#allocation5_spill] sm:$0xff] }
 0x535   : > { %v2363_v15 = vpack.c.bf16 %v2332_v43, %v2329_v2 }
 0x537   : > { %10066 = vmatprep.mubr.bf16.mxu0 %v2363_v15  ;;  %v17157_v15 = vld [vmem:[#allocation6_spill] sm:$0xff] }
 0x539   : > { %v9400_v32 = vpop.f32.mrb[84].mxu0 }
 0x53a   : > { %v9401_v37 = vpop.f32.mrb[85].mxu0 }
 0x53b   : > { %v9402_v30 = vadd.f32 %v9401_v37, %v9400_v32  ;;  %v9403_v33 = vpop.f32.mrb[86].mxu0 }
 0x53c   : > { %v9404_v42 = vpop.f32.mrb[87].mxu0 }
 0x53d   : > { %v9405_v60 = vadd.f32 %v9404_v42, %v9403_v33  ;;  %v9464_v17 = vpop.f32.mrb[68].mxu1  ;;  %v2811_v33 = vld [vmem:[%s16884_s2 + $0x10] sm:$0xff] }
 0x53e   : > { %v9465_v47 = vpop.f32.mrb[69].mxu1  ;;  %v2813_v42 = vld [vmem:[%s16884_s2 + $0x30] sm:$0xff] }
 0x53f   : > { %v9466_v27 = vadd.f32 %v9465_v47, %v9464_v17  ;;  %v9467_v31 = vpop.f32.mrb[70].mxu1  ;;  %v8950_v17 = vcombine.high %v2811_v33, %v2813_v42  ;;  %v2814_v47 = vld [vmem:[%s16884_s2 + $0x38] sm:$0xff] }
 0x540   : > { %v9468_v61 = vpop.f32.mrb[71].mxu1 }
 0x541   : > { %v2337_v4 = vadd.f32 %v9466_v27, %v9402_v30  ;;  %v9469_v12 = vadd.f32 %v9468_v61, %v9467_v31  ;;  %v8949_v27 = vcombine.low %v2811_v33, %v2813_v42  ;;  %3026 = vmatprep.subr.bf16.mxu1 %v8950_v17 }
 0x543   : > { %v2340_v57 = vadd.f32 %v9469_v12, %v9405_v60  ;;  %v2812_v60 = vld [vmem:[%s16884_s2 + $0x18] sm:$0xff]  ;;  %3027 = vmatpush1.bf16.msra.mxu1 %v8949_v27  ;;  %v2817_v12 = vld [vmem:[%s16884_s2 + $0x70] sm:$0xff] }
 0x544   : > { %v8951_v31 = vcombine.low %v2812_v60, %v2814_v47  ;;  %v8952_v61 = vcombine.high %v2812_v60, %v2814_v47  ;;  %v2835_v47 = vld [vmem:[%s16884_s2 + $0x190] sm:$0xff] }
 0x545   : > { %v2364_v62 = vpack.c.bf16 %v2340_v57, %v2337_v4  ;;  %v2815_v4 = vld [vmem:[%s16884_s2 + $0x50] sm:$0xff]  ;;  %v2816_v57 = vld [vmem:[%s16884_s2 + $0x58] sm:$0xff] }
 0x546   : > { %3139 = vmatprep.subr.bf16.mxu0 %v8952_v61  ;;  %v2837_v27 = vld [vmem:[%s16884_s2 + $0x1b0] sm:$0xff] }
 0x547   : > { %10067 = vmatmul.mubr.bf16.gmra.mrb[104].mxu0 %v2364_v62  ;;  %v8954_v62 = vcombine.high %v2815_v4, %v2817_v12  ;;  %v17160_v61 = vld [vmem:[#allocation9_spill] sm:$0xff] }
 0x548   : > { %3140 = vmatpush1.bf16.msra.mxu0 %v8951_v31  ;;  %v2836_v31 = vld [vmem:[%s16884_s2 + $0x198] sm:$0xff] }
 0x549   : > { %v9406_v41 = vpop.f32.mrb[88].mxu0  ;;  %3028 = vmatprep.subr.bf16.mxu1 %v8954_v62  ;;  %v8973_v62 = vcombine.low %v2835_v47, %v2837_v27 }
 0x54a   : > { %v9407_v36 = vpop.f32.mrb[89].mxu0 }
 0x54b   : > { %v9408_v52 = vadd.f32 %v9407_v36, %v9406_v41  ;;  %v9409_v10 = vpop.f32.mrb[90].mxu0  ;;  %v2818_v41 = vld [vmem:[%s16884_s2 + $0x78] sm:$0xff]  ;;  %v8953_v36 = vcombine.low %v2815_v4, %v2817_v12  ;;  %v8974_v12 = vcombine.high %v2835_v47, %v2837_v27  ;;  %v17168_v47 = vld [vmem:[#allocation17_spill] sm:$0xff] }
 0x54c   : > { %v9410_v38 = vpop.f32.mrb[91].mxu0 }
 0x54d   : > { %v9411_v44 = vadd.f32 %v9410_v38, %v9409_v10  ;;  %v9470_v25 = vpop.f32.mrb[72].mxu1  ;;  %v8956_v10 = vcombine.high %v2816_v57, %v2818_v41  ;;  %3029 = vmatpush1.bf16.msra.mxu1 %v8953_v36  ;;  %v2819_v38 = vld [vmem:[%s16884_s2 + $0x90] sm:$0xff] }
 0x54e   : > { %v9471_v50 = vpop.f32.mrb[73].mxu1 }
 0x54f   : > { %v9472_v35 = vadd.f32 %v9471_v50, %v9470_v25  ;;  %v9473_v5 = vpop.f32.mrb[74].mxu1  ;;  %3141 = vmatprep.subr.bf16.mxu0 %v8956_v10  ;;  %v2820_v25 = vld [vmem:[%s16884_s2 + $0x98] sm:$0xff]  ;;  %v2841_v10 = vld [vmem:[%s16884_s2 + $0x1f0] sm:$0xff] }
 0x550   : > { %v9474_v51 = vpop.f32.mrb[75].mxu1 }
 0x551   : > { %v2345_v23 = vadd.f32 %v9472_v35, %v9408_v52  ;;  %v9475_v55 = vadd.f32 %v9474_v51, %v9473_v5  ;;  %v8955_v52 = vcombine.low %v2816_v57, %v2818_v41  ;;  %v2822_v35 = vld [vmem:[%s16884_s2 + $0xb8] sm:$0xff] }
 0x552   : > { %v8959_v51 = vcombine.low %v2820_v25, %v2822_v35  ;;  %v2838_v57 = vld [vmem:[%s16884_s2 + $0x1b8] sm:$0xff] }
 0x553   : > { %v2348_v21 = vadd.f32 %v9475_v55, %v9411_v44  ;;  %v2821_v44 = vld [vmem:[%s16884_s2 + $0xb0] sm:$0xff]  ;;  %3142 = vmatpush1.bf16.msra.mxu0 %v8955_v52  ;;  %v8975_v41 = vcombine.low %v2836_v31, %v2838_v57  ;;  %v8976_v36 = vcombine.high %v2836_v31, %v2838_v57  ;;  %v17169_v31 = vld [vmem:[#allocation18_spill] sm:$0xff] }
 0x554   : > { %v8958_v50 = vcombine.high %v2819_v38, %v2821_v44  ;;  %v8957_v5 = vcombine.low %v2819_v38, %v2821_v44  ;;  %v2823_v55 = vld [vmem:[%s16884_s2 + $0xd0] sm:$0xff]  ;;  %v2840_v38 = vld [vmem:[%s16884_s2 + $0x1d8] sm:$0xff] }
 0x555   : > { %v2365_v28 = vpack.c.bf16 %v2348_v21, %v2345_v23  ;;  %v8960_v23 = vcombine.high %v2820_v25, %v2822_v35  ;;  %v2825_v21 = vld [vmem:[%s16884_s2 + $0xf0] sm:$0xff]  ;;  %v17161_v44 = vld [vmem:[#allocation10_spill] sm:$0xff] }
 0x556   : > { %3030 = vmatprep.subr.bf16.mxu1 %v8958_v50  ;;  %v2839_v52 = vld [vmem:[%s16884_s2 + $0x1d0] sm:$0xff]  ;;  %v2842_v35 = vld [vmem:[%s16884_s2 + $0x1f8] sm:$0xff] }
 0x557   : > { %10070 = vmatprep.mubr.bf16.mxu0 %v2365_v28  ;;  %3143 = vmatprep.subr.bf16.mxu0 %v8960_v23  ;;  %v2824_v28 = vld [vmem:[%s16884_s2 + $0xd8] sm:$0xff]  ;;  %v8978_v50 = vcombine.high %v2839_v52, %v2841_v10 }
 0x558   : > { %3031 = vmatpush1.bf16.msra.mxu1 %v8957_v5  ;;  %3144 = vmatpush1.bf16.msra.mxu0 %v8959_v51  ;;  %v8977_v5 = vcombine.low %v2839_v52, %v2841_v10  ;;  %v8980_v51 = vcombine.high %v2840_v38, %v2842_v35 }
 0x559   : > { %v9412_v19 = vpop.f32.mrb[92].mxu0 }
 0x55a   : > { %v9413_v0 = vpop.f32.mrb[93].mxu0 }
 0x55b   : > { %v9414_v45 = vadd.f32 %v9413_v0, %v9412_v19  ;;  %v9415_v46 = vpop.f32.mrb[94].mxu0  ;;  %v8962_v0 = vcombine.high %v2823_v55, %v2825_v21 }
 0x55c   : > { %v9416_v8 = vpop.f32.mrb[95].mxu0 }
 0x55d   : > { %v9417_v16 = vadd.f32 %v9416_v8, %v9415_v46  ;;  %v8961_v8 = vcombine.low %v2823_v55, %v2825_v21  ;;  %3032 = vmatprep.subr.bf16.mxu1 %v8962_v0  ;;  %v8979_v55 = vcombine.low %v2840_v38, %v2842_v35 }
 0x55f   : > { %3033 = vmatpush1.bf16.msra.mxu1 %v8961_v8  ;;  %v17162_v8 = vld [vmem:[#allocation11_spill] sm:$0xff] }
 0x560   : > { %v9476_v56 = vpop.f32.mrb[76].mxu1 }
 0x561   : > { %v9477_v1 = vpop.f32.mrb[77].mxu1 }
 0x562   : > { %v9478_v24 = vadd.f32 %v9477_v1, %v9476_v56  ;;  %v9479_v22 = vpop.f32.mrb[78].mxu1 }
 0x563   : > { %v9480_v3 = vpop.f32.mrb[79].mxu1 }
 0x564   : > { %v2353_v59 = vadd.f32 %v9478_v24, %v9414_v45  ;;  %v9481_v54 = vadd.f32 %v9480_v3, %v9479_v22  ;;  %v2826_v45 = vld [vmem:[%s16884_s2 + $0xf8] sm:$0xff]  ;;  %v2827_v3 = vld [vmem:[%s16884_s2 + $0x110] sm:$0xff] }
 0x565   : > { %v8964_v56 = vcombine.high %v2824_v28, %v2826_v45 }
 0x566   : > { %v2356_v29 = vadd.f32 %v9481_v54, %v9417_v16  ;;  %v8963_v16 = vcombine.low %v2824_v28, %v2826_v45  ;;  %v2828_v54 = vld [vmem:[%s16884_s2 + $0x118] sm:$0xff] }
 0x567   : > { %3145 = vmatprep.subr.bf16.mxu0 %v8964_v56 }
 0x568   : > { %v2366_v13 = vpack.c.bf16 %v2356_v29, %v2353_v59  ;;  %v2829_v59 = vld [vmem:[%s16884_s2 + $0x130] sm:$0xff]  ;;  %v17158_v29 = vld [vmem:[#allocation7_spill] sm:$0xff]  ;;  %3146 = vmatpush1.bf16.msra.mxu0 %v8963_v16 }
 0x56a   : > { %10071 = vmatmul.mubr.bf16.gmra.mrb[108].mxu0 %v2366_v13 }
 0x56b   : > { %3171 = vmatprep.mubr.bf16.mxu0 %v17153_v34 }
 0x5da   : > { %v10060_v7 = vpop.f32.mrb[96].mxu0 }
 0x5db   : > { %v2466_v14 = vpop.f32.mrb[97].mxu0  ;;  %v2475_v53 = vadd.f32 %v10060_v7, %v12868_v40 }
 0x5dc   : > { %v2467_v20 = vadd.f32 %v2466_v14, %v12868_v40  ;;  %v10061_v6 = vpop.f32.mrb[98].mxu0  ;;  %v8966_v14 = vcombine.high %v2827_v3, %v2829_v59 }
 0x5dd   : > { %v2469_v63 = vpop.f32.mrb[99].mxu0  ;;  %v2478_v18 = vadd.f32 %v10061_v6, %v12868_v40  ;;  %v12887_v43 = vadd.f32 %v2475_v53, %v17156_v49  ;;  %v8965_v6 = vcombine.low %v2827_v3, %v2829_v59  ;;  %v2831_v53 = vld [vmem:[%s16884_s2 + $0x150] sm:$0xff] }
 0x5de   : > { %v12872_v11 = vadd.f32 %v2467_v20, %v17154_v39  ;;  %v2470_v9 = vadd.f32 %v2469_v63, %v12868_v40  ;;  %v2830_v20 = vld [vmem:[%s16884_s2 + $0x138] sm:$0xff]  ;;  %v17159_v39 = vld [vmem:[#allocation8_spill] sm:$0xff]  ;;  %3034 = vmatprep.subr.bf16.mxu1 %v8966_v14 }
 0x5df   : > { %v12890_v32 = vadd.f32 %v2478_v18, %v17157_v15  ;;  %v2597_v37 = vmul.f32 %v12887_v43, %v12887_v43  ;;  %v8967_v63 = vcombine.low %v2828_v54, %v2830_v20  ;;  %3035 = vmatpush1.bf16.msra.mxu1 %v8965_v6  ;;  %v2832_v18 = vld [vmem:[%s16884_s2 + $0x158] sm:$0xff] }
 0x5e0   : > { %v12876_v26 = vadd.f32 %v2470_v9, %v17155_v48  ;;  %2547 = vadd.xlane.f32.xlu0 %v12872_v11  ;;  %v2595_v58 = vmul.f32 %v12872_v11, %v12872_v11  ;;  %v8968_v48 = vcombine.high %v2828_v54, %v2830_v20  ;;  %v17165_v14 = vld [vmem:[#allocation14_spill] sm:$0xff] }
 0x5e1   : > { %v2598_v30 = vmul.f32 %v12890_v32, %v12890_v32 }
 0x5e2   : > { %2549 = vadd.xlane.f32.xlu1 %v12876_v26  ;;  %v2596_v2 = vmul.f32 %v12876_v26, %v12876_v26  ;;  %3147 = vmatprep.subr.bf16.mxu0 %v8968_v48 }
 0x5e3   : > { %3148 = vmatpush1.bf16.msra.mxu0 %v8967_v63 }
 0x5e4   : > { %2611 = vadd.xlane.f32.xlu0 %v2595_v58  ;;  %v2833_v58 = vld [vmem:[%s16884_s2 + $0x170] sm:$0xff] }
 0x5e5   : > { %v8970_v15 = vcombine.high %v2831_v53, %v2833_v58 }
 0x5e6   : > { %2613 = vadd.xlane.f32.xlu1 %v2596_v2 }
 0x5e7   : > { %3036 = vmatprep.subr.bf16.mxu1 %v8970_v15 }
 0x5e8   : > { %2551 = vadd.xlane.f32.xlu0 %v12887_v43 }
 0x5ea   : > { %2553 = vadd.xlane.f32.xlu1 %v12890_v32 }
 0x5ec   : > { %2615 = vadd.xlane.f32.xlu0 %v2597_v37  ;;  %v2834_v37 = vld [vmem:[%s16884_s2 + $0x178] sm:$0xff] }
 0x5ed   : > { %v8971_v33 = vcombine.low %v2832_v18, %v2834_v37  ;;  %v8972_v42 = vcombine.high %v2832_v18, %v2834_v37  ;;  %v17167_v37 = vld [vmem:[#allocation16_spill] sm:$0xff] }
 0x5ee   : > { %2617 = vadd.xlane.f32.xlu1 %v2598_v30  ;;  %v8969_v30 = vcombine.low %v2831_v53, %v2833_v58 }
 0x5ef   : > { %3149 = vmatprep.subr.bf16.mxu0 %v8972_v42 }
 0x5f0   : > { %3037 = vmatpush1.bf16.msra.mxu1 %v8969_v30  ;;  %3150 = vmatpush1.bf16.msra.mxu0 %v8971_v33 }
 0x5f1   : > { %3038 = vmatprep.subr.bf16.mxu1 %v8974_v12  ;;  %3151 = vmatprep.subr.bf16.mxu0 %v8976_v36 }
 0x5f4   : > { %3039 = vmatpush1.bf16.msra.mxu1 %v8973_v62  ;;  %3152 = vmatpush1.bf16.msra.mxu0 %v8975_v41 }
 0x5f5   : > { %3040 = vmatprep.subr.bf16.mxu1 %v8978_v50  ;;  %3153 = vmatprep.subr.bf16.mxu0 %v8980_v51 }
 0x5f8   : > { %3041 = vmatpush1.bf16.msra.mxu1 %v8977_v5  ;;  %3154 = vmatpush1.bf16.msra.mxu0 %v8979_v55 }
 0x5fa   : > { %v10064_v19 = vpop.f32.mrb[100].mxu0 }
 0x5fb   : > { %v2482_v46 = vpop.f32.mrb[101].mxu0  ;;  %v2491_v2 = vadd.f32 %v10064_v19, %v12868_v40 }
 0x5fc   : > { %v2483_v1 = vadd.f32 %v2482_v46, %v12868_v40  ;;  %v10065_v24 = vpop.f32.mrb[102].mxu0 }
 0x5fd   : > { %v2485_v22 = vpop.f32.mrb[103].mxu0  ;;  %v2494_v60 = vadd.f32 %v10065_v24, %v12868_v40  ;;  %v12996_v4 = vadd.f32 %v2491_v2, %v17160_v61  ;;  %v17166_v2 = vld [vmem:[#allocation15_spill] sm:$0xff] }
 0x5fe   : > { %v12957_v13 = vadd.f32 %v2483_v1, %v17158_v29  ;;  %v2486_v7 = vadd.f32 %v2485_v22, %v12868_v40  ;;  %v17163_v1 = vld [vmem:[#allocation12_spill] sm:$0xff]  ;;  %v17164_v29 = vld [vmem:[#allocation13_spill] sm:$0xff] }
 0x5ff   : > { %v13011_v25 = vadd.f32 %v2494_v60, %v17161_v44  ;;  %v2601_v23 = vmul.f32 %v12996_v4, %v12996_v4 }
 0x600   : > { %v12964_v9 = vadd.f32 %v2486_v7, %v17159_v39  ;;  %2555 = vadd.xlane.f32.xlu0 %v12957_v13  ;;  %v2599_v49 = vmul.f32 %v12957_v13, %v12957_v13 }
 0x601   : > { %v2602_v21 = vmul.f32 %v13011_v25, %v13011_v25 }
 0x602   : > { %2557 = vadd.xlane.f32.xlu1 %v12964_v9  ;;  %v2600_v17 = vmul.f32 %v12964_v9, %v12964_v9 }
 0x604   : > { %2619 = vadd.xlane.f32.xlu0 %v2599_v49 }
 0x606   : > { %2621 = vadd.xlane.f32.xlu1 %v2600_v17 }
 0x608   : > { %2559 = vadd.xlane.f32.xlu0 %v12996_v4 }
 0x60a   : > { %2561 = vadd.xlane.f32.xlu1 %v13011_v25 }
 0x60c   : > { %2623 = vadd.xlane.f32.xlu0 %v2601_v23 }
 0x60e   : > { %2625 = vadd.xlane.f32.xlu1 %v2602_v21 }
 0x61a   : > { %v10068_v28 = vpop.f32.mrb[104].mxu0 }
 0x61b   : > { %v2498_v19 = vpop.f32.mrb[105].mxu0  ;;  %v2507_v22 = vadd.f32 %v10068_v28, %v12868_v40 }
 0x61c   : > { %v2499_v0 = vadd.f32 %v2498_v19, %v12868_v40  ;;  %v10069_v45 = vpop.f32.mrb[106].mxu0 }
 0x61d   : > { %v2501_v46 = vpop.f32.mrb[107].mxu0  ;;  %v2510_v59 = vadd.f32 %v10069_v45, %v12868_v40  ;;  %v13039_v7 = vadd.f32 %v2507_v22, %v17164_v29 }
 0x61e   : > { %v13024_v16 = vadd.f32 %v2499_v0, %v17162_v8  ;;  %v2502_v56 = vadd.f32 %v2501_v46, %v12868_v40 }
 0x61f   : > { %v13042_v20 = vadd.f32 %v2510_v59, %v17165_v14  ;;  %v2605_v6 = vmul.f32 %v13039_v7, %v13039_v7 }
 0x620   : > { %v13028_v24 = vadd.f32 %v2502_v56, %v17163_v1  ;;  %2563 = vadd.xlane.f32.xlu0 %v13024_v16  ;;  %v2603_v3 = vmul.f32 %v13024_v16, %v13024_v16 }
 0x621   : > { %v2606_v63 = vmul.f32 %v13042_v20, %v13042_v20 }
 0x622   : > { %2565 = vadd.xlane.f32.xlu1 %v13028_v24  ;;  %v2604_v54 = vmul.f32 %v13028_v24, %v13028_v24 }
 0x624   : > { %2627 = vadd.xlane.f32.xlu0 %v2603_v3 }
 0x626   : > { %2629 = vadd.xlane.f32.xlu1 %v2604_v54 }
 0x628   : > { %2567 = vadd.xlane.f32.xlu0 %v13039_v7 }
 0x62a   : > { %2569 = vadd.xlane.f32.xlu1 %v13042_v20 }
 0x62c   : > { %2631 = vadd.xlane.f32.xlu0 %v2605_v6 }
 0x62e   : > { %2633 = vadd.xlane.f32.xlu1 %v2606_v63 }
 0x63d   : > { %v10072_v39 = vpop.f32.mrb[108].mxu0 }
 0x63e   : > { %v2514_v48 = vpop.f32.mrb[109].mxu0  ;;  %v2523_v33 = vadd.f32 %v10072_v39, %v12868_v40 }
 0x63f   : > { %v2515_v53 = vadd.f32 %v2514_v48, %v12868_v40  ;;  %v10073_v58 = vpop.f32.mrb[110].mxu0 }
 0x640   : > { %v2517_v18 = vpop.f32.mrb[111].mxu0  ;;  %v2526_v60 = vadd.f32 %v10073_v58, %v12868_v40  ;;  %v13067_v27 = vadd.f32 %v2523_v33, %v17168_v47  ;;  %v13082_v58 = vld [vmem:[%s16887_s5 + $0x20] ss:$0 sm:$0xff] }
 0x641   : > { %v13052_v49 = vadd.f32 %v2515_v53, %v17166_v2  ;;  %v2518_v15 = vadd.f32 %v2517_v18, %v12868_v40 }
 0x642   : > { %v13070_v61 = vadd.f32 %v2526_v60, %v17169_v31  ;;  %v2609_v12 = vmul.f32 %v13067_v27, %v13067_v27 }
 0x643   : > { %v13056_v30 = vadd.f32 %v2518_v15, %v17167_v37  ;;  %2571 = vadd.xlane.f32.xlu0 %v13052_v49  ;;  %v2607_v42 = vmul.f32 %v13052_v49, %v13052_v49 }
 0x644   : > { %v2610_v40 = vmul.f32 %v13070_v61, %v13070_v61 }
 0x645   : > { %2573 = vadd.xlane.f32.xlu1 %v13056_v30  ;;  %v2608_v17 = vmul.f32 %v13056_v30, %v13056_v30 }
 0x647   : > { %2635 = vadd.xlane.f32.xlu0 %v2607_v42  ;;  %v13089_v42 = vld [vmem:[%s16887_s5 + $0x21] ss:$0 sm:$0xff] }
 0x649   : > { %2637 = vadd.xlane.f32.xlu1 %v2608_v17 }
 0x64b   : > { %2575 = vadd.xlane.f32.xlu0 %v13067_v27 }
 0x64d   : > { %2577 = vadd.xlane.f32.xlu1 %v13070_v61 }
 0x64f   : > { %2639 = vadd.xlane.f32.xlu0 %v2609_v12 }
 0x651   : > { %2641 = vadd.xlane.f32.xlu1 %v2610_v40 }
 0x66d   : > { %v2548_v57 = vpop.xlane.xlu0 %2547 }
 0x66e   : > { %v2579_v62 = vmul.f32 0.0078125, %v2548_v57 }
 0x66f   : > { %v2550_v41 = vpop.xlane.xlu1 %2549 }
 0x670   : > { %v2580_v36 = vmul.f32 0.0078125, %v2550_v41  ;;  %v2659_v10 = vmul.f32 %v2579_v62, %v2579_v62  ;;  %v2707_v48 = vsub.f32 %v12872_v11, %v2579_v62 }
 0x671   : > { %v2612_v52 = vpop.xlane.xlu0 %2611 }
 0x672   : > { %v2643_v38 = vmul.f32 0.0078125, %v2612_v52  ;;  %v2660_v50 = vmul.f32 %v2580_v36, %v2580_v36  ;;  %v2708_v18 = vsub.f32 %v12876_v26, %v2580_v36 }
 0x673   : > { %v2614_v44 = vpop.xlane.xlu1 %2613 }
 0x674   : > { %v2675_v35 = vsub.f32 %v2643_v38, %v2659_v10  ;;  %v2644_v5 = vmul.f32 0.0078125, %v2614_v44 }
 0x675   : > { %v2552_v51 = vpop.xlane.xlu0 %2551 }
 0x676   : > { %v2691_v23 = vmax.f32 %v2675_v35, 0.0  ;;  %v2676_v55 = vsub.f32 %v2644_v5, %v2660_v50  ;;  %v2581_v21 = vmul.f32 0.0078125, %v2552_v51 }
 0x677   : > { %v2554_v28 = vpop.xlane.xlu1 %2553 }
 0x678   : > { %v2723_v19 = vadd.f32 1e-12, %v2691_v23  ;;  %v2692_v0 = vmax.f32 %v2676_v55, 0.0  ;;  %v2582_v45 = vmul.f32 0.0078125, %v2554_v28  ;;  %v2661_v56 = vmul.f32 %v2581_v21, %v2581_v21 }
 0x679   : > { %v2616_v46 = vpop.xlane.xlu0 %2615  ;;  %v2709_v60 = vsub.f32 %v12887_v43, %v2581_v21 }
 0x67a   : > { %10659 = vrsqrt.f32 %v2723_v19  ;;  %v2724_v8 = vadd.f32 1e-12, %v2692_v0  ;;  %v2645_v1 = vmul.f32 0.0078125, %v2616_v46  ;;  %v2662_v3 = vmul.f32 %v2582_v45, %v2582_v45 }
 0x67b   : > { %v2618_v22 = vpop.xlane.xlu1 %2617  ;;  %v2710_v31 = vsub.f32 %v12890_v32, %v2582_v45 }
 0x67c   : > { %10661 = vrsqrt.f32 %v2724_v8  ;;  %v2677_v59 = vsub.f32 %v2645_v1, %v2661_v56  ;;  %v2646_v54 = vmul.f32 0.0078125, %v2618_v22 }
 0x67e   : > { %v2693_v29 = vmax.f32 %v2677_v59, 0.0  ;;  %v2678_v14 = vsub.f32 %v2646_v54, %v2662_v3 }
 0x680   : > { %v2725_v6 = vadd.f32 1e-12, %v2693_v29  ;;  %v2694_v63 = vmax.f32 %v2678_v14, 0.0 }
 0x682   : > { %10663 = vrsqrt.f32 %v2725_v6  ;;  %v2726_v39 = vadd.f32 1e-12, %v2694_v63 }
 0x684   : > { %v10660_v53 = vpop.eup %10659  ;;  %10665 = vrsqrt.f32 %v2726_v39 }
 0x685   : > { %v2755_v2 = vmul.f32 %v10660_v53, %v2707_v48 }
 0x686   : > { %v10662_v15 = vpop.eup %10661 }
 0x687   : > { %v2756_v37 = vmul.f32 %v10662_v15, %v2708_v18  ;;  %v2771_v33 = vmul.f32 %v2755_v2, %v13082_v58 }
 0x689   : > { %v2772_v11 = vmul.f32 %v2756_v37, %v13082_v58  ;;  %v13094_v17 = vadd.f32 %v2771_v33, %v13089_v42 }
 0x68b   : > { %17170 = vst [vmem:[#allocation27_spill] sm:$0xff] %v13094_v17  ;;  %v13097_v47 = vadd.f32 %v2772_v11, %v13089_v42 }
 0x68c   : > { %v10664_v26 = vpop.eup %10663 }
 0x68d   : > { %17171 = vst [vmem:[#allocation28_spill] sm:$0xff] %v13097_v47  ;;  %v2556_v12 = vpop.xlane.xlu0 %2555  ;;  %v2803_v40 = vpack.c.bf16 %v13097_v47, %v13094_v17  ;;  %v2757_v57 = vmul.f32 %v10664_v26, %v2709_v60 }
 0x68e   : > { %v10666_v62 = vpop.eup %10665  ;;  %v2583_v41 = vmul.f32 0.0078125, %v2556_v12 }
 0x68f   : > { %v2558_v36 = vpop.xlane.xlu1 %2557  ;;  %3059 = vmatmul.mubr.bf16.vlgmr.msra.gmra.mrb[80].mxu1 %v2803_v40  ;;  %3172 = vmatmul.mubr.bf16.vlgmr.msra.gmra.mrb[112].mxu0 %v2803_v40  ;;  %v2758_v43 = vmul.f32 %v10666_v62, %v2710_v31  ;;  %v2773_v52 = vmul.f32 %v2757_v57, %v13082_v58 }
 0x690   : > { %v2584_v10 = vmul.f32 0.0078125, %v2558_v36  ;;  %3068 = vmatprep.mubr.bf16.mxu1 %v17153_v34  ;;  %3181 = vmatprep.mubr.bf16.mxu0 %v17153_v34  ;;  %v2663_v44 = vmul.f32 %v2583_v41, %v2583_v41  ;;  %v2711_v37 = vsub.f32 %v12957_v13, %v2583_v41 }
 0x691   : > { %v2620_v38 = vpop.xlane.xlu0 %2619  ;;  %v2774_v32 = vmul.f32 %v2758_v43, %v13082_v58  ;;  %v13107_v5 = vadd.f32 %v2773_v52, %v13089_v42 }
 0x692   : > { %v2647_v50 = vmul.f32 0.0078125, %v2620_v38  ;;  %v2664_v23 = vmul.f32 %v2584_v10, %v2584_v10  ;;  %v2712_v11 = vsub.f32 %v12964_v9, %v2584_v10 }
 0x693   : > { %v2622_v35 = vpop.xlane.xlu1 %2621  ;;  %17172 = vst [vmem:[#allocation30_spill] sm:$0xff] %v13107_v5  ;;  %v13110_v51 = vadd.f32 %v2774_v32, %v13089_v42 }
 0x694   : > { %v2679_v55 = vsub.f32 %v2647_v50, %v2663_v44  ;;  %v2648_v21 = vmul.f32 0.0078125, %v2622_v35 }
 0x695   : > { %17173 = vst [vmem:[#allocation31_spill] sm:$0xff] %v13110_v51  ;;  %v2560_v28 = vpop.xlane.xlu0 %2559  ;;  %v2804_v19 = vpack.c.bf16 %v13110_v51, %v13107_v5 }
 0x696   : > { %v2695_v0 = vmax.f32 %v2679_v55, 0.0  ;;  %v2680_v45 = vsub.f32 %v2648_v21, %v2664_v23  ;;  %v2585_v46 = vmul.f32 0.0078125, %v2560_v28 }
 0x697   : > { %v2562_v8 = vpop.xlane.xlu1 %2561  ;;  %3069 = vmatmul.mubr.bf16.gmra.mrb[84].mxu1 %v2804_v19  ;;  %3182 = vmatmul.mubr.bf16.gmra.mrb[116].mxu0 %v2804_v19 }
 0x698   : > { %v2727_v56 = vadd.f32 1e-12, %v2695_v0  ;;  %v2696_v1 = vmax.f32 %v2680_v45, 0.0  ;;  %3078 = vmatprep.mubr.bf16.mxu1 %v17153_v34  ;;  %3191 = vmatprep.mubr.bf16.mxu0 %v17153_v34  ;;  %v2586_v22 = vmul.f32 0.0078125, %v2562_v8  ;;  %v2665_v54 = vmul.f32 %v2585_v46, %v2585_v46 }
 0x699   : > { %v2624_v3 = vpop.xlane.xlu0 %2623  ;;  %v2713_v57 = vsub.f32 %v12996_v4, %v2585_v46 }
 0x69a   : > { %10667 = vrsqrt.f32 %v2727_v56  ;;  %v2728_v59 = vadd.f32 1e-12, %v2696_v1  ;;  %v2649_v29 = vmul.f32 0.0078125, %v2624_v3  ;;  %v2666_v6 = vmul.f32 %v2586_v22, %v2586_v22 }
 0x69b   : > { %v2626_v14 = vpop.xlane.xlu1 %2625  ;;  %v2714_v41 = vsub.f32 %v13011_v25, %v2586_v22 }
 0x69c   : > { %10669 = vrsqrt.f32 %v2728_v59  ;;  %v2681_v63 = vsub.f32 %v2649_v29, %v2665_v54  ;;  %v2650_v39 = vmul.f32 0.0078125, %v2626_v14 }
 0x69e   : > { %v2697_v48 = vmax.f32 %v2681_v63, 0.0  ;;  %v2682_v53 = vsub.f32 %v2650_v39, %v2666_v6 }
 0x6a0   : > { %v2729_v18 = vadd.f32 1e-12, %v2697_v48  ;;  %v2698_v2 = vmax.f32 %v2682_v53, 0.0 }
 0x6a2   : > { %10671 = vrsqrt.f32 %v2729_v18  ;;  %v2730_v15 = vadd.f32 1e-12, %v2698_v2 }
 0x6a4   : > { %v10668_v33 = vpop.eup %10667  ;;  %10673 = vrsqrt.f32 %v2730_v15 }
 0x6a5   : > { %v2759_v60 = vmul.f32 %v10668_v33, %v2711_v37 }
 0x6a6   : > { %v10670_v26 = vpop.eup %10669 }
 0x6a7   : > { %v2760_v31 = vmul.f32 %v10670_v26, %v2712_v11  ;;  %v2775_v12 = vmul.f32 %v2759_v60, %v13082_v58 }
 0x6a9   : > { %v2776_v40 = vmul.f32 %v2760_v31, %v13082_v58  ;;  %v13122_v62 = vadd.f32 %v2775_v12, %v13089_v42 }
 0x6ab   : > { %17174 = vst [vmem:[#allocation29_spill] sm:$0xff] %v13122_v62  ;;  %v13125_v36 = vadd.f32 %v2776_v40, %v13089_v42 }
 0x6ac   : > { %v10672_v13 = vpop.eup %10671 }
 0x6ad   : > { %17175 = vst [vmem:[#allocation33_spill] sm:$0xff] %v13125_v36  ;;  %v2564_v43 = vpop.xlane.xlu0 %2563  ;;  %v2805_v9 = vpack.c.bf16 %v13125_v36, %v13122_v62  ;;  %v2761_v52 = vmul.f32 %v10672_v13, %v2713_v57 }
 0x6ae   : > { %v10674_v10 = vpop.eup %10673  ;;  %v2587_v38 = vmul.f32 0.0078125, %v2564_v43 }
 0x6af   : > { %v2566_v32 = vpop.xlane.xlu1 %2565  ;;  %3079 = vmatmul.mubr.bf16.gmra.mrb[88].mxu1 %v2805_v9  ;;  %3192 = vmatmul.mubr.bf16.gmra.mrb[120].mxu0 %v2805_v9  ;;  %v2762_v4 = vmul.f32 %v10674_v10, %v2714_v41  ;;  %v2777_v44 = vmul.f32 %v2761_v52, %v13082_v58 }
 0x6b0   : > { %v2588_v50 = vmul.f32 0.0078125, %v2566_v32  ;;  %3088 = vmatprep.mubr.bf16.mxu1 %v17153_v34  ;;  %3201 = vmatprep.mubr.bf16.mxu0 %v17153_v34  ;;  %v2667_v23 = vmul.f32 %v2587_v38, %v2587_v38  ;;  %v2715_v31 = vsub.f32 %v13024_v16, %v2587_v38 }
 0x6b1   : > { %v2628_v35 = vpop.xlane.xlu0 %2627  ;;  %v2778_v25 = vmul.f32 %v2762_v4, %v13082_v58  ;;  %v13135_v28 = vadd.f32 %v2777_v44, %v13089_v42 }
 0x6b2   : > { %v2651_v55 = vmul.f32 0.0078125, %v2628_v35  ;;  %v2668_v0 = vmul.f32 %v2588_v50, %v2588_v50  ;;  %v2716_v40 = vsub.f32 %v13028_v24, %v2588_v50 }
 0x6b3   : > { %v2630_v21 = vpop.xlane.xlu1 %2629  ;;  %17176 = vst [vmem:[#allocation36_spill] sm:$0xff] %v13135_v28  ;;  %v13138_v19 = vadd.f32 %v2778_v25, %v13089_v42 }
 0x6b4   : > { %v2683_v45 = vsub.f32 %v2651_v55, %v2667_v23  ;;  %v2652_v46 = vmul.f32 0.0078125, %v2630_v21 }
 0x6b5   : > { %17177 = vst [vmem:[#allocation41_spill] sm:$0xff] %v13138_v19  ;;  %v2568_v8 = vpop.xlane.xlu0 %2567  ;;  %v2806_v56 = vpack.c.bf16 %v13138_v19, %v13135_v28 }
 0x6b6   : > { %v2699_v1 = vmax.f32 %v2683_v45, 0.0  ;;  %v2684_v22 = vsub.f32 %v2652_v46, %v2668_v0  ;;  %v2589_v3 = vmul.f32 0.0078125, %v2568_v8 }
 0x6b7   : > { %v2570_v59 = vpop.xlane.xlu1 %2569  ;;  %3089 = vmatmul.mubr.bf16.gmra.mrb[92].mxu1 %v2806_v56  ;;  %3202 = vmatmul.mubr.bf16.gmra.mrb[124].mxu0 %v2806_v56 }
 0x6b8   : > { %v2731_v54 = vadd.f32 1e-12, %v2699_v1  ;;  %v2700_v29 = vmax.f32 %v2684_v22, 0.0  ;;  %3098 = vmatprep.mubr.bf16.mxu1 %v17153_v34  ;;  %3211 = vmatprep.mubr.bf16.mxu0 %v17153_v34  ;;  %v2590_v14 = vmul.f32 0.0078125, %v2570_v59  ;;  %v2669_v39 = vmul.f32 %v2589_v3, %v2589_v3 }
 0x6b9   : > { %v2632_v6 = vpop.xlane.xlu0 %2631  ;;  %v2717_v52 = vsub.f32 %v13039_v7, %v2589_v3 }
 0x6ba   : > { %10675 = vrsqrt.f32 %v2731_v54  ;;  %v2732_v63 = vadd.f32 1e-12, %v2700_v29  ;;  %v2653_v48 = vmul.f32 0.0078125, %v2632_v6  ;;  %v2670_v18 = vmul.f32 %v2590_v14, %v2590_v14 }
 0x6bb   : > { %v2634_v53 = vpop.xlane.xlu1 %2633  ;;  %v2718_v38 = vsub.f32 %v13042_v20, %v2590_v14 }
 0x6bc   : > { %10677 = vrsqrt.f32 %v2732_v63  ;;  %v2685_v2 = vsub.f32 %v2653_v48, %v2669_v39  ;;  %v2654_v15 = vmul.f32 0.0078125, %v2634_v53 }
 0x6be   : > { %v2701_v37 = vmax.f32 %v2685_v2, 0.0  ;;  %v2686_v33 = vsub.f32 %v2654_v15, %v2670_v18 }
 0x6c0   : > { %v2733_v11 = vadd.f32 1e-12, %v2701_v37  ;;  %v2702_v60 = vmax.f32 %v2686_v33, 0.0 }
 0x6c2   : > { %10679 = vrsqrt.f32 %v2733_v11  ;;  %v2734_v26 = vadd.f32 1e-12, %v2702_v60 }
 0x6c4   : > { %v10676_v12 = vpop.eup %10675  ;;  %10681 = vrsqrt.f32 %v2734_v26 }
 0x6c5   : > { %v2763_v57 = vmul.f32 %v10676_v12, %v2715_v31 }
 0x6c6   : > { %v10678_v13 = vpop.eup %10677 }
 0x6c7   : > { %v2764_v41 = vmul.f32 %v10678_v13, %v2716_v40  ;;  %v2779_v43 = vmul.f32 %v2763_v57, %v13082_v58 }
 0x6c9   : > { %v2780_v9 = vmul.f32 %v2764_v41, %v13082_v58  ;;  %v13150_v10 = vadd.f32 %v2779_v43, %v13089_v42 }
 0x6cb   : > { %17178 = vst [vmem:[#allocation32_spill] sm:$0xff] %v13150_v10  ;;  %v13153_v32 = vadd.f32 %v2780_v9, %v13089_v42 }
 0x6cc   : > { %v10680_v16 = vpop.eup %10679 }
 0x6cd   : > { %17179 = vst [vmem:[#allocation35_spill] sm:$0xff] %v13153_v32  ;;  %v2807_v24 = vpack.c.bf16 %v13153_v32, %v13150_v10  ;;  %v2765_v4 = vmul.f32 %v10680_v16, %v2717_v52  ;;  %v10291_v16 = vld [vmem:[%s16885_s3 + $0x40] sm:$0xff]  }
 0x6ce   : > { %v10682_v44 = vpop.eup %10681  ;;  %9498 = vmatprep.subr.bf16.mxu1 %v10291_v16  ;;  %v17186_v16 = vld [vmem:[#allocation19_spill] sm:$0xff] }
 0x6cf   : > { %3099 = vmatmul.mubr.bf16.gmra.mrb[96].mxu1 %v2807_v24  ;;  %3212 = vmatmul.mubr.bf16.gmra.mrb[128].mxu0 %v2807_v24  ;;  %v2766_v50 = vmul.f32 %v10682_v44, %v2718_v38  ;;  %v2781_v35 = vmul.f32 %v2765_v4, %v13082_v58  ;;  %v10292_v38 = vld [vmem:[%s16885_s3 + $0xc0] sm:$0xff]  }
 0x6d0   : > { %v2572_v7 = vpop.xlane.xlu0 %2571  ;;  %3108 = vmatprep.mubr.bf16.mxu1 %v17153_v34  ;;  %3221 = vmatprep.mubr.bf16.mxu0 %v17153_v34  ;;  %v10293_v4 = vld [vmem:[%s16885_s3] sm:$0xff]  }
 0x6d1   : > { %v2591_v25 = vmul.f32 0.0078125, %v2572_v7  ;;  %v2782_v23 = vmul.f32 %v2766_v50, %v13082_v58  ;;  %v13163_v21 = vadd.f32 %v2781_v35, %v13089_v42  ;;  %9562 = vmatprep.subr.bf16.mxu0 %v10292_v38  ;;  %9499 = vmatpush3.bf16.msra.mxu1 %v10293_v4  ;;  %v10295_v35 = vld [vmem:[%s16885_s3 + $0x48] sm:$0xff]   ;;  %v16958_v38 = vsub.s32 3, %v17186_v16 }
 0x6d2   : > { %v2574_v55 = vpop.xlane.xlu1 %2573  ;;  %v10296_v7 = vld [vmem:[%s16885_s3 + $0xc8] sm:$0xff]   ;;  %9500 = vmatprep.subr.bf16.mxu1 %v10295_v35 }
 0x6d3   : > { %v2592_v20 = vmul.f32 0.0078125, %v2574_v55  ;;  %17180 = vst [vmem:[#allocation42_spill] sm:$0xff] %v13163_v21  ;;  %v13166_v0 = vadd.f32 %v2782_v23, %v13089_v42  ;;  %v2671_v46 = vmul.f32 %v2591_v25, %v2591_v25  ;;  %v2719_v41 = vsub.f32 %v13052_v49, %v2591_v25  ;;  %v10294_v49 = vld [vmem:[%s16885_s3 + $0x80] sm:$0xff]  }
 0x6d4   : > { %v2636_v45 = vpop.xlane.xlu0 %2635  ;;  %9563 = vmatpush3.bf16.msra.mxu0 %v10294_v49  ;;  %v17188_v49 = vld [vmem:[#allocation22_spill] sm:$0xff] }
 0x6d5   : > { %17181 = vst [vmem:[#allocation43_spill] sm:$0xff] %v13166_v0  ;;  %v2655_v8 = vmul.f32 0.0078125, %v2636_v45  ;;  %v2808_v56 = vpack.c.bf16 %v13166_v0, %v13163_v21  ;;  %v2672_v22 = vmul.f32 %v2592_v20, %v2592_v20  ;;  %v2720_v9 = vsub.f32 %v13056_v30, %v2592_v20  ;;  %9564 = vmatprep.subr.bf16.mxu0 %v10296_v7  ;;  %v10297_v45 = vld [vmem:[%s16885_s3 + $0x8] sm:$0xff]  }
 0x6d6   : > { %v2638_v1 = vpop.xlane.xlu1 %2637  ;;  %9501 = vmatpush3.bf16.msra.mxu1 %v10297_v45 }
 0x6d7   : > { %v2687_v3 = vsub.f32 %v2655_v8, %v2671_v46  ;;  %v2656_v59 = vmul.f32 0.0078125, %v2638_v1  ;;  %3109 = vmatmul.mubr.bf16.gmra.mrb[100].mxu1 %v2808_v56  ;;  %3222 = vmatmul.mubr.bf16.gmra.mrb[132].mxu0 %v2808_v56  ;;  %v10298_v46 = vld [vmem:[%s16885_s3 + $0x88] sm:$0xff]  }
 0x6d8   : > { %v2576_v54 = vpop.xlane.xlu0 %2575  ;;  %3118 = vmatprep.mubr.bf16.mxu1 %v17153_v34  ;;  %3231 = vmatprep.mubr.bf16.mxu0 %v17153_v34 }
 0x6d9   : > { %v2703_v29 = vmax.f32 %v2687_v3, 0.0  ;;  %v2688_v14 = vsub.f32 %v2656_v59, %v2672_v22  ;;  %v2593_v6 = vmul.f32 0.0078125, %v2576_v54  ;;  %9565 = vmatpush3.bf16.msra.mxu0 %v10298_v46 }
 0x6da   : > { %v2578_v63 = vpop.xlane.xlu1 %2577 }
 0x6db   : > { %v2735_v39 = vadd.f32 1e-12, %v2703_v29  ;;  %v2704_v48 = vmax.f32 %v2688_v14, 0.0  ;;  %v2594_v53 = vmul.f32 0.0078125, %v2578_v63  ;;  %v2673_v15 = vmul.f32 %v2593_v6, %v2593_v6  ;;  %v10299_v14 = vld [vmem:[%s16885_s3 + $0x50] sm:$0xff]   ;;  %v10303_v63 = vld [vmem:[%s16885_s3 + $0x58] sm:$0xff]  }
 0x6dc   : > { %v2640_v18 = vpop.xlane.xlu0 %2639  ;;  %v2721_v25 = vsub.f32 %v13067_v27, %v2593_v6  ;;  %v10300_v6 = vld [vmem:[%s16885_s3 + $0xd0] sm:$0xff]   ;;  %9502 = vmatprep.subr.bf16.mxu1 %v10299_v14 }
 0x6dd   : > { %10683 = vrsqrt.f32 %v2735_v39  ;;  %v2736_v2 = vadd.f32 1e-12, %v2704_v48  ;;  %v2657_v37 = vmul.f32 0.0078125, %v2640_v18  ;;  %v2674_v11 = vmul.f32 %v2594_v53, %v2594_v53  ;;  %9566 = vmatprep.subr.bf16.mxu0 %v10300_v6  ;;  %v10304_v39 = vld [vmem:[%s16885_s3 + $0xd8] sm:$0xff]   ;;  %v10307_v18 = vld [vmem:[%s16885_s3 + $0x60] sm:$0xff]  }
 0x6de   : > { %v2642_v33 = vpop.xlane.xlu1 %2641  ;;  %v2722_v8 = vsub.f32 %v13070_v61, %v2594_v53  ;;  %v10305_v48 = vld [vmem:[%s16885_s3 + $0x18] sm:$0xff]  }
 0x6df   : > { %10685 = vrsqrt.f32 %v2736_v2  ;;  %v2689_v60 = vsub.f32 %v2657_v37, %v2673_v15  ;;  %v2658_v26 = vmul.f32 0.0078125, %v2642_v33  ;;  %v10306_v53 = vld [vmem:[%s16885_s3 + $0x98] sm:$0xff]   ;;  %v10308_v2 = vld [vmem:[%s16885_s3 + $0xe0] sm:$0xff]   ;;  %v10311_v33 = vld [vmem:[%s16885_s3 + $0x68] sm:$0xff]  }
 0x6e0   : > { %v10309_v15 = vld [vmem:[%s16885_s3 + $0x20] sm:$0xff]  }
 0x6e1   : > { %v2705_v31 = vmax.f32 %v2689_v60, 0.0  ;;  %v2690_v12 = vsub.f32 %v2658_v26, %v2674_v11  ;;  %v10310_v37 = vld [vmem:[%s16885_s3 + $0xa0] sm:$0xff]   ;;  %v10312_v11 = vld [vmem:[%s16885_s3 + $0xe8] sm:$0xff]  }
 0x6e2   : > { %v10313_v60 = vld [vmem:[%s16885_s3 + $0x28] sm:$0xff]  }
 0x6e3   : > { %v2737_v40 = vadd.f32 1e-12, %v2705_v31  ;;  %v2706_v57 = vmax.f32 %v2690_v12, 0.0  ;;  %v10314_v26 = vld [vmem:[%s16885_s3 + $0xa8] sm:$0xff]   ;;  %v10315_v31 = vld [vmem:[%s16885_s3 + $0x70] sm:$0xff]  }
 0x6e4   : > { %v10316_v12 = vld [vmem:[%s16885_s3 + $0xf0] sm:$0xff]  }
 0x6e5   : > { %10687 = vrsqrt.f32 %v2737_v40  ;;  %v2738_v13 = vadd.f32 1e-12, %v2706_v57  ;;  %v10317_v40 = vld [vmem:[%s16885_s3 + $0x30] sm:$0xff]  }
 0x6e6   : > { %v10318_v57 = vld [vmem:[%s16885_s3 + $0xb0] sm:$0xff]  }
 0x6e7   : > { %v10684_v43 = vpop.eup %10683  ;;  %10689 = vrsqrt.f32 %v2738_v13  ;;  %v10319_v13 = vld [vmem:[%s16885_s3 + $0x78] sm:$0xff]  }
 0x6e8   : > { %v2767_v52 = vmul.f32 %v10684_v43, %v2719_v41  ;;  %v10320_v41 = vld [vmem:[%s16885_s3 + $0xf8] sm:$0xff]  }
 0x6e9   : > { %v10686_v24 = vpop.eup %10685  ;;  %v10321_v43 = vld [vmem:[%s16885_s3 + $0x38] sm:$0xff]  }
 0x6ea   : > { %v2768_v44 = vmul.f32 %v10686_v24, %v2720_v9  ;;  %v2783_v30 = vmul.f32 %v2767_v52, %v13082_v58  ;;  %v10322_v9 = vld [vmem:[%s16885_s3 + $0xb8] sm:$0xff]   ;;  %v17187_v24 = vld [vmem:[#allocation20_spill] sm:$0xff] }
 0x6eb   : > { %v8948_v52 = vld [vmem:[%s16887_s5 + $0x6] ss:$8 sm:$0xf] }
 0x6ec   : > { %v2784_v50 = vmul.f32 %v2768_v44, %v13082_v58  ;;  %v13196_v23 = vadd.f32 %v2783_v30, %v13089_v42  ;;  %v13299_v4 = vrot.slane %v8948_v52, %v17187_v24  ;;  %v13302_v44 = vrot.slane %v8948_v52, %v17188_v49  ;;  %v17189_v30 = vld [vmem:[#allocation21_spill] sm:$0xff] }
 0x6ed   : > { %v13309_v35 = vrot.slane %v8948_v52, %v16958_v38 }
 0x6ee   : > { %17182 = vst [vmem:[#allocation34_spill] sm:$0xff] %v13196_v23  ;;  %v13199_v55 = vadd.f32 %v2784_v50, %v13089_v42  ;;  %v13305_v50 = vrot.slane %v8948_v52, %v17189_v30 }
 0x6ef   : > { %v10688_v20 = vpop.eup %10687 }
 0x6f0   : > { %17183 = vst [vmem:[#allocation39_spill] sm:$0xff] %v13199_v55  ;;  %v2809_v27 = vpack.c.bf16 %v13199_v55, %v13196_v23  ;;  %v2769_v56 = vmul.f32 %v10688_v20, %v2721_v25 }
 0x6f1   : > { %v10690_v1 = vpop.eup %10689 }
 0x6f2   : > { %3119 = vmatmul.mubr.bf16.gmra.mrb[104].mxu1 %v2809_v27  ;;  %3232 = vmatmul.mubr.bf16.gmra.mrb[136].mxu0 %v2809_v27  ;;  %v2770_v22 = vmul.f32 %v10690_v1, %v2722_v8  ;;  %v2785_v3 = vmul.f32 %v2769_v56, %v13082_v58 }
 0x6f3   : > { %3128 = vmatprep.mubr.bf16.mxu1 %v17153_v34  ;;  %3241 = vmatprep.mubr.bf16.mxu0 %v17153_v34 }
 0x6f4   : > { %v2786_v59 = vmul.f32 %v2770_v22, %v13082_v58  ;;  %v13215_v61 = vadd.f32 %v2785_v3, %v13089_v42  ;;  %v10301_v58 = vld [vmem:[%s16885_s3 + $0x10] sm:$0xff]  }
 0x6f5   : > { %9503 = vmatpush3.bf16.msra.mxu1 %v10301_v58 }
 0x6f6   : > { %17184 = vst [vmem:[#allocation38_spill] sm:$0xff] %v13215_v61  ;;  %v13218_v54 = vadd.f32 %v2786_v59, %v13089_v42  ;;  %v10302_v42 = vld [vmem:[%s16885_s3 + $0x90] sm:$0xff]   ;;  %9504 = vmatprep.subr.bf16.mxu1 %v10303_v63 }
 0x6f7   : > { %9567 = vmatpush3.bf16.msra.mxu0 %v10302_v42 }
 0x6f8   : > { %17185 = vst [vmem:[#allocation40_spill] sm:$0xff] %v13218_v54  ;;  %v2810_v29 = vpack.c.bf16 %v13218_v54, %v13215_v61  ;;  %9568 = vmatprep.subr.bf16.mxu0 %v10304_v39 }
 0x6f9   : > { %9505 = vmatpush3.bf16.msra.mxu1 %v10305_v48 }
 0x6fa   : > { %3129 = vmatmul.mubr.bf16.gmra.mrb[108].mxu1 %v2810_v29  ;;  %3242 = vmatmul.mubr.bf16.gmra.mrb[140].mxu0 %v2810_v29 }
 0x6fb   : > { %9569 = vmatpush3.bf16.msra.mxu0 %v10306_v53  ;;  %9506 = vmatprep.subr.bf16.mxu1 %v10307_v18 }
 0x6fc   : > { %9570 = vmatprep.subr.bf16.mxu0 %v10308_v2 }
 0x6fd   : > { %9507 = vmatpush3.bf16.msra.mxu1 %v10309_v15 }
 0x6fe   : > { %9508 = vmatprep.subr.bf16.mxu1 %v10311_v33 }
 0x6ff   : > { %9571 = vmatpush3.bf16.msra.mxu0 %v10310_v37 }
 0x700   : > { %9572 = vmatprep.subr.bf16.mxu0 %v10312_v11 }
 0x701   : > { %9509 = vmatpush3.bf16.msra.mxu1 %v10313_v60 }
 0x702   : > { %9510 = vmatprep.subr.bf16.mxu1 %v10315_v31 }
 0x703   : > { %9573 = vmatpush3.bf16.msra.mxu0 %v10314_v26 }
 0x704   : > { %9574 = vmatprep.subr.bf16.mxu0 %v10316_v12 }
 0x705   : > { %9511 = vmatpush3.bf16.msra.mxu1 %v10317_v40 }
 0x706   : > { %9512 = vmatprep.subr.bf16.mxu1 %v10319_v13 }
 0x707   : > { %9575 = vmatpush3.bf16.msra.mxu0 %v10318_v57 }
 0x708   : > { %9576 = vmatprep.subr.bf16.mxu0 %v10320_v41 }
 0x709   : > { %9513 = vmatpush3.bf16.msra.mxu1 %v10321_v43 }
 0x70b   : > { %9577 = vmatpush3.bf16.msra.mxu0 %v10322_v9 }
 0x762   : > { %v3060_v7 = vpop.f32.mrb[80].mxu1  ;;  %v3173_v25 = vpop.f32.mrb[112].mxu0 }
 0x763   : > { %v13312_v20 = vadd.f32 %v3060_v7, %v13299_v4  ;;  %v13315_v45 = vadd.f32 %v3173_v25, %v13302_v44  ;;  %v3062_v46 = vpop.f32.mrb[81].mxu1  ;;  %v3175_v8 = vpop.f32.mrb[113].mxu0 }
 0x764   : > { %v13318_v27 = vadd.f32 %v3062_v46, %v13305_v50  ;;  %v13321_v56 = vadd.f32 %v3175_v8, %v13309_v35  ;;  %v3064_v1 = vpop.f32.mrb[82].mxu1  ;;  %v3177_v22 = vpop.f32.mrb[114].mxu0 }
 0x765   : > { %v3252_v3 = vmul.f32 %v13312_v20, %v13312_v20  ;;  %v3254_v59 = vmul.f32 %v13315_v45, %v13315_v45  ;;  %v13328_v29 = vadd.f32 %v3064_v1, %v13299_v4  ;;  %v13331_v14 = vadd.f32 %v3177_v22, %v13302_v44  ;;  %v3066_v6 = vpop.f32.mrb[83].mxu1  ;;  %v3179_v58 = vpop.f32.mrb[115].mxu0 }
 0x766   : > { %v3253_v42 = vmul.f32 %v13318_v27, %v13318_v27  ;;  %v3255_v63 = vmul.f32 %v13321_v56, %v13321_v56  ;;  %v13338_v39 = vadd.f32 %v3066_v6, %v13305_v50  ;;  %v13341_v48 = vadd.f32 %v3179_v58, %v13309_v35 }
 0x767   : > { %v3316_v53 = vmul.f32 %v3252_v3, %v13312_v20  ;;  %v3318_v18 = vmul.f32 %v3254_v59, %v13315_v45  ;;  %v3256_v2 = vmul.f32 %v13328_v29, %v13328_v29  ;;  %v3258_v15 = vmul.f32 %v13331_v14, %v13331_v14 }
 0x768   : > { %v3317_v37 = vmul.f32 %v3253_v42, %v13318_v27  ;;  %v3319_v33 = vmul.f32 %v3255_v63, %v13321_v56  ;;  %v3257_v11 = vmul.f32 %v13338_v39, %v13338_v39  ;;  %v3259_v60 = vmul.f32 %v13341_v48, %v13341_v48 }
 0x769   : > { %v3380_v26 = vmul.f32 0.044715, %v3316_v53  ;;  %v3382_v31 = vmul.f32 0.044715, %v3318_v18  ;;  %v3320_v12 = vmul.f32 %v3256_v2, %v13328_v29  ;;  %v3322_v40 = vmul.f32 %v3258_v15, %v13331_v14 }
 0x76a   : > { %v3381_v57 = vmul.f32 0.044715, %v3317_v37  ;;  %v3383_v13 = vmul.f32 0.044715, %v3319_v33  ;;  %v3321_v41 = vmul.f32 %v3257_v11, %v13338_v39  ;;  %v3323_v43 = vmul.f32 %v3259_v60, %v13341_v48  ;;  %v3070_v9 = vpop.f32.mrb[84].mxu1  ;;  %v3183_v52 = vpop.f32.mrb[116].mxu0 }
 0x76b   : > { %v3444_v7 = vadd.f32 %v3380_v26, %v13312_v20  ;;  %v3446_v25 = vadd.f32 %v3382_v31, %v13315_v45  ;;  %v3384_v46 = vmul.f32 0.044715, %v3320_v12  ;;  %v3386_v8 = vmul.f32 0.044715, %v3322_v40  ;;  %v3072_v1 = vpop.f32.mrb[85].mxu1  ;;  %v3185_v22 = vpop.f32.mrb[117].mxu0 }
 0x76c   : > { %v3445_v3 = vadd.f32 %v3381_v57, %v13318_v27  ;;  %v3447_v59 = vadd.f32 %v3383_v13, %v13321_v56  ;;  %v3385_v6 = vmul.f32 0.044715, %v3321_v41  ;;  %v3387_v58 = vmul.f32 0.044715, %v3323_v43  ;;  %v3074_v42 = vpop.f32.mrb[86].mxu1  ;;  %v3187_v63 = vpop.f32.mrb[118].mxu0 }
 0x76d   : > { %v3508_v53 = vmul.f32 0.7978846, %v3444_v7  ;;  %v3510_v18 = vmul.f32 0.7978846, %v3446_v25  ;;  %v3448_v2 = vadd.f32 %v3384_v46, %v13328_v29  ;;  %v3450_v15 = vadd.f32 %v3386_v8, %v13331_v14  ;;  %v3076_v37 = vpop.f32.mrb[87].mxu1  ;;  %v3189_v33 = vpop.f32.mrb[119].mxu0 }
 0x76e   : > { %v3509_v11 = vmul.f32 0.7978846, %v3445_v3  ;;  %v3511_v60 = vmul.f32 0.7978846, %v3447_v59  ;;  %v3449_v26 = vadd.f32 %v3385_v6, %v13338_v39  ;;  %v3451_v31 = vadd.f32 %v3387_v58, %v13341_v48 }
 0x76f   : > { %10691 = vtanh.f32 %v3508_v53  ;;  %v3512_v12 = vmul.f32 0.7978846, %v3448_v2  ;;  %v3514_v40 = vmul.f32 0.7978846, %v3450_v15  ;;  %v13368_v57 = vadd.f32 %v3070_v9, %v13299_v4 }
 0x770   : > { %10693 = vtanh.f32 %v3510_v18  ;;  %v3513_v13 = vmul.f32 0.7978846, %v3449_v26  ;;  %v3515_v41 = vmul.f32 0.7978846, %v3451_v31  ;;  %v13371_v43 = vadd.f32 %v3183_v52, %v13302_v44 }
 0x771   : > { %10695 = vtanh.f32 %v3509_v11  ;;  %v3260_v7 = vmul.f32 %v13368_v57, %v13368_v57  ;;  %v13376_v25 = vadd.f32 %v3072_v1, %v13305_v50  ;;  %v13379_v46 = vadd.f32 %v3185_v22, %v13309_v35 }
 0x772   : > { %10697 = vtanh.f32 %v3511_v60  ;;  %v3262_v9 = vmul.f32 %v13371_v43, %v13371_v43  ;;  %v13384_v8 = vadd.f32 %v3074_v42, %v13299_v4  ;;  %v13387_v52 = vadd.f32 %v3187_v63, %v13302_v44 }
 0x773   : > { %10699 = vtanh.f32 %v3512_v12  ;;  %v3324_v3 = vmul.f32 %v3260_v7, %v13368_v57  ;;  %v3261_v1 = vmul.f32 %v13376_v25, %v13376_v25  ;;  %v3263_v22 = vmul.f32 %v13379_v46, %v13379_v46 }
 0x774   : > { %10701 = vtanh.f32 %v3514_v40  ;;  %v3326_v59 = vmul.f32 %v3262_v9, %v13371_v43  ;;  %v3264_v6 = vmul.f32 %v13384_v8, %v13384_v8  ;;  %v3266_v58 = vmul.f32 %v13387_v52, %v13387_v52 }
 0x775   : > { %10703 = vtanh.f32 %v3513_v13  ;;  %v3388_v42 = vmul.f32 0.044715, %v3324_v3  ;;  %v3325_v63 = vmul.f32 %v3261_v1, %v13376_v25  ;;  %v3327_v53 = vmul.f32 %v3263_v22, %v13379_v46 }
 0x776   : > { %10705 = vtanh.f32 %v3515_v41  ;;  %v3390_v18 = vmul.f32 0.044715, %v3326_v59  ;;  %v3328_v2 = vmul.f32 %v3264_v6, %v13384_v8  ;;  %v3330_v15 = vmul.f32 %v3266_v58, %v13387_v52 }
 0x777   : > { %v3452_v11 = vadd.f32 %v3388_v42, %v13368_v57  ;;  %v3389_v60 = vmul.f32 0.044715, %v3325_v63  ;;  %v3391_v26 = vmul.f32 0.044715, %v3327_v53  ;;  %v13405_v31 = vadd.f32 %v3076_v37, %v13305_v50 }
 0x778   : > { %v3454_v12 = vadd.f32 %v3390_v18, %v13371_v43  ;;  %v3392_v40 = vmul.f32 0.044715, %v3328_v2  ;;  %v3394_v13 = vmul.f32 0.044715, %v3330_v15  ;;  %v13409_v7 = vadd.f32 %v3189_v33, %v13309_v35 }
 0x779   : > { %v10692_v41 = vpop.eup %10691  ;;  %v3516_v9 = vmul.f32 0.7978846, %v3452_v11  ;;  %v3453_v3 = vadd.f32 %v3389_v60, %v13376_v25  ;;  %v3455_v1 = vadd.f32 %v3391_v26, %v13379_v46  ;;  %v3265_v22 = vmul.f32 %v13405_v31, %v13405_v31 }
 0x77a   : > { %v10694_v59 = vpop.eup %10693  ;;  %v3636_v6 = vadd.f32 1.0, %v10692_v41  ;;  %v3518_v37 = vmul.f32 0.7978846, %v3454_v12  ;;  %v3456_v58 = vadd.f32 %v3392_v40, %v13384_v8  ;;  %v3458_v42 = vadd.f32 %v3394_v13, %v13387_v52 }
 0x77b   : > { %v10696_v63 = vpop.eup %10695  ;;  %v3638_v53 = vadd.f32 1.0, %v10694_v59  ;;  %10707 = vtanh.f32 %v3516_v9  ;;  %v3517_v33 = vmul.f32 0.7978846, %v3453_v3  ;;  %v3519_v18 = vmul.f32 0.7978846, %v3455_v1 }
 0x77c   : > { %v10698_v2 = vpop.eup %10697  ;;  %v3700_v15 = vmul.f32 0.5, %v3636_v6  ;;  %10709 = vtanh.f32 %v3518_v37  ;;  %v3520_v11 = vmul.f32 0.7978846, %v3456_v58  ;;  %v3522_v60 = vmul.f32 0.7978846, %v3458_v42 }
 0x77d   : > { %v10700_v26 = vpop.eup %10699  ;;  %v3702_v38 = vmul.f32 0.5, %v3638_v53  ;;  %10711 = vtanh.f32 %v3517_v33  ;;  %v3329_v41 = vmul.f32 %v3265_v22, %v13405_v31  ;;  %v3267_v12 = vmul.f32 %v13409_v7, %v13409_v7 }
 0x77e   : > { %v10702_v40 = vpop.eup %10701  ;;  %v13421_v13 = vmul.f32 %v3700_v15, %v13312_v20  ;;  %v3640_v9 = vadd.f32 1.0, %v10700_v26  ;;  %10713 = vtanh.f32 %v3519_v18  ;;  %v3637_v3 = vadd.f32 1.0, %v10696_v63 }
 0x77f   : > { %v10704_v1 = vpop.eup %10703  ;;  %v13424_v59 = vmul.f32 %v3702_v38, %v13315_v45  ;;  %v3642_v6 = vadd.f32 1.0, %v10702_v40  ;;  %10715 = vtanh.f32 %v3520_v11  ;;  %v3393_v37 = vmul.f32 0.044715, %v3329_v41 }
 0x780   : > { %v10706_v58 = vpop.eup %10705  ;;  %v3704_v42 = vmul.f32 0.5, %v3640_v9  ;;  %10717 = vtanh.f32 %v3522_v60  ;;  %v3331_v22 = vmul.f32 %v3267_v12, %v13409_v7  ;;  %v3641_v53 = vadd.f32 1.0, %v10704_v1 }
 0x781   : > { %v3706_v33 = vmul.f32 0.5, %v3642_v6  ;;  %v3457_v20 = vadd.f32 %v3393_v37, %v13405_v31  ;;  %v13428_v15 = vmul.f32 0.5, %v3637_v3  ;;  %v13430_v18 = vadd.f32 1.0, %v10698_v2 }
 0x782   : > { %v13433_v63 = vmul.f32 %v3704_v42, %v13328_v29  ;;  %v3395_v38 = vmul.f32 0.044715, %v3331_v22  ;;  %v3080_v45 = vpop.f32.mrb[88].mxu1  ;;  %v3193_v11 = vpop.f32.mrb[120].mxu0  ;;  %v13435_v26 = vmul.f32 0.5, %v3641_v53  ;;  %v13437_v41 = vadd.f32 1.0, %v10706_v58 }
 0x783   : > { %v13440_v60 = vmul.f32 %v3706_v33, %v13331_v14  ;;  %v3521_v12 = vmul.f32 0.7978846, %v3457_v20  ;;  %v13443_v40 = vadd.f32 %v3080_v45, %v13299_v4  ;;  %v13446_v2 = vadd.f32 %v3193_v11, %v13302_v44  ;;  %v3082_v9 = vpop.f32.mrb[89].mxu1  ;;  %v3195_v29 = vpop.f32.mrb[121].mxu0 }
 0x784   : > { %v3459_v1 = vadd.f32 %v3395_v38, %v13409_v7  ;;  %v13452_v6 = vadd.f32 %v3082_v9, %v13305_v50  ;;  %v13455_v14 = vadd.f32 %v3195_v29, %v13309_v35  ;;  %v3084_v37 = vpop.f32.mrb[90].mxu1  ;;  %v3197_v58 = vpop.f32.mrb[122].mxu0 }
 0x785   : > { %v13457_v42 = vpop.eup %10707  ;;  %10719 = vtanh.f32 %v3521_v12  ;;  %v3268_v53 = vmul.f32 %v13443_v40, %v13443_v40  ;;  %v3270_v33 = vmul.f32 %v13446_v2, %v13446_v2  ;;  %v3086_v20 = vpop.f32.mrb[91].mxu1  ;;  %v13472_v22 = vadd.f32 %v3084_v37, %v13299_v4 }
 0x786   : > { %v3199_v38 = vpop.f32.mrb[123].mxu0  ;;  %v13465_v45 = vpop.eup %10709  ;;  %v3523_v11 = vmul.f32 0.7978846, %v3459_v1  ;;  %v3269_v9 = vmul.f32 %v13452_v6, %v13452_v6  ;;  %v3271_v29 = vmul.f32 %v13455_v14, %v13455_v14  ;;  %v13479_v49 = vadd.f32 %v3197_v58, %v13302_v44 }
 0x787   : > { %v13474_v12 = vpop.eup %10711  ;;  %v3332_v3 = vmul.f32 %v3268_v53, %v13443_v40  ;;  %v3334_v16 = vmul.f32 %v3270_v33, %v13446_v2  ;;  %v13482_v1 = vadd.f32 %v3086_v20, %v13305_v50  ;;  %v3272_v54 = vmul.f32 %v13472_v22, %v13472_v22 }
 0x788   : > { %v13484_v30 = vpop.eup %10713  ;;  %10721 = vtanh.f32 %v3523_v11  ;;  %v3333_v24 = vmul.f32 %v3269_v9, %v13452_v6  ;;  %v3335_v37 = vmul.f32 %v3271_v29, %v13455_v14  ;;  %v3274_v58 = vmul.f32 %v13479_v49, %v13479_v49 }
 0x789   : > { %v13490_v61 = vpop.eup %10715  ;;  %v3396_v53 = vmul.f32 0.044715, %v3332_v3  ;;  %v3398_v33 = vmul.f32 0.044715, %v3334_v16  ;;  %v3273_v20 = vmul.f32 %v13482_v1, %v13482_v1  ;;  %v3336_v9 = vmul.f32 %v3272_v54, %v13472_v22 }
 0x78a   : > { %v13496_v55 = vpop.eup %10717  ;;  %v3397_v11 = vmul.f32 0.044715, %v3333_v24  ;;  %v3399_v23 = vmul.f32 0.044715, %v3335_v37  ;;  %v13500_v29 = vadd.f32 %v3199_v38, %v13309_v35  ;;  %v3090_v0 = vpop.f32.mrb[92].mxu1  ;;  %v3338_v32 = vmul.f32 %v3274_v58, %v13479_v49 }
 0x78b   : > { %v3203_v21 = vpop.f32.mrb[124].mxu0  ;;  %v3460_v3 = vadd.f32 %v3396_v53, %v13443_v40  ;;  %v3462_v16 = vadd.f32 %v3398_v33, %v13446_v2  ;;  %v3337_v10 = vmul.f32 %v3273_v20, %v13482_v1  ;;  %v3092_v19 = vpop.f32.mrb[93].mxu1  ;;  %v3400_v54 = vmul.f32 0.044715, %v3336_v9 }
 0x78c   : > { %v3205_v28 = vpop.f32.mrb[125].mxu0  ;;  %v3461_v24 = vadd.f32 %v3397_v11, %v13452_v6  ;;  %v3463_v37 = vadd.f32 %v3399_v23, %v13455_v14  ;;  %v3275_v38 = vmul.f32 %v13500_v29, %v13500_v29  ;;  %v3094_v36 = vpop.f32.mrb[94].mxu1  ;;  %v3402_v5 = vmul.f32 0.044715, %v3338_v32 }
 0x78d   : > { %v3207_v62 = vpop.f32.mrb[126].mxu0  ;;  %v3524_v51 = vmul.f32 0.7978846, %v3460_v3  ;;  %v3526_v53 = vmul.f32 0.7978846, %v3462_v16  ;;  %v3765_v33 = vmul.f32 %v13428_v15, %v13318_v27  ;;  %v3464_v47 = vadd.f32 %v3400_v54, %v13472_v22  ;;  %v3096_v16 = vpop.f32.mrb[95].mxu1 }
 0x78e   : > { %v3525_v58 = vmul.f32 0.7978846, %v3461_v24  ;;  %v3527_v20 = vmul.f32 0.7978846, %v3463_v37  ;;  %v3401_v17 = vmul.f32 0.044715, %v3337_v10  ;;  %v3466_v23 = vadd.f32 %v3402_v5, %v13479_v49 }
 0x78f   : > { %v13513_v11 = vpop.eup %10719  ;;  %10723 = vtanh.f32 %v3524_v51  ;;  %v3339_v9 = vmul.f32 %v3275_v38, %v13500_v29  ;;  %v3769_v3 = vmul.f32 %v13435_v26, %v13338_v39  ;;  %v3209_v32 = vpop.f32.mrb[127].mxu0  ;;  %v3528_v34 = vmul.f32 0.7978846, %v3464_v47 }
 0x790   : > { %10725 = vtanh.f32 %v3526_v53  ;;  %v3465_v27 = vadd.f32 %v3401_v17, %v13482_v1  ;;  %v3703_v15 = vmul.f32 0.5, %v13430_v18  ;;  %v3530_v10 = vmul.f32 0.7978846, %v3466_v23 }
 0x791   : > { %10727 = vtanh.f32 %v3525_v58  ;;  %v3403_v24 = vmul.f32 0.044715, %v3339_v9  ;;  %v3829_v37 = vpack.c.bf16 %v3769_v3, %v3765_v33  ;;  %v3707_v54 = vmul.f32 0.5, %v13437_v41 }
 0x792   : > { %v13521_v51 = vpop.eup %10721  ;;  %10729 = vtanh.f32 %v3527_v20  ;;  %v3529_v5 = vmul.f32 0.7978846, %v3465_v27  ;;  %v3767_v39 = vmul.f32 %v3703_v15, %v13321_v56  ;;  %v13527_v17 = vadd.f32 %v3090_v0, %v13299_v4 }
 0x793   : > { %10731 = vtanh.f32 %v3528_v34  ;;  %v3467_v26 = vadd.f32 %v3403_v24, %v13500_v29  ;;  %4149 = vmatprep.mubr.bf16.mxu1 %v3829_v37  ;;  %v13530_v47 = vadd.f32 %v3203_v21, %v13302_v44  ;;  %v3771_v18 = vmul.f32 %v3707_v54, %v13341_v48 }
 0x794   : > { %17190 = vst [vmem:[#allocation37_spill] sm:$0xff] %v13527_v17  ;;  %10733 = vtanh.f32 %v3530_v10  ;;  %v17192_v38 = vpack.c.bf16 %v13433_v63, %v13421_v13  ;;  %v13537_v41 = vadd.f32 %v3092_v19, %v13305_v50  ;;  %v13540_v34 = vadd.f32 %v3205_v28, %v13309_v35 }
 0x795   : > { %17191 = vst [vmem:[#allocation44_spill] sm:$0xff] %v13530_v47  ;;  %10735 = vtanh.f32 %v3529_v5  ;;  %v3531_v56 = vmul.f32 0.7978846, %v3467_v26  ;;  %v3276_v0 = vmul.f32 %v13527_v17, %v13527_v17  ;;  %v3278_v21 = vmul.f32 %v13530_v47, %v13530_v47 }
 0x796   : > { %4150 = vmatmul.mubr.bf16.vlgmr.msra.gmra.mrb[112].mxu1 %v17192_v38  ;;  %v3831_v53 = vpack.c.bf16 %v3771_v18, %v3767_v39  ;;  %v3277_v48 = vmul.f32 %v13537_v41, %v13537_v41  ;;  %v3279_v13 = vmul.f32 %v13540_v34, %v13540_v34  ;;  %v13551_v19 = vadd.f32 %v3094_v36, %v13299_v4 }
 0x797   : > { %10737 = vtanh.f32 %v3531_v56  ;;  %v3340_v28 = vmul.f32 %v3276_v0, %v13527_v17  ;;  %v3342_v63 = vmul.f32 %v3278_v21, %v13530_v47  ;;  %v13556_v33 = vadd.f32 %v3207_v62, %v13302_v44 }
 0x798   : > { %17193 = vst [vmem:[#allocation45_spill] sm:$0xff] %v13551_v19  ;;  %4246 = vmatprep.mubr.bf16.mxu0 %v3831_v53  ;;  %v3341_v58 = vmul.f32 %v3277_v48, %v13537_v41  ;;  %v3343_v20 = vmul.f32 %v3279_v13, %v13540_v34  ;;  %v3280_v23 = vmul.f32 %v13551_v19, %v13551_v19 }
 0x799   : > { %17194 = vst [vmem:[#allocation46_spill] sm:$0xff] %v13556_v33  ;;  %v13563_v9 = vadd.f32 %v3096_v16, %v13305_v50  ;;  %v13565_v36 = vpop.eup %10723  ;;  %v17195_v3 = vpack.c.bf16 %v13440_v60, %v13424_v59  ;;  %v3404_v27 = vmul.f32 0.044715, %v3340_v28  ;;  %v3406_v62 = vmul.f32 0.044715, %v3342_v63 }
 0x79a   : > { %v3282_v15 = vmul.f32 %v13556_v33, %v13556_v33  ;;  %v13573_v10 = vadd.f32 %v3209_v32, %v13309_v35  ;;  %v13575_v24 = vpop.eup %10725  ;;  %v3405_v37 = vmul.f32 0.044715, %v3341_v58  ;;  %v3407_v5 = vmul.f32 0.044715, %v3343_v20 }
 0x79b   : > { %4247 = vmatmul.mubr.bf16.vlgmr.msra.gmra.mrb[144].mxu0 %v17195_v3  ;;  %v3344_v16 = vmul.f32 %v3280_v23, %v13551_v19  ;;  %v3281_v54 = vmul.f32 %v13563_v9, %v13563_v9  ;;  %v13580_v39 = vpop.eup %10727  ;;  %v3468_v59 = vadd.f32 %v3404_v27, %v13527_v17  ;;  %v3470_v60 = vadd.f32 %v3406_v62, %v13530_v47 }
 0x79c   : > { %17196 = vst [vmem:[#allocation47_spill] sm:$0xff] %v13573_v10  ;;  %v3346_v26 = vmul.f32 %v3282_v15, %v13556_v33  ;;  %v3283_v32 = vmul.f32 %v13573_v10, %v13573_v10  ;;  %v13587_v18 = vpop.eup %10729  ;;  %v3469_v38 = vadd.f32 %v3405_v37, %v13537_v41  ;;  %v3471_v56 = vadd.f32 %v3407_v5, %v13540_v34 }
 0x79d   : > { %v3408_v0 = vmul.f32 0.044715, %v3344_v16  ;;  %v3345_v21 = vmul.f32 %v3281_v54, %v13563_v9  ;;  %v13592_v53 = vpop.eup %10731  ;;  %v3532_v48 = vmul.f32 0.7978846, %v3468_v59  ;;  %v3534_v13 = vmul.f32 0.7978846, %v3470_v60 }
 0x79e   : > { %v3410_v28 = vmul.f32 0.044715, %v3346_v26  ;;  %v3347_v63 = vmul.f32 %v3283_v32, %v13573_v10  ;;  %v13595_v58 = vpop.eup %10733  ;;  %v3533_v20 = vmul.f32 0.7978846, %v3469_v38  ;;  %v3535_v23 = vmul.f32 0.7978846, %v3471_v56 }
 0x79f   : > { %v3472_v3 = vadd.f32 %v3408_v0, %v13551_v19  ;;  %v3409_v27 = vmul.f32 0.044715, %v3345_v21  ;;  %v13598_v62 = vpop.eup %10735  ;;  %10739 = vtanh.f32 %v3532_v48  ;;  %v3645_v5 = vadd.f32 1.0, %v13474_v12 }
 0x7a0   : > { %v3474_v15 = vadd.f32 %v3410_v28, %v13556_v33  ;;  %v3411_v37 = vmul.f32 0.044715, %v3347_v63  ;;  %10741 = vtanh.f32 %v3534_v13  ;;  %v3649_v59 = vadd.f32 1.0, %v13513_v11 }
 0x7a1   : > { %v3536_v16 = vmul.f32 0.7978846, %v3472_v3  ;;  %v3473_v54 = vadd.f32 %v3409_v27, %v13563_v9  ;;  %v13604_v60 = vpop.eup %10737  ;;  %10743 = vtanh.f32 %v3533_v20  ;;  %v3709_v38 = vmul.f32 0.5, %v3645_v5 }
 0x7a2   : > { %v3538_v26 = vmul.f32 0.7978846, %v3474_v15  ;;  %v3475_v32 = vadd.f32 %v3411_v37, %v13573_v10  ;;  %10745 = vtanh.f32 %v3535_v23  ;;  %v3713_v0 = vmul.f32 0.5, %v3649_v59  ;;  %v3100_v48 = vpop.f32.mrb[96].mxu1  ;;  %v3213_v12 = vpop.f32.mrb[128].mxu0 }
 0x7a3   : > { %v3537_v56 = vmul.f32 0.7978846, %v3473_v54  ;;  %v3647_v21 = vadd.f32 1.0, %v13484_v30  ;;  %10747 = vtanh.f32 %v3536_v16  ;;  %v3773_v28 = vmul.f32 %v3709_v38, %v13376_v25  ;;  %v3102_v63 = vpop.f32.mrb[97].mxu1  ;;  %v3215_v3 = vpop.f32.mrb[129].mxu0 }
 0x7a4   : > { %v3539_v13 = vmul.f32 0.7978846, %v3475_v32  ;;  %v3651_v11 = vadd.f32 1.0, %v13521_v51  ;;  %10749 = vtanh.f32 %v3538_v26  ;;  %v3777_v20 = vmul.f32 %v3713_v0, %v13405_v31  ;;  %v3104_v15 = vpop.f32.mrb[98].mxu1  ;;  %v3217_v37 = vpop.f32.mrb[130].mxu0 }
 0x7a5   : > { %v3711_v27 = vmul.f32 0.5, %v3647_v21  ;;  %v3644_v23 = vadd.f32 1.0, %v13457_v42  ;;  %10751 = vtanh.f32 %v3537_v56  ;;  %v3648_v5 = vadd.f32 1.0, %v13490_v61  ;;  %v3106_v54 = vpop.f32.mrb[99].mxu1  ;;  %v3219_v25 = vpop.f32.mrb[131].mxu0 }
 0x7a6   : > { %v3715_v30 = vmul.f32 0.5, %v3651_v11  ;;  %v3646_v16 = vadd.f32 1.0, %v13465_v45  ;;  %10753 = vtanh.f32 %v3539_v13  ;;  %v3833_v51 = vpack.c.bf16 %v3777_v20, %v3773_v28 }
 0x7a7   : > { %v3775_v59 = vmul.f32 %v3711_v27, %v13379_v46  ;;  %v3708_v26 = vmul.f32 0.5, %v3644_v23  ;;  %v3712_v32 = vmul.f32 0.5, %v3648_v5  ;;  %v3650_v42 = vadd.f32 1.0, %v13496_v55 }
 0x7a8   : > { %v3779_v31 = vmul.f32 %v3715_v30, %v13409_v7  ;;  %v3710_v38 = vmul.f32 0.5, %v3646_v16  ;;  %4157 = vmatprep.mubr.bf16.mxu1 %v3833_v51  ;;  %v13619_v61 = vadd.f32 %v3100_v48, %v13299_v4  ;;  %v13622_v45 = vadd.f32 %v3213_v12, %v13302_v44 }
 0x7a9   : > { %v3772_v56 = vmul.f32 %v3708_v26, %v13368_v57  ;;  %v13625_v0 = vadd.f32 %v3102_v63, %v13305_v50  ;;  %v13627_v46 = vpop.eup %10739  ;;  %v3776_v7 = vmul.f32 %v3712_v32, %v13384_v8  ;;  %v3714_v13 = vmul.f32 0.5, %v3650_v42 }
 0x7aa   : > { %v3835_v21 = vpack.c.bf16 %v3779_v31, %v3775_v59  ;;  %v3774_v55 = vmul.f32 %v3710_v38, %v13371_v43  ;;  %v13631_v28 = vpop.eup %10741  ;;  %v3284_v57 = vmul.f32 %v13619_v61, %v13619_v61  ;;  %v3286_v48 = vmul.f32 %v13622_v45, %v13622_v45  ;;  %v13642_v63 = vpop.f32.mrb[100].mxu1 }
 0x7ab   : > { %17197 = vst [vmem:[#allocation3_spill] sm:$0xff] %v13631_v28  ;;  %v3285_v12 = vmul.f32 %v13625_v0, %v13625_v0  ;;  %v13640_v11 = vadd.f32 %v3215_v3, %v13309_v35  ;;  %v13644_v8 = vpop.f32.mrb[132].mxu0  ;;  %v13646_v20 = vpop.eup %10743  ;;  %v3832_v43 = vpack.c.bf16 %v3776_v7, %v3772_v56  ;;  %v3778_v27 = vmul.f32 %v3714_v13, %v13387_v52 }
 0x7ac   : > { %4254 = vmatprep.mubr.bf16.mxu0 %v3835_v21  ;;  %v13650_v23 = vadd.f32 %v3104_v15, %v13299_v4  ;;  %v13653_v30 = vadd.f32 %v3217_v37, %v13302_v44  ;;  %v13655_v5 = vpop.f32.mrb[101].mxu1  ;;  %v13657_v3 = vpop.f32.mrb[133].mxu0  ;;  %v3348_v51 = vmul.f32 %v3284_v57, %v13619_v61  ;;  %v3350_v59 = vmul.f32 %v3286_v48, %v13622_v45 }
 0x7ad   : > { %v13659_v16 = vpop.eup %10745  ;;  %v3349_v26 = vmul.f32 %v3285_v12, %v13625_v0  ;;  %v3287_v52 = vmul.f32 %v13640_v11, %v13640_v11  ;;  %v13666_v15 = vpop.f32.mrb[102].mxu1  ;;  %4158 = vmatmul.mubr.bf16.gmra.mrb[116].mxu1 %v3832_v43  ;;  %v3834_v32 = vpack.c.bf16 %v3778_v27, %v3774_v55  ;;  %v13677_v56 = vadd.f32 %v3106_v54, %v13305_v50 }
 0x7ae   : > { %v13668_v31 = vpop.f32.mrb[134].mxu0  ;;  %v13670_v37 = vpop.eup %10747  ;;  %v3288_v42 = vmul.f32 %v13650_v23, %v13650_v23  ;;  %v3290_v38 = vmul.f32 %v13653_v30, %v13653_v30  ;;  %v3412_v57 = vmul.f32 0.044715, %v3348_v51  ;;  %v3414_v48 = vmul.f32 0.044715, %v3350_v59 }
 0x7af   : > { %17198 = vst [vmem:[#allocation4_spill] sm:$0xff] %v13670_v37  ;;  %v13679_v21 = vpop.f32.mrb[103].mxu1  ;;  %v13681_v7 = vpop.f32.mrb[135].mxu0  ;;  %v3413_v12 = vmul.f32 0.044715, %v3349_v26  ;;  %v3351_v55 = vmul.f32 %v3287_v52, %v13640_v11  ;;  %4255 = vmatmul.mubr.bf16.gmra.mrb[148].mxu0 %v3834_v32  ;;  %v3289_v54 = vmul.f32 %v13677_v56, %v13677_v56  ;;  %v13693_v47 = vadd.f32 %v3219_v25, %v13309_v35 }
 0x7b0   : > { %v13683_v13 = vpop.eup %10749  ;;  %v3352_v27 = vmul.f32 %v3288_v42, %v13650_v23  ;;  %v3354_v33 = vmul.f32 %v3290_v38, %v13653_v30  ;;  %v3476_v51 = vadd.f32 %v3412_v57, %v13619_v61  ;;  %v3478_v59 = vadd.f32 %v3414_v48, %v13622_v45 }
 0x7b1   : > { %17199 = vst [vmem:[#allocation5_spill] sm:$0xff] %v13683_v13  ;;  %v13686_v43 = vpop.eup %10751  ;;  %v3477_v26 = vadd.f32 %v3413_v12, %v13625_v0  ;;  %v3415_v52 = vmul.f32 0.044715, %v3351_v55  ;;  %v3353_v42 = vmul.f32 %v3289_v54, %v13677_v56  ;;  %v3291_v38 = vmul.f32 %v13693_v47, %v13693_v47 }
 0x7b2   : > { %v13695_v19 = vpop.eup %10753  ;;  %v3416_v32 = vmul.f32 0.044715, %v3352_v27  ;;  %v3418_v17 = vmul.f32 0.044715, %v3354_v33  ;;  %v3540_v10 = vmul.f32 0.7978846, %v3476_v51 }
 0x7b3   : > { %v3542_v13 = vmul.f32 0.7978846, %v3478_v59  ;;  %v3541_v25 = vmul.f32 0.7978846, %v3477_v26  ;;  %v3479_v28 = vadd.f32 %v3415_v52, %v13640_v11  ;;  %v3417_v48 = vmul.f32 0.044715, %v3353_v42 }
 0x7b4   : > { %v3480_v37 = vadd.f32 %v3416_v32, %v13650_v23  ;;  %v3482_v57 = vadd.f32 %v3418_v17, %v13653_v30  ;;  %v3355_v12 = vmul.f32 %v3291_v38, %v13693_v47  ;;  %10755 = vtanh.f32 %v3540_v10 }
 0x7b5   : > { %v3543_v55 = vmul.f32 0.7978846, %v3479_v28  ;;  %v3653_v33 = vadd.f32 1.0, %v13580_v39  ;;  %v3657_v27 = vadd.f32 1.0, %v13598_v62  ;;  %10757 = vtanh.f32 %v3542_v13 }
 0x7b6   : > { %v3544_v54 = vmul.f32 0.7978846, %v3480_v37  ;;  %v3546_v51 = vmul.f32 0.7978846, %v3482_v57  ;;  %v3481_v59 = vadd.f32 %v3417_v48, %v13677_v56  ;;  %10759 = vtanh.f32 %v3541_v25 }
 0x7b7   : > { %v3419_v26 = vmul.f32 0.044715, %v3355_v12  ;;  %v3717_v52 = vmul.f32 0.5, %v3653_v33  ;;  %v3721_v32 = vmul.f32 0.5, %v3657_v27  ;;  %10761 = vtanh.f32 %v3543_v55 }
 0x7b8   : > { %v3545_v17 = vmul.f32 0.7978846, %v3481_v59  ;;  %v3655_v42 = vadd.f32 1.0, %v13587_v18  ;;  %v3659_v10 = vadd.f32 1.0, %v13604_v60  ;;  %10763 = vtanh.f32 %v3544_v54 }
 0x7b9   : > { %v3483_v39 = vadd.f32 %v3419_v26, %v13693_v47  ;;  %v3781_v62 = vmul.f32 %v3717_v52, %v13452_v6  ;;  %v3785_v28 = vmul.f32 %v3721_v32, %v13482_v1  ;;  %10765 = vtanh.f32 %v3546_v51 }
 0x7ba   : > { %v3719_v37 = vmul.f32 0.5, %v3655_v42  ;;  %v3723_v13 = vmul.f32 0.5, %v3659_v10  ;;  %v3652_v38 = vadd.f32 1.0, %v13565_v36  ;;  %10767 = vtanh.f32 %v3545_v17 }
 0x7bb   : > { %v3547_v25 = vmul.f32 0.7978846, %v3483_v39  ;;  %v3837_v57 = vpack.c.bf16 %v3785_v28, %v3781_v62  ;;  %v3656_v48 = vadd.f32 1.0, %v13592_v53  ;;  %v3654_v55 = vadd.f32 1.0, %v13575_v24 }
 0x7bc   : > { %v3783_v18 = vmul.f32 %v3719_v37, %v13455_v14  ;;  %v3787_v60 = vmul.f32 %v3723_v13, %v13500_v29  ;;  %v3716_v12 = vmul.f32 0.5, %v3652_v38  ;;  %v3658_v1 = vadd.f32 1.0, %v13595_v58 }
 0x7bd   : > { %10769 = vtanh.f32 %v3547_v25  ;;  %4165 = vmatprep.mubr.bf16.mxu1 %v3837_v57  ;;  %v3720_v6 = vmul.f32 0.5, %v3656_v48  ;;  %v13723_v36 = vadd.f32 %v13642_v63, %v13299_v4  ;;  %v3718_v53 = vmul.f32 0.5, %v3654_v55 }
 0x7be   : > { %v3839_v33 = vpack.c.bf16 %v3787_v60, %v3783_v18  ;;  %v3780_v27 = vmul.f32 %v3716_v12, %v13443_v40  ;;  %v13728_v14 = vadd.f32 %v13644_v8, %v13302_v44  ;;  %v13730_v29 = vpop.eup %10755  ;;  %v3722_v54 = vmul.f32 0.5, %v3658_v1 }
 0x7bf   : > { %v3784_v24 = vmul.f32 %v3720_v6, %v13472_v22  ;;  %v3292_v58 = vmul.f32 %v13723_v36, %v13723_v36  ;;  %v13737_v63 = vadd.f32 %v13655_v5, %v13305_v50  ;;  %v13739_v51 = vpop.eup %10757  ;;  %v3782_v40 = vmul.f32 %v3718_v53, %v13446_v2 }
 0x7c0   : > { %4262 = vmatprep.mubr.bf16.mxu0 %v3839_v33  ;;  %v3294_v8 = vmul.f32 %v13728_v14, %v13728_v14  ;;  %v13746_v59 = vadd.f32 %v13657_v3, %v13309_v35  ;;  %v13750_v22 = vadd.f32 %v13666_v15, %v13299_v4  ;;  %v13752_v26 = vpop.eup %10759  ;;  %v3786_v52 = vmul.f32 %v3722_v54, %v13479_v49 }
 0x7c1   : > { %v3836_v5 = vpack.c.bf16 %v3784_v24, %v3780_v27  ;;  %v3356_v32 = vmul.f32 %v3292_v58, %v13723_v36  ;;  %v3293_v2 = vmul.f32 %v13737_v63, %v13737_v63  ;;  %v13758_v17 = vpop.eup %10761  ;;  %v13767_v10 = vadd.f32 %v13668_v31, %v13302_v44 }
 0x7c2   : > { %v3358_v42 = vmul.f32 %v3294_v8, %v13728_v14  ;;  %v3295_v3 = vmul.f32 %v13746_v59, %v13746_v59  ;;  %v3296_v15 = vmul.f32 %v13750_v22, %v13750_v22  ;;  %v13769_v49 = vpop.eup %10763  ;;  %v3838_v39 = vpack.c.bf16 %v3786_v52, %v3782_v40 }
 0x7c3   : > { %4166 = vmatmul.mubr.bf16.gmra.mrb[120].mxu1 %v3836_v5  ;;  %v3420_v62 = vmul.f32 0.044715, %v3356_v32  ;;  %v3357_v28 = vmul.f32 %v3293_v2, %v13737_v63  ;;  %v13774_v37 = vadd.f32 %v13679_v21, %v13305_v50  ;;  %v13776_v13 = vpop.eup %10765  ;;  %v3298_v31 = vmul.f32 %v13767_v10, %v13767_v10 }
 0x7c4   : > { %v3422_v38 = vmul.f32 0.044715, %v3358_v42  ;;  %v3359_v25 = vmul.f32 %v3295_v3, %v13746_v59  ;;  %v3360_v57 = vmul.f32 %v3296_v15, %v13750_v22  ;;  %v13782_v48 = vpop.eup %10767  ;;  %4263 = vmatmul.mubr.bf16.gmra.mrb[152].mxu0 %v3838_v39  ;;  %v13789_v12 = vadd.f32 %v13681_v7, %v13309_v35 }
 0x7c5   : > { %v3484_v18 = vadd.f32 %v3420_v62, %v13723_v36  ;;  %v3421_v60 = vmul.f32 0.044715, %v3357_v28  ;;  %v3297_v21 = vmul.f32 %v13774_v37, %v13774_v37  ;;  %v3362_v33 = vmul.f32 %v3298_v31, %v13767_v10  ;;  %v13793_v27 = vpop.f32.mrb[104].mxu1  ;;  %v13795_v53 = vpop.f32.mrb[136].mxu0 }
 0x7c6   : > { %v3486_v55 = vadd.f32 %v3422_v38, %v13728_v14  ;;  %v3423_v6 = vmul.f32 0.044715, %v3359_v25  ;;  %v3424_v1 = vmul.f32 0.044715, %v3360_v57  ;;  %v3299_v7 = vmul.f32 %v13789_v12, %v13789_v12  ;;  %v13803_v8 = vpop.f32.mrb[105].mxu1  ;;  %v13805_v5 = vpop.f32.mrb[137].mxu0 }
 0x7c7   : > { %v13797_v24 = vpop.eup %10769  ;;  %v3548_v54 = vmul.f32 0.7978846, %v3484_v18  ;;  %v3485_v58 = vadd.f32 %v3421_v60, %v13737_v63  ;;  %v3361_v40 = vmul.f32 %v3297_v21, %v13774_v37  ;;  %v3426_v42 = vmul.f32 0.044715, %v3362_v33  ;;  %v13809_v3 = vpop.f32.mrb[106].mxu1 }
 0x7c8   : > { %v3550_v52 = vmul.f32 0.7978846, %v3486_v55  ;;  %v3487_v32 = vadd.f32 %v3423_v6, %v13746_v59  ;;  %v3488_v2 = vadd.f32 %v3424_v1, %v13750_v22  ;;  %v13811_v15 = vpop.f32.mrb[138].mxu0  ;;  %v3363_v28 = vmul.f32 %v3299_v7, %v13789_v12  ;;  %v13814_v38 = vpop.f32.mrb[107].mxu1 }
 0x7c9   : > { %10771 = vtanh.f32 %v3548_v54  ;;  %v3549_v39 = vmul.f32 0.7978846, %v3485_v58  ;;  %v3425_v62 = vmul.f32 0.044715, %v3361_v40  ;;  %v13816_v25 = vpop.f32.mrb[139].mxu0  ;;  %v3490_v18 = vadd.f32 %v3426_v42, %v13767_v10 }
 0x7ca   : > { %10773 = vtanh.f32 %v3550_v52  ;;  %v3551_v57 = vmul.f32 0.7978846, %v3487_v32  ;;  %v3552_v31 = vmul.f32 0.7978846, %v3488_v2  ;;  %v3427_v21 = vmul.f32 0.044715, %v3363_v28 }
 0x7cb   : > { %10775 = vtanh.f32 %v3549_v39  ;;  %v3489_v60 = vadd.f32 %v3425_v62, %v13774_v37  ;;  %v3661_v55 = vadd.f32 1.0, %v13646_v20  ;;  %v3554_v6 = vmul.f32 0.7978846, %v3490_v18 }
 0x7cc   : > { %10777 = vtanh.f32 %v3551_v57  ;;  %v3665_v1 = vadd.f32 1.0, %v13686_v43  ;;  %v3663_v33 = vadd.f32 1.0, %v13659_v16  ;;  %v3491_v58 = vadd.f32 %v3427_v21, %v13789_v12 }
 0x7cd   : > { %10779 = vtanh.f32 %v3552_v31  ;;  %v3553_v54 = vmul.f32 0.7978846, %v3489_v60  ;;  %v3725_v40 = vmul.f32 0.5, %v3661_v55  ;;  %v3667_v52 = vadd.f32 1.0, %v13695_v19  ;;  %v13825_v2 = vpop.f32.mrb[108].mxu1  ;;  %v13827_v42 = vpop.f32.mrb[140].mxu0 }
 0x7ce   : > { %10781 = vtanh.f32 %v3554_v6  ;;  %v3729_v7 = vmul.f32 0.5, %v3665_v1  ;;  %v3727_v32 = vmul.f32 0.5, %v3663_v33  ;;  %v3555_v20 = vmul.f32 0.7978846, %v3491_v58  ;;  %v13831_v39 = vpop.f32.mrb[109].mxu1  ;;  %v13833_v62 = vpop.f32.mrb[141].mxu0 }
 0x7cf   : > { %10783 = vtanh.f32 %v3553_v54  ;;  %v3789_v43 = vmul.f32 %v3725_v40, %v13537_v41  ;;  %v3660_v16 = vadd.f32 1.0, %v13627_v46  ;;  %v3731_v57 = vmul.f32 0.5, %v3667_v52  ;;  %v17200_v31 = vld [vmem:[#allocation4_spill] sm:$0xff]  ;;  %v13838_v60 = vpop.f32.mrb[110].mxu1  ;;  %v13840_v21 = vpop.f32.mrb[142].mxu0  ;;  %v17201_v41 = vld [vmem:[#allocation3_spill] sm:$0xff] }
 0x7d0   : > { %v3793_v28 = vmul.f32 %v3729_v7, %v13563_v9  ;;  %v3791_v19 = vmul.f32 %v3727_v32, %v13540_v34  ;;  %v3664_v18 = vadd.f32 1.0, %v17200_v31  ;;  %10785 = vtanh.f32 %v3555_v20  ;;  %v17202_v46 = vld [vmem:[#allocation5_spill] sm:$0xff]  ;;  %v13844_v33 = vpop.f32.mrb[111].mxu1  ;;  %v13846_v54 = vpop.f32.mrb[143].mxu0  ;;  %v17205_v58 = vld [vmem:[#allocation47_spill] sm:$0xff] }
 0x7d1   : > { %v3724_v55 = vmul.f32 0.5, %v3660_v16  ;;  %v3662_v6 = vadd.f32 1.0, %v17201_v41  ;;  %v3666_v1 = vadd.f32 1.0, %v17202_v46  ;;  %17203 = vst [vmem:[#allocation6_spill] sm:$0xff] %v13844_v33  ;;  %17204 = vst [vmem:[#allocation7_spill] sm:$0xff] %v13846_v54  ;;  %v3795_v40 = vmul.f32 %v3731_v57, %v17205_v58  ;;  %v17206_v32 = vld [vmem:[#allocation37_spill] sm:$0xff] }
 0x7d2   : > { %v3841_v9 = vpack.c.bf16 %v3793_v28, %v3789_v43  ;;  %v3728_v34 = vmul.f32 0.5, %v3664_v18  ;;  %v13851_v7 = vadd.f32 %v13793_v27, %v13299_v4  ;;  %v13858_v41 = vadd.f32 %v13795_v53, %v13302_v44  ;;  %v17207_v28 = vld [vmem:[#allocation45_spill] sm:$0xff] }
 0x7d3   : > { %v13853_v52 = vpop.eup %10771  ;;  %v3788_v20 = vmul.f32 %v3724_v55, %v17206_v32  ;;  %v3726_v16 = vmul.f32 0.5, %v3662_v6  ;;  %v3730_v31 = vmul.f32 0.5, %v3666_v1  ;;  %v3843_v43 = vpack.c.bf16 %v3795_v40, %v3791_v19  ;;  %v17208_v55 = vld [vmem:[#allocation44_spill] sm:$0xff]  ;;  %v17209_v1 = vld [vmem:[#allocation46_spill] sm:$0xff] }
 0x7d4   : > { %v13860_v46 = vpop.eup %10773  ;;  %4173 = vmatprep.mubr.bf16.mxu1 %v3841_v9  ;;  %v3792_v57 = vmul.f32 %v3728_v34, %v17207_v28  ;;  %v3300_v27 = vmul.f32 %v13851_v7, %v13851_v7  ;;  %v3669_v18 = vadd.f32 1.0, %v13752_v26  ;;  %v3302_v53 = vmul.f32 %v13858_v41, %v13858_v41 }
 0x7d5   : > { %v13866_v58 = vpop.eup %10775  ;;  %v3790_v6 = vmul.f32 %v3726_v16, %v17208_v55  ;;  %v3794_v32 = vmul.f32 %v3730_v31, %v17209_v1  ;;  %v3673_v54 = vadd.f32 1.0, %v13782_v48  ;;  %4270 = vmatprep.mubr.bf16.mxu0 %v3843_v43  ;;  %v3671_v26 = vadd.f32 1.0, %v13758_v17 }
 0x7d6   : > { %v13873_v9 = vpop.eup %10777  ;;  %v3840_v19 = vpack.c.bf16 %v3792_v57, %v3788_v20  ;;  %v3364_v40 = vmul.f32 %v3300_v27, %v13851_v7  ;;  %v3733_v34 = vmul.f32 0.5, %v3669_v18  ;;  %v3366_v16 = vmul.f32 %v3302_v53, %v13858_v41 }
 0x7d7   : > { %v13877_v28 = vpop.eup %10779  ;;  %v3842_v33 = vpack.c.bf16 %v3794_v32, %v3790_v6  ;;  %v3737_v31 = vmul.f32 0.5, %v3673_v54  ;;  %v3675_v55 = vadd.f32 1.0, %v13797_v24  ;;  %v3735_v20 = vmul.f32 0.5, %v3671_v26 }
 0x7d8   : > { %v13881_v1 = vpop.eup %10781  ;;  %4174 = vmatmul.mubr.bf16.gmra.mrb[124].mxu1 %v3840_v19  ;;  %v3428_v48 = vmul.f32 0.044715, %v3364_v40  ;;  %v3797_v43 = vmul.f32 %v3733_v34, %v13625_v0  ;;  %v13886_v57 = vadd.f32 %v13803_v8, %v13305_v50  ;;  %v3430_v27 = vmul.f32 0.044715, %v3366_v16 }
 0x7d9   : > { %v13888_v17 = vpop.eup %10783  ;;  %4271 = vmatmul.mubr.bf16.gmra.mrb[156].mxu0 %v3842_v33  ;;  %v3801_v18 = vmul.f32 %v3737_v31, %v13677_v56  ;;  %v3739_v54 = vmul.f32 0.5, %v3675_v55  ;;  %v13893_v24 = vadd.f32 %v13805_v5, %v13309_v35  ;;  %v3799_v0 = vmul.f32 %v3735_v20, %v13640_v11 }
 0x7da   : > { %v3492_v6 = vadd.f32 %v3428_v48, %v13851_v7  ;;  %v3301_v32 = vmul.f32 %v13886_v57, %v13886_v57  ;;  %v3668_v8 = vadd.f32 1.0, %v13730_v29  ;;  %v13900_v53 = vpop.eup %10785  ;;  %v3494_v33 = vadd.f32 %v3430_v27, %v13858_v41 }
 0x7db   : > { %v3845_v19 = vpack.c.bf16 %v3801_v18, %v3797_v43  ;;  %v3803_v56 = vmul.f32 %v3739_v54, %v13693_v47  ;;  %v3303_v5 = vmul.f32 %v13893_v24, %v13893_v24  ;;  %v3672_v11 = vadd.f32 1.0, %v13769_v49 }
 0x7dc   : > { %v3556_v40 = vmul.f32 0.7978846, %v3492_v6  ;;  %v3365_v34 = vmul.f32 %v3301_v32, %v13886_v57  ;;  %v3732_v26 = vmul.f32 0.5, %v3668_v8  ;;  %v3558_v16 = vmul.f32 0.7978846, %v3494_v33 }
 0x7dd   : > { %4181 = vmatprep.mubr.bf16.mxu1 %v3845_v19  ;;  %v3847_v31 = vpack.c.bf16 %v3803_v56, %v3799_v0  ;;  %v3367_v29 = vmul.f32 %v3303_v5, %v13893_v24  ;;  %v3670_v55 = vadd.f32 1.0, %v13739_v51  ;;  %v3736_v43 = vmul.f32 0.5, %v3672_v11 }
 0x7de   : > { %10787 = vtanh.f32 %v3556_v40  ;;  %v3429_v48 = vmul.f32 0.044715, %v3365_v34  ;;  %v3796_v47 = vmul.f32 %v3732_v26, %v13619_v61  ;;  %v3674_v27 = vadd.f32 1.0, %v13776_v13 }
 0x7df   : > { %10789 = vtanh.f32 %v3558_v16  ;;  %4278 = vmatprep.mubr.bf16.mxu0 %v3847_v31  ;;  %v3431_v20 = vmul.f32 0.044715, %v3367_v29  ;;  %v3734_v18 = vmul.f32 0.5, %v3670_v55  ;;  %v3800_v54 = vmul.f32 %v3736_v43, %v13650_v23 }
 0x7e0   : > { %v3493_v49 = vadd.f32 %v3429_v48, %v13886_v57  ;;  %v13916_v6 = vadd.f32 %v13809_v3, %v13299_v4  ;;  %v13920_v51 = vadd.f32 %v13811_v15, %v13302_v44  ;;  %v3738_v0 = vmul.f32 0.5, %v3674_v27 }
 0x7e1   : > { %v3495_v61 = vadd.f32 %v3431_v20, %v13893_v24  ;;  %v3798_v32 = vmul.f32 %v3734_v18, %v13622_v45  ;;  %v13926_v13 = vadd.f32 %v13814_v38, %v13305_v50  ;;  %v3844_v33 = vpack.c.bf16 %v3800_v54, %v3796_v47 }
 0x7e2   : > { %v3557_v8 = vmul.f32 0.7978846, %v3493_v49  ;;  %v3304_v23 = vmul.f32 %v13916_v6, %v13916_v6  ;;  %v3306_v3 = vmul.f32 %v13920_v51, %v13920_v51  ;;  %v3802_v15 = vmul.f32 %v3738_v0, %v13653_v30 }
 0x7e3   : > { %v3559_v19 = vmul.f32 0.7978846, %v3495_v61  ;;  %v3305_v56 = vmul.f32 %v13926_v13, %v13926_v13  ;;  %v13937_v45 = vadd.f32 %v13816_v25, %v13309_v35  ;;  %4182 = vmatmul.mubr.bf16.gmra.mrb[128].mxu1 %v3844_v33  ;;  %v13943_v40 = vadd.f32 %v13825_v2, %v13299_v4 }
 0x7e4   : > { %10791 = vtanh.f32 %v3557_v8  ;;  %v3368_v38 = vmul.f32 %v3304_v23, %v13916_v6  ;;  %v3370_v5 = vmul.f32 %v3306_v3, %v13920_v51  ;;  %v3846_v34 = vpack.c.bf16 %v3802_v15, %v3798_v32 }
 0x7e5   : > { %10793 = vtanh.f32 %v3559_v19  ;;  %v3369_v30 = vmul.f32 %v3305_v56, %v13926_v13  ;;  %v3307_v11 = vmul.f32 %v13937_v45, %v13937_v45  ;;  %v3308_v16 = vmul.f32 %v13943_v40, %v13943_v40 }
 0x7e6   : > { %v3432_v26 = vmul.f32 0.044715, %v3368_v38  ;;  %v3434_v25 = vmul.f32 0.044715, %v3370_v5  ;;  %v13952_v31 = vadd.f32 %v13827_v42, %v13302_v44  ;;  %4279 = vmatmul.mubr.bf16.gmra.mrb[160].mxu0 %v3846_v34  ;;  %v3677_v55 = vadd.f32 1.0, %v13866_v58 }
 0x7e7   : > { %v3433_v29 = vmul.f32 0.044715, %v3369_v30  ;;  %v3371_v2 = vmul.f32 %v3307_v11, %v13937_v45  ;;  %v3681_v48 = vadd.f32 1.0, %v13888_v17  ;;  %v3372_v27 = vmul.f32 %v3308_v16, %v13943_v40 }
 0x7e8   : > { %v13957_v43 = vpop.eup %10787  ;;  %v3496_v47 = vadd.f32 %v3432_v26, %v13916_v6  ;;  %v3498_v20 = vadd.f32 %v3434_v25, %v13920_v51  ;;  %v3310_v42 = vmul.f32 %v13952_v31, %v13952_v31  ;;  %v3741_v61 = vmul.f32 0.5, %v3677_v55 }
 0x7e9   : > { %v13964_v18 = vpop.eup %10789  ;;  %v3497_v49 = vadd.f32 %v3433_v29, %v13926_v13  ;;  %v3435_v54 = vmul.f32 0.044715, %v3371_v2  ;;  %v3745_v58 = vmul.f32 0.5, %v3681_v48  ;;  %v3436_v32 = vmul.f32 0.044715, %v3372_v27 }
 0x7ea   : > { %v3560_v0 = vmul.f32 0.7978846, %v3496_v47  ;;  %v3562_v17 = vmul.f32 0.7978846, %v3498_v20  ;;  %v3374_v8 = vmul.f32 %v3310_v42, %v13952_v31  ;;  %v3805_v3 = vmul.f32 %v3741_v61, %v13737_v63 }
 0x7eb   : > { %v3561_v33 = vmul.f32 0.7978846, %v3497_v49  ;;  %v3499_v23 = vadd.f32 %v3435_v54, %v13937_v45  ;;  %v3809_v19 = vmul.f32 %v3745_v58, %v13774_v37  ;;  %v3500_v15 = vadd.f32 %v3436_v32, %v13943_v40 }
 0x7ec   : > { %10795 = vtanh.f32 %v3560_v0  ;;  %v3438_v56 = vmul.f32 0.044715, %v3374_v8  ;;  %v3679_v38 = vadd.f32 1.0, %v13873_v9  ;;  %v3683_v30 = vadd.f32 1.0, %v13900_v53 }
 0x7ed   : > { %10797 = vtanh.f32 %v3562_v17  ;;  %v3563_v5 = vmul.f32 0.7978846, %v3499_v23  ;;  %v3849_v34 = vpack.c.bf16 %v3809_v19, %v3805_v3  ;;  %v3564_v26 = vmul.f32 0.7978846, %v3500_v15 }
 0x7ee   : > { %v10792_v11 = vpop.eup %10791  ;;  %10799 = vtanh.f32 %v3561_v33  ;;  %v3502_v25 = vadd.f32 %v3438_v56, %v13952_v31  ;;  %v3743_v16 = vmul.f32 0.5, %v3679_v38  ;;  %v3747_v37 = vmul.f32 0.5, %v3683_v30  ;;  %v17211_v56 = vld [vmem:[#allocation7_spill] sm:$0xff] }
 0x7ef   : > { %v10794_v63 = vpop.eup %10793  ;;  %10801 = vtanh.f32 %v3563_v5  ;;  %4189 = vmatprep.mubr.bf16.mxu1 %v3849_v34  ;;  %v13977_v29 = vadd.f32 %v13831_v39, %v13305_v50  ;;  %v13981_v9 = vadd.f32 %v13833_v62, %v13309_v35  ;;  %v3676_v55 = vadd.f32 1.0, %v13853_v52 }
 0x7f0   : > { %10803 = vtanh.f32 %v3564_v26  ;;  %v3566_v53 = vmul.f32 0.7978846, %v3502_v25  ;;  %v3807_v2 = vmul.f32 %v3743_v16, %v13746_v59  ;;  %v3811_v48 = vmul.f32 %v3747_v37, %v13789_v12 }
 0x7f1   : > { %v3309_v47 = vmul.f32 %v13977_v29, %v13977_v29  ;;  %v3311_v20 = vmul.f32 %v13981_v9, %v13981_v9  ;;  %v3680_v39 = vadd.f32 1.0, %v13877_v28  ;;  %v3740_v27 = vmul.f32 0.5, %v3676_v55 }
 0x7f2   : > { %10805 = vtanh.f32 %v3566_v53  ;;  %v3678_v62 = vadd.f32 1.0, %v13860_v46  ;;  %v3682_v42 = vadd.f32 1.0, %v13881_v1  ;;  %v3851_v49 = vpack.c.bf16 %v3811_v48, %v3807_v2 }
 0x7f3   : > { %v3373_v59 = vmul.f32 %v3309_v47, %v13977_v29  ;;  %v3375_v52 = vmul.f32 %v3311_v20, %v13981_v9  ;;  %v3744_v12 = vmul.f32 0.5, %v3680_v39  ;;  %v3804_v54 = vmul.f32 %v3740_v27, %v13723_v36 }
 0x7f4   : > { %v3742_v61 = vmul.f32 0.5, %v3678_v62  ;;  %v3746_v58 = vmul.f32 0.5, %v3682_v42  ;;  %v13998_v0 = vadd.f32 %v13838_v60, %v13299_v4  ;;  %4286 = vmatprep.mubr.bf16.mxu0 %v3851_v49  ;;  %v14003_v1 = vadd.f32 %v13840_v21, %v13302_v44  ;;  %v17210_v4 = vld [vmem:[#allocation6_spill] sm:$0xff] }
 0x7f5   : > { %v3437_v28 = vmul.f32 0.044715, %v3373_v59  ;;  %v3439_v17 = vmul.f32 0.044715, %v3375_v52  ;;  %v3808_v46 = vmul.f32 %v3744_v12, %v13750_v22  ;;  %v14011_v60 = vadd.f32 %v17210_v4, %v13305_v50 }
 0x7f6   : > { %v10796_v32 = vpop.eup %10795  ;;  %v3806_v8 = vmul.f32 %v3742_v61, %v13728_v14  ;;  %v3810_v36 = vmul.f32 %v3746_v58, %v13767_v10  ;;  %v3312_v33 = vmul.f32 %v13998_v0, %v13998_v0  ;;  %v3314_v44 = vmul.f32 %v14003_v1, %v14003_v1 }
 0x7f7   : > { %v10798_v23 = vpop.eup %10797  ;;  %v3501_v3 = vadd.f32 %v3437_v28, %v13977_v29  ;;  %v3503_v22 = vadd.f32 %v3439_v17, %v13981_v9  ;;  %v3848_v19 = vpack.c.bf16 %v3808_v46, %v3804_v54  ;;  %v3313_v15 = vmul.f32 %v14011_v60, %v14011_v60 }
 0x7f8   : > { %v10800_v21 = vpop.eup %10799  ;;  %v3850_v14 = vpack.c.bf16 %v3810_v36, %v3806_v8  ;;  %v3376_v10 = vmul.f32 %v3312_v33, %v13998_v0  ;;  %v14022_v50 = vadd.f32 %v17211_v56, %v13309_v35  ;;  %v3378_v30 = vmul.f32 %v3314_v44, %v14003_v1 }
 0x7f9   : > { %v10802_v38 = vpop.eup %10801  ;;  %v3565_v5 = vmul.f32 0.7978846, %v3501_v3  ;;  %v3567_v34 = vmul.f32 0.7978846, %v3503_v22  ;;  %4190 = vmatmul.mubr.bf16.gmra.mrb[132].mxu1 %v3848_v19  ;;  %v3685_v26 = vadd.f32 1.0, %v10792_v11  ;;  %v3377_v37 = vmul.f32 %v3313_v15, %v14011_v60 }
 0x7fa   : > { %v10804_v25 = vpop.eup %10803  ;;  %4287 = vmatmul.mubr.bf16.gmra.mrb[164].mxu0 %v3850_v14  ;;  %v3440_v16 = vmul.f32 0.044715, %v3376_v10  ;;  %v3315_v53 = vmul.f32 %v14022_v50, %v14022_v50  ;;  %v3689_v2 = vadd.f32 1.0, %v10800_v21  ;;  %v3442_v55 = vmul.f32 0.044715, %v3378_v30 }
 0x7fb   : > { %10807 = vtanh.f32 %v3565_v5  ;;  %v3749_v35 = vmul.f32 0.5, %v3685_v26  ;;  %v3687_v48 = vadd.f32 1.0, %v10794_v63  ;;  %v3441_v39 = vmul.f32 0.044715, %v3377_v37 }
 0x7fc   : > { %v10806_v47 = vpop.eup %10805  ;;  %10809 = vtanh.f32 %v3567_v34  ;;  %v3504_v20 = vadd.f32 %v3440_v16, %v13998_v0  ;;  %v3379_v11 = vmul.f32 %v3315_v53, %v14022_v50  ;;  %v3506_v27 = vadd.f32 %v3442_v55, %v14003_v1 }
 0x7fd   : > { %v3753_v62 = vmul.f32 0.5, %v3689_v2  ;;  %v3813_v42 = vmul.f32 %v3749_v35, %v13886_v57  ;;  %v3691_v49 = vadd.f32 1.0, %v10802_v38  ;;  %v3505_v52 = vadd.f32 %v3441_v39, %v14011_v60 }
 0x7fe   : > { %v3568_v59 = vmul.f32 0.7978846, %v3504_v20  ;;  %v3443_v12 = vmul.f32 0.044715, %v3379_v11  ;;  %v3751_v54 = vmul.f32 0.5, %v3687_v48  ;;  %v3684_v28 = vadd.f32 1.0, %v13957_v43 }
 0x7ff   : > { %v3570_v61 = vmul.f32 0.7978846, %v3506_v27  ;;  %v3817_v63 = vmul.f32 %v3753_v62, %v13926_v13  ;;  %v3755_v58 = vmul.f32 0.5, %v3691_v49  ;;  %v3569_v17 = vmul.f32 0.7978846, %v3505_v52 }
 0x800   : > { %10811 = vtanh.f32 %v3568_v59  ;;  %v3507_v46 = vadd.f32 %v3443_v12, %v14022_v50  ;;  %v3815_v8 = vmul.f32 %v3751_v54, %v13893_v24  ;;  %v3688_v33 = vadd.f32 1.0, %v10796_v32 }
 0x801   : > { %10813 = vtanh.f32 %v3570_v61  ;;  %v3853_v57 = vpack.c.bf16 %v3817_v63, %v3813_v42  ;;  %v3819_v36 = vmul.f32 %v3755_v58, %v13937_v45  ;;  %v3748_v3 = vmul.f32 0.5, %v3684_v28 }
 0x802   : > { %10815 = vtanh.f32 %v3569_v17  ;;  %v3571_v4 = vmul.f32 0.7978846, %v3507_v46  ;;  %v3686_v22 = vadd.f32 1.0, %v13964_v18  ;;  %v3752_v19 = vmul.f32 0.5, %v3688_v33 }
 0x803   : > { %4197 = vmatprep.mubr.bf16.mxu1 %v3853_v57  ;;  %v3855_v13 = vpack.c.bf16 %v3819_v36, %v3815_v8  ;;  %v3690_v43 = vadd.f32 1.0, %v10798_v23  ;;  %v3812_v24 = vmul.f32 %v3748_v3, %v13851_v7  ;;  %v3692_v32 = vadd.f32 1.0, %v10804_v25 }
 0x804   : > { %10817 = vtanh.f32 %v3571_v4  ;;  %v3750_v44 = vmul.f32 0.5, %v3686_v22  ;;  %v3816_v14 = vmul.f32 %v3752_v19, %v13916_v6  ;;  %v3694_v38 = vadd.f32 1.0, %v10806_v47  ;;  %v17213_v22 = vld [vmem:[#allocation27_spill] sm:$0xff]  ;;  %v17214_v19 = vld [vmem:[#allocation28_spill] sm:$0xff] }
 0x805   : > { %v10808_v21 = vpop.eup %10807  ;;  %4294 = vmatprep.mubr.bf16.mxu0 %v3855_v13  ;;  %v3754_v10 = vmul.f32 0.5, %v3690_v43  ;;  %v3756_v30 = vmul.f32 0.5, %v3692_v32 }
 0x806   : > { %v10810_v45 = vpop.eup %10809  ;;  %v3852_v15 = vpack.c.bf16 %v3816_v14, %v3812_v24  ;;  %v3814_v56 = vmul.f32 %v3750_v44, %v13858_v41  ;;  %v3693_v23 = vadd.f32 1.0, %v10808_v21  ;;  %v3758_v53 = vmul.f32 0.5, %v3694_v38 }
 0x807   : > { %v3818_v18 = vmul.f32 %v3754_v10, %v13920_v51  ;;  %v3695_v16 = vadd.f32 1.0, %v10810_v45  ;;  %v3820_v41 = vmul.f32 %v3756_v30, %v13943_v40  ;;  %v9015_v30 = vld [vmem:[%s16884_s2 + $0x220] sm:$0xff] }
 0x808   : > { %4198 = vmatmul.mubr.bf16.gmra.mrb[136].mxu1 %v3852_v15  ;;  %v3757_v25 = vmul.f32 0.5, %v3693_v23  ;;  %v3822_v11 = vmul.f32 %v3758_v53, %v13952_v31 }
 0x809   : > { %v3854_v5 = vpack.c.bf16 %v3818_v18, %v3814_v56  ;;  %v3759_v20 = vmul.f32 0.5, %v3695_v16 }
 0x80a   : > { %v10812_v34 = vpop.eup %10811  ;;  %v3821_v62 = vmul.f32 %v3757_v25, %v13977_v29  ;;  %v14055_v29 = vld [vmem:[%s16887_s5 + $0x7] ss:$0 sm:$0xff]  ;;  %v17215_v25 = vld [vmem:[#allocation30_spill] sm:$0xff] }
 0x80b   : > { %v10814_v26 = vpop.eup %10813  ;;  %4295 = vmatmul.mubr.bf16.gmra.mrb[168].mxu0 %v3854_v5  ;;  %v3696_v7 = vadd.f32 1.0, %v10812_v34  ;;  %v3823_v40 = vmul.f32 %v3759_v20, %v13981_v9  ;;  %v9013_v34 = vld [vmem:[%s16884_s2 + $0x200] sm:$0xff] }
 0x80c   : > { %v10816_v37 = vpop.eup %10815  ;;  %v3698_v6 = vadd.f32 1.0, %v10814_v26  ;;  %v9046_v16 = vcombine.low %v9013_v34, %v9015_v30 }
 0x80d   : > { %v3697_v2 = vadd.f32 1.0, %v10816_v37  ;;  %v3760_v55 = vmul.f32 0.5, %v3696_v7  ;;  %v9047_v7 = vcombine.high %v9013_v34, %v9015_v30  ;;  %v9033_v34 = vld [vmem:[%s16884_s2 + $0x340] sm:$0xff] }
 0x80e   : > { %v10818_v35 = vpop.eup %10817  ;;  %v3762_v51 = vmul.f32 0.5, %v3698_v6  ;;  %v9035_v30 = vld [vmem:[%s16884_s2 + $0x360] sm:$0xff] }
 0x80f   : > { %v3761_v48 = vmul.f32 0.5, %v3697_v2  ;;  %v3699_v47 = vadd.f32 1.0, %v10818_v35  ;;  %v3824_v39 = vmul.f32 %v3760_v55, %v13998_v0  ;;  %v17212_v0 = vmov 0   ;;  %4772 = vmatprep.subr.bf16.mxu1 %v9047_v7  ;;  %v17216_v35 = vld [vmem:[#allocation31_spill] sm:$0xff]  ;;  %v9026_v7 = vld [vmem:[%s16884_s2 + $0x2c8] sm:$0xf] }
 0x810   : > { %v3826_v27 = vmul.f32 %v3762_v51, %v14003_v1  ;;  %4773 = vmatpush1.bf16.msra.mxu1 %v9046_v16 }
 0x811   : > { %v3825_v42 = vmul.f32 %v3761_v48, %v14011_v60  ;;  %v3763_v49 = vmul.f32 0.5, %v3699_v47  ;;  %v3856_v59 = vpack.c.bf16 %v3824_v39, %v3820_v41 }
 0x812   : > { %v3858_v52 = vpack.c.bf16 %v3826_v27, %v3822_v11 }
 0x813   : > { %v3857_v12 = vpack.c.bf16 %v3825_v42, %v3821_v62  ;;  %v3827_v54 = vmul.f32 %v3763_v49, %v14022_v50 }
 0x815   : > { %4205 = vmatprep.mubr.bf16.mxu1 %v3857_v12  ;;  %v3859_v61 = vpack.c.bf16 %v3827_v54, %v3823_v40  ;;  %v9017_v40 = vld [vmem:[%s16884_s2 + $0x240] sm:$0xff] }
 0x816   : > { %4206 = vmatmul.mubr.bf16.gmra.mrb[140].mxu1 %v3856_v59  ;;  %v9019_v54 = vld [vmem:[%s16884_s2 + $0x260] sm:$0xff] }
 0x817   : > { %4302 = vmatprep.mubr.bf16.mxu0 %v3859_v61  ;;  %4804 = vmatprep.mubr.bf16.mxu1 %v17212_v0 }
 0x818   : > { %4303 = vmatmul.mubr.bf16.gmra.mrb[172].mxu0 %v3858_v52 }
 0x869   : > { %v9514_v31 = vpop.f32.mrb[112].mxu1 }
 0x86a   : > { %v9515_v1 = vpop.f32.mrb[113].mxu1 }
 0x86b   : > { %v9516_v60 = vadd.f32 %v9515_v1, %v9514_v31  ;;  %v9517_v63 = vpop.f32.mrb[114].mxu1  ;;  %v9049_v31 = vcombine.low %v9017_v40, %v9019_v54  ;;  %v9050_v1 = vcombine.high %v9017_v40, %v9019_v54 }
 0x86c   : > { %v9518_v58 = vpop.f32.mrb[115].mxu1 }
 0x86d   : > { %v9519_v9 = vadd.f32 %v9518_v58, %v9517_v63  ;;  %v4152_v50 = vadd.f32 %v9516_v60, %v14055_v29  ;;  %4774 = vmatprep.subr.bf16.mxu1 %v9050_v1  ;;  %v9043_v1 = vld [vmem:[%s16884_s2 + $0x3e0] sm:$0xff] }
 0x86e   : > { %v9578_v28 = vpop.f32.mrb[144].mxu0  ;;  %4775 = vmatpush1.bf16.msra.mxu1 %v9049_v31  ;;  %v9041_v31 = vld [vmem:[%s16884_s2 + $0x3c0] sm:$0xff] }
 0x86f   : > { %v9579_v17 = vpop.f32.mrb[145].mxu0  ;;  %v4155_v57 = vadd.f32 %v9519_v9, %v14055_v29  ;;  %v9021_v9 = vld [vmem:[%s16884_s2 + $0x280] sm:$0xff] }
 0x870   : > { %v9580_v46 = vadd.f32 %v9579_v17, %v9578_v28  ;;  %v9581_v8 = vpop.f32.mrb[146].mxu0  ;;  %v9023_v28 = vld [vmem:[%s16884_s2 + $0x2a0] sm:$0xff] }
 0x871   : > { %v9582_v36 = vpop.f32.mrb[147].mxu0  ;;  %v9053_v17 = vcombine.high %v9021_v9, %v9023_v28 }
 0x872   : > { %v4249_v33 = vadd.f32 %v9580_v46, %v4152_v50  ;;  %v9583_v4 = vadd.f32 %v9582_v36, %v9581_v8  ;;  %v9014_v50 = vld [vmem:[%s16884_s2 + $0x208] sm:$0xf] }
 0x873   : > { %v9016_v46 = vld [vmem:[%s16884_s2 + $0x228] sm:$0xf]  ;;  %4776 = vmatprep.subr.bf16.mxu1 %v9053_v17  ;;  %v9068_v17 = vcombine.high %v9041_v31, %v9043_v1 }
 0x874   : > { %v4252_v3 = vadd.f32 %v9583_v4, %v4155_v57  ;;  %v14060_v13 = vadd.f32 %v4249_v33, %v17213_v22  ;;  %v17217_v57 = vld [vmem:[#allocation29_spill] sm:$0xff]  ;;  %v9052_v33 = vcombine.low %v9021_v9, %v9023_v28  ;;  %v9048_v4 = vcombine.low %v9014_v50, %v9016_v46 }
 0x876   : > { %4329 = vadd.xlane.f32.xlu0 %v14060_v13  ;;  %v14064_v43 = vadd.f32 %v4252_v3, %v17214_v19  ;;  %v4377_v44 = vmul.f32 %v14060_v13, %v14060_v13  ;;  %v17218_v3 = vld [vmem:[#allocation33_spill] sm:$0xff]  ;;  %10074 = vmatprep.subr.bf16.mxu0 %v9048_v4 }
 0x877   : > { %10075 = vmatpush3.bf16.msra.mxu0 %v9048_v4  ;;  %4777 = vmatpush1.bf16.msra.mxu1 %v9052_v33  ;;  %v9038_v4 = vld [vmem:[%s16884_s2 + $0x388] sm:$0xf] }
 0x878   : > { %4331 = vadd.xlane.f32.xlu1 %v14064_v43  ;;  %v4378_v21 = vmul.f32 %v14064_v43, %v14064_v43 }
 0x87a   : > { %4393 = vadd.xlane.f32.xlu0 %v4377_v44 }
 0x87c   : > { %4395 = vadd.xlane.f32.xlu1 %v4378_v21  ;;  %v9025_v21 = vld [vmem:[%s16884_s2 + $0x2c0] sm:$0xff] }
 0x880   : > { %v9520_v24 = vpop.f32.mrb[116].mxu1 }
 0x881   : > { %v9521_v14 = vpop.f32.mrb[117].mxu1 }
 0x882   : > { %v9584_v10 = vpop.f32.mrb[148].mxu0  ;;  %v9522_v45 = vadd.f32 %v9521_v14, %v9520_v24  ;;  %v9523_v32 = vpop.f32.mrb[118].mxu1  ;;  %v9027_v24 = vld [vmem:[%s16884_s2 + $0x2e0] sm:$0xff]  ;;  %v9018_v14 = vld [vmem:[%s16884_s2 + $0x248] sm:$0xf] }
 0x883   : > { %v9585_v15 = vpop.f32.mrb[149].mxu0  ;;  %v9524_v56 = vpop.f32.mrb[119].mxu1 }
 0x884   : > { %v4160_v18 = vadd.f32 %v9522_v45, %v14055_v29  ;;  %v9586_v38 = vadd.f32 %v9585_v15, %v9584_v10  ;;  %v9587_v5 = vpop.f32.mrb[150].mxu0  ;;  %v9525_v23 = vadd.f32 %v9524_v56, %v9523_v32  ;;  %v9055_v10 = vcombine.low %v9025_v21, %v9027_v24  ;;  %v9020_v32 = vld [vmem:[%s16884_s2 + $0x268] sm:$0xf]  ;;  %v9029_v56 = vld [vmem:[%s16884_s2 + $0x300] sm:$0xff] }
 0x885   : > { %v9588_v26 = vpop.f32.mrb[151].mxu0  ;;  %v9056_v45 = vcombine.high %v9025_v21, %v9027_v24  ;;  %v9051_v15 = vcombine.low %v9018_v14, %v9020_v32  ;;  %v9067_v21 = vcombine.low %v9041_v31, %v9043_v1 }
 0x886   : > { %v4257_v37 = vadd.f32 %v9586_v38, %v4160_v18  ;;  %v4163_v6 = vadd.f32 %v9525_v23, %v14055_v29  ;;  %v9589_v53 = vadd.f32 %v9588_v26, %v9587_v5  ;;  %v9031_v18 = vld [vmem:[%s16884_s2 + $0x320] sm:$0xff]  ;;  %v9022_v38 = vld [vmem:[%s16884_s2 + $0x288] sm:$0xf] }
 0x887   : > { %4778 = vmatprep.subr.bf16.mxu1 %v9056_v45  ;;  %v9059_v5 = vcombine.high %v9029_v56, %v9031_v18  ;;  %v9024_v23 = vld [vmem:[%s16884_s2 + $0x2a8] sm:$0xf]  ;;  %10076 = vmatprep.subr.bf16.mxu0 %v9051_v15  ;;  %v9058_v26 = vcombine.low %v9029_v56, %v9031_v18 }
 0x888   : > { %v4260_v2 = vadd.f32 %v9589_v53, %v4163_v6  ;;  %v14080_v55 = vadd.f32 %v4257_v37, %v17215_v25  ;;  %4779 = vmatpush1.bf16.msra.mxu1 %v9055_v10  ;;  %v9054_v16 = vcombine.low %v9022_v38, %v9024_v23  ;;  %v9028_v37 = vld [vmem:[%s16884_s2 + $0x2e8] sm:$0xf]  ;;  %10077 = vmatpush3.bf16.msra.mxu0 %v9051_v15  ;;  %v9037_v25 = vld [vmem:[%s16884_s2 + $0x380] sm:$0xff] }
 0x889   : > { %4780 = vmatprep.subr.bf16.mxu1 %v9059_v5  ;;  %v9062_v6 = vcombine.high %v9033_v34, %v9035_v30  ;;  %v9042_v5 = vld [vmem:[%s16884_s2 + $0x3c8] sm:$0xf] }
 0x88a   : > { %4333 = vadd.xlane.f32.xlu0 %v14080_v55  ;;  %v14084_v41 = vadd.f32 %v4260_v2, %v17216_v35  ;;  %v4379_v51 = vmul.f32 %v14080_v55, %v14080_v55  ;;  %10078 = vmatprep.subr.bf16.mxu0 %v9054_v16  ;;  %v9057_v2 = vcombine.low %v9026_v7, %v9028_v37  ;;  %v9039_v35 = vld [vmem:[%s16884_s2 + $0x3a0] sm:$0xff]  ;;  %v9044_v23 = vld [vmem:[%s16884_s2 + $0x3e8] sm:$0xf] }
 0x88b   : > { %v9064_v50 = vcombine.low %v9037_v25, %v9039_v35 }
 0x88c   : > { %4335 = vadd.xlane.f32.xlu1 %v14084_v41  ;;  %v4380_v48 = vmul.f32 %v14084_v41, %v14084_v41  ;;  %4781 = vmatpush1.bf16.msra.mxu1 %v9058_v26 }
 0x88d   : > { %10079 = vmatpush3.bf16.msra.mxu0 %v9054_v16  ;;  %4782 = vmatprep.subr.bf16.mxu1 %v9062_v6  ;;  %v9069_v16 = vcombine.low %v9042_v5, %v9044_v23 }
 0x88e   : > { %4397 = vadd.xlane.f32.xlu0 %v4379_v51  ;;  %10080 = vmatprep.subr.bf16.mxu0 %v9057_v2 }
 0x890   : > { %4399 = vadd.xlane.f32.xlu1 %v4380_v48 }
 0x891   : > { %10081 = vmatpush3.bf16.msra.mxu0 %v9057_v2 }
 0x896   : > { %v9526_v47 = vpop.f32.mrb[120].mxu1 }
 0x897   : > { %v9527_v20 = vpop.f32.mrb[121].mxu1  ;;  %v9590_v39 = vpop.f32.mrb[152].mxu0 }
 0x898   : > { %v9528_v11 = vadd.f32 %v9527_v20, %v9526_v47  ;;  %v9529_v27 = vpop.f32.mrb[122].mxu1  ;;  %v9591_v62 = vpop.f32.mrb[153].mxu0  ;;  %v9030_v47 = vld [vmem:[%s16884_s2 + $0x308] sm:$0xf] }
 0x899   : > { %v9530_v42 = vpop.f32.mrb[123].mxu1  ;;  %v9592_v59 = vadd.f32 %v9591_v62, %v9590_v39  ;;  %v9593_v52 = vpop.f32.mrb[154].mxu0  ;;  %v9032_v20 = vld [vmem:[%s16884_s2 + $0x328] sm:$0xf]  ;;  %v9061_v62 = vcombine.low %v9033_v34, %v9035_v30 }
 0x89a   : > { %v4168_v49 = vadd.f32 %v9528_v11, %v14055_v29  ;;  %v9531_v12 = vadd.f32 %v9530_v42, %v9529_v27  ;;  %v9594_v61 = vpop.f32.mrb[155].mxu0 }
 0x89b   : > { %v9595_v58 = vadd.f32 %v9594_v61, %v9593_v52  ;;  %v9065_v52 = vcombine.high %v9037_v25, %v9039_v35  ;;  %v9060_v61 = vcombine.low %v9030_v47, %v9032_v20  ;;  %4783 = vmatpush1.bf16.msra.mxu1 %v9061_v62  ;;  %v17222_v47 = vld [vmem:[#allocation35_spill] sm:$0xff] }
 0x89c   : > { %v4265_v60 = vadd.f32 %v9592_v59, %v4168_v49  ;;  %v4171_v63 = vadd.f32 %v9531_v12, %v14055_v29 }
 0x89d   : > { %4784 = vmatprep.subr.bf16.mxu1 %v9065_v52  ;;  %10082 = vmatprep.subr.bf16.mxu0 %v9060_v61 }
 0x89e   : > { %v4268_v8 = vadd.f32 %v9595_v58, %v4171_v63  ;;  %v14112_v36 = vadd.f32 %v4265_v60, %v17217_v57  ;;  %v9034_v63 = vld [vmem:[%s16884_s2 + $0x348] sm:$0xf]  ;;  %10083 = vmatpush3.bf16.msra.mxu0 %v9060_v61 }
 0x89f   : > { %v9036_v58 = vld [vmem:[%s16884_s2 + $0x368] sm:$0xf]  ;;  %4785 = vmatpush1.bf16.msra.mxu1 %v9064_v50 }
 0x8a0   : > { %4337 = vadd.xlane.f32.xlu0 %v14112_v36  ;;  %v14116_v22 = vadd.f32 %v4268_v8, %v17218_v3  ;;  %v4381_v19 = vmul.f32 %v14112_v36, %v14112_v36  ;;  %v17219_v8 = vld [vmem:[#allocation36_spill] sm:$0xff]  ;;  %v9063_v33 = vcombine.low %v9034_v63, %v9036_v58  ;;  %4786 = vmatprep.subr.bf16.mxu1 %v9068_v17  ;;  %v17224_v17 = vld [vmem:[#allocation43_spill] sm:$0xff] }
 0x8a1   : > { %v9040_v3 = vld [vmem:[%s16884_s2 + $0x3a8] sm:$0xf] }
 0x8a2   : > { %4339 = vadd.xlane.f32.xlu1 %v14116_v22  ;;  %v4382_v44 = vmul.f32 %v14116_v22, %v14116_v22  ;;  %10084 = vmatprep.subr.bf16.mxu0 %v9063_v33  ;;  %v9066_v10 = vcombine.low %v9038_v4, %v9040_v3 }
 0x8a3   : > { %4787 = vmatpush1.bf16.msra.mxu1 %v9067_v21  ;;  %10085 = vmatpush3.bf16.msra.mxu0 %v9063_v33 }
 0x8a4   : > { %4401 = vadd.xlane.f32.xlu0 %v4381_v19  ;;  %v17220_v19 = vld [vmem:[#allocation41_spill] sm:$0xff]  ;;  %10086 = vmatprep.subr.bf16.mxu0 %v9066_v10 }
 0x8a6   : > { %4403 = vadd.xlane.f32.xlu1 %v4382_v44 }
 0x8a7   : > { %10087 = vmatpush3.bf16.msra.mxu0 %v9066_v10 }
 0x8a8   : > { %10088 = vmatprep.subr.bf16.mxu0 %v9069_v16 }
 0x8ab   : > { %v9532_v53 = vpop.f32.mrb[124].mxu1  ;;  %10089 = vmatpush3.bf16.msra.mxu0 %v9069_v16  ;;  %v17226_v16 = vld [vmem:[#allocation39_spill] sm:$0xff] }
 0x8ac   : > { %v9596_v51 = vpop.f32.mrb[156].mxu0  ;;  %v9533_v48 = vpop.f32.mrb[125].mxu1 }
 0x8ad   : > { %v9534_v39 = vadd.f32 %v9533_v48, %v9532_v53  ;;  %v9597_v11 = vpop.f32.mrb[157].mxu0  ;;  %v9535_v27 = vpop.f32.mrb[126].mxu1 }
 0x8ae   : > { %v9598_v42 = vadd.f32 %v9597_v11, %v9596_v51  ;;  %v9599_v49 = vpop.f32.mrb[158].mxu0  ;;  %v9536_v59 = vpop.f32.mrb[127].mxu1  ;;  %v17221_v51 = vld [vmem:[#allocation32_spill] sm:$0xff] }
 0x8af   : > { %v4176_v12 = vadd.f32 %v9534_v39, %v14055_v29  ;;  %v9537_v40 = vadd.f32 %v9536_v59, %v9535_v27  ;;  %v9600_v54 = vpop.f32.mrb[159].mxu0 }
 0x8b0   : > { %v9601_v60 = vadd.f32 %v9600_v54, %v9599_v49 }
 0x8b1   : > { %v4273_v9 = vadd.f32 %v9598_v42, %v4176_v12  ;;  %v4179_v28 = vadd.f32 %v9537_v40, %v14055_v29 }
 0x8b3   : > { %v4276_v46 = vadd.f32 %v9601_v60, %v4179_v28  ;;  %v14186_v57 = vadd.f32 %v4273_v9, %v17219_v8  ;;  %v17223_v28 = vld [vmem:[#allocation42_spill] sm:$0xff] }
 0x8b5   : > { %4341 = vadd.xlane.f32.xlu0 %v14186_v57  ;;  %v14196_v44 = vadd.f32 %v4276_v46, %v17220_v19  ;;  %v4383_v24 = vmul.f32 %v14186_v57, %v14186_v57 }
 0x8b6   : > { %v9538_v14 = vpop.f32.mrb[128].mxu1 }
 0x8b7   : > { %4343 = vadd.xlane.f32.xlu1 %v14196_v44  ;;  %v9539_v45 = vpop.f32.mrb[129].mxu1  ;;  %v4384_v32 = vmul.f32 %v14196_v44, %v14196_v44 }
 0x8b8   : > { %v9540_v15 = vadd.f32 %v9539_v45, %v9538_v14  ;;  %v9541_v56 = vpop.f32.mrb[130].mxu1 }
 0x8b9   : > { %4405 = vadd.xlane.f32.xlu0 %v4383_v24  ;;  %v9602_v18 = vpop.f32.mrb[160].mxu0  ;;  %v9542_v38 = vpop.f32.mrb[131].mxu1 }
 0x8ba   : > { %v4184_v34 = vadd.f32 %v9540_v15, %v14055_v29  ;;  %v9603_v30 = vpop.f32.mrb[161].mxu0  ;;  %v9543_v26 = vadd.f32 %v9542_v38, %v9541_v56 }
 0x8bb   : > { %4407 = vadd.xlane.f32.xlu1 %v4384_v32  ;;  %v9604_v7 = vadd.f32 %v9603_v30, %v9602_v18  ;;  %v9605_v37 = vpop.f32.mrb[162].mxu0  ;;  %v17225_v30 = vld [vmem:[#allocation34_spill] sm:$0xff] }
 0x8bc   : > { %v4187_v6 = vadd.f32 %v9543_v26, %v14055_v29  ;;  %v9606_v53 = vpop.f32.mrb[163].mxu0 }
 0x8bd   : > { %v4281_v2 = vadd.f32 %v9604_v7, %v4184_v34  ;;  %v9607_v25 = vadd.f32 %v9606_v53, %v9605_v37 }
 0x8bf   : > { %v4284_v35 = vadd.f32 %v9607_v25, %v4187_v6  ;;  %v14212_v48 = vadd.f32 %v4281_v2, %v17221_v51 }
 0x8c1   : > { %4345 = vadd.xlane.f32.xlu0 %v14212_v48  ;;  %v14216_v20 = vadd.f32 %v4284_v35, %v17222_v47  ;;  %v4385_v39 = vmul.f32 %v14212_v48, %v14212_v48 }
 0x8c3   : > { %4347 = vadd.xlane.f32.xlu1 %v14216_v20  ;;  %v4386_v11 = vmul.f32 %v14216_v20, %v14216_v20 }
 0x8c5   : > { %4409 = vadd.xlane.f32.xlu0 %v4385_v39 }
 0x8c7   : > { %4411 = vadd.xlane.f32.xlu1 %v4386_v11 }
 0x8cc   : > { %v9544_v27 = vpop.f32.mrb[132].mxu1 }
 0x8cd   : > { %v9608_v62 = vpop.f32.mrb[164].mxu0  ;;  %v9545_v42 = vpop.f32.mrb[133].mxu1 }
 0x8ce   : > { %v9546_v49 = vadd.f32 %v9545_v42, %v9544_v27  ;;  %v9609_v59 = vpop.f32.mrb[165].mxu0  ;;  %v9547_v52 = vpop.f32.mrb[134].mxu1 }
 0x8cf   : > { %v9610_v12 = vadd.f32 %v9609_v59, %v9608_v62  ;;  %v9611_v40 = vpop.f32.mrb[166].mxu0  ;;  %v9548_v54 = vpop.f32.mrb[135].mxu1 }
 0x8d0   : > { %v4192_v61 = vadd.f32 %v9546_v49, %v14055_v29  ;;  %v9549_v31 = vadd.f32 %v9548_v54, %v9547_v52  ;;  %v9612_v1 = vpop.f32.mrb[167].mxu0  ;;  %v17227_v54 = vld [vmem:[#allocation38_spill] sm:$0xff] }
 0x8d1   : > { %v9613_v60 = vadd.f32 %v9612_v1, %v9611_v40 }
 0x8d2   : > { %v4289_v63 = vadd.f32 %v9610_v12, %v4192_v61  ;;  %v4195_v58 = vadd.f32 %v9549_v31, %v14055_v29  ;;  %v17228_v31 = vld [vmem:[#allocation40_spill] sm:$0xff] }
 0x8d4   : > { %v4292_v9 = vadd.f32 %v9613_v60, %v4195_v58  ;;  %v14226_v50 = vadd.f32 %v4289_v63, %v17223_v28 }
 0x8d6   : > { %4349 = vadd.xlane.f32.xlu0 %v14226_v50  ;;  %v14230_v46 = vadd.f32 %v4292_v9, %v17224_v17  ;;  %v4387_v8 = vmul.f32 %v14226_v50, %v14226_v50 }
 0x8d8   : > { %4351 = vadd.xlane.f32.xlu1 %v14230_v46  ;;  %v4388_v33 = vmul.f32 %v14230_v46, %v14230_v46 }
 0x8da   : > { %4413 = vadd.xlane.f32.xlu0 %v4387_v8 }
 0x8db   : > { %v9550_v4 = vpop.f32.mrb[136].mxu1 }
 0x8dc   : > { %4415 = vadd.xlane.f32.xlu1 %v4388_v33  ;;  %v9551_v3 = vpop.f32.mrb[137].mxu1 }
 0x8dd   : > { %v9552_v21 = vadd.f32 %v9551_v3, %v9550_v4  ;;  %v9553_v24 = vpop.f32.mrb[138].mxu1 }
 0x8de   : > { %v9614_v19 = vpop.f32.mrb[168].mxu0  ;;  %v9554_v10 = vpop.f32.mrb[139].mxu1 }
 0x8df   : > { %v9615_v14 = vpop.f32.mrb[169].mxu0  ;;  %v4200_v45 = vadd.f32 %v9552_v21, %v14055_v29  ;;  %v9555_v56 = vadd.f32 %v9554_v10, %v9553_v24 }
 0x8e0   : > { %v9616_v32 = vadd.f32 %v9615_v14, %v9614_v19  ;;  %v9617_v15 = vpop.f32.mrb[170].mxu0 }
 0x8e1   : > { %v9618_v18 = vpop.f32.mrb[171].mxu0  ;;  %v4203_v5 = vadd.f32 %v9555_v56, %v14055_v29 }
 0x8e2   : > { %v4297_v38 = vadd.f32 %v9616_v32, %v4200_v45  ;;  %v9619_v23 = vadd.f32 %v9618_v18, %v9617_v15 }
 0x8e4   : > { %v4300_v34 = vadd.f32 %v9619_v23, %v4203_v5  ;;  %v14240_v26 = vadd.f32 %v4297_v38, %v17225_v30  ;;  %v14269_v5 = vld [vmem:[%s16887_s5 + $0x22] ss:$0 sm:$0xff] }
 0x8e6   : > { %4353 = vadd.xlane.f32.xlu0 %v14240_v26  ;;  %v14244_v7 = vadd.f32 %v4300_v34, %v17226_v16  ;;  %v4389_v37 = vmul.f32 %v14240_v26, %v14240_v26 }
 0x8e8   : > { %4355 = vadd.xlane.f32.xlu1 %v14244_v7  ;;  %v4390_v2 = vmul.f32 %v14244_v7, %v14244_v7 }
 0x8e9   : > { %v9556_v6 = vpop.f32.mrb[140].mxu1 }
 0x8ea   : > { %v9557_v53 = vpop.f32.mrb[141].mxu1  ;;  %4417 = vadd.xlane.f32.xlu0 %v4389_v37 }
 0x8eb   : > { %v9620_v25 = vpop.f32.mrb[172].mxu0  ;;  %v9558_v35 = vadd.f32 %v9557_v53, %v9556_v6  ;;  %v9559_v51 = vpop.f32.mrb[142].mxu1 }
 0x8ec   : > { %v9621_v47 = vpop.f32.mrb[173].mxu0  ;;  %v9560_v39 = vpop.f32.mrb[143].mxu1  ;;  %4419 = vadd.xlane.f32.xlu1 %v4390_v2 }
 0x8ed   : > { %v4208_v11 = vadd.f32 %v9558_v35, %v14055_v29  ;;  %v9622_v27 = vadd.f32 %v9621_v47, %v9620_v25  ;;  %v9623_v62 = vpop.f32.mrb[174].mxu0  ;;  %v9561_v42 = vadd.f32 %v9560_v39, %v9559_v51  ;;  %v14276_v35 = vld [vmem:[%s16887_s5 + $0x23] ss:$0 sm:$0xff] }
 0x8ee   : > { %v9624_v49 = vpop.f32.mrb[175].mxu0 }
 0x8ef   : > { %v4305_v59 = vadd.f32 %v9622_v27, %v4208_v11  ;;  %v4211_v52 = vadd.f32 %v9561_v42, %v14055_v29  ;;  %v9625_v12 = vadd.f32 %v9624_v49, %v9623_v62 }
 0x8f1   : > { %v4308_v40 = vadd.f32 %v9625_v12, %v4211_v52  ;;  %v14254_v61 = vadd.f32 %v4305_v59, %v17227_v54 }
 0x8f3   : > { %4357 = vadd.xlane.f32.xlu0 %v14254_v61  ;;  %v14258_v1 = vadd.f32 %v4308_v40, %v17228_v31  ;;  %v4391_v60 = vmul.f32 %v14254_v61, %v14254_v61 }
 0x8f5   : > { %4359 = vadd.xlane.f32.xlu1 %v14258_v1  ;;  %v4392_v63 = vmul.f32 %v14258_v1, %v14258_v1 }
 0x8f7   : > { %4421 = vadd.xlane.f32.xlu0 %v4391_v60 }
 0x8f9   : > { %4423 = vadd.xlane.f32.xlu1 %v4392_v63 }
 0x903   : > { %v4330_v29 = vpop.xlane.xlu0 %4329 }
 0x904   : > { %v4361_v58 = vmul.f32 0.0078125, %v4330_v29 }
 0x905   : > { %v4332_v9 = vpop.xlane.xlu1 %4331 }
 0x906   : > { %v4362_v28 = vmul.f32 0.0078125, %v4332_v9  ;;  %v4441_v8 = vmul.f32 %v4361_v58, %v4361_v58  ;;  %v4489_v15 = vsub.f32 %v14060_v13, %v4361_v58 }
 0x907   : > { %v4394_v17 = vpop.xlane.xlu0 %4393 }
 0x908   : > { %v4425_v33 = vmul.f32 0.0078125, %v4394_v17  ;;  %v4442_v3 = vmul.f32 %v4362_v28, %v4362_v28  ;;  %v4490_v23 = vsub.f32 %v14064_v43, %v4362_v28 }
 0x909   : > { %v4396_v4 = vpop.xlane.xlu1 %4395 }
 0x90a   : > { %v4457_v19 = vsub.f32 %v4425_v33, %v4441_v8  ;;  %v4426_v21 = vmul.f32 0.0078125, %v4396_v4 }
 0x90c   : > { %v4473_v24 = vmax.f32 %v4457_v19, 0.0  ;;  %v4458_v14 = vsub.f32 %v4426_v21, %v4442_v3 }
 0x90e   : > { %v4505_v10 = vadd.f32 1e-12, %v4473_v24  ;;  %v4474_v45 = vmax.f32 %v4458_v14, 0.0 }
 0x910   : > { %10819 = vrsqrt.f32 %v4505_v10  ;;  %v4506_v32 = vadd.f32 1e-12, %v4474_v45 }
 0x912   : > { %10821 = vrsqrt.f32 %v4506_v32 }
 0x917   : > { %v4334_v56 = vpop.xlane.xlu0 %4333 }
 0x918   : > { %v4363_v38 = vmul.f32 0.0078125, %v4334_v56 }
 0x919   : > { %v4336_v30 = vpop.xlane.xlu1 %4335 }
 0x91a   : > { %v10820_v18 = vpop.eup %10819  ;;  %v4364_v37 = vmul.f32 0.0078125, %v4336_v30  ;;  %v4443_v25 = vmul.f32 %v4363_v38, %v4363_v38  ;;  %v4491_v31 = vsub.f32 %v14080_v55, %v4363_v38 }
 0x91b   : > { %v4537_v34 = vmul.f32 %v10820_v18, %v4489_v15  ;;  %v4398_v53 = vpop.xlane.xlu0 %4397 }
 0x91c   : > { %v10822_v16 = vpop.eup %10821  ;;  %v4427_v13 = vmul.f32 0.0078125, %v4398_v53  ;;  %v4444_v39 = vmul.f32 %v4364_v37, %v4364_v37  ;;  %v4492_v58 = vsub.f32 %v14084_v41, %v4364_v37 }
 0x91d   : > { %v4538_v6 = vmul.f32 %v10822_v16, %v4490_v23  ;;  %v4553_v2 = vmul.f32 %v4537_v34, %v14269_v5  ;;  %v4400_v51 = vpop.xlane.xlu1 %4399 }
 0x91e   : > { %v4459_v43 = vsub.f32 %v4427_v13, %v4443_v25  ;;  %v4428_v11 = vmul.f32 0.0078125, %v4400_v51 }
 0x91f   : > { %v4554_v47 = vmul.f32 %v4538_v6, %v14269_v5  ;;  %v14280_v27 = vadd.f32 %v4553_v2, %v14276_v35 }
 0x920   : > { %v4475_v42 = vmax.f32 %v4459_v43, 0.0  ;;  %v4460_v49 = vsub.f32 %v4428_v11, %v4444_v39 }
 0x921   : > { %17229 = vst [vmem:[#allocation8_spill] sm:$0xff] %v14280_v27  ;;  %v14283_v62 = vadd.f32 %v4554_v47, %v14276_v35 }
 0x922   : > { %v4507_v52 = vadd.f32 1e-12, %v4475_v42  ;;  %v4476_v12 = vmax.f32 %v4460_v49, 0.0 }
 0x923   : > { %17230 = vst [vmem:[#allocation9_spill] sm:$0xff] %v14283_v62  ;;  %v4585_v59 = vpack.c.bf16 %v14283_v62, %v14280_v27 }
 0x924   : > { %10823 = vrsqrt.f32 %v4507_v52  ;;  %v4508_v40 = vadd.f32 1e-12, %v4476_v12 }
 0x925   : > { %4805 = vmatmul.mubr.bf16.vlgmr.msra.gmra.mrb[144].mxu1 %v4585_v59  ;;  %10090 = vmatprep.mubr.bf16.mxu0 %v4585_v59 }
 0x926   : > { %4814 = vmatprep.mubr.bf16.mxu1 %v17212_v0  ;;  %10825 = vrsqrt.f32 %v4508_v40 }
 0x92d   : > { %v4338_v54 = vpop.xlane.xlu0 %4337 }
 0x92e   : > { %v4365_v60 = vmul.f32 0.0078125, %v4338_v54  ;;  %v10824_v63 = vpop.eup %10823 }
 0x92f   : > { %v4340_v29 = vpop.xlane.xlu1 %4339  ;;  %v4539_v28 = vmul.f32 %v10824_v63, %v4491_v31 }
 0x930   : > { %v4366_v9 = vmul.f32 0.0078125, %v4340_v29  ;;  %v10826_v17 = vpop.eup %10825  ;;  %v4445_v33 = vmul.f32 %v4365_v60, %v4365_v60  ;;  %v4493_v30 = vsub.f32 %v14112_v36, %v4365_v60 }
 0x931   : > { %v4402_v8 = vpop.xlane.xlu0 %4401  ;;  %v4540_v3 = vmul.f32 %v10826_v17, %v4492_v58  ;;  %v4555_v21 = vmul.f32 %v4539_v28, %v14269_v5 }
 0x932   : > { %v4429_v4 = vmul.f32 0.0078125, %v4402_v8  ;;  %v4446_v24 = vmul.f32 %v4366_v9, %v4366_v9  ;;  %v4494_v53 = vsub.f32 %v14116_v22, %v4366_v9 }
 0x933   : > { %v4404_v19 = vpop.xlane.xlu1 %4403  ;;  %v4556_v55 = vmul.f32 %v4540_v3, %v14269_v5  ;;  %v14293_v15 = vadd.f32 %v4555_v21, %v14276_v35 }
 0x934   : > { %v4461_v14 = vsub.f32 %v4429_v4, %v4445_v33  ;;  %v4430_v10 = vmul.f32 0.0078125, %v4404_v19 }
 0x935   : > { %17231 = vst [vmem:[#allocation10_spill] sm:$0xff] %v14293_v15  ;;  %v14296_v41 = vadd.f32 %v4556_v55, %v14276_v35 }
 0x936   : > { %v4477_v45 = vmax.f32 %v4461_v14, 0.0  ;;  %v4462_v32 = vsub.f32 %v4430_v10, %v4446_v24 }
 0x937   : > { %17232 = vst [vmem:[#allocation11_spill] sm:$0xff] %v14296_v41  ;;  %v4586_v38 = vpack.c.bf16 %v14296_v41, %v14293_v15 }
 0x938   : > { %v4509_v56 = vadd.f32 1e-12, %v4477_v45  ;;  %v4478_v18 = vmax.f32 %v4462_v32, 0.0 }
 0x939   : > { %4815 = vmatmul.mubr.bf16.gmra.mrb[148].mxu1 %v4586_v38  ;;  %10091 = vmatmul.mubr.bf16.vlgmr.msra.gmra.mrb[176].mxu0 %v4586_v38 }
 0x93a   : > { %10827 = vrsqrt.f32 %v4509_v56  ;;  %v4510_v23 = vadd.f32 1e-12, %v4478_v18  ;;  %4824 = vmatprep.mubr.bf16.mxu1 %v17212_v0 }
 0x93c   : > { %10829 = vrsqrt.f32 %v4510_v23 }
 0x942   : > { %v4342_v34 = vpop.xlane.xlu0 %4341 }
 0x943   : > { %v4367_v16 = vmul.f32 0.0078125, %v4342_v34 }
 0x944   : > { %v10828_v37 = vpop.eup %10827  ;;  %v4344_v6 = vpop.xlane.xlu1 %4343 }
 0x945   : > { %v4368_v2 = vmul.f32 0.0078125, %v4344_v6  ;;  %v4541_v25 = vmul.f32 %v10828_v37, %v4493_v30  ;;  %v4447_v47 = vmul.f32 %v4367_v16, %v4367_v16  ;;  %v4495_v14 = vsub.f32 %v14186_v57, %v4367_v16 }
 0x946   : > { %v10830_v13 = vpop.eup %10829  ;;  %v4406_v51 = vpop.xlane.xlu0 %4405 }
 0x947   : > { %v4431_v39 = vmul.f32 0.0078125, %v4406_v51  ;;  %v4542_v43 = vmul.f32 %v10830_v13, %v4494_v53  ;;  %v4557_v42 = vmul.f32 %v4541_v25, %v14269_v5  ;;  %v4448_v49 = vmul.f32 %v4368_v2, %v4368_v2 }
 0x948   : > { %v4408_v11 = vpop.xlane.xlu1 %4407  ;;  %v4496_v32 = vsub.f32 %v14196_v44, %v4368_v2 }
 0x949   : > { %v4463_v59 = vsub.f32 %v4431_v39, %v4447_v47  ;;  %v4432_v52 = vmul.f32 0.0078125, %v4408_v11  ;;  %v4558_v36 = vmul.f32 %v4542_v43, %v14269_v5  ;;  %v14306_v54 = vadd.f32 %v4557_v42, %v14276_v35 }
 0x94b   : > { %v4479_v12 = vmax.f32 %v4463_v59, 0.0  ;;  %v4464_v40 = vsub.f32 %v4432_v52, %v4448_v49  ;;  %17233 = vst [vmem:[#allocation12_spill] sm:$0xff] %v14306_v54  ;;  %v14309_v22 = vadd.f32 %v4558_v36, %v14276_v35 }
 0x94d   : > { %17234 = vst [vmem:[#allocation13_spill] sm:$0xff] %v14309_v22  ;;  %v4511_v31 = vadd.f32 1e-12, %v4479_v12  ;;  %v4480_v60 = vmax.f32 %v4464_v40, 0.0  ;;  %v4587_v63 = vpack.c.bf16 %v14309_v22, %v14306_v54 }
 0x94e   : > { %v4346_v58 = vpop.xlane.xlu0 %4345 }
 0x94f   : > { %10831 = vrsqrt.f32 %v4511_v31  ;;  %v4512_v29 = vadd.f32 1e-12, %v4480_v60  ;;  %4825 = vmatmul.mubr.bf16.gmra.mrb[152].mxu1 %v4587_v63  ;;  %10094 = vmatprep.mubr.bf16.mxu0 %v4587_v63  ;;  %v4369_v9 = vmul.f32 0.0078125, %v4346_v58 }
 0x950   : > { %4834 = vmatprep.mubr.bf16.mxu1 %v17212_v0  ;;  %v4348_v28 = vpop.xlane.xlu1 %4347 }
 0x951   : > { %10833 = vrsqrt.f32 %v4512_v29  ;;  %v4370_v17 = vmul.f32 0.0078125, %v4348_v28  ;;  %v4449_v33 = vmul.f32 %v4369_v9, %v4369_v9  ;;  %v4497_v25 = vsub.f32 %v14212_v48, %v4369_v9 }
 0x952   : > { %v4410_v8 = vpop.xlane.xlu0 %4409 }
 0x953   : > { %v4433_v4 = vmul.f32 0.0078125, %v4410_v8  ;;  %v4450_v19 = vmul.f32 %v4370_v17, %v4370_v17  ;;  %v4498_v39 = vsub.f32 %v14216_v20, %v4370_v17 }
 0x954   : > { %v4412_v3 = vpop.xlane.xlu1 %4411 }
 0x955   : > { %v4465_v21 = vsub.f32 %v4433_v4, %v4449_v33  ;;  %v4434_v24 = vmul.f32 0.0078125, %v4412_v3 }
 0x957   : > { %v4481_v10 = vmax.f32 %v4465_v21, 0.0  ;;  %v4466_v55 = vsub.f32 %v4434_v24, %v4450_v19 }
 0x959   : > { %v10832_v45 = vpop.eup %10831  ;;  %v4513_v56 = vadd.f32 1e-12, %v4481_v10  ;;  %v4482_v18 = vmax.f32 %v4466_v55, 0.0 }
 0x95a   : > { %v4543_v38 = vmul.f32 %v10832_v45, %v4495_v14 }
 0x95b   : > { %v10834_v23 = vpop.eup %10833  ;;  %10835 = vrsqrt.f32 %v4513_v56  ;;  %v4514_v34 = vadd.f32 1e-12, %v4482_v18 }
 0x95c   : > { %v4544_v30 = vmul.f32 %v10834_v23, %v4496_v32  ;;  %v4559_v37 = vmul.f32 %v4543_v38, %v14269_v5 }
 0x95d   : > { %10837 = vrsqrt.f32 %v4514_v34 }
 0x95e   : > { %v4560_v6 = vmul.f32 %v4544_v30, %v14269_v5  ;;  %v14319_v53 = vadd.f32 %v4559_v37, %v14276_v35 }
 0x960   : > { %17235 = vst [vmem:[#allocation14_spill] sm:$0xff] %v14319_v53  ;;  %v14322_v57 = vadd.f32 %v4560_v6, %v14276_v35 }
 0x962   : > { %17236 = vst [vmem:[#allocation15_spill] sm:$0xff] %v14322_v57  ;;  %v4588_v44 = vpack.c.bf16 %v14322_v57, %v14319_v53 }
 0x963   : > { %v4350_v16 = vpop.xlane.xlu0 %4349 }
 0x964   : > { %v4371_v2 = vmul.f32 0.0078125, %v4350_v16  ;;  %4835 = vmatmul.mubr.bf16.gmra.mrb[156].mxu1 %v4588_v44  ;;  %10095 = vmatmul.mubr.bf16.gmra.mrb[180].mxu0 %v4588_v44 }
 0x965   : > { %v4352_v13 = vpop.xlane.xlu1 %4351  ;;  %4844 = vmatprep.mubr.bf16.mxu1 %v17212_v0  ;;  %v10836_v51 = vpop.eup %10835 }
 0x966   : > { %v4372_v47 = vmul.f32 0.0078125, %v4352_v13  ;;  %v4545_v11 = vmul.f32 %v10836_v51, %v4497_v25  ;;  %v4451_v49 = vmul.f32 %v4371_v2, %v4371_v2  ;;  %v4499_v10 = vsub.f32 %v14226_v50, %v4371_v2 }
 0x967   : > { %v4414_v43 = vpop.xlane.xlu0 %4413  ;;  %v10838_v42 = vpop.eup %10837 }
 0x968   : > { %v4435_v59 = vmul.f32 0.0078125, %v4414_v43  ;;  %v4546_v36 = vmul.f32 %v10838_v42, %v4498_v39  ;;  %v4561_v12 = vmul.f32 %v4545_v11, %v14269_v5  ;;  %v4452_v40 = vmul.f32 %v4372_v47, %v4372_v47 }
 0x969   : > { %v4416_v52 = vpop.xlane.xlu1 %4415  ;;  %v4500_v38 = vsub.f32 %v14230_v46, %v4372_v47 }
 0x96a   : > { %v4467_v31 = vsub.f32 %v4435_v59, %v4451_v49  ;;  %v4436_v60 = vmul.f32 0.0078125, %v4416_v52  ;;  %v4562_v48 = vmul.f32 %v4546_v36, %v14269_v5  ;;  %v14332_v58 = vadd.f32 %v4561_v12, %v14276_v35 }
 0x96c   : > { %v4483_v63 = vmax.f32 %v4467_v31, 0.0  ;;  %v4468_v29 = vsub.f32 %v4436_v60, %v4452_v40  ;;  %17237 = vst [vmem:[#allocation16_spill] sm:$0xff] %v14332_v58  ;;  %v14335_v20 = vadd.f32 %v4562_v48, %v14276_v35 }
 0x96e   : > { %17238 = vst [vmem:[#allocation17_spill] sm:$0xff] %v14335_v20  ;;  %v4515_v9 = vadd.f32 1e-12, %v4483_v63  ;;  %v4484_v28 = vmax.f32 %v4468_v29, 0.0  ;;  %v4589_v17 = vpack.c.bf16 %v14335_v20, %v14332_v58 }
 0x970   : > { %10839 = vrsqrt.f32 %v4515_v9  ;;  %v4516_v8 = vadd.f32 1e-12, %v4484_v28  ;;  %4845 = vmatmul.mubr.bf16.gmra.mrb[160].mxu1 %v4589_v17  ;;  %10098 = vmatprep.mubr.bf16.mxu0 %v4589_v17 }
 0x971   : > { %4854 = vmatprep.mubr.bf16.mxu1 %v17212_v0 }
 0x972   : > { %10841 = vrsqrt.f32 %v4516_v8 }
 0x973   : > { %v4354_v33 = vpop.xlane.xlu0 %4353 }
 0x974   : > { %v4373_v4 = vmul.f32 0.0078125, %v4354_v33 }
 0x975   : > { %v4356_v3 = vpop.xlane.xlu1 %4355 }
 0x976   : > { %v4374_v19 = vmul.f32 0.0078125, %v4356_v3  ;;  %v4453_v24 = vmul.f32 %v4373_v4, %v4373_v4  ;;  %v4501_v31 = vsub.f32 %v14240_v26, %v4373_v4 }
 0x977   : > { %v4418_v21 = vpop.xlane.xlu0 %4417 }
 0x978   : > { %v4437_v14 = vmul.f32 0.0078125, %v4418_v21  ;;  %v4454_v32 = vmul.f32 %v4374_v19, %v4374_v19  ;;  %v4502_v29 = vsub.f32 %v14244_v7, %v4374_v19 }
 0x979   : > { %v4420_v55 = vpop.xlane.xlu1 %4419 }
 0x97a   : > { %v10840_v45 = vpop.eup %10839  ;;  %v4469_v56 = vsub.f32 %v4437_v14, %v4453_v24  ;;  %v4438_v18 = vmul.f32 0.0078125, %v4420_v55 }
 0x97b   : > { %v4547_v23 = vmul.f32 %v10840_v45, %v4499_v10 }
 0x97c   : > { %v10842_v34 = vpop.eup %10841  ;;  %v4485_v30 = vmax.f32 %v4469_v56, 0.0  ;;  %v4470_v37 = vsub.f32 %v4438_v18, %v4454_v32 }
 0x97d   : > { %v4548_v6 = vmul.f32 %v10842_v34, %v4500_v38  ;;  %v4563_v44 = vmul.f32 %v4547_v23, %v14269_v5  ;;  %v17245_v34 = vld [vmem:[#allocation20_spill] sm:$0xff] }
 0x97e   : > { %v4517_v16 = vadd.f32 1e-12, %v4485_v30  ;;  %v4486_v25 = vmax.f32 %v4470_v37, 0.0 }
 0x97f   : > { %v4564_v13 = vmul.f32 %v4548_v6, %v14269_v5  ;;  %v14345_v51 = vadd.f32 %v4563_v44, %v14276_v35 }
 0x980   : > { %10843 = vrsqrt.f32 %v4517_v16  ;;  %v4518_v50 = vadd.f32 1e-12, %v4486_v25  ;;  %v4358_v2 = vpop.xlane.xlu0 %4357 }
 0x981   : > { %17239 = vst [vmem:[#allocation18_spill] sm:$0xff] %v14345_v51  ;;  %v14348_v39 = vadd.f32 %v4564_v13, %v14276_v35  ;;  %v4375_v46 = vmul.f32 0.0078125, %v4358_v2 }
 0x982   : > { %10845 = vrsqrt.f32 %v4518_v50  ;;  %v4360_v47 = vpop.xlane.xlu1 %4359 }
 0x983   : > { %17240 = vst [vmem:[#allocation4_spill] sm:$0xff] %v14348_v39  ;;  %v4590_v43 = vpack.c.bf16 %v14348_v39, %v14345_v51  ;;  %v4376_v11 = vmul.f32 0.0078125, %v4360_v47  ;;  %v4455_v49 = vmul.f32 %v4375_v46, %v4375_v46  ;;  %v4503_v4 = vsub.f32 %v14254_v61, %v4375_v46 }
 0x984   : > { %v4422_v42 = vpop.xlane.xlu0 %4421 }
 0x985   : > { %4855 = vmatmul.mubr.bf16.gmra.mrb[164].mxu1 %v4590_v43  ;;  %10099 = vmatmul.mubr.bf16.gmra.mrb[184].mxu0 %v4590_v43  ;;  %v4439_v59 = vmul.f32 0.0078125, %v4422_v42  ;;  %v4456_v36 = vmul.f32 %v4376_v11, %v4376_v11  ;;  %v4504_v10 = vsub.f32 %v14258_v1, %v4376_v11  ;;  %v9045_v1 = vld [vmem:[%s16887_s5 + $0x24] ss:$8 sm:$0x7] }
 0x986   : > { %v4424_v52 = vpop.xlane.xlu1 %4423  ;;  %4864 = vmatprep.mubr.bf16.mxu1 %v17212_v0  ;;  %v14382_v30 = vrot.slane %v9045_v1, %v17245_v34 }
 0x987   : > { %v4471_v12 = vsub.f32 %v4439_v59, %v4455_v49  ;;  %v4440_v40 = vmul.f32 0.0078125, %v4424_v52 }
 0x989   : > { %v4487_v60 = vmax.f32 %v4471_v12, 0.0  ;;  %v4472_v48 = vsub.f32 %v4440_v40, %v4456_v36  ;;  %v17251_v36 = vld [vmem:[#allocation22_spill] sm:$0xff] }
 0x98a   : > { %v10844_v63 = vpop.eup %10843  ;;  %v14404_v12 = vrot.slane %v9045_v1, %v17251_v36 }
 0x98b   : > { %v4519_v9 = vadd.f32 1e-12, %v4487_v60  ;;  %v4488_v28 = vmax.f32 %v4472_v48, 0.0  ;;  %v4549_v17 = vmul.f32 %v10844_v63, %v4501_v31 }
 0x98c   : > { %v10846_v8 = vpop.eup %10845 }
 0x98d   : > { %10847 = vrsqrt.f32 %v4519_v9  ;;  %v4520_v33 = vadd.f32 1e-12, %v4488_v28  ;;  %v4550_v3 = vmul.f32 %v10846_v8, %v4502_v29  ;;  %v4565_v21 = vmul.f32 %v4549_v17, %v14269_v5 }
 0x98f   : > { %10849 = vrsqrt.f32 %v4520_v33  ;;  %v4566_v24 = vmul.f32 %v4550_v3, %v14269_v5  ;;  %v14358_v14 = vadd.f32 %v4565_v21, %v14276_v35 }
 0x991   : > { %17241 = vst [vmem:[#allocation3_spill] sm:$0xff] %v14358_v14  ;;  %v14361_v26 = vadd.f32 %v4566_v24, %v14276_v35 }
 0x993   : > { %17242 = vst [vmem:[#allocation5_spill] sm:$0xff] %v14361_v26  ;;  %v4591_v7 = vpack.c.bf16 %v14361_v26, %v14358_v14 }
 0x995   : > { %4865 = vmatmul.mubr.bf16.gmra.mrb[168].mxu1 %v4591_v7  ;;  %10102 = vmatprep.mubr.bf16.mxu0 %v4591_v7 }
 0x996   : > { %4874 = vmatprep.mubr.bf16.mxu1 %v17212_v0 }
 0x997   : > { %v10848_v19 = vpop.eup %10847 }
 0x998   : > { %v4551_v55 = vmul.f32 %v10848_v19, %v4503_v4 }
 0x999   : > { %v10850_v45 = vpop.eup %10849 }
 0x99a   : > { %v4552_v32 = vmul.f32 %v10850_v45, %v4504_v10  ;;  %v4567_v56 = vmul.f32 %v4551_v55, %v14269_v5 }
 0x99c   : > { %v4568_v18 = vmul.f32 %v4552_v32, %v14269_v5  ;;  %v14371_v38 = vadd.f32 %v4567_v56, %v14276_v35  ;;  %v17246_v5 = vld [vmem:[#allocation21_spill] sm:$0xff] }
 0x99d   : > { %v14385_v6 = vrot.slane %v9045_v1, %v17246_v5 }
 0x99e   : > { %17243 = vst [vmem:[#allocation47_spill] sm:$0xff] %v14371_v38  ;;  %v14374_v23 = vadd.f32 %v4568_v18, %v14276_v35 }
 0x9a0   : > { %17244 = vst [vmem:[#allocation37_spill] sm:$0xff] %v14374_v23  ;;  %v4592_v61 = vpack.c.bf16 %v14374_v23, %v14371_v38 }
 0x9a2   : > { %4875 = vmatmul.mubr.bf16.gmra.mrb[172].mxu1 %v4592_v61  ;;  %10103 = vmatmul.mubr.bf16.gmra.mrb[188].mxu0 %v4592_v61 }
 0x9f8   : > { %v4806_v37 = vpop.f32.mrb[144].mxu1 }
 0x9f9   : > { %v4808_v44 = vpop.f32.mrb[145].mxu1  ;;  %v4807_v35 = vadd.f32 %v4806_v37, %v14382_v30 }
 0x9fa   : > { %v4810_v16 = vpop.f32.mrb[146].mxu1  ;;  %v4809_v50 = vadd.f32 %v4808_v44, %v14385_v6 }
 0x9fb   : > { %v4811_v25 = vadd.f32 %v4810_v16, %v14382_v30  ;;  %v4812_v13 = vpop.f32.mrb[147].mxu1 }
 0x9fc   : > { %v4813_v2 = vadd.f32 %v4812_v13, %v14385_v6 }
 0x9fd   : > { %v14391_v46 = vpack.c.bf16 %v4811_v25, %v4807_v35 }
 0x9fe   : > { %v4990_v47 = vpack.c.bf16 %v4813_v2, %v4809_v50 }
 0x9ff   : > { %9658 = vmatprep.mubr.bf16.mxu1 %v14391_v46  ;;  %9690 = vmatprep.mubr.bf16.mxu0 %v14391_v46 }
 0xa00   : > { %10234 = vmatprep.subr.msk.bf16.mxu1 %vm11881_vm13, %v4990_v47  ;;  %10242 = vmatprep.subr.msk.bf16.mxu0 %vm11889_vm15, %v4990_v47  ;;  %v5006_v49 = vsel %vm11875_vm12, %v4990_v47, 0  ;;  %v5022_v52 = vsel %vm11885_vm14, %v4990_v47, 0 }
 0xa01   : > { %9643 = vmatpush3.bf16.xpose.msra.mxu1 %v5006_v49  ;;  %9675 = vmatpush3.bf16.xpose.msra.mxu0 %v5022_v52 }
 0xa0c   : > { %v4816_v40 = vpop.f32.mrb[148].mxu1  ;;  %v10092_v31 = vpop.f32.mrb[176].mxu0 }
 0xa0d   : > { %v4818_v60 = vpop.f32.mrb[149].mxu1  ;;  %v4919_v48 = vpop.f32.mrb[177].mxu0  ;;  %v4817_v9 = vadd.f32 %v4816_v40, %v14382_v30  ;;  %v4928_v28 = vadd.f32 %v10092_v31, %v14404_v12 }
 0xa0e   : > { %v4820_v63 = vpop.f32.mrb[150].mxu1  ;;  %v10093_v29 = vpop.f32.mrb[178].mxu0  ;;  %v4819_v21 = vadd.f32 %v4818_v60, %v14385_v6  ;;  %v4920_v24 = vadd.f32 %v4919_v48, %v14404_v12 }
 0xa0f   : > { %v4821_v17 = vadd.f32 %v4820_v63, %v14382_v30  ;;  %v4931_v8 = vadd.f32 %v10093_v29, %v14404_v12  ;;  %v4822_v33 = vpop.f32.mrb[151].mxu1  ;;  %v4922_v3 = vpop.f32.mrb[179].mxu0 }
 0xa10   : > { %v4823_v7 = vadd.f32 %v4822_v33, %v14385_v6  ;;  %v4923_v4 = vadd.f32 %v4922_v3, %v14404_v12 }
 0xa11   : > { %v14414_v19 = vpack.c.bf16 %v4821_v17, %v4817_v9  ;;  %v14416_v10 = vpack.c.bf16 %v4931_v8, %v4928_v28 }
 0xa12   : > { %v4991_v55 = vpack.c.bf16 %v4823_v7, %v4819_v21  ;;  %v14418_v45 = vpack.c.bf16 %v4923_v4, %v4920_v24 }
 0xa14   : > { %10235 = vmatprep.subr.msk.bf16.mxu1 %vm11881_vm13, %v4991_v55  ;;  %10243 = vmatprep.subr.msk.bf16.mxu0 %vm11889_vm15, %v4991_v55  ;;  %v5007_v32 = vsel %vm11875_vm12, %v4991_v55, 0  ;;  %v5023_v56 = vsel %vm11885_vm14, %v4991_v55, 0 }
 0xa15   : > { %9645 = vmatpush3.bf16.xpose.msra.mxu1 %v5007_v32  ;;  %9677 = vmatpush3.bf16.xpose.msra.mxu0 %v5023_v56 }
 0xa22   : > { %v4826_v18 = vpop.f32.mrb[152].mxu1 }
 0xa23   : > { %v4828_v61 = vpop.f32.mrb[153].mxu1  ;;  %v4827_v37 = vadd.f32 %v4826_v18, %v14382_v30 }
 0xa24   : > { %v4830_v1 = vpop.f32.mrb[154].mxu1  ;;  %v4829_v35 = vadd.f32 %v4828_v61, %v14385_v6 }
 0xa25   : > { %v4831_v44 = vadd.f32 %v4830_v1, %v14382_v30  ;;  %v4832_v16 = vpop.f32.mrb[155].mxu1 }
 0xa26   : > { %v4833_v25 = vadd.f32 %v4832_v16, %v14385_v6 }
 0xa27   : > { %v14432_v13 = vpack.c.bf16 %v4831_v44, %v4827_v37 }
 0xa28   : > { %v4992_v50 = vpack.c.bf16 %v4833_v25, %v4829_v35 }
 0xa2a   : > { %10236 = vmatprep.subr.msk.bf16.mxu1 %vm11881_vm13, %v4992_v50  ;;  %10244 = vmatprep.subr.msk.bf16.mxu0 %vm11889_vm15, %v4992_v50  ;;  %v5008_v2 = vsel %vm11875_vm12, %v4992_v50, 0  ;;  %v5024_v47 = vsel %vm11885_vm14, %v4992_v50, 0 }
 0xa2b   : > { %9647 = vmatpush3.bf16.xpose.msra.mxu1 %v5008_v2  ;;  %9679 = vmatpush3.bf16.xpose.msra.mxu0 %v5024_v47 }
 0xa37   : > { %v4836_v49 = vpop.f32.mrb[156].mxu1  ;;  %v10096_v52 = vpop.f32.mrb[180].mxu0 }
 0xa38   : > { %v4838_v40 = vpop.f32.mrb[157].mxu1  ;;  %v4935_v31 = vpop.f32.mrb[181].mxu0  ;;  %v4837_v63 = vadd.f32 %v4836_v49, %v14382_v30  ;;  %v4944_v29 = vadd.f32 %v10096_v52, %v14404_v12 }
 0xa39   : > { %v4840_v60 = vpop.f32.mrb[158].mxu1  ;;  %v10097_v48 = vpop.f32.mrb[182].mxu0  ;;  %v4839_v33 = vadd.f32 %v4838_v40, %v14385_v6  ;;  %v4936_v3 = vadd.f32 %v4935_v31, %v14404_v12 }
 0xa3a   : > { %v4841_v9 = vadd.f32 %v4840_v60, %v14382_v30  ;;  %v4947_v28 = vadd.f32 %v10097_v48, %v14404_v12  ;;  %v4842_v17 = vpop.f32.mrb[159].mxu1  ;;  %v4938_v8 = vpop.f32.mrb[183].mxu0 }
 0xa3b   : > { %v4843_v21 = vadd.f32 %v4842_v17, %v14385_v6  ;;  %v4939_v24 = vadd.f32 %v4938_v8, %v14404_v12 }
 0xa3c   : > { %v14450_v7 = vpack.c.bf16 %v4841_v9, %v4837_v63  ;;  %v14452_v4 = vpack.c.bf16 %v4947_v28, %v4944_v29 }
 0xa3d   : > { %v4993_v55 = vpack.c.bf16 %v4843_v21, %v4839_v33  ;;  %v14454_v32 = vpack.c.bf16 %v4939_v24, %v4936_v3 }
 0xa3f   : > { %10237 = vmatprep.subr.msk.bf16.mxu1 %vm11881_vm13, %v4993_v55  ;;  %10245 = vmatprep.subr.msk.bf16.mxu0 %vm11889_vm15, %v4993_v55  ;;  %v5009_v56 = vsel %vm11875_vm12, %v4993_v55, 0  ;;  %v5025_v18 = vsel %vm11885_vm14, %v4993_v55, 0 }
 0xa40   : > { %9649 = vmatpush3.bf16.xpose.msra.mxu1 %v5009_v56  ;;  %9681 = vmatpush3.bf16.xpose.msra.mxu0 %v5025_v18 }
 0xa43   : > { %v4846_v61 = vpop.f32.mrb[160].mxu1 }
 0xa44   : > { %v4848_v1 = vpop.f32.mrb[161].mxu1  ;;  %v4847_v44 = vadd.f32 %v4846_v61, %v14382_v30 }
 0xa45   : > { %v4850_v37 = vpop.f32.mrb[162].mxu1  ;;  %v4849_v25 = vadd.f32 %v4848_v1, %v14385_v6 }
 0xa46   : > { %v4851_v16 = vadd.f32 %v4850_v37, %v14382_v30  ;;  %v4852_v35 = vpop.f32.mrb[163].mxu1 }
 0xa47   : > { %v4853_v50 = vadd.f32 %v4852_v35, %v14385_v6 }
 0xa48   : > { %v14468_v2 = vpack.c.bf16 %v4851_v16, %v4847_v44 }
 0xa49   : > { %v4994_v47 = vpack.c.bf16 %v4853_v50, %v4849_v25 }
 0xa4b   : > { %10238 = vmatprep.subr.msk.bf16.mxu1 %vm11881_vm13, %v4994_v47  ;;  %10246 = vmatprep.subr.msk.bf16.mxu0 %vm11889_vm15, %v4994_v47  ;;  %v5010_v49 = vsel %vm11875_vm12, %v4994_v47, 0  ;;  %v5026_v52 = vsel %vm11885_vm14, %v4994_v47, 0 }
 0xa4c   : > { %9651 = vmatpush3.bf16.xpose.msra.mxu1 %v5010_v49  ;;  %9683 = vmatpush3.bf16.xpose.msra.mxu0 %v5026_v52 }
 0xa58   : > { %v4856_v40 = vpop.f32.mrb[164].mxu1  ;;  %v10100_v31 = vpop.f32.mrb[184].mxu0 }
 0xa59   : > { %v4858_v60 = vpop.f32.mrb[165].mxu1  ;;  %v4951_v48 = vpop.f32.mrb[185].mxu0  ;;  %v4857_v9 = vadd.f32 %v4856_v40, %v14382_v30  ;;  %v4960_v28 = vadd.f32 %v10100_v31, %v14404_v12 }
 0xa5a   : > { %v4860_v63 = vpop.f32.mrb[166].mxu1  ;;  %v10101_v29 = vpop.f32.mrb[186].mxu0  ;;  %v4859_v21 = vadd.f32 %v4858_v60, %v14385_v6  ;;  %v4952_v24 = vadd.f32 %v4951_v48, %v14404_v12 }
 0xa5b   : > { %v4861_v17 = vadd.f32 %v4860_v63, %v14382_v30  ;;  %v4963_v8 = vadd.f32 %v10101_v29, %v14404_v12  ;;  %v4862_v33 = vpop.f32.mrb[167].mxu1  ;;  %v4954_v3 = vpop.f32.mrb[187].mxu0 }
 0xa5c   : > { %v4863_v55 = vadd.f32 %v4862_v33, %v14385_v6  ;;  %v4955_v56 = vadd.f32 %v4954_v3, %v14404_v12 }
 0xa5d   : > { %v14486_v18 = vpack.c.bf16 %v4861_v17, %v4857_v9  ;;  %v14488_v61 = vpack.c.bf16 %v4963_v8, %v4960_v28 }
 0xa5e   : > { %v4995_v1 = vpack.c.bf16 %v4863_v55, %v4859_v21  ;;  %v14490_v37 = vpack.c.bf16 %v4955_v56, %v4952_v24 }
 0xa60   : > { %10239 = vmatprep.subr.msk.bf16.mxu1 %vm11881_vm13, %v4995_v1  ;;  %10247 = vmatprep.subr.msk.bf16.mxu0 %vm11889_vm15, %v4995_v1  ;;  %v5011_v44 = vsel %vm11875_vm12, %v4995_v1, 0  ;;  %v5027_v16 = vsel %vm11885_vm14, %v4995_v1, 0 }
 0xa61   : > { %9653 = vmatpush3.bf16.xpose.msra.mxu1 %v5011_v44  ;;  %9685 = vmatpush3.bf16.xpose.msra.mxu0 %v5027_v16 }
 0xa68   : > { %v4866_v35 = vpop.f32.mrb[168].mxu1 }
 0xa69   : > { %v4868_v25 = vpop.f32.mrb[169].mxu1  ;;  %v4867_v47 = vadd.f32 %v4866_v35, %v14382_v30 }
 0xa6a   : > { %v4870_v50 = vpop.f32.mrb[170].mxu1  ;;  %v4869_v40 = vadd.f32 %v4868_v25, %v14385_v6 }
 0xa6b   : > { %v4871_v49 = vadd.f32 %v4870_v50, %v14382_v30  ;;  %v4872_v52 = vpop.f32.mrb[171].mxu1 }
 0xa6c   : > { %v4873_v31 = vadd.f32 %v4872_v52, %v14385_v6 }
 0xa6d   : > { %v14504_v60 = vpack.c.bf16 %v4871_v49, %v4867_v47 }
 0xa6e   : > { %v4996_v48 = vpack.c.bf16 %v4873_v31, %v4869_v40  ;;  %v5054_v31 = vsel %vm11885_vm14, %v14418_v45, 0 }
 0xa70   : > { %10240 = vmatprep.subr.msk.bf16.mxu1 %vm11881_vm13, %v4996_v48  ;;  %10248 = vmatprep.subr.msk.bf16.mxu0 %vm11889_vm15, %v4996_v48  ;;  %v5012_v63 = vsel %vm11875_vm12, %v4996_v48, 0  ;;  %v5028_v29 = vsel %vm11885_vm14, %v4996_v48, 0  ;;  %v5055_v48 = vsel %vm11885_vm14, %v14416_v10, 0 }
 0xa71   : > { %9655 = vmatpush3.bf16.xpose.msra.mxu1 %v5012_v63  ;;  %9687 = vmatpush3.bf16.xpose.msra.mxu0 %v5028_v29  ;;  %v5057_v63 = vsel %vm11885_vm14, %v14452_v4, 0  ;;  %v5059_v29 = vsel %vm11885_vm14, %v14488_v61, 0 }
 0xa75   : > { %v4876_v9 = vpop.f32.mrb[172].mxu1  ;;  %v10104_v28 = vpop.f32.mrb[188].mxu0 }
 0xa76   : > { %v4878_v17 = vpop.f32.mrb[173].mxu1  ;;  %v4967_v8 = vpop.f32.mrb[189].mxu0  ;;  %v4877_v21 = vadd.f32 %v4876_v9, %v14382_v30  ;;  %v4976_v24 = vadd.f32 %v10104_v28, %v14404_v12 }
 0xa77   : > { %v4880_v33 = vpop.f32.mrb[174].mxu1  ;;  %v10105_v3 = vpop.f32.mrb[190].mxu0  ;;  %v4879_v16 = vadd.f32 %v4878_v17, %v14385_v6  ;;  %v4968_v35 = vadd.f32 %v4967_v8, %v14404_v12  ;;  %v11331_v17 = vld [vmem:[%s12165_s26] sm:$0xff] }
 0xa78   : > { %v4881_v55 = vadd.f32 %v4880_v33, %v14382_v30  ;;  %v4979_v56 = vadd.f32 %v10105_v3, %v14404_v12  ;;  %v4882_v1 = vpop.f32.mrb[175].mxu1  ;;  %v4970_v44 = vpop.f32.mrb[191].mxu0 }
 0xa79   : > { %v4883_v25 = vadd.f32 %v4882_v1, %v14385_v6  ;;  %v4971_v50 = vadd.f32 %v4970_v44, %v14404_v12  ;;  %v5038_v12 = vsel %vm11875_vm12, %v14418_v45, 0 }
 0xa7a   : > { %v14522_v47 = vpack.c.bf16 %v4881_v55, %v4877_v21  ;;  %v14524_v49 = vpack.c.bf16 %v4979_v56, %v4976_v24  ;;  %v11332_v24 = vld [vmem:[%s12165_s26 + $0x8] sm:$0xff] }
 0xa7b   : > { %v4997_v52 = vpack.c.bf16 %v4883_v25, %v4879_v16  ;;  %v14526_v40 = vpack.c.bf16 %v4971_v50, %v4968_v35 }
 0xa7c   : > { %v5061_v9 = vsel %vm11885_vm14, %v14524_v49, 0 }
 0xa7d   : > { %10241 = vmatprep.subr.msk.bf16.mxu1 %vm11881_vm13, %v4997_v52  ;;  %10249 = vmatprep.subr.msk.bf16.mxu0 %vm11889_vm15, %v4997_v52  ;;  %v5013_v30 = vsel %vm11875_vm12, %v4997_v52, 0  ;;  %v5029_v6 = vsel %vm11885_vm14, %v4997_v52, 0 }
 0xa7e   : > { %9657 = vmatpush3.bf16.xpose.msra.mxu1 %v5013_v30  ;;  %9689 = vmatpush3.bf16.xpose.msra.mxu0 %v5029_v6 }
 0xa7f   : > { %10250 = vmatprep.subr.msk.bf16.mxu1 %vm11881_vm13, %v14418_v45  ;;  %10258 = vmatprep.subr.msk.bf16.mxu0 %vm11889_vm15, %v14418_v45  ;;  %v5056_v45 = vsel %vm11885_vm14, %v14454_v32, 0 }
 0xa85   : > { %9659 = vmatmul.mubr.bf16.vlgmr.msra.gmra.mrb[176].mxu1 %v14391_v46  ;;  %9691 = vmatmul.mubr.bf16.vlgmr.msra.gmra.mrb[192].mxu0 %v14391_v46  ;;  %v5039_v46 = vsel %vm11875_vm12, %v14416_v10, 0 }
 0xa86   : > { %9660 = vmatprep.mubr.bf16.mxu1 %v14414_v19  ;;  %9692 = vmatprep.mubr.bf16.mxu0 %v14414_v19 }
 0xa87   : > { %9707 = vmatpush3.bf16.msra.mxu1 %v5038_v12  ;;  %9771 = vmatpush3.bf16.msra.mxu0 %v5054_v31 }
 0xa88   : > { %10251 = vmatprep.subr.msk.bf16.mxu1 %vm11881_vm13, %v14416_v10  ;;  %10259 = vmatprep.subr.msk.bf16.mxu0 %vm11889_vm15, %v14416_v10  ;;  %v5040_v10 = vsel %vm11875_vm12, %v14454_v32, 0 }
 0xa8b   : > { %9709 = vmatpush3.bf16.msra.mxu1 %v5039_v46  ;;  %9773 = vmatpush3.bf16.msra.mxu0 %v5055_v48 }
 0xa8c   : > { %10252 = vmatprep.subr.msk.bf16.mxu1 %vm11881_vm13, %v14454_v32  ;;  %10260 = vmatprep.subr.msk.bf16.mxu0 %vm11889_vm15, %v14454_v32  ;;  %v5058_v32 = vsel %vm11885_vm14, %v14490_v37, 0 }
 0xa8d   : > { %9661 = vmatmul.mubr.bf16.gmra.mrb[180].mxu1 %v14414_v19  ;;  %9693 = vmatmul.mubr.bf16.gmra.mrb[196].mxu0 %v14414_v19  ;;  %v5041_v19 = vsel %vm11875_vm12, %v14452_v4, 0 }
 0xa8e   : > { %9662 = vmatprep.mubr.bf16.mxu1 %v14432_v13  ;;  %9694 = vmatprep.mubr.bf16.mxu0 %v14432_v13 }
 0xa8f   : > { %9711 = vmatpush3.bf16.msra.mxu1 %v5040_v10  ;;  %9775 = vmatpush3.bf16.msra.mxu0 %v5056_v45 }
 0xa90   : > { %10253 = vmatprep.subr.msk.bf16.mxu1 %vm11881_vm13, %v14452_v4  ;;  %10261 = vmatprep.subr.msk.bf16.mxu0 %vm11889_vm15, %v14452_v4  ;;  %v5042_v4 = vsel %vm11875_vm12, %v14490_v37, 0 }
 0xa93   : > { %9713 = vmatpush3.bf16.msra.mxu1 %v5041_v19  ;;  %9777 = vmatpush3.bf16.msra.mxu0 %v5057_v63 }
 0xa94   : > { %10254 = vmatprep.subr.msk.bf16.mxu1 %vm11881_vm13, %v14490_v37  ;;  %10262 = vmatprep.subr.msk.bf16.mxu0 %vm11889_vm15, %v14490_v37  ;;  %v5060_v37 = vsel %vm11885_vm14, %v14526_v40, 0 }
 0xa95   : > { %9663 = vmatmul.mubr.bf16.gmra.mrb[184].mxu1 %v14432_v13  ;;  %9695 = vmatmul.mubr.bf16.gmra.mrb[200].mxu0 %v14432_v13  ;;  %v5043_v13 = vsel %vm11875_vm12, %v14488_v61, 0 }
 0xa96   : > { %9664 = vmatprep.mubr.bf16.mxu1 %v14450_v7  ;;  %9696 = vmatprep.mubr.bf16.mxu0 %v14450_v7 }
 0xa97   : > { %9715 = vmatpush3.bf16.msra.mxu1 %v5042_v4  ;;  %9779 = vmatpush3.bf16.msra.mxu0 %v5058_v32 }
 0xa98   : > { %10255 = vmatprep.subr.msk.bf16.mxu1 %vm11881_vm13, %v14488_v61  ;;  %10263 = vmatprep.subr.msk.bf16.mxu0 %vm11889_vm15, %v14488_v61  ;;  %v5044_v61 = vsel %vm11875_vm12, %v14526_v40, 0 }
 0xa9b   : > { %9717 = vmatpush3.bf16.msra.mxu1 %v5043_v13  ;;  %9781 = vmatpush3.bf16.msra.mxu0 %v5059_v29 }
 0xa9c   : > { %10256 = vmatprep.subr.msk.bf16.mxu1 %vm11881_vm13, %v14526_v40  ;;  %10264 = vmatprep.subr.msk.bf16.mxu0 %vm11889_vm15, %v14526_v40 }
 0xa9d   : > { %9665 = vmatmul.mubr.bf16.gmra.mrb[188].mxu1 %v14450_v7  ;;  %9697 = vmatmul.mubr.bf16.gmra.mrb[204].mxu0 %v14450_v7  ;;  %v5045_v7 = vsel %vm11875_vm12, %v14524_v49, 0 }
 0xa9e   : > { %9666 = vmatprep.mubr.bf16.mxu1 %v14468_v2  ;;  %9698 = vmatprep.mubr.bf16.mxu0 %v14468_v2 }
 0xa9f   : > { %9719 = vmatpush3.bf16.msra.mxu1 %v5044_v61  ;;  %9783 = vmatpush3.bf16.msra.mxu0 %v5060_v37 }
 0xaa0   : > { %10257 = vmatprep.subr.msk.bf16.mxu1 %vm11881_vm13, %v14524_v49  ;;  %10265 = vmatprep.subr.msk.bf16.mxu0 %vm11889_vm15, %v14524_v49 }
 0xaa3   : > { %9721 = vmatpush3.bf16.msra.mxu1 %v5045_v7  ;;  %9785 = vmatpush3.bf16.msra.mxu0 %v5061_v9  ;;  %v11333_v7 = vld [vmem:[%s12165_s26 + $0x10] sm:$0xff] }
 0xaa5   : > { %9667 = vmatmul.mubr.bf16.gmra.mrb[192].mxu1 %v14468_v2  ;;  %9699 = vmatmul.mubr.bf16.gmra.mrb[208].mxu0 %v14468_v2 }
 0xaa6   : > { %9668 = vmatprep.mubr.bf16.mxu1 %v14486_v18  ;;  %9700 = vmatprep.mubr.bf16.mxu0 %v14486_v18 }
 0xaad   : > { %9669 = vmatmul.mubr.bf16.gmra.mrb[196].mxu1 %v14486_v18  ;;  %9701 = vmatmul.mubr.bf16.gmra.mrb[212].mxu0 %v14486_v18 }
 0xaae   : > { %9670 = vmatprep.mubr.bf16.mxu1 %v14504_v60  ;;  %9702 = vmatprep.mubr.bf16.mxu0 %v14504_v60 }
 0xab5   : > { %9671 = vmatmul.mubr.bf16.gmra.mrb[200].mxu1 %v14504_v60  ;;  %9703 = vmatmul.mubr.bf16.gmra.mrb[216].mxu0 %v14504_v60 }
 0xab6   : > { %9672 = vmatprep.mubr.bf16.mxu1 %v14522_v47  ;;  %9704 = vmatprep.mubr.bf16.mxu0 %v14522_v47 }
 0xabd   : > { %9673 = vmatmul.mubr.bf16.gmra.mrb[204].mxu1 %v14522_v47  ;;  %9705 = vmatmul.mubr.bf16.gmra.mrb[220].mxu0 %v14522_v47 }
 0xb58   : > { %v5104_v43 = vpop.f32.mrb[176].mxu1  ;;  %v5217_v11 = vpop.f32.mrb[192].mxu0 }
 0xb59   : > { %v5296_v42 = vmul.f32 0.17677669, %v5104_v43  ;;  %v5106_v59 = vpop.f32.mrb[177].mxu1  ;;  %v5219_v2 = vpop.f32.mrb[193].mxu0  ;;  %v5298_v60 = vmul.f32 0.17677669, %v5217_v11 }
 0xb5a   : > { %v5108_v18 = vpop.f32.mrb[178].mxu1  ;;  %v5221_v28 = vpop.f32.mrb[194].mxu0  ;;  %v5297_v44 = vmul.f32 0.17677669, %v5106_v59  ;;  %v5299_v6 = vmul.f32 0.17677669, %v5219_v2 }
 0xb5b   : > { %v14663_v8 = vadd.f32 %v11331_v17, %v5296_v42  ;;  %v5300_v33 = vmul.f32 0.17677669, %v5108_v18  ;;  %v5110_v3 = vpop.f32.mrb[179].mxu1  ;;  %v5223_v21 = vpop.f32.mrb[195].mxu0  ;;  %v5302_v56 = vmul.f32 0.17677669, %v5221_v28  ;;  %v14669_v1 = vadd.f32 %v11331_v17, %v5298_v60 }
 0xb5c   : > { %v5301_v50 = vmul.f32 0.17677669, %v5110_v3  ;;  %v14675_v30 = vadd.f32 %v11331_v17, %v5297_v44  ;;  %v5303_v48 = vmul.f32 0.17677669, %v5223_v21  ;;  %v14681_v10 = vadd.f32 %v11331_v17, %v5299_v6  ;;  %v11334_v59 = vld [vmem:[%s12165_s26 + $0x18] sm:$0xff] }
 0xb5d   : > { %v14666_v55 = vadd.f32 %v11332_v24, %v5300_v33  ;;  %5376 = vmax.xlane.f32.xlu0 %v14663_v8  ;;  %v14672_v25 = vadd.f32 %v11332_v24, %v5302_v56 }
 0xb5e   : > { %v14678_v46 = vadd.f32 %v11332_v24, %v5301_v50  ;;  %v14684_v4 = vadd.f32 %v11332_v24, %v5303_v48 }
 0xb5f   : > { %5378 = vmax.xlane.f32.xlu1 %v14666_v55 }
 0xb60   : > { %v5114_v16 = vpop.f32.mrb[180].mxu1  ;;  %v5227_v35 = vpop.f32.mrb[196].mxu0 }
 0xb61   : > { %v5229_v47 = vpop.f32.mrb[197].mxu0  ;;  %5696 = vmax.xlane.f32.xlu0 %v14669_v1  ;;  %v5116_v49 = vpop.f32.mrb[181].mxu1  ;;  %v5304_v45 = vmul.f32 0.17677669, %v5114_v16  ;;  %v5306_v43 = vmul.f32 0.17677669, %v5227_v35 }
 0xb62   : > { %v5118_v52 = vpop.f32.mrb[182].mxu1  ;;  %v5231_v40 = vpop.f32.mrb[198].mxu0  ;;  %v5305_v17 = vmul.f32 0.17677669, %v5116_v49  ;;  %v5307_v35 = vmul.f32 0.17677669, %v5229_v47 }
 0xb63   : > { %v5233_v12 = vpop.f32.mrb[199].mxu0  ;;  %5698 = vmax.xlane.f32.xlu1 %v14672_v25  ;;  %v5120_v31 = vpop.f32.mrb[183].mxu1  ;;  %v5308_v32 = vmul.f32 0.17677669, %v5118_v52  ;;  %v14690_v9 = vadd.f32 %v11333_v7, %v5304_v45  ;;  %v5310_v18 = vmul.f32 0.17677669, %v5231_v40  ;;  %v14699_v28 = vadd.f32 %v11333_v7, %v5306_v43 }
 0xb64   : > { %v5309_v21 = vmul.f32 0.17677669, %v5120_v31  ;;  %v14713_v50 = vadd.f32 %v11333_v7, %v5305_v17  ;;  %v5311_v40 = vmul.f32 0.17677669, %v5233_v12  ;;  %v14723_v31 = vadd.f32 %v11333_v7, %v5307_v35 }
 0xb65   : > { %5536 = vmax.xlane.f32.xlu0 %v14675_v30  ;;  %v14696_v2 = vadd.f32 %v11334_v59, %v5308_v32  ;;  %v14704_v3 = vadd.f32 %v11334_v59, %v5310_v18 }
 0xb66   : > { %v14720_v6 = vadd.f32 %v11334_v59, %v5309_v21  ;;  %v14730_v32 = vadd.f32 %v11334_v59, %v5311_v40 }
 0xb67   : > { %5538 = vmax.xlane.f32.xlu1 %v14678_v46 }
 0xb68   : > { %v5124_v19 = vpop.f32.mrb[184].mxu1  ;;  %v5237_v63 = vpop.f32.mrb[200].mxu0 }
 0xb69   : > { %v14686_v13 = vpop.f32.mrb[201].mxu0  ;;  %5856 = vmax.xlane.f32.xlu0 %v14681_v10  ;;  %v5126_v29 = vpop.f32.mrb[185].mxu1  ;;  %v5312_v48 = vmul.f32 0.17677669, %v5124_v19  ;;  %v11335_v19 = vld [vmem:[%s12165_s26 + $0x20] sm:$0xff] }
 0xb6a   : > { %v5128_v61 = vpop.f32.mrb[186].mxu1  ;;  %v5241_v37 = vpop.f32.mrb[202].mxu0  ;;  %v5314_v35 = vmul.f32 0.17677669, %v5237_v63  ;;  %v5313_v23 = vmul.f32 0.17677669, %v5126_v29 }
 0xb6b   : > { %v14692_v11 = vpop.f32.mrb[203].mxu0  ;;  %5858 = vmax.xlane.f32.xlu1 %v14684_v4  ;;  %v5130_v42 = vpop.f32.mrb[187].mxu1  ;;  %v5316_v43 = vmul.f32 0.17677669, %v5128_v61  ;;  %v14742_v21 = vadd.f32 %v11335_v19, %v5312_v48  ;;  %v11336_v61 = vld [vmem:[%s12165_s26 + $0x28] sm:$0xff] }
 0xb6c   : > { %v5318_v36 = vmul.f32 0.17677669, %v5241_v37  ;;  %v14753_v34 = vadd.f32 %v11335_v19, %v5314_v35  ;;  %v5317_v26 = vmul.f32 0.17677669, %v5130_v42  ;;  %v5315_v29 = vmul.f32 0.17677669, %v14686_v13 }
 0xb6d   : > { %5380 = vmax.xlane.f32.xlu0 %v14690_v9  ;;  %v14750_v40 = vadd.f32 %v11336_v61, %v5316_v43  ;;  %v14772_v39 = vadd.f32 %v11335_v19, %v5313_v23  ;;  %v5319_v42 = vmul.f32 0.17677669, %v14692_v11 }
 0xb6e   : > { %17252 = vst [vmem:[#allocation45_spill] sm:$0xff] %v14753_v34  ;;  %v14760_v38 = vadd.f32 %v11336_v61, %v5318_v36  ;;  %v14780_v20 = vadd.f32 %v11336_v61, %v5317_v26  ;;  %v14783_v58 = vadd.f32 %v11335_v19, %v5315_v29 }
 0xb6f   : > { %5382 = vmax.xlane.f32.xlu1 %v14696_v2  ;;  %17254 = vst [vmem:[#allocation46_spill] sm:$0xff] %v14772_v39  ;;  %v14790_v53 = vadd.f32 %v11336_v61, %v5319_v42  ;;  %v11338_v61 = vld [vmem:[%s12165_s26 + $0x38] sm:$0xff] }
 0xb70   : > { %v5134_v60 = vpop.f32.mrb[188].mxu1  ;;  %v14702_v33 = vpop.f32.mrb[204].mxu0  ;;  %17253 = vst [vmem:[#allocation44_spill] sm:$0xff] %v14760_v38  ;;  %17255 = vst [vmem:[#allocation6_spill] sm:$0xff] %v14780_v20 }
 0xb71   : > { %v14706_v24 = vpop.f32.mrb[205].mxu0  ;;  %5700 = vmax.xlane.f32.xlu0 %v14699_v28  ;;  %v14709_v56 = vpop.f32.mrb[189].mxu1  ;;  %17256 = vst [vmem:[#allocation7_spill] sm:$0xff] %v14783_v58  ;;  %v5320_v57 = vmul.f32 0.17677669, %v5134_v60  ;;  %17257 = vst [vmem:[#allocation27_spill] sm:$0xff] %v14790_v53 }
 0xb72   : > { %v5138_v44 = vpop.f32.mrb[190].mxu1  ;;  %v14711_v16 = vpop.f32.mrb[206].mxu0  ;;  %v11337_v60 = vld [vmem:[%s12165_s26 + $0x30] sm:$0xff]  ;;  %v5322_v41 = vmul.f32 0.17677669, %v14702_v33 }
 0xb73   : > { %v14715_v49 = vpop.f32.mrb[207].mxu0  ;;  %5702 = vmax.xlane.f32.xlu1 %v14704_v3  ;;  %v14718_v52 = vpop.f32.mrb[191].mxu1  ;;  %v5324_v22 = vmul.f32 0.17677669, %v5138_v44  ;;  %v14802_v29 = vadd.f32 %v11337_v60, %v5320_v57  ;;  %v5326_v62 = vmul.f32 0.17677669, %v14711_v16 }
 0xb74   : > { %v14815_v27 = vadd.f32 %v11337_v60, %v5322_v41  ;;  %v5321_v57 = vmul.f32 0.17677669, %v14709_v56 }
 0xb75   : > { %5540 = vmax.xlane.f32.xlu0 %v14713_v50  ;;  %17258 = vst [vmem:[#allocation28_spill] sm:$0xff] %v14802_v29  ;;  %v14811_v42 = vadd.f32 %v11338_v61, %v5324_v22 }
 0xb76   : > { %17260 = vst [vmem:[#allocation31_spill] sm:$0xff] %v14815_v27 }
 0xb77   : > { %5542 = vmax.xlane.f32.xlu1 %v14720_v6  ;;  %17259 = vst [vmem:[#allocation30_spill] sm:$0xff] %v14811_v42 }
 0xb78   : > { %v14726_v47 = vpop.f32.mrb[192].mxu1  ;;  %v14728_v45 = vpop.f32.mrb[208].mxu0 }
 0xb79   : > { %v14732_v18 = vpop.f32.mrb[209].mxu0  ;;  %5860 = vmax.xlane.f32.xlu0 %v14723_v31  ;;  %v14735_v12 = vpop.f32.mrb[193].mxu1 }
 0xb7a   : > { %v14737_v17 = vpop.f32.mrb[194].mxu1  ;;  %v14739_v7 = vpop.f32.mrb[210].mxu0 }
 0xb7b   : > { %v14744_v5 = vpop.f32.mrb[211].mxu0  ;;  %5862 = vmax.xlane.f32.xlu1 %v14730_v32  ;;  %v14747_v59 = vpop.f32.mrb[195].mxu1 }
 0xb7d   : > { %5384 = vmax.xlane.f32.xlu0 %v14742_v21 }
 0xb7f   : > { %5386 = vmax.xlane.f32.xlu1 %v14750_v40 }
 0xb80   : > { %v14756_v48 = vpop.f32.mrb[196].mxu1  ;;  %v14758_v63 = vpop.f32.mrb[212].mxu0 }
 0xb81   : > { %v14762_v14 = vpop.f32.mrb[213].mxu0  ;;  %5704 = vmax.xlane.f32.xlu0 %v14753_v34  ;;  %v14765_v43 = vpop.f32.mrb[197].mxu1 }
 0xb82   : > { %v14767_v37 = vpop.f32.mrb[198].mxu1  ;;  %v14769_v35 = vpop.f32.mrb[214].mxu0 }
 0xb83   : > { %v14774_v51 = vpop.f32.mrb[215].mxu0  ;;  %5706 = vmax.xlane.f32.xlu1 %v14760_v38  ;;  %v14777_v36 = vpop.f32.mrb[199].mxu1  ;;  %v5328_v38 = vmul.f32 0.17677669, %v14726_v47  ;;  %v5334_v47 = vmul.f32 0.17677669, %v14739_v7 }
 0xb84   : > { %v5335_v7 = vmul.f32 0.17677669, %v14744_v5  ;;  %v5338_v5 = vmul.f32 0.17677669, %v14758_v63  ;;  %v5341_v63 = vmul.f32 0.17677669, %v14777_v36 }
 0xb85   : > { %5544 = vmax.xlane.f32.xlu0 %v14772_v39 }
 0xb87   : > { %5546 = vmax.xlane.f32.xlu1 %v14780_v20 }
 0xb88   : > { %v14786_v23 = vpop.f32.mrb[200].mxu1  ;;  %v14788_v13 = vpop.f32.mrb[216].mxu0 }
 0xb89   : > { %v14792_v54 = vpop.f32.mrb[217].mxu0  ;;  %5864 = vmax.xlane.f32.xlu0 %v14783_v58  ;;  %v14795_v26 = vpop.f32.mrb[201].mxu1  ;;  %v5325_v58 = vmul.f32 0.17677669, %v14718_v52 }
 0xb8a   : > { %v14797_v11 = vpop.f32.mrb[202].mxu1  ;;  %v14799_v19 = vpop.f32.mrb[218].mxu0 }
 0xb8b   : > { %v14805_v15 = vpop.f32.mrb[219].mxu0  ;;  %5866 = vmax.xlane.f32.xlu1 %v14790_v53  ;;  %v14808_v44 = vpop.f32.mrb[203].mxu1  ;;  %v14823_v53 = vadd.f32 %v11338_v61, %v5326_v62  ;;  %v14844_v20 = vadd.f32 %v11338_v61, %v5325_v58  ;;  %v5330_v58 = vmul.f32 0.17677669, %v14728_v45  ;;  %v5333_v45 = vmul.f32 0.17677669, %v14747_v59 }
 0xb8d   : > { %5388 = vmax.xlane.f32.xlu0 %v14802_v29  ;;  %17261 = vst [vmem:[#allocation29_spill] sm:$0xff] %v14823_v53  ;;  %v14836_v29 = vadd.f32 %v11337_v60, %v5321_v57  ;;  %v5332_v57 = vmul.f32 0.17677669, %v14737_v17  ;;  %v5329_v17 = vmul.f32 0.17677669, %v14735_v12 }
 0xb8f   : > { %5390 = vmax.xlane.f32.xlu1 %v14811_v42  ;;  %v5323_v42 = vmul.f32 0.17677669, %v14706_v24 }
 0xb90   : > { %v14819_v33 = vpop.f32.mrb[204].mxu1  ;;  %v14821_v0 = vpop.f32.mrb[220].mxu0 }
 0xb91   : > { %5708 = vmax.xlane.f32.xlu0 %v14815_v27  ;;  %v14827_v22 = vpop.f32.mrb[205].mxu1  ;;  %v14829_v16 = vpop.f32.mrb[221].mxu0  ;;  %v5327_v27 = vmul.f32 0.17677669, %v14715_v49  ;;  %v14847_v39 = vadd.f32 %v11337_v60, %v5323_v42  ;;  %v11340_v49 = vld [vmem:[%s12165_s26 + $0x48] sm:$0xff] }
 0xb92   : > { %v14831_v41 = vpop.f32.mrb[206].mxu1  ;;  %v14833_v56 = vpop.f32.mrb[222].mxu0  ;;  %v14861_v60 = vadd.f32 %v11340_v49, %v5332_v57  ;;  %v14878_v57 = vadd.f32 %v11340_v49, %v5333_v45  ;;  %v14885_v59 = vadd.f32 %v11340_v49, %v5335_v7  ;;  %v11342_v45 = vld [vmem:[%s12165_s26 + $0x58] sm:$0xff]  ;;  %v5339_v7 = vmul.f32 0.17677669, %v14762_v14 }
 0xb93   : > { %5710 = vmax.xlane.f32.xlu1 %v14823_v53  ;;  %v14839_v62 = vpop.f32.mrb[207].mxu1  ;;  %v14841_v52 = vpop.f32.mrb[223].mxu0  ;;  %v14851_v24 = vadd.f32 %v11338_v61, %v5327_v27  ;;  %v11339_v53 = vld [vmem:[%s12165_s26 + $0x40] sm:$0xff]  ;;  %v5331_v61 = vmul.f32 0.17677669, %v14732_v18 }
 0xb94   : > { %v14856_v34 = vadd.f32 %v11339_v53, %v5328_v38  ;;  %v14865_v27 = vadd.f32 %v11339_v53, %v5330_v58  ;;  %v14869_v38 = vadd.f32 %v11340_v49, %v5334_v47  ;;  %v14874_v42 = vadd.f32 %v11339_v53, %v5329_v17  ;;  %v11341_v47 = vld [vmem:[%s12165_s26 + $0x50] sm:$0xff] }
 0xb95   : > { %5548 = vmax.xlane.f32.xlu0 %v14836_v29  ;;  %v14881_v12 = vadd.f32 %v11339_v53, %v5331_v61  ;;  %v5336_v58 = vmul.f32 0.17677669, %v14756_v48  ;;  %v5340_v18 = vmul.f32 0.17677669, %v14767_v37  ;;  %v5342_v48 = vmul.f32 0.17677669, %v14769_v35 }
 0xb96   : > { %v14899_v49 = vadd.f32 %v11341_v47, %v5338_v5  ;;  %v5337_v37 = vmul.f32 0.17677669, %v14765_v43  ;;  %v5343_v35 = vmul.f32 0.17677669, %v14774_v51  ;;  %v14915_v43 = vadd.f32 %v11341_v47, %v5339_v7 }
 0xb97   : > { %5550 = vmax.xlane.f32.xlu1 %v14844_v20  ;;  %v14890_v17 = vadd.f32 %v11341_v47, %v5336_v58  ;;  %v14895_v53 = vadd.f32 %v11342_v45, %v5340_v18  ;;  %v14903_v61 = vadd.f32 %v11342_v45, %v5342_v48  ;;  %v14912_v18 = vadd.f32 %v11342_v45, %v5341_v63  ;;  %v11343_v48 = vld [vmem:[%s12165_s26 + $0x60] sm:$0xff]  ;;  %v11344_v63 = vld [vmem:[%s12165_s26 + $0x68] sm:$0xff] }
 0xb98   : > { %v14908_v58 = vadd.f32 %v11341_v47, %v5337_v37  ;;  %v5344_v5 = vmul.f32 0.17677669, %v14786_v23  ;;  %v14919_v36 = vadd.f32 %v11342_v45, %v5343_v35  ;;  %v5348_v14 = vmul.f32 0.17677669, %v14797_v11 }
 0xb99   : > { %5868 = vmax.xlane.f32.xlu0 %v14847_v39  ;;  %v5346_v51 = vmul.f32 0.17677669, %v14788_v13  ;;  %v5350_v23 = vmul.f32 0.17677669, %v14799_v19  ;;  %v5345_v11 = vmul.f32 0.17677669, %v14795_v26 }
 0xb9a   : > { %v14924_v37 = vadd.f32 %v11343_v48, %v5344_v5  ;;  %v14929_v47 = vadd.f32 %v11344_v63, %v5348_v14  ;;  %v5349_v13 = vmul.f32 0.17677669, %v14808_v44  ;;  %v5347_v35 = vmul.f32 0.17677669, %v14792_v54 }
 0xb9b   : > { %5870 = vmax.xlane.f32.xlu1 %v14851_v24  ;;  %v14933_v45 = vadd.f32 %v11343_v48, %v5346_v51  ;;  %v14937_v7 = vadd.f32 %v11344_v63, %v5350_v23  ;;  %v14942_v5 = vadd.f32 %v11343_v48, %v5345_v11  ;;  %v5351_v19 = vmul.f32 0.17677669, %v14805_v15  ;;  %v11345_v23 = vld [vmem:[%s12165_s26 + $0x70] sm:$0xff] }
 0xb9c   : > { %v14946_v14 = vadd.f32 %v11344_v63, %v5349_v13  ;;  %v14949_v26 = vadd.f32 %v11343_v48, %v5347_v35  ;;  %v5352_v51 = vmul.f32 0.17677669, %v14819_v33  ;;  %v5356_v54 = vmul.f32 0.17677669, %v14831_v41  ;;  %v11346_v13 = vld [vmem:[%s12165_s26 + $0x78] sm:$0xff] }
 0xb9d   : > { %5392 = vmax.xlane.f32.xlu0 %v14856_v34  ;;  %v14953_v44 = vadd.f32 %v11344_v63, %v5351_v19  ;;  %v5354_v15 = vmul.f32 0.17677669, %v14821_v0  ;;  %v5358_v33 = vmul.f32 0.17677669, %v14833_v56  ;;  %v5353_v41 = vmul.f32 0.17677669, %v14827_v22 }
 0xb9e   : > { %v14958_v11 = vadd.f32 %v11345_v23, %v5352_v51  ;;  %v14963_v48 = vadd.f32 %v11346_v13, %v5356_v54  ;;  %v5357_v19 = vmul.f32 0.17677669, %v14839_v62  ;;  %v5355_v51 = vmul.f32 0.17677669, %v14829_v16 }
 0xb9f   : > { %5394 = vmax.xlane.f32.xlu1 %v14861_v60  ;;  %v14967_v63 = vadd.f32 %v11345_v23, %v5354_v15  ;;  %v14971_v35 = vadd.f32 %v11346_v13, %v5358_v33  ;;  %v14975_v0 = vadd.f32 %v11345_v23, %v5353_v41  ;;  %v5359_v54 = vmul.f32 0.17677669, %v14841_v52 }
 0xba0   : > { %v14979_v56 = vadd.f32 %v11346_v13, %v5357_v19  ;;  %v14983_v22 = vadd.f32 %v11345_v23, %v5355_v51 }
 0xba1   : > { %5712 = vmax.xlane.f32.xlu0 %v14865_v27  ;;  %17262 = vst [vmem:[#allocation33_spill] sm:$0xff] %v14967_v63  ;;  %17263 = vst [vmem:[#allocation36_spill] sm:$0xff] %v14971_v35  ;;  %v14986_v15 = vadd.f32 %v11346_v13, %v5359_v54 }
 0xba2   : > { %17264 = vst [vmem:[#allocation41_spill] sm:$0xff] %v14983_v22 }
 0xba3   : > { %5714 = vmax.xlane.f32.xlu1 %v14869_v38  ;;  %17265 = vst [vmem:[#allocation32_spill] sm:$0xff] %v14986_v15 }
 0xba5   : > { %5552 = vmax.xlane.f32.xlu0 %v14874_v42 }
 0xba7   : > { %5554 = vmax.xlane.f32.xlu1 %v14878_v57 }
 0xba9   : > { %5872 = vmax.xlane.f32.xlu0 %v14881_v12 }
 0xbab   : > { %5874 = vmax.xlane.f32.xlu1 %v14885_v59 }
 0xbad   : > { %5396 = vmax.xlane.f32.xlu0 %v14890_v17 }
 0xbaf   : > { %5398 = vmax.xlane.f32.xlu1 %v14895_v53 }
 0xbb1   : > { %5716 = vmax.xlane.f32.xlu0 %v14899_v49 }
 0xbb3   : > { %5718 = vmax.xlane.f32.xlu1 %v14903_v61 }
 0xbb5   : > { %5556 = vmax.xlane.f32.xlu0 %v14908_v58 }
 0xbb7   : > { %5558 = vmax.xlane.f32.xlu1 %v14912_v18 }
 0xbb9   : > { %5876 = vmax.xlane.f32.xlu0 %v14915_v43 }
 0xbbb   : > { %5878 = vmax.xlane.f32.xlu1 %v14919_v36 }
 0xbbd   : > { %5400 = vmax.xlane.f32.xlu0 %v14924_v37 }
 0xbbf   : > { %5402 = vmax.xlane.f32.xlu1 %v14929_v47 }
 0xbc1   : > { %5720 = vmax.xlane.f32.xlu0 %v14933_v45 }
 0xbc3   : > { %5722 = vmax.xlane.f32.xlu1 %v14937_v7 }
 0xbc5   : > { %5560 = vmax.xlane.f32.xlu0 %v14942_v5 }
 0xbc7   : > { %5562 = vmax.xlane.f32.xlu1 %v14946_v14 }
 0xbc9   : > { %5880 = vmax.xlane.f32.xlu0 %v14949_v26 }
 0xbcb   : > { %5882 = vmax.xlane.f32.xlu1 %v14953_v44 }
 0xbcd   : > { %5404 = vmax.xlane.f32.xlu0 %v14958_v11 }
 0xbcf   : > { %5406 = vmax.xlane.f32.xlu1 %v14963_v48 }
 0xbd1   : > { %5724 = vmax.xlane.f32.xlu0 %v14967_v63 }
 0xbd3   : > { %5726 = vmax.xlane.f32.xlu1 %v14971_v35 }
 0xbd5   : > { %5564 = vmax.xlane.f32.xlu0 %v14975_v0 }
 0xbd7   : > { %5566 = vmax.xlane.f32.xlu1 %v14979_v56 }
 0xbd9   : > { %5884 = vmax.xlane.f32.xlu0 %v14983_v22 }
 0xbdb   : > { %5886 = vmax.xlane.f32.xlu1 %v14986_v15 }
 0xbea   : > { %v5377_v62 = vpop.xlane.xlu0 %5376 }
 0xbeb   : > { %v5408_v16 = vsub.f32 %v14663_v8, %v5377_v62 }
 0xbec   : > { %v5379_v33 = vpop.xlane.xlu1 %5378 }
 0xbed   : > { %v5424_v41 = vmul.f32 1.442695, %v5408_v16  ;;  %v5409_v19 = vsub.f32 %v14666_v55, %v5379_v33 }
 0xbee   : > { %v5697_v52 = vpop.xlane.xlu0 %5696 }
 0xbef   : > { %10851 = vpow2.f32 %v5424_v41  ;;  %v5426_v35 = vmul.f32 1.442695, %v5409_v19  ;;  %v5728_v23 = vsub.f32 %v14669_v1, %v5697_v52 }
 0xbf0   : > { %v5699_v51 = vpop.xlane.xlu1 %5698 }
 0xbf1   : > { %10853 = vpow2.f32 %v5426_v35  ;;  %v5744_v13 = vmul.f32 1.442695, %v5728_v23  ;;  %v5729_v54 = vsub.f32 %v14672_v25, %v5699_v51 }
 0xbf2   : > { %v5537_v22 = vpop.xlane.xlu0 %5536 }
 0xbf3   : > { %10855 = vpow2.f32 %v5744_v13  ;;  %v5746_v15 = vmul.f32 1.442695, %v5729_v54  ;;  %v5568_v63 = vsub.f32 %v14675_v30, %v5537_v22 }
 0xbf4   : > { %v5539_v8 = vpop.xlane.xlu1 %5538 }
 0xbf5   : > { %10857 = vpow2.f32 %v5746_v15  ;;  %v5584_v62 = vmul.f32 1.442695, %v5568_v63  ;;  %v5569_v55 = vsub.f32 %v14678_v46, %v5539_v8 }
 0xbf6   : > { %v5857_v16 = vpop.xlane.xlu0 %5856 }
 0xbf7   : > { %10859 = vpow2.f32 %v5584_v62  ;;  %v5586_v33 = vmul.f32 1.442695, %v5569_v55  ;;  %v5888_v1 = vsub.f32 %v14681_v10, %v5857_v16 }
 0xbf8   : > { %v5859_v41 = vpop.xlane.xlu1 %5858 }
 0xbf9   : > { %v14997_v35 = vpop.eup %10851  ;;  %10861 = vpow2.f32 %v5586_v33  ;;  %v5904_v25 = vmul.f32 1.442695, %v5888_v1  ;;  %v5889_v19 = vsub.f32 %v14684_v4, %v5859_v41 }
 0xbfa   : > { %v5381_v52 = vpop.xlane.xlu0 %5380  ;;  %5456 = vadd.xlane.f32.xlu0 %v14997_v35 }
 0xbfb   : > { %v15001_v30 = vpop.eup %10853  ;;  %10863 = vpow2.f32 %v5904_v25  ;;  %v5906_v63 = vmul.f32 1.442695, %v5889_v19  ;;  %v5410_v46 = vsub.f32 %v14690_v9, %v5381_v52 }
 0xbfc   : > { %v5383_v22 = vpop.xlane.xlu1 %5382  ;;  %5458 = vadd.xlane.f32.xlu1 %v15001_v30 }
 0xbfd   : > { %v15005_v10 = vpop.eup %10855  ;;  %10865 = vpow2.f32 %v5906_v63  ;;  %v5428_v15 = vmul.f32 1.442695, %v5410_v46  ;;  %v5411_v23 = vsub.f32 %v14696_v2, %v5383_v22 }
 0xbfe   : > { %v5701_v51 = vpop.xlane.xlu0 %5700  ;;  %5776 = vadd.xlane.f32.xlu0 %v15005_v10 }
 0xbff   : > { %v15009_v4 = vpop.eup %10857  ;;  %10867 = vpow2.f32 %v5428_v15  ;;  %v5430_v13 = vmul.f32 1.442695, %v5411_v23  ;;  %v5730_v54 = vsub.f32 %v14699_v28, %v5701_v51 }
 0xc00   : > { %v5703_v8 = vpop.xlane.xlu1 %5702  ;;  %5778 = vadd.xlane.f32.xlu1 %v15009_v4 }
 0xc01   : > { %v15013_v9 = vpop.eup %10859  ;;  %10869 = vpow2.f32 %v5430_v13  ;;  %v5748_v62 = vmul.f32 1.442695, %v5730_v54  ;;  %v5731_v55 = vsub.f32 %v14704_v3, %v5703_v8 }
 0xc02   : > { %v5541_v16 = vpop.xlane.xlu0 %5540  ;;  %5616 = vadd.xlane.f32.xlu0 %v15013_v9 }
 0xc03   : > { %v15017_v2 = vpop.eup %10861  ;;  %10871 = vpow2.f32 %v5748_v62  ;;  %v5750_v33 = vmul.f32 1.442695, %v5731_v55  ;;  %v5570_v1 = vsub.f32 %v14713_v50, %v5541_v16 }
 0xc04   : > { %v5543_v41 = vpop.xlane.xlu1 %5542  ;;  %5618 = vadd.xlane.f32.xlu1 %v15017_v2 }
 0xc05   : > { %v15021_v28 = vpop.eup %10863  ;;  %10873 = vpow2.f32 %v5750_v33  ;;  %v5588_v25 = vmul.f32 1.442695, %v5570_v1  ;;  %v5571_v19 = vsub.f32 %v14720_v6, %v5543_v41  ;;  %v17266_v1 = vld [vmem:[#allocation45_spill] sm:$0xff] }
 0xc06   : > { %v5861_v52 = vpop.xlane.xlu0 %5860  ;;  %5936 = vadd.xlane.f32.xlu0 %v15021_v28 }
 0xc07   : > { %v15025_v3 = vpop.eup %10865  ;;  %10875 = vpow2.f32 %v5588_v25  ;;  %v5590_v63 = vmul.f32 1.442695, %v5571_v19  ;;  %v5890_v46 = vsub.f32 %v14723_v31, %v5861_v52  ;;  %v17267_v52 = vld [vmem:[#allocation44_spill] sm:$0xff] }
 0xc08   : > { %v5863_v22 = vpop.xlane.xlu1 %5862  ;;  %5938 = vadd.xlane.f32.xlu1 %v15025_v3 }
 0xc09   : > { %v15029_v50 = vpop.eup %10867  ;;  %10877 = vpow2.f32 %v5590_v63  ;;  %v5908_v15 = vmul.f32 1.442695, %v5890_v46  ;;  %v5891_v23 = vsub.f32 %v14730_v32, %v5863_v22 }
 0xc0a   : > { %v5385_v51 = vpop.xlane.xlu0 %5384  ;;  %5460 = vadd.xlane.f32.xlu0 %v15029_v50 }
 0xc0b   : > { %v15033_v6 = vpop.eup %10869  ;;  %10879 = vpow2.f32 %v5908_v15  ;;  %v5910_v13 = vmul.f32 1.442695, %v5891_v23  ;;  %v5412_v54 = vsub.f32 %v14742_v21, %v5385_v51  ;;  %v17268_v15 = vld [vmem:[#allocation46_spill] sm:$0xff] }
 0xc0c   : > { %v5387_v8 = vpop.xlane.xlu1 %5386  ;;  %5462 = vadd.xlane.f32.xlu1 %v15033_v6 }
 0xc0d   : > { %v15037_v31 = vpop.eup %10871  ;;  %10881 = vpow2.f32 %v5910_v13  ;;  %v5432_v62 = vmul.f32 1.442695, %v5412_v54  ;;  %v5413_v55 = vsub.f32 %v14750_v40, %v5387_v8  ;;  %v17269_v8 = vld [vmem:[#allocation6_spill] sm:$0xff] }
 0xc0e   : > { %v5705_v16 = vpop.xlane.xlu0 %5704  ;;  %5780 = vadd.xlane.f32.xlu0 %v15037_v31 }
 0xc0f   : > { %v15041_v32 = vpop.eup %10873  ;;  %10883 = vpow2.f32 %v5432_v62  ;;  %v5434_v33 = vmul.f32 1.442695, %v5413_v55  ;;  %v5732_v41 = vsub.f32 %v17266_v1, %v5705_v16  ;;  %v17270_v1 = vld [vmem:[#allocation7_spill] sm:$0xff] }
 0xc10   : > { %v5707_v25 = vpop.xlane.xlu1 %5706  ;;  %5782 = vadd.xlane.f32.xlu1 %v15041_v32 }
 0xc11   : > { %v15045_v21 = vpop.eup %10875  ;;  %10885 = vpow2.f32 %v5434_v33  ;;  %v5752_v19 = vmul.f32 1.442695, %v5732_v41  ;;  %v5733_v63 = vsub.f32 %v17267_v52, %v5707_v25 }
 0xc12   : > { %v5545_v46 = vpop.xlane.xlu0 %5544  ;;  %5620 = vadd.xlane.f32.xlu0 %v15045_v21 }
 0xc13   : > { %v15049_v40 = vpop.eup %10877  ;;  %10887 = vpow2.f32 %v5752_v19  ;;  %v5754_v22 = vmul.f32 1.442695, %v5733_v63  ;;  %v5572_v23 = vsub.f32 %v17268_v15, %v5545_v46  ;;  %v17272_v63 = vld [vmem:[#allocation27_spill] sm:$0xff] }
 0xc14   : > { %v5547_v51 = vpop.xlane.xlu1 %5546  ;;  %5622 = vadd.xlane.f32.xlu1 %v15049_v40 }
 0xc15   : > { %v15053_v13 = vpop.eup %10879  ;;  %10889 = vpow2.f32 %v5754_v22  ;;  %v5592_v54 = vmul.f32 1.442695, %v5572_v23  ;;  %v5573_v62 = vsub.f32 %v17269_v8, %v5547_v51  ;;  %v17274_v51 = vld [vmem:[#allocation28_spill] sm:$0xff] }
 0xc16   : > { %v5865_v55 = vpop.xlane.xlu0 %5864  ;;  %5940 = vadd.xlane.f32.xlu0 %v15053_v13 }
 0xc17   : > { %v15057_v16 = vpop.eup %10881  ;;  %10891 = vpow2.f32 %v5592_v54  ;;  %v5594_v33 = vmul.f32 1.442695, %v5573_v62  ;;  %v5892_v41 = vsub.f32 %v17270_v1, %v5865_v55 }
 0xc18   : > { %v5867_v25 = vpop.xlane.xlu1 %5866  ;;  %5942 = vadd.xlane.f32.xlu1 %v15057_v16 }
 0xc19   : > { %v15061_v19 = vpop.eup %10883  ;;  %10893 = vpow2.f32 %v5594_v33  ;;  %v5912_v52 = vmul.f32 1.442695, %v5892_v41  ;;  %v5893_v46 = vsub.f32 %v17272_v63, %v5867_v25  ;;  %v17275_v33 = vld [vmem:[#allocation30_spill] sm:$0xff] }
 0xc1a   : > { %17271 = vst [vmem:[#allocation35_spill] sm:$0xff] %v15061_v19  ;;  %v5389_v22 = vpop.xlane.xlu0 %5388  ;;  %5464 = vadd.xlane.f32.xlu0 %v15061_v19 }
 0xc1b   : > { %v15065_v15 = vpop.eup %10885  ;;  %10895 = vpow2.f32 %v5912_v52  ;;  %v5914_v23 = vmul.f32 1.442695, %v5893_v46  ;;  %v5414_v54 = vsub.f32 %v17274_v51, %v5389_v22  ;;  %v17276_v52 = vld [vmem:[#allocation31_spill] sm:$0xff] }
 0xc1c   : > { %17273 = vst [vmem:[#allocation42_spill] sm:$0xff] %v15065_v15  ;;  %v5391_v8 = vpop.xlane.xlu1 %5390  ;;  %5466 = vadd.xlane.f32.xlu1 %v15065_v15 }
 0xc1d   : > { %v15069_v62 = vpop.eup %10887  ;;  %10897 = vpow2.f32 %v5914_v23  ;;  %v5436_v55 = vmul.f32 1.442695, %v5414_v54  ;;  %v5415_v1 = vsub.f32 %v17275_v33, %v5391_v8  ;;  %v17277_v23 = vld [vmem:[#allocation29_spill] sm:$0xff] }
 0xc1e   : > { %v5709_v41 = vpop.xlane.xlu0 %5708  ;;  %5784 = vadd.xlane.f32.xlu0 %v15069_v62 }
 0xc1f   : > { %v15073_v25 = vpop.eup %10889  ;;  %10899 = vpow2.f32 %v5436_v55  ;;  %v5438_v63 = vmul.f32 1.442695, %v5415_v1  ;;  %v5734_v46 = vsub.f32 %v17276_v52, %v5709_v41 }
 0xc20   : > { %v5711_v19 = vpop.xlane.xlu1 %5710  ;;  %5786 = vadd.xlane.f32.xlu1 %v15073_v25 }
 0xc21   : > { %v15077_v22 = vpop.eup %10891  ;;  %10901 = vpow2.f32 %v5438_v63  ;;  %v5756_v51 = vmul.f32 1.442695, %v5734_v46  ;;  %v5735_v54 = vsub.f32 %v17277_v23, %v5711_v19 }
 0xc22   : > { %v5549_v15 = vpop.xlane.xlu0 %5548  ;;  %5624 = vadd.xlane.f32.xlu0 %v15077_v22 }
 0xc23   : > { %v15081_v8 = vpop.eup %10893  ;;  %10903 = vpow2.f32 %v5756_v51  ;;  %v5758_v33 = vmul.f32 1.442695, %v5735_v54  ;;  %v5574_v55 = vsub.f32 %v14836_v29, %v5549_v15 }
 0xc24   : > { %v5551_v1 = vpop.xlane.xlu1 %5550  ;;  %5626 = vadd.xlane.f32.xlu1 %v15081_v8 }
 0xc25   : > { %v15085_v41 = vpop.eup %10895  ;;  %10905 = vpow2.f32 %v5758_v33  ;;  %v5596_v52 = vmul.f32 1.442695, %v5574_v55  ;;  %v5575_v63 = vsub.f32 %v14844_v20, %v5551_v1 }
 0xc26   : > { %v5869_v46 = vpop.xlane.xlu0 %5868  ;;  %5944 = vadd.xlane.f32.xlu0 %v15085_v41 }
 0xc27   : > { %v15089_v19 = vpop.eup %10897  ;;  %10907 = vpow2.f32 %v5596_v52  ;;  %v5598_v23 = vmul.f32 1.442695, %v5575_v63  ;;  %v5894_v51 = vsub.f32 %v14847_v39, %v5869_v46 }
 0xc28   : > { %v5871_v54 = vpop.xlane.xlu1 %5870  ;;  %5946 = vadd.xlane.f32.xlu1 %v15089_v19 }
 0xc29   : > { %v15093_v29 = vpop.eup %10899  ;;  %10909 = vpow2.f32 %v5598_v23  ;;  %v5916_v15 = vmul.f32 1.442695, %v5894_v51  ;;  %v5895_v33 = vsub.f32 %v14851_v24, %v5871_v54 }
 0xc2a   : > { %v5393_v55 = vpop.xlane.xlu0 %5392  ;;  %5468 = vadd.xlane.f32.xlu0 %v15093_v29 }
 0xc2b   : > { %v15097_v20 = vpop.eup %10901  ;;  %10911 = vpow2.f32 %v5916_v15  ;;  %v5918_v1 = vmul.f32 1.442695, %v5895_v33  ;;  %v5416_v52 = vsub.f32 %v14856_v34, %v5393_v55 }
 0xc2c   : > { %v5395_v63 = vpop.xlane.xlu1 %5394  ;;  %5470 = vadd.xlane.f32.xlu1 %v15097_v20 }
 0xc2d   : > { %v15101_v39 = vpop.eup %10903  ;;  %10913 = vpow2.f32 %v5918_v1  ;;  %v5440_v46 = vmul.f32 1.442695, %v5416_v52  ;;  %v5417_v23 = vsub.f32 %v14861_v60, %v5395_v63 }
 0xc2e   : > { %v5713_v51 = vpop.xlane.xlu0 %5712  ;;  %5788 = vadd.xlane.f32.xlu0 %v15101_v39 }
 0xc2f   : > { %v15105_v24 = vpop.eup %10905  ;;  %10915 = vpow2.f32 %v5440_v46  ;;  %v5442_v54 = vmul.f32 1.442695, %v5417_v23  ;;  %v5736_v15 = vsub.f32 %v14865_v27, %v5713_v51 }
 0xc30   : > { %v5715_v33 = vpop.xlane.xlu1 %5714  ;;  %5790 = vadd.xlane.f32.xlu1 %v15105_v24 }
 0xc31   : > { %v15109_v34 = vpop.eup %10907  ;;  %10917 = vpow2.f32 %v5442_v54  ;;  %v5760_v55 = vmul.f32 1.442695, %v5736_v15  ;;  %v5737_v1 = vsub.f32 %v14869_v38, %v5715_v33 }
 0xc32   : > { %v5553_v52 = vpop.xlane.xlu0 %5552  ;;  %5628 = vadd.xlane.f32.xlu0 %v15109_v34 }
 0xc33   : > { %v15113_v60 = vpop.eup %10909  ;;  %10919 = vpow2.f32 %v5760_v55  ;;  %v5762_v63 = vmul.f32 1.442695, %v5737_v1  ;;  %v5576_v46 = vsub.f32 %v14874_v42, %v5553_v52 }
 0xc34   : > { %v5555_v23 = vpop.xlane.xlu1 %5554  ;;  %5630 = vadd.xlane.f32.xlu1 %v15113_v60 }
 0xc35   : > { %v15117_v27 = vpop.eup %10911  ;;  %10921 = vpow2.f32 %v5762_v63  ;;  %v5600_v51 = vmul.f32 1.442695, %v5576_v46  ;;  %v5577_v54 = vsub.f32 %v14878_v57, %v5555_v23 }
 0xc36   : > { %v5873_v15 = vpop.xlane.xlu0 %5872  ;;  %5948 = vadd.xlane.f32.xlu0 %v15117_v27 }
 0xc37   : > { %v15121_v38 = vpop.eup %10913  ;;  %10923 = vpow2.f32 %v5600_v51  ;;  %v5602_v33 = vmul.f32 1.442695, %v5577_v54  ;;  %v5896_v55 = vsub.f32 %v14881_v12, %v5873_v15 }
 0xc38   : > { %v5875_v1 = vpop.xlane.xlu1 %5874  ;;  %5950 = vadd.xlane.f32.xlu1 %v15121_v38 }
 0xc39   : > { %v15125_v42 = vpop.eup %10915  ;;  %10925 = vpow2.f32 %v5602_v33  ;;  %v5920_v52 = vmul.f32 1.442695, %v5896_v55  ;;  %v5897_v63 = vsub.f32 %v14885_v59, %v5875_v1 }
 0xc3a   : > { %v5397_v46 = vpop.xlane.xlu0 %5396  ;;  %5472 = vadd.xlane.f32.xlu0 %v15125_v42 }
 0xc3b   : > { %v15129_v57 = vpop.eup %10917  ;;  %10927 = vpow2.f32 %v5920_v52  ;;  %v5922_v23 = vmul.f32 1.442695, %v5897_v63  ;;  %v5418_v51 = vsub.f32 %v14890_v17, %v5397_v46 }
 0xc3c   : > { %v5399_v54 = vpop.xlane.xlu1 %5398  ;;  %5474 = vadd.xlane.f32.xlu1 %v15129_v57 }
 0xc3d   : > { %v15133_v12 = vpop.eup %10919  ;;  %10929 = vpow2.f32 %v5922_v23  ;;  %v5444_v15 = vmul.f32 1.442695, %v5418_v51  ;;  %v5419_v33 = vsub.f32 %v14895_v53, %v5399_v54 }
 0xc3e   : > { %v5717_v55 = vpop.xlane.xlu0 %5716  ;;  %5792 = vadd.xlane.f32.xlu0 %v15133_v12 }
 0xc3f   : > { %v15137_v59 = vpop.eup %10921  ;;  %10931 = vpow2.f32 %v5444_v15  ;;  %v5446_v1 = vmul.f32 1.442695, %v5419_v33  ;;  %v5738_v52 = vsub.f32 %v14899_v49, %v5717_v55 }
 0xc40   : > { %v5719_v63 = vpop.xlane.xlu1 %5718  ;;  %5794 = vadd.xlane.f32.xlu1 %v15137_v59 }
 0xc41   : > { %v15141_v17 = vpop.eup %10923  ;;  %10933 = vpow2.f32 %v5446_v1  ;;  %v5764_v46 = vmul.f32 1.442695, %v5738_v52  ;;  %v5739_v23 = vsub.f32 %v14903_v61, %v5719_v63 }
 0xc42   : > { %v5557_v51 = vpop.xlane.xlu0 %5556  ;;  %5632 = vadd.xlane.f32.xlu0 %v15141_v17 }
 0xc43   : > { %v15145_v53 = vpop.eup %10925  ;;  %10935 = vpow2.f32 %v5764_v46  ;;  %v5766_v54 = vmul.f32 1.442695, %v5739_v23  ;;  %v5578_v15 = vsub.f32 %v14908_v58, %v5557_v51 }
 0xc44   : > { %v5559_v33 = vpop.xlane.xlu1 %5558  ;;  %5634 = vadd.xlane.f32.xlu1 %v15145_v53 }
 0xc45   : > { %v15149_v49 = vpop.eup %10927  ;;  %10937 = vpow2.f32 %v5766_v54  ;;  %v5604_v55 = vmul.f32 1.442695, %v5578_v15  ;;  %v5579_v1 = vsub.f32 %v14912_v18, %v5559_v33 }
 0xc46   : > { %v5877_v52 = vpop.xlane.xlu0 %5876  ;;  %5952 = vadd.xlane.f32.xlu0 %v15149_v49 }
 0xc47   : > { %v15153_v61 = vpop.eup %10929  ;;  %10939 = vpow2.f32 %v5604_v55  ;;  %v5606_v63 = vmul.f32 1.442695, %v5579_v1  ;;  %v5898_v46 = vsub.f32 %v14915_v43, %v5877_v52 }
 0xc48   : > { %v5879_v23 = vpop.xlane.xlu1 %5878  ;;  %5954 = vadd.xlane.f32.xlu1 %v15153_v61 }
 0xc49   : > { %v15157_v58 = vpop.eup %10931  ;;  %10941 = vpow2.f32 %v5606_v63  ;;  %v5924_v51 = vmul.f32 1.442695, %v5898_v46  ;;  %v5899_v54 = vsub.f32 %v14919_v36, %v5879_v23 }
 0xc4a   : > { %v5401_v15 = vpop.xlane.xlu0 %5400  ;;  %5476 = vadd.xlane.f32.xlu0 %v15157_v58 }
 0xc4b   : > { %v15161_v18 = vpop.eup %10933  ;;  %10943 = vpow2.f32 %v5924_v51  ;;  %v5926_v33 = vmul.f32 1.442695, %v5899_v54  ;;  %v5420_v55 = vsub.f32 %v14924_v37, %v5401_v15 }
 0xc4c   : > { %v5403_v1 = vpop.xlane.xlu1 %5402  ;;  %5478 = vadd.xlane.f32.xlu1 %v15161_v18 }
 0xc4d   : > { %v15165_v43 = vpop.eup %10935  ;;  %10945 = vpow2.f32 %v5926_v33  ;;  %v5448_v52 = vmul.f32 1.442695, %v5420_v55  ;;  %v5421_v63 = vsub.f32 %v14929_v47, %v5403_v1 }
 0xc4e   : > { %17278 = vst [vmem:[#allocation43_spill] sm:$0xff] %v15165_v43  ;;  %v5721_v46 = vpop.xlane.xlu0 %5720  ;;  %5796 = vadd.xlane.f32.xlu0 %v15165_v43 }
 0xc4f   : > { %v15169_v36 = vpop.eup %10937  ;;  %10947 = vpow2.f32 %v5448_v52  ;;  %v5450_v23 = vmul.f32 1.442695, %v5421_v63  ;;  %v5740_v51 = vsub.f32 %v14933_v45, %v5721_v46 }
 0xc50   : > { %v5723_v54 = vpop.xlane.xlu1 %5722  ;;  %5798 = vadd.xlane.f32.xlu1 %v15169_v36 }
 0xc51   : > { %v15173_v37 = vpop.eup %10939  ;;  %10949 = vpow2.f32 %v5450_v23  ;;  %v5768_v15 = vmul.f32 1.442695, %v5740_v51  ;;  %v5741_v33 = vsub.f32 %v14937_v7, %v5723_v54 }
 0xc52   : > { %v5561_v55 = vpop.xlane.xlu0 %5560  ;;  %5636 = vadd.xlane.f32.xlu0 %v15173_v37 }
 0xc53   : > { %v15177_v47 = vpop.eup %10941  ;;  %10951 = vpow2.f32 %v5768_v15  ;;  %v5770_v1 = vmul.f32 1.442695, %v5741_v33  ;;  %v5580_v52 = vsub.f32 %v14942_v5, %v5561_v55 }
 0xc54   : > { %v5563_v63 = vpop.xlane.xlu1 %5562  ;;  %5638 = vadd.xlane.f32.xlu1 %v15177_v47 }
 0xc55   : > { %v15181_v45 = vpop.eup %10943  ;;  %10953 = vpow2.f32 %v5770_v1  ;;  %v5608_v46 = vmul.f32 1.442695, %v5580_v52  ;;  %v5581_v23 = vsub.f32 %v14946_v14, %v5563_v63 }
 0xc56   : > { %17279 = vst [vmem:[#allocation34_spill] sm:$0xff] %v15181_v45  ;;  %v5881_v51 = vpop.xlane.xlu0 %5880  ;;  %5956 = vadd.xlane.f32.xlu0 %v15181_v45 }
 0xc57   : > { %v15185_v7 = vpop.eup %10945  ;;  %10955 = vpow2.f32 %v5608_v46  ;;  %v5610_v54 = vmul.f32 1.442695, %v5581_v23  ;;  %v5900_v15 = vsub.f32 %v14949_v26, %v5881_v51 }
 0xc58   : > { %17280 = vst [vmem:[#allocation39_spill] sm:$0xff] %v15185_v7  ;;  %v5883_v33 = vpop.xlane.xlu1 %5882  ;;  %5958 = vadd.xlane.f32.xlu1 %v15185_v7 }
 0xc59   : > { %v15189_v5 = vpop.eup %10947  ;;  %10957 = vpow2.f32 %v5610_v54  ;;  %v5928_v55 = vmul.f32 1.442695, %v5900_v15  ;;  %v5901_v1 = vsub.f32 %v14953_v44, %v5883_v33 }
 0xc5a   : > { %17281 = vst [vmem:[#allocation38_spill] sm:$0xff] %v15189_v5  ;;  %v5405_v52 = vpop.xlane.xlu0 %5404  ;;  %5480 = vadd.xlane.f32.xlu0 %v15189_v5 }
 0xc5b   : > { %v15193_v14 = vpop.eup %10949  ;;  %10959 = vpow2.f32 %v5928_v55  ;;  %v5930_v63 = vmul.f32 1.442695, %v5901_v1  ;;  %v5422_v46 = vsub.f32 %v14958_v11, %v5405_v52 }
 0xc5c   : > { %17282 = vst [vmem:[#allocation40_spill] sm:$0xff] %v15193_v14  ;;  %v5407_v23 = vpop.xlane.xlu1 %5406  ;;  %5482 = vadd.xlane.f32.xlu1 %v15193_v14 }
 0xc5d   : > { %v15197_v26 = vpop.eup %10951  ;;  %10961 = vpow2.f32 %v5930_v63  ;;  %v5452_v51 = vmul.f32 1.442695, %v5422_v46  ;;  %v5423_v54 = vsub.f32 %v14963_v48, %v5407_v23 }
 0xc5e   : > { %17283 = vst [vmem:[#allocation24_spill] sm:$0xff] %v15197_v26  ;;  %v5725_v15 = vpop.xlane.xlu0 %5724  ;;  %5800 = vadd.xlane.f32.xlu0 %v15197_v26 }
 0xc5f   : > { %v15201_v44 = vpop.eup %10953  ;;  %10963 = vpow2.f32 %v5452_v51  ;;  %v5454_v33 = vmul.f32 1.442695, %v5423_v54 }
 0xc60   : > { %17284 = vst [vmem:[#allocation26_spill] sm:$0xff] %v15201_v44  ;;  %v5727_v55 = vpop.xlane.xlu1 %5726  ;;  %5802 = vadd.xlane.f32.xlu1 %v15201_v44 }
 0xc61   : > { %v15204_v11 = vpop.eup %10955  ;;  %10965 = vpow2.f32 %v5454_v33  ;;  %v17289_v33 = vld [vmem:[#allocation33_spill] sm:$0xff] }
 0xc62   : > { %17285 = vst [vmem:[#allocation23_spill] sm:$0xff] %v15204_v11  ;;  %5640 = vadd.xlane.f32.xlu0 %v15204_v11  ;;  %v5565_v1 = vpop.xlane.xlu0 %5564  ;;  %v5742_v44 = vsub.f32 %v17289_v33, %v5725_v15  ;;  %v17290_v11 = vld [vmem:[#allocation41_spill] sm:$0xff] }
 0xc63   : > { %v15207_v52 = vpop.eup %10957  ;;  %v5582_v48 = vsub.f32 %v14975_v0, %v5565_v1 }
 0xc64   : > { %17286 = vst [vmem:[#allocation25_spill] sm:$0xff] %v15207_v52  ;;  %5642 = vadd.xlane.f32.xlu1 %v15207_v52  ;;  %v5567_v63 = vpop.xlane.xlu1 %5566  ;;  %v17292_v52 = vld [vmem:[#allocation36_spill] sm:$0xff]  ;;  %v5772_v15 = vmul.f32 1.442695, %v5742_v44 }
 0xc65   : > { %v15211_v46 = vpop.eup %10959  ;;  %v5612_v23 = vmul.f32 1.442695, %v5582_v48  ;;  %v5583_v51 = vsub.f32 %v14979_v56, %v5567_v63  ;;  %v5743_v48 = vsub.f32 %v17292_v52, %v5727_v55  ;;  %v17293_v63 = vld [vmem:[#allocation32_spill] sm:$0xff] }
 0xc66   : > { %17287 = vst [vmem:[#allocation45_spill] sm:$0xff] %v15211_v46  ;;  %5960 = vadd.xlane.f32.xlu0 %v15211_v46  ;;  %v5885_v54 = vpop.xlane.xlu0 %5884 }
 0xc67   : > { %v15215_v26 = vpop.eup %10961  ;;  %10967 = vpow2.f32 %v5612_v23  ;;  %v5614_v5 = vmul.f32 1.442695, %v5583_v51  ;;  %v5902_v14 = vsub.f32 %v17290_v11, %v5885_v54  ;;  %v5774_v11 = vmul.f32 1.442695, %v5743_v48 }
 0xc68   : > { %17288 = vst [vmem:[#allocation44_spill] sm:$0xff] %v15215_v26  ;;  %5962 = vadd.xlane.f32.xlu1 %v15215_v26  ;;  %v5887_v0 = vpop.xlane.xlu1 %5886 }
 0xc69   : > { %v15220_v1 = vpop.eup %10963  ;;  %10969 = vpow2.f32 %v5614_v5  ;;  %v5932_v56 = vmul.f32 1.442695, %v5902_v14  ;;  %v5903_v46 = vsub.f32 %v17293_v63, %v5887_v0 }
 0xc6a   : > { %17291 = vst [vmem:[#allocation46_spill] sm:$0xff] %v15220_v1  ;;  %5484 = vadd.xlane.f32.xlu0 %v15220_v1 }
 0xc6b   : > { %v15225_v43 = vpop.eup %10965  ;;  %10971 = vpow2.f32 %v5932_v56  ;;  %v5934_v23 = vmul.f32 1.442695, %v5903_v46 }
 0xc6c   : > { %17294 = vst [vmem:[#allocation6_spill] sm:$0xff] %v15225_v43  ;;  %5486 = vadd.xlane.f32.xlu1 %v15225_v43 }
 0xc6d   : > { %10973 = vpow2.f32 %v5934_v23 }
 0xc6e   : > { %10975 = vpow2.f32 %v5772_v15 }
 0xc6f   : > { %10977 = vpow2.f32 %v5774_v11 }
 0xc71   : > { %v15228_v51 = vpop.eup %10967 }
 0xc72   : > { %17295 = vst [vmem:[#allocation7_spill] sm:$0xff] %v15228_v51  ;;  %5644 = vadd.xlane.f32.xlu0 %v15228_v51 }
 0xc73   : > { %v15231_v5 = vpop.eup %10969 }
 0xc74   : > { %17296 = vst [vmem:[#allocation27_spill] sm:$0xff] %v15231_v5  ;;  %5646 = vadd.xlane.f32.xlu1 %v15231_v5 }
 0xc75   : > { %v15234_v14 = vpop.eup %10971 }
 0xc76   : > { %17297 = vst [vmem:[#allocation28_spill] sm:$0xff] %v15234_v14  ;;  %5964 = vadd.xlane.f32.xlu0 %v15234_v14 }
 0xc77   : > { %v15237_v44 = vpop.eup %10973 }
 0xc78   : > { %17298 = vst [vmem:[#allocation30_spill] sm:$0xff] %v15237_v44  ;;  %5966 = vadd.xlane.f32.xlu1 %v15237_v44  ;;  %v15240_v55 = vpop.eup %10975 }
 0xc79   : > { %17299 = vst [vmem:[#allocation31_spill] sm:$0xff] %v15240_v55  ;;  %v15243_v52 = vpop.eup %10977 }
 0xc7a   : > { %5804 = vadd.xlane.f32.xlu0 %v15240_v55  ;;  %17300 = vst [vmem:[#allocation29_spill] sm:$0xff] %v15243_v52 }
 0xc7c   : > { %5806 = vadd.xlane.f32.xlu1 %v15243_v52  ;;  %v9070_v52 = vld [vmem:[%s16884_s2 + $0x20c] sm:$0xf] }
 0xc87   : > { %v5457_v46 = vpop.xlane.xlu0 %5456 }
 0xc89   : > { %v5459_v54 = vpop.xlane.xlu1 %5458 }
 0xc8a   : > { %10979 = vrcp.f32 %v5459_v54  ;;  %v9071_v54 = vld [vmem:[%s16884_s2 + $0x22c] sm:$0xf] }
 0xc8b   : > { %v5777_v33 = vpop.xlane.xlu0 %5776 }
 0xc8d   : > { %v5779_v0 = vpop.xlane.xlu1 %5778 }
 0xc8f   : > { %v5617_v48 = vpop.xlane.xlu0 %5616 }
 0xc90   : > { %10981 = vrcp.f32 %v5617_v48  ;;  %v9086_v48 = vcombine.low %v9070_v52, %v9071_v54 }
 0xc91   : > { %10983 = vrcp.f32 %v5457_v46  ;;  %v5619_v56 = vpop.xlane.xlu1 %5618 }
 0xc92   : > { %10985 = vrcp.f32 %v5619_v56  ;;  %10106 = vmatprep.subr.bf16.mxu1 %v9086_v48 }
 0xc93   : > { %10987 = vrcp.f32 %v5779_v0  ;;  %v5937_v63 = vpop.xlane.xlu0 %5936 }
 0xc94   : > { %10989 = vrcp.f32 %v5937_v63  ;;  %v10980_v11 = vpop.eup %10979 }
 0xc95   : > { %10991 = vrcp.f32 %v5777_v33  ;;  %v5939_v15 = vpop.xlane.xlu1 %5938  ;;  %v5505_v33 = vmul.f32 %v10980_v11, %v15001_v30 }
 0xc96   : > { %10993 = vrcp.f32 %v5939_v15 }
 0xc97   : > { %v5461_v23 = vpop.xlane.xlu0 %5460 }
 0xc99   : > { %v5463_v55 = vpop.xlane.xlu1 %5462 }
 0xc9a   : > { %v10982_v46 = vpop.eup %10981  ;;  %10995 = vrcp.f32 %v5463_v55 }
 0xc9b   : > { %v10984_v56 = vpop.eup %10983  ;;  %v5781_v0 = vpop.xlane.xlu0 %5780  ;;  %v5664_v14 = vmul.f32 %v10982_v46, %v15013_v9 }
 0xc9c   : > { %v10986_v44 = vpop.eup %10985  ;;  %v5504_v51 = vmul.f32 %v10984_v56, %v14997_v35 }
 0xc9d   : > { %v10988_v63 = vpop.eup %10987  ;;  %v5783_v15 = vpop.xlane.xlu1 %5782  ;;  %v5665_v1 = vmul.f32 %v10986_v44, %v15017_v2 }
 0xc9e   : > { %v10990_v5 = vpop.eup %10989  ;;  %v5825_v54 = vmul.f32 %v10988_v63, %v15009_v4  ;;  %v6000_v45 = vpack.c.bf16 %v5505_v33, %v5504_v51 }
 0xc9f   : > { %v10992_v43 = vpop.eup %10991  ;;  %v5621_v26 = vpop.xlane.xlu0 %5620  ;;  %v6001_v7 = vpack.c.bf16 %v5665_v1, %v5664_v14  ;;  %v5984_v11 = vmul.f32 %v10990_v5, %v15021_v28 }
 0xca0   : > { %v10994_v52 = vpop.eup %10993  ;;  %10997 = vrcp.f32 %v5621_v26  ;;  %v5824_v2 = vmul.f32 %v10992_v43, %v15005_v10 }
 0xca1   : > { %10999 = vrcp.f32 %v5461_v23  ;;  %6064 = vmatprep.mubr.bf16.mxu1 %v6001_v7  ;;  %v5623_v30 = vpop.xlane.xlu1 %5622  ;;  %v5985_v9 = vmul.f32 %v10994_v52, %v15025_v3 }
 0xca2   : > { %11001 = vrcp.f32 %v5623_v30  ;;  %6065 = vmatmul.mubr.bf16.vlgmr.msra.gmra.mrb[208].mxu1 %v6000_v45  ;;  %v6002_v1 = vpack.c.bf16 %v5825_v54, %v5824_v2 }
 0xca3   : > { %11003 = vrcp.f32 %v5783_v15  ;;  %v5941_v35 = vpop.xlane.xlu0 %5940  ;;  %v6003_v44 = vpack.c.bf16 %v5985_v9, %v5984_v11  ;;  %10107 = vmatpush3.bf16.msra.mxu1 %v9086_v48 }
 0xca4   : > { %11005 = vrcp.f32 %v5941_v35  ;;  %v10996_v26 = vpop.eup %10995 }
 0xca5   : > { %11007 = vrcp.f32 %v5781_v0  ;;  %6161 = vmatprep.mubr.bf16.mxu0 %v6003_v44  ;;  %v5943_v4 = vpop.xlane.xlu1 %5942  ;;  %v5507_v43 = vmul.f32 %v10996_v26, %v15033_v6 }
 0xca6   : > { %11009 = vrcp.f32 %v5943_v4  ;;  %6162 = vmatmul.mubr.bf16.vlgmr.msra.gmra.mrb[224].mxu0 %v6002_v1  ;;  %v17301_v4 = vld [vmem:[#allocation42_spill] sm:$0xff] }
 0xca7   : > { %v5465_v7 = vpop.xlane.xlu0 %5464 }
 0xca9   : > { %v5467_v28 = vpop.xlane.xlu1 %5466 }
 0xcaa   : > { %v10998_v51 = vpop.eup %10997  ;;  %11011 = vrcp.f32 %v5467_v28 }
 0xcab   : > { %v11000_v3 = vpop.eup %10999  ;;  %v5785_v5 = vpop.xlane.xlu0 %5784  ;;  %v5666_v55 = vmul.f32 %v10998_v51, %v15045_v21 }
 0xcac   : > { %v11002_v10 = vpop.eup %11001  ;;  %v5506_v48 = vmul.f32 %v11000_v3, %v15029_v50 }
 0xcad   : > { %v11004_v45 = vpop.eup %11003  ;;  %v5787_v14 = vpop.xlane.xlu1 %5786  ;;  %v5667_v23 = vmul.f32 %v11002_v10, %v15049_v40 }
 0xcae   : > { %v11006_v46 = vpop.eup %11005  ;;  %v6004_v15 = vpack.c.bf16 %v5507_v43, %v5506_v48  ;;  %v5827_v52 = vmul.f32 %v11004_v45, %v15041_v32 }
 0xcaf   : > { %v11008_v56 = vpop.eup %11007  ;;  %v5625_v0 = vpop.xlane.xlu0 %5624  ;;  %v6005_v33 = vpack.c.bf16 %v5667_v23, %v5666_v55  ;;  %v5986_v54 = vmul.f32 %v11006_v46, %v15053_v13 }
 0xcb0   : > { %v11010_v63 = vpop.eup %11009  ;;  %11013 = vrcp.f32 %v5625_v0  ;;  %v5826_v50 = vmul.f32 %v11008_v56, %v15037_v31 }
 0xcb1   : > { %11015 = vrcp.f32 %v5465_v7  ;;  %6072 = vmatprep.mubr.bf16.mxu1 %v6005_v33  ;;  %v5627_v6 = vpop.xlane.xlu1 %5626  ;;  %v5987_v21 = vmul.f32 %v11010_v63, %v15057_v16 }
 0xcb2   : > { %11017 = vrcp.f32 %v5627_v6  ;;  %6073 = vmatmul.mubr.bf16.gmra.mrb[212].mxu1 %v6004_v15  ;;  %v6006_v11 = vpack.c.bf16 %v5827_v52, %v5826_v50 }
 0xcb3   : > { %11019 = vrcp.f32 %v5787_v14  ;;  %v5945_v40 = vpop.xlane.xlu0 %5944  ;;  %v6007_v30 = vpack.c.bf16 %v5987_v21, %v5986_v54 }
 0xcb4   : > { %11021 = vrcp.f32 %v5945_v40  ;;  %v11012_v2 = vpop.eup %11011 }
 0xcb5   : > { %11023 = vrcp.f32 %v5785_v5  ;;  %6169 = vmatprep.mubr.bf16.mxu0 %v6007_v30  ;;  %v5947_v9 = vpop.xlane.xlu1 %5946  ;;  %v5509_v7 = vmul.f32 %v11012_v2, %v17301_v4  ;;  %v17302_v5 = vld [vmem:[#allocation35_spill] sm:$0xff] }
 0xcb6   : > { %11025 = vrcp.f32 %v5947_v9  ;;  %6170 = vmatmul.mubr.bf16.gmra.mrb[228].mxu0 %v6006_v11 }
 0xcb7   : > { %v5469_v32 = vpop.xlane.xlu0 %5468 }
 0xcb9   : > { %v5471_v35 = vpop.xlane.xlu1 %5470 }
 0xcba   : > { %v11014_v13 = vpop.eup %11013  ;;  %11027 = vrcp.f32 %v5471_v35 }
 0xcbb   : > { %v11016_v44 = vpop.eup %11015  ;;  %v5789_v16 = vpop.xlane.xlu0 %5788  ;;  %v5668_v28 = vmul.f32 %v11014_v13, %v15077_v22 }
 0xcbc   : > { %v11018_v1 = vpop.eup %11017  ;;  %v5508_v10 = vmul.f32 %v11016_v44, %v17302_v5 }
 0xcbd   : > { %v11020_v31 = vpop.eup %11019  ;;  %v5791_v26 = vpop.xlane.xlu1 %5790  ;;  %v5669_v51 = vmul.f32 %v11018_v1, %v15081_v8 }
 0xcbe   : > { %v11022_v3 = vpop.eup %11021  ;;  %v6008_v23 = vpack.c.bf16 %v5509_v7, %v5508_v10  ;;  %v5829_v46 = vmul.f32 %v11020_v31, %v15073_v25 }
 0xcbf   : > { %v11024_v43 = vpop.eup %11023  ;;  %v5629_v45 = vpop.xlane.xlu0 %5628  ;;  %v6009_v14 = vpack.c.bf16 %v5669_v51, %v5668_v28  ;;  %v5988_v56 = vmul.f32 %v11022_v3, %v15085_v41 }
 0xcc0   : > { %v11026_v55 = vpop.eup %11025  ;;  %11029 = vrcp.f32 %v5629_v45  ;;  %v5828_v8 = vmul.f32 %v11024_v43, %v15069_v62 }
 0xcc1   : > { %11031 = vrcp.f32 %v5469_v32  ;;  %6080 = vmatprep.mubr.bf16.mxu1 %v6009_v14  ;;  %v5631_v48 = vpop.xlane.xlu1 %5630  ;;  %v5989_v22 = vmul.f32 %v11026_v55, %v15089_v19 }
 0xcc2   : > { %11033 = vrcp.f32 %v5631_v48  ;;  %6081 = vmatmul.mubr.bf16.gmra.mrb[216].mxu1 %v6008_v23  ;;  %v6010_v63 = vpack.c.bf16 %v5829_v46, %v5828_v8 }
 0xcc3   : > { %11035 = vrcp.f32 %v5791_v26  ;;  %v5949_v0 = vpop.xlane.xlu0 %5948  ;;  %v6011_v33 = vpack.c.bf16 %v5989_v22, %v5988_v56 }
 0xcc4   : > { %11037 = vrcp.f32 %v5949_v0  ;;  %v11028_v52 = vpop.eup %11027 }
 0xcc5   : > { %11039 = vrcp.f32 %v5789_v16  ;;  %6177 = vmatprep.mubr.bf16.mxu0 %v6011_v33  ;;  %v5951_v15 = vpop.xlane.xlu1 %5950  ;;  %v5511_v50 = vmul.f32 %v11028_v52, %v15097_v20 }
 0xcc6   : > { %11041 = vrcp.f32 %v5951_v15  ;;  %6178 = vmatmul.mubr.bf16.gmra.mrb[232].mxu0 %v6010_v63 }
 0xcc7   : > { %v5473_v25 = vpop.xlane.xlu0 %5472 }
 0xcc9   : > { %v5475_v6 = vpop.xlane.xlu1 %5474 }
 0xcca   : > { %v11030_v41 = vpop.eup %11029  ;;  %11043 = vrcp.f32 %v5475_v6 }
 0xccb   : > { %v11032_v54 = vpop.eup %11031  ;;  %v5793_v19 = vpop.xlane.xlu0 %5792  ;;  %v5670_v30 = vmul.f32 %v11030_v41, %v15109_v34 }
 0xccc   : > { %v11034_v21 = vpop.eup %11033  ;;  %v5510_v32 = vmul.f32 %v11032_v54, %v15093_v29 }
 0xccd   : > { %v11036_v62 = vpop.eup %11035  ;;  %v5795_v40 = vpop.xlane.xlu1 %5794  ;;  %v5671_v11 = vmul.f32 %v11034_v21, %v15113_v60 }
 0xcce   : > { %v11038_v9 = vpop.eup %11037  ;;  %v6012_v16 = vpack.c.bf16 %v5511_v50, %v5510_v32  ;;  %v5831_v1 = vmul.f32 %v11036_v62, %v15105_v24 }
 0xccf   : > { %v11040_v2 = vpop.eup %11039  ;;  %v5633_v35 = vpop.xlane.xlu0 %5632  ;;  %v6013_v13 = vpack.c.bf16 %v5671_v11, %v5670_v30  ;;  %v5990_v4 = vmul.f32 %v11038_v9, %v15117_v27 }
 0xcd0   : > { %v11042_v44 = vpop.eup %11041  ;;  %11045 = vrcp.f32 %v5633_v35  ;;  %v5830_v29 = vmul.f32 %v11040_v2, %v15101_v39 }
 0xcd1   : > { %11047 = vrcp.f32 %v5473_v25  ;;  %6088 = vmatprep.mubr.bf16.mxu1 %v6013_v13  ;;  %v5635_v20 = vpop.xlane.xlu1 %5634  ;;  %v5991_v34 = vmul.f32 %v11042_v44, %v15121_v38  ;;  %v17303_v44 = vld [vmem:[#allocation34_spill] sm:$0xff] }
 0xcd2   : > { %11049 = vrcp.f32 %v5635_v20  ;;  %6089 = vmatmul.mubr.bf16.gmra.mrb[220].mxu1 %v6012_v16  ;;  %v6014_v31 = vpack.c.bf16 %v5831_v1, %v5830_v29 }
 0xcd3   : > { %11051 = vrcp.f32 %v5795_v40  ;;  %v5953_v60 = vpop.xlane.xlu0 %5952  ;;  %v6015_v7 = vpack.c.bf16 %v5991_v34, %v5990_v4 }
 0xcd4   : > { %11053 = vrcp.f32 %v5953_v60  ;;  %v11044_v28 = vpop.eup %11043  ;;  %v9073_v60 = vld [vmem:[%s16884_s2 + $0x26c] sm:$0xf] }
 0xcd5   : > { %11055 = vrcp.f32 %v5793_v19  ;;  %6185 = vmatprep.mubr.bf16.mxu0 %v6015_v7  ;;  %v5955_v26 = vpop.xlane.xlu1 %5954  ;;  %v5513_v10 = vmul.f32 %v11044_v28, %v15129_v57 }
 0xcd6   : > { %11057 = vrcp.f32 %v5955_v26  ;;  %6186 = vmatmul.mubr.bf16.gmra.mrb[236].mxu0 %v6014_v31 }
 0xcd7   : > { %v5477_v24 = vpop.xlane.xlu0 %5476 }
 0xcd9   : > { %v5479_v51 = vpop.xlane.xlu1 %5478 }
 0xcda   : > { %v11046_v27 = vpop.eup %11045  ;;  %11059 = vrcp.f32 %v5479_v51 }
 0xcdb   : > { %v11048_v3 = vpop.eup %11047  ;;  %v5797_v38 = vpop.xlane.xlu0 %5796  ;;  %v5672_v45 = vmul.f32 %v11046_v27, %v15141_v17 }
 0xcdc   : > { %v11050_v5 = vpop.eup %11049  ;;  %v5512_v23 = vmul.f32 %v11048_v3, %v15125_v42  ;;  %v17306_v3 = vld [vmem:[#allocation40_spill] sm:$0xff] }
 0xcdd   : > { %v11052_v39 = vpop.eup %11051  ;;  %v5799_v43 = vpop.xlane.xlu1 %5798  ;;  %v5673_v14 = vmul.f32 %v11050_v5, %v15145_v53 }
 0xcde   : > { %v11054_v55 = vpop.eup %11053  ;;  %v6016_v8 = vpack.c.bf16 %v5513_v10, %v5512_v23  ;;  %v5833_v0 = vmul.f32 %v11052_v39, %v15137_v59  ;;  %v17307_v10 = vld [vmem:[#allocation23_spill] sm:$0xff] }
 0xcdf   : > { %v11056_v46 = vpop.eup %11055  ;;  %v5637_v48 = vpop.xlane.xlu0 %5636  ;;  %v6017_v56 = vpack.c.bf16 %v5673_v14, %v5672_v45  ;;  %v5992_v33 = vmul.f32 %v11054_v55, %v15149_v49  ;;  %v9074_v14 = vld [vmem:[%s16884_s2 + $0x28c] sm:$0xf] }
 0xce0   : > { %v11058_v22 = vpop.eup %11057  ;;  %11061 = vrcp.f32 %v5637_v48  ;;  %v5832_v42 = vmul.f32 %v11056_v46, %v15133_v12  ;;  %v9075_v55 = vld [vmem:[%s16884_s2 + $0x2ac] sm:$0xf]  ;;  %v17309_v46 = vld [vmem:[#allocation38_spill] sm:$0xff] }
 0xce1   : > { %11063 = vrcp.f32 %v5477_v24  ;;  %6096 = vmatprep.mubr.bf16.mxu1 %v6017_v56  ;;  %v5639_v57 = vpop.xlane.xlu1 %5638  ;;  %v5993_v17 = vmul.f32 %v11058_v22, %v15153_v61  ;;  %v9088_v56 = vcombine.low %v9074_v14, %v9075_v55  ;;  %v17320_v14 = vld [vmem:[#allocation31_spill] sm:$0xff] }
 0xce2   : > { %11065 = vrcp.f32 %v5639_v57  ;;  %6097 = vmatmul.mubr.bf16.gmra.mrb[224].mxu1 %v6016_v8  ;;  %v6018_v15 = vpack.c.bf16 %v5833_v0, %v5832_v42  ;;  %v9076_v57 = vld [vmem:[%s16884_s2 + $0x2cc] sm:$0xf] }
 0xce3   : > { %11067 = vrcp.f32 %v5799_v43  ;;  %v5957_v53 = vpop.xlane.xlu0 %5956  ;;  %v6019_v63 = vpack.c.bf16 %v5993_v17, %v5992_v33  ;;  %v17308_v43 = vld [vmem:[#allocation25_spill] sm:$0xff]  ;;  %v9077_v33 = vld [vmem:[%s16884_s2 + $0x2ec] sm:$0xf] }
 0xce4   : > { %11069 = vrcp.f32 %v5957_v53  ;;  %v11060_v52 = vpop.eup %11059  ;;  %v9078_v17 = vld [vmem:[%s16884_s2 + $0x30c] sm:$0xf] }
 0xce5   : > { %11071 = vrcp.f32 %v5797_v38  ;;  %6193 = vmatprep.mubr.bf16.mxu0 %v6019_v63  ;;  %v5959_v25 = vpop.xlane.xlu1 %5958  ;;  %v5515_v19 = vmul.f32 %v11060_v52, %v15161_v18  ;;  %v17310_v63 = vld [vmem:[#allocation26_spill] sm:$0xff] }
 0xce6   : > { %11073 = vrcp.f32 %v5959_v25  ;;  %6194 = vmatmul.mubr.bf16.gmra.mrb[240].mxu0 %v6018_v15  ;;  %v9089_v25 = vcombine.low %v9076_v57, %v9077_v33 }
 0xce7   : > { %v5481_v59 = vpop.xlane.xlu0 %5480 }
 0xce9   : > { %v5483_v6 = vpop.xlane.xlu1 %5482 }
 0xcea   : > { %v11062_v49 = vpop.eup %11061  ;;  %11075 = vrcp.f32 %v5483_v6  ;;  %v17311_v6 = vld [vmem:[#allocation45_spill] sm:$0xff] }
 0xceb   : > { %v11064_v41 = vpop.eup %11063  ;;  %v5801_v61 = vpop.xlane.xlu0 %5800  ;;  %v5674_v50 = vmul.f32 %v11062_v49, %v15173_v37  ;;  %v17304_v37 = vld [vmem:[#allocation39_spill] sm:$0xff] }
 0xcec   : > { %v11066_v54 = vpop.eup %11065  ;;  %v5514_v30 = vmul.f32 %v11064_v41, %v15157_v58  ;;  %v17312_v41 = vld [vmem:[#allocation44_spill] sm:$0xff] }
 0xced   : > { %v11068_v12 = vpop.eup %11067  ;;  %v5803_v21 = vpop.xlane.xlu1 %5802  ;;  %v5675_v62 = vmul.f32 %v11066_v54, %v15177_v47  ;;  %v17305_v47 = vld [vmem:[#allocation43_spill] sm:$0xff]  ;;  %v17313_v54 = vld [vmem:[#allocation24_spill] sm:$0xff] }
 0xcee   : > { %v11070_v40 = vpop.eup %11069  ;;  %v6020_v35 = vpack.c.bf16 %v5515_v19, %v5514_v30  ;;  %v5835_v13 = vmul.f32 %v11068_v12, %v15169_v36  ;;  %v9072_v36 = vld [vmem:[%s16884_s2 + $0x24c] sm:$0xf] }
 0xcef   : > { %v11072_v11 = vpop.eup %11071  ;;  %v5641_v9 = vpop.xlane.xlu0 %5640  ;;  %v6021_v32 = vpack.c.bf16 %v5675_v62, %v5674_v50  ;;  %v5994_v16 = vmul.f32 %v11070_v40, %v17303_v44  ;;  %v9087_v7 = vcombine.low %v9072_v36, %v9073_v60  ;;  %v17317_v36 = vld [vmem:[#allocation46_spill] sm:$0xff] }
 0xcf0   : > { %v11074_v2 = vpop.eup %11073  ;;  %11077 = vrcp.f32 %v5641_v9  ;;  %v5834_v58 = vmul.f32 %v11072_v11, %v17305_v47  ;;  %v9080_v11 = vld [vmem:[%s16884_s2 + $0x34c] sm:$0xf] }
 0xcf1   : > { %11079 = vrcp.f32 %v5481_v59  ;;  %6104 = vmatprep.mubr.bf16.mxu1 %v6021_v32  ;;  %v5643_v18 = vpop.xlane.xlu1 %5642  ;;  %v5995_v1 = vmul.f32 %v11074_v2, %v17304_v37  ;;  %10108 = vmatprep.subr.bf16.mxu1 %v9087_v7  ;;  %v9079_v59 = vld [vmem:[%s16884_s2 + $0x32c] sm:$0xf] }
 0xcf2   : > { %11081 = vrcp.f32 %v5643_v18  ;;  %6105 = vmatmul.mubr.bf16.gmra.mrb[228].mxu1 %v6020_v35  ;;  %v6022_v34 = vpack.c.bf16 %v5835_v13, %v5834_v58  ;;  %v9090_v12 = vcombine.low %v9078_v17, %v9079_v59  ;;  %v9081_v9 = vld [vmem:[%s16884_s2 + $0x36c] sm:$0xf]  ;;  %v17316_v58 = vld [vmem:[#allocation27_spill] sm:$0xff] }
 0xcf3   : > { %11083 = vrcp.f32 %v5803_v21  ;;  %v5961_v20 = vpop.xlane.xlu0 %5960  ;;  %v6023_v4 = vpack.c.bf16 %v5995_v1, %v5994_v16  ;;  %10109 = vmatpush3.bf16.msra.mxu1 %v9087_v7  ;;  %v9091_v32 = vcombine.low %v9080_v11, %v9081_v9  ;;  %v17314_v16 = vld [vmem:[#allocation6_spill] sm:$0xff]  ;;  %v17315_v1 = vld [vmem:[#allocation7_spill] sm:$0xff] }
 0xcf4   : > { %11085 = vrcp.f32 %v5961_v20  ;;  %v11076_v31 = vpop.eup %11075  ;;  %10110 = vmatprep.subr.bf16.mxu1 %v9088_v56 }
 0xcf5   : > { %11087 = vrcp.f32 %v5801_v61  ;;  %6201 = vmatprep.mubr.bf16.mxu0 %v6023_v4  ;;  %v5963_v29 = vpop.xlane.xlu1 %5962  ;;  %v5517_v38 = vmul.f32 %v11076_v31, %v17306_v3  ;;  %v9082_v4 = vld [vmem:[%s16884_s2 + $0x38c] sm:$0xf] }
 0xcf6   : > { %11089 = vrcp.f32 %v5963_v29  ;;  %6202 = vmatmul.mubr.bf16.gmra.mrb[244].mxu0 %v6022_v34  ;;  %v9083_v34 = vld [vmem:[%s16884_s2 + $0x3ac] sm:$0xf] }
 0xcf7   : > { %v5485_v28 = vpop.xlane.xlu0 %5484  ;;  %10111 = vmatpush3.bf16.msra.mxu1 %v9088_v56  ;;  %v9092_v7 = vcombine.low %v9082_v4, %v9083_v34  ;;  %v17322_v56 = vmov 0  }
 0xcf8   : > { %10112 = vmatprep.subr.bf16.mxu1 %v9089_v25 }
 0xcf9   : > { %v5487_v27 = vpop.xlane.xlu1 %5486 }
 0xcfa   : > { %v11078_v26 = vpop.eup %11077  ;;  %11091 = vrcp.f32 %v5487_v27  ;;  %v17319_v27 = vld [vmem:[#allocation30_spill] sm:$0xff] }
 0xcfb   : > { %v11080_v24 = vpop.eup %11079  ;;  %v5676_v39 = vmul.f32 %v11078_v26, %v17307_v10  ;;  %10113 = vmatpush3.bf16.msra.mxu1 %v9089_v25 }
 0xcfc   : > { %v11082_v51 = vpop.eup %11081  ;;  %v5516_v48 = vmul.f32 %v11080_v24, %v17309_v46  ;;  %10114 = vmatprep.subr.bf16.mxu1 %v9090_v12 }
 0xcfd   : > { %v11084_v5 = vpop.eup %11083  ;;  %v5677_v45 = vmul.f32 %v11082_v51, %v17308_v43 }
 0xcfe   : > { %v11086_v23 = vpop.eup %11085  ;;  %v6024_v53 = vpack.c.bf16 %v5517_v38, %v5516_v48  ;;  %v5837_v15 = vmul.f32 %v11084_v5, %v17310_v63  ;;  %v9084_v38 = vld [vmem:[%s16884_s2 + $0x3cc] sm:$0xf] }
 0xcff   : > { %v11088_v22 = vpop.eup %11087  ;;  %v5645_v8 = vpop.xlane.xlu0 %5644  ;;  %v6025_v0 = vpack.c.bf16 %v5677_v45, %v5676_v39  ;;  %v5996_v49 = vmul.f32 %v11086_v23, %v17311_v6  ;;  %10115 = vmatpush3.bf16.msra.mxu1 %v9090_v12  ;;  %v9085_v5 = vld [vmem:[%s16884_s2 + $0x3ec] sm:$0xf]  ;;  %v17321_v23 = vld [vmem:[#allocation29_spill] sm:$0xff] }
 0xd00   : > { %v11090_v42 = vpop.eup %11089  ;;  %11093 = vrcp.f32 %v5645_v8  ;;  %v5836_v19 = vmul.f32 %v11088_v22, %v17313_v54  ;;  %10116 = vmatprep.subr.bf16.mxu1 %v9091_v32  ;;  %v9093_v39 = vcombine.low %v9084_v38, %v9085_v5 }
 0xd01   : > { %11095 = vrcp.f32 %v5485_v28  ;;  %6112 = vmatprep.mubr.bf16.mxu1 %v6025_v0  ;;  %v5647_v52 = vpop.xlane.xlu1 %5646  ;;  %v5997_v61 = vmul.f32 %v11090_v42, %v17312_v41  ;;  %v17318_v28 = vld [vmem:[#allocation28_spill] sm:$0xff] }
 0xd02   : > { %11097 = vrcp.f32 %v5647_v52  ;;  %6113 = vmatmul.mubr.bf16.gmra.mrb[232].mxu1 %v6024_v53  ;;  %v6026_v62 = vpack.c.bf16 %v5837_v15, %v5836_v19 }
 0xd03   : > { %v5965_v21 = vpop.xlane.xlu0 %5964  ;;  %v6027_v50 = vpack.c.bf16 %v5997_v61, %v5996_v49  ;;  %10117 = vmatpush3.bf16.msra.mxu1 %v9091_v32 }
 0xd04   : > { %11099 = vrcp.f32 %v5965_v21  ;;  %v11092_v2 = vpop.eup %11091  ;;  %10118 = vmatprep.subr.bf16.mxu1 %v9092_v7 }
 0xd05   : > { %6209 = vmatprep.mubr.bf16.mxu0 %v6027_v50  ;;  %v5967_v40 = vpop.xlane.xlu1 %5966  ;;  %v5519_v37 = vmul.f32 %v11092_v2, %v17314_v16 }
 0xd06   : > { %11101 = vrcp.f32 %v5967_v40  ;;  %6210 = vmatmul.mubr.bf16.gmra.mrb[248].mxu0 %v6026_v62 }
 0xd07   : > { %v5805_v30 = vpop.xlane.xlu0 %5804  ;;  %10119 = vmatpush3.bf16.msra.mxu1 %v9092_v7 }
 0xd08   : > { %11103 = vrcp.f32 %v5805_v30  ;;  %10120 = vmatprep.subr.bf16.mxu1 %v9093_v39 }
 0xd09   : > { %v5807_v35 = vpop.xlane.xlu1 %5806 }
 0xd0a   : > { %v11094_v13 = vpop.eup %11093  ;;  %11105 = vrcp.f32 %v5807_v35 }
 0xd0b   : > { %v11096_v18 = vpop.eup %11095  ;;  %v5678_v47 = vmul.f32 %v11094_v13, %v17315_v1  ;;  %10121 = vmatpush3.bf16.msra.mxu1 %v9093_v39 }
 0xd0c   : > { %v11098_v44 = vpop.eup %11097  ;;  %v5518_v60 = vmul.f32 %v11096_v18, %v17317_v36 }
 0xd0d   : > { %v5679_v20 = vmul.f32 %v11098_v44, %v17316_v58 }
 0xd0e   : > { %v11100_v29 = vpop.eup %11099  ;;  %v6028_v24 = vpack.c.bf16 %v5519_v37, %v5518_v60 }
 0xd0f   : > { %v6029_v31 = vpack.c.bf16 %v5679_v20, %v5678_v47  ;;  %v5998_v51 = vmul.f32 %v11100_v29, %v17318_v28 }
 0xd10   : > { %v11102_v26 = vpop.eup %11101 }
 0xd11   : > { %6120 = vmatprep.mubr.bf16.mxu1 %v6029_v31  ;;  %v5999_v3 = vmul.f32 %v11102_v26, %v17319_v27 }
 0xd12   : > { %v11104_v10 = vpop.eup %11103  ;;  %6121 = vmatmul.mubr.bf16.gmra.mrb[236].mxu1 %v6028_v24 }
 0xd13   : > { %v6031_v43 = vpack.c.bf16 %v5999_v3, %v5998_v51  ;;  %v5838_v55 = vmul.f32 %v11104_v10, %v17320_v14 }
 0xd14   : > { %v11106_v45 = vpop.eup %11105 }
 0xd15   : > { %6217 = vmatprep.mubr.bf16.mxu0 %v6031_v43  ;;  %v5839_v46 = vmul.f32 %v11106_v45, %v17321_v23 }
 0xd17   : > { %v6030_v48 = vpack.c.bf16 %v5839_v46, %v5838_v55 }
 0xd19   : > { %6218 = vmatmul.mubr.bf16.gmra.mrb[252].mxu0 %v6030_v48 }
 0xd1a   : > { %6925 = vmatprep.mubr.bf16.mxu0 %v17322_v56 }
 0xd75   : > { %v9722_v22 = vpop.f32.mrb[208].mxu1 }
 0xd76   : > { %v9723_v8 = vpop.f32.mrb[209].mxu1 }
 0xd77   : > { %v9724_v0 = vadd.f32 %v9723_v8, %v9722_v22  ;;  %v9725_v57 = vpop.f32.mrb[210].mxu1 }
 0xd78   : > { %v9726_v33 = vpop.f32.mrb[211].mxu1 }
 0xd79   : > { %v9727_v17 = vadd.f32 %v9726_v33, %v9725_v57  ;;  %v9786_v42 = vpop.f32.mrb[224].mxu0 }
 0xd7a   : > { %v9787_v53 = vpop.f32.mrb[225].mxu0 }
 0xd7b   : > { %v9788_v63 = vadd.f32 %v9787_v53, %v9786_v42  ;;  %v9789_v15 = vpop.f32.mrb[226].mxu0 }
 0xd7c   : > { %v9790_v25 = vpop.f32.mrb[227].mxu0 }
 0xd7d   : > { %v6164_v59 = vadd.f32 %v9788_v63, %v9724_v0  ;;  %v9791_v52 = vadd.f32 %v9790_v25, %v9789_v15 }
 0xd7f   : > { %v6167_v6 = vadd.f32 %v9791_v52, %v9727_v17 }
 0xd81   : > { %v6226_v49 = vpack.c.bf16 %v6167_v6, %v6164_v59 }
 0xd83   : > { %10122 = vmatprep.mubr.bf16.mxu1 %v6226_v49 }
 0xd85   : > { %v9728_v41 = vpop.f32.mrb[212].mxu1 }
 0xd86   : > { %v9729_v61 = vpop.f32.mrb[213].mxu1 }
 0xd87   : > { %v9730_v54 = vadd.f32 %v9729_v61, %v9728_v41  ;;  %v9731_v19 = vpop.f32.mrb[214].mxu1 }
 0xd88   : > { %v9732_v12 = vpop.f32.mrb[215].mxu1 }
 0xd89   : > { %v9733_v21 = vadd.f32 %v9732_v12, %v9731_v19  ;;  %v9792_v50 = vpop.f32.mrb[228].mxu0 }
 0xd8a   : > { %v9793_v62 = vpop.f32.mrb[229].mxu0 }
 0xd8b   : > { %v9794_v40 = vadd.f32 %v9793_v62, %v9792_v50  ;;  %v9795_v30 = vpop.f32.mrb[230].mxu0 }
 0xd8c   : > { %v9796_v11 = vpop.f32.mrb[231].mxu0 }
 0xd8d   : > { %v6172_v9 = vadd.f32 %v9794_v40, %v9730_v54  ;;  %v9797_v32 = vadd.f32 %v9796_v11, %v9795_v30 }
 0xd8f   : > { %v6175_v2 = vadd.f32 %v9797_v32, %v9733_v21 }
 0xd91   : > { %v6227_v35 = vpack.c.bf16 %v6175_v2, %v6172_v9 }
 0xd93   : > { %10123 = vmatmul.mubr.bf16.vlgmr.msra.gmra.mrb[240].mxu1 %v6227_v35 }
 0xd95   : > { %v9734_v13 = vpop.f32.mrb[216].mxu1 }
 0xd96   : > { %v9735_v18 = vpop.f32.mrb[217].mxu1 }
 0xd97   : > { %v9736_v44 = vadd.f32 %v9735_v18, %v9734_v13  ;;  %v9737_v16 = vpop.f32.mrb[218].mxu1 }
 0xd98   : > { %v9738_v37 = vpop.f32.mrb[219].mxu1 }
 0xd99   : > { %v9739_v1 = vadd.f32 %v9738_v37, %v9737_v16  ;;  %v9798_v47 = vpop.f32.mrb[232].mxu0 }
 0xd9a   : > { %v9799_v58 = vpop.f32.mrb[233].mxu0 }
 0xd9b   : > { %v9800_v20 = vadd.f32 %v9799_v58, %v9798_v47  ;;  %v9801_v4 = vpop.f32.mrb[234].mxu0 }
 0xd9c   : > { %v9802_v34 = vpop.f32.mrb[235].mxu0 }
 0xd9d   : > { %v6180_v29 = vadd.f32 %v9800_v20, %v9736_v44  ;;  %v9803_v36 = vadd.f32 %v9802_v34, %v9801_v4 }
 0xd9f   : > { %v6183_v60 = vadd.f32 %v9803_v36, %v9739_v1 }
 0xda1   : > { %v6228_v7 = vpack.c.bf16 %v6183_v60, %v6180_v29 }
 0xda3   : > { %10126 = vmatprep.mubr.bf16.mxu1 %v6228_v7 }
 0xda5   : > { %v9740_v31 = vpop.f32.mrb[220].mxu1 }
 0xda6   : > { %v9741_v26 = vpop.f32.mrb[221].mxu1 }
 0xda7   : > { %v9742_v24 = vadd.f32 %v9741_v26, %v9740_v31  ;;  %v9743_v28 = vpop.f32.mrb[222].mxu1 }
 0xda8   : > { %v9744_v51 = vpop.f32.mrb[223].mxu1 }
 0xda9   : > { %v9745_v27 = vadd.f32 %v9744_v51, %v9743_v28  ;;  %v9804_v3 = vpop.f32.mrb[236].mxu0 }
 0xdaa   : > { %v9805_v38 = vpop.f32.mrb[237].mxu0 }
 0xdab   : > { %v9806_v5 = vadd.f32 %v9805_v38, %v9804_v3  ;;  %v9807_v10 = vpop.f32.mrb[238].mxu0 }
 0xdac   : > { %v9808_v39 = vpop.f32.mrb[239].mxu0 }
 0xdad   : > { %v6188_v43 = vadd.f32 %v9806_v5, %v9742_v24  ;;  %v9809_v45 = vadd.f32 %v9808_v39, %v9807_v10 }
 0xdaf   : > { %v6191_v14 = vadd.f32 %v9809_v45, %v9745_v27  ;;  %v15363_v45 = vld [vmem:[%s16887_s5 + $0x25] ss:$0 sm:$0xff] }
 0xdb1   : > { %v6229_v55 = vpack.c.bf16 %v6191_v14, %v6188_v43 }
 0xdb3   : > { %10127 = vmatmul.mubr.bf16.gmra.mrb[244].mxu1 %v6229_v55 }
 0xdb5   : > { %v9746_v23 = vpop.f32.mrb[224].mxu1 }
 0xdb6   : > { %v9747_v46 = vpop.f32.mrb[225].mxu1 }
 0xdb7   : > { %v9748_v48 = vadd.f32 %v9747_v46, %v9746_v23  ;;  %v9749_v22 = vpop.f32.mrb[226].mxu1 }
 0xdb8   : > { %v9750_v8 = vpop.f32.mrb[227].mxu1 }
 0xdb9   : > { %v9751_v0 = vadd.f32 %v9750_v8, %v9749_v22  ;;  %v9810_v57 = vpop.f32.mrb[240].mxu0  ;;  %v17323_v22 = vld [vmem:[#allocation8_spill] sm:$0xff] }
 0xdba   : > { %v9811_v33 = vpop.f32.mrb[241].mxu0 }
 0xdbb   : > { %v9812_v17 = vadd.f32 %v9811_v33, %v9810_v57  ;;  %v9813_v42 = vpop.f32.mrb[242].mxu0  ;;  %v17324_v57 = vld [vmem:[#allocation9_spill] sm:$0xff] }
 0xdbc   : > { %v9814_v53 = vpop.f32.mrb[243].mxu0 }
 0xdbd   : > { %v6196_v63 = vadd.f32 %v9812_v17, %v9748_v48  ;;  %v9815_v15 = vadd.f32 %v9814_v53, %v9813_v42 }
 0xdbf   : > { %v6199_v25 = vadd.f32 %v9815_v15, %v9751_v0  ;;  %v17325_v15 = vld [vmem:[#allocation10_spill] sm:$0xff] }
 0xdc1   : > { %v6230_v59 = vpack.c.bf16 %v6199_v25, %v6196_v63 }
 0xdc3   : > { %10130 = vmatprep.mubr.bf16.mxu1 %v6230_v59  ;;  %v17326_v59 = vld [vmem:[#allocation11_spill] sm:$0xff] }
 0xdc5   : > { %v9752_v52 = vpop.f32.mrb[228].mxu1 }
 0xdc6   : > { %v9753_v6 = vpop.f32.mrb[229].mxu1 }
 0xdc7   : > { %v9754_v49 = vadd.f32 %v9753_v6, %v9752_v52  ;;  %v9755_v41 = vpop.f32.mrb[230].mxu1 }
 0xdc8   : > { %v9756_v61 = vpop.f32.mrb[231].mxu1 }
 0xdc9   : > { %v9757_v54 = vadd.f32 %v9756_v61, %v9755_v41  ;;  %v9816_v19 = vpop.f32.mrb[244].mxu0  ;;  %v9094_v41 = vld [vmem:[%s16884_s2 + $0x210] sm:$0xff] }
 0xdca   : > { %v9817_v12 = vpop.f32.mrb[245].mxu0  ;;  %v9096_v61 = vld [vmem:[%s16884_s2 + $0x230] sm:$0xff] }
 0xdcb   : > { %v9818_v21 = vadd.f32 %v9817_v12, %v9816_v19  ;;  %v9819_v50 = vpop.f32.mrb[246].mxu0  ;;  %v9127_v19 = vcombine.low %v9094_v41, %v9096_v61  ;;  %v9128_v12 = vcombine.high %v9094_v41, %v9096_v61  ;;  %v9114_v61 = vld [vmem:[%s16884_s2 + $0x350] sm:$0xff] }
 0xdcc   : > { %v9820_v62 = vpop.f32.mrb[247].mxu0 }
 0xdcd   : > { %v6204_v40 = vadd.f32 %v9818_v21, %v9754_v49  ;;  %v9821_v30 = vadd.f32 %v9820_v62, %v9819_v50  ;;  %v9097_v21 = vld [vmem:[%s16884_s2 + $0x238] sm:$0xff]  ;;  %6893 = vmatprep.subr.bf16.mxu0 %v9128_v12 }
 0xdce   : > { %6894 = vmatpush1.bf16.msra.mxu0 %v9127_v19  ;;  %v9115_v19 = vld [vmem:[%s16884_s2 + $0x358] sm:$0xff] }
 0xdcf   : > { %v6207_v11 = vadd.f32 %v9821_v30, %v9757_v54  ;;  %v9095_v54 = vld [vmem:[%s16884_s2 + $0x218] sm:$0xff] }
 0xdd0   : > { %v9129_v50 = vcombine.low %v9095_v54, %v9097_v21  ;;  %v9130_v62 = vcombine.high %v9095_v54, %v9097_v21  ;;  %v9116_v54 = vld [vmem:[%s16884_s2 + $0x370] sm:$0xff] }
 0xdd1   : > { %v6231_v9 = vpack.c.bf16 %v6207_v11, %v6204_v40  ;;  %v9098_v11 = vld [vmem:[%s16884_s2 + $0x250] sm:$0xff]  ;;  %v9148_v21 = vcombine.high %v9114_v61, %v9116_v54 }
 0xdd2   : > { %7006 = vmatprep.subr.bf16.mxu1 %v9130_v62  ;;  %v9147_v62 = vcombine.low %v9114_v61, %v9116_v54 }
 0xdd3   : > { %10131 = vmatmul.mubr.bf16.gmra.mrb[248].mxu1 %v6231_v9  ;;  %v9100_v9 = vld [vmem:[%s16884_s2 + $0x270] sm:$0xff] }
 0xdd4   : > { %7007 = vmatpush1.bf16.msra.mxu1 %v9129_v50  ;;  %v9117_v50 = vld [vmem:[%s16884_s2 + $0x378] sm:$0xff] }
 0xdd5   : > { %v9758_v32 = vpop.f32.mrb[232].mxu1 }
 0xdd6   : > { %v9759_v2 = vpop.f32.mrb[233].mxu1 }
 0xdd7   : > { %v9760_v35 = vadd.f32 %v9759_v2, %v9758_v32  ;;  %v9761_v13 = vpop.f32.mrb[234].mxu1  ;;  %v9099_v32 = vld [vmem:[%s16884_s2 + $0x258] sm:$0xff] }
 0xdd8   : > { %v9762_v18 = vpop.f32.mrb[235].mxu1 }
 0xdd9   : > { %v9763_v44 = vadd.f32 %v9762_v18, %v9761_v13  ;;  %v9822_v16 = vpop.f32.mrb[248].mxu0  ;;  %v9132_v13 = vcombine.high %v9098_v11, %v9100_v9  ;;  %v9101_v18 = vld [vmem:[%s16884_s2 + $0x278] sm:$0xff] }
 0xdda   : > { %v9823_v37 = vpop.f32.mrb[249].mxu0 }
 0xddb   : > { %v9824_v1 = vadd.f32 %v9823_v37, %v9822_v16  ;;  %v9825_v47 = vpop.f32.mrb[250].mxu0  ;;  %v9131_v16 = vcombine.low %v9098_v11, %v9100_v9  ;;  %v9133_v37 = vcombine.low %v9099_v32, %v9101_v18  ;;  %6895 = vmatprep.subr.bf16.mxu0 %v9132_v13  ;;  %v9118_v11 = vld [vmem:[%s16884_s2 + $0x390] sm:$0xff] }
 0xddc   : > { %v9826_v58 = vpop.f32.mrb[251].mxu0  ;;  %v9120_v9 = vld [vmem:[%s16884_s2 + $0x3b0] sm:$0xff] }
 0xddd   : > { %v6212_v20 = vadd.f32 %v9824_v1, %v9760_v35  ;;  %v9827_v4 = vadd.f32 %v9826_v58, %v9825_v47  ;;  %v17327_v1 = vld [vmem:[#allocation12_spill] sm:$0xff]  ;;  %6896 = vmatpush1.bf16.msra.mxu0 %v9131_v16  ;;  %v9151_v13 = vcombine.low %v9118_v11, %v9120_v9  ;;  %v9122_v16 = vld [vmem:[%s16884_s2 + $0x3d0] sm:$0xff] }
 0xddf   : > { %v6215_v34 = vadd.f32 %v9827_v4, %v9763_v44  ;;  %v9102_v4 = vld [vmem:[%s16884_s2 + $0x290] sm:$0xff] }
 0xde1   : > { %v6232_v29 = vpack.c.bf16 %v6215_v34, %v6212_v20  ;;  %v9134_v20 = vcombine.high %v9099_v32, %v9101_v18  ;;  %v9104_v34 = vld [vmem:[%s16884_s2 + $0x2b0] sm:$0xff]  ;;  %v9119_v32 = vld [vmem:[%s16884_s2 + $0x398] sm:$0xff] }
 0xde3   : > { %10134 = vmatprep.mubr.bf16.mxu1 %v6232_v29  ;;  %v9103_v29 = vld [vmem:[%s16884_s2 + $0x298] sm:$0xff]  ;;  %7008 = vmatprep.subr.bf16.mxu1 %v9134_v20 }
 0xde4   : > { %7009 = vmatpush1.bf16.msra.mxu1 %v9133_v37  ;;  %v9124_v37 = vld [vmem:[%s16884_s2 + $0x3f0] sm:$0xff]  ;;  %v9125_v20 = vld [vmem:[%s16884_s2 + $0x3f8] sm:$0xff] }
 0xde5   : > { %v9764_v36 = vpop.f32.mrb[236].mxu1 }
 0xde6   : > { %v9765_v60 = vpop.f32.mrb[237].mxu1 }
 0xde7   : > { %v9766_v7 = vadd.f32 %v9765_v60, %v9764_v36  ;;  %v9767_v31 = vpop.f32.mrb[238].mxu1  ;;  %v17328_v36 = vld [vmem:[#allocation13_spill] sm:$0xff] }
 0xde8   : > { %v9768_v26 = vpop.f32.mrb[239].mxu1 }
 0xde9   : > { %v9769_v24 = vadd.f32 %v9768_v26, %v9767_v31  ;;  %v9105_v31 = vld [vmem:[%s16884_s2 + $0x2b8] sm:$0xff]  ;;  %v9135_v26 = vcombine.low %v9102_v4, %v9104_v34 }
 0xdec   : > { %v9828_v28 = vpop.f32.mrb[252].mxu0 }
 0xded   : > { %v9829_v51 = vpop.f32.mrb[253].mxu0 }
 0xdee   : > { %v9830_v27 = vadd.f32 %v9829_v51, %v9828_v28  ;;  %v9831_v3 = vpop.f32.mrb[254].mxu0  ;;  %v9138_v28 = vcombine.high %v9103_v29, %v9105_v31 }
 0xdef   : > { %v9832_v38 = vpop.f32.mrb[255].mxu0 }
 0xdf0   : > { %v6220_v5 = vadd.f32 %v9830_v27, %v9766_v7  ;;  %v9833_v10 = vadd.f32 %v9832_v38, %v9831_v3  ;;  %v9136_v7 = vcombine.high %v9102_v4, %v9104_v34  ;;  %7010 = vmatprep.subr.bf16.mxu1 %v9138_v28  ;;  %v9106_v3 = vld [vmem:[%s16884_s2 + $0x2d0] sm:$0xff]  ;;  %v9155_v4 = vcombine.low %v9122_v16, %v9124_v37  ;;  %v17331_v28 = vld [vmem:[#allocation16_spill] sm:$0xff] }
 0xdf1   : > { %v9108_v38 = vld [vmem:[%s16884_s2 + $0x2f0] sm:$0xff] }
 0xdf2   : > { %v6223_v39 = vadd.f32 %v9833_v10, %v9769_v24  ;;  %v9137_v24 = vcombine.low %v9103_v29, %v9105_v31  ;;  %6897 = vmatprep.subr.bf16.mxu0 %v9136_v7 }
 0xdf3   : > { %6898 = vmatpush1.bf16.msra.mxu0 %v9135_v26 }
 0xdf4   : > { %v6233_v43 = vpack.c.bf16 %v6223_v39, %v6220_v5  ;;  %v9107_v5 = vld [vmem:[%s16884_s2 + $0x2d8] sm:$0xff]  ;;  %7011 = vmatpush1.bf16.msra.mxu1 %v9137_v24 }
 0xdf6   : > { %10135 = vmatmul.mubr.bf16.gmra.mrb[252].mxu1 %v6233_v43  ;;  %v9140_v43 = vcombine.high %v9106_v3, %v9108_v38 }
 0xdf7   : > { %7038 = vmatprep.mubr.bf16.mxu1 %v17322_v56 }
 0xdf8   : > { %6899 = vmatprep.subr.bf16.mxu0 %v9140_v43 }
 0xe66   : > { %v10124_v14 = vpop.f32.mrb[240].mxu1 }
 0xe67   : > { %v6333_v55 = vpop.f32.mrb[241].mxu1  ;;  %v6342_v17 = vadd.f32 %v10124_v14, %v15363_v45  ;;  %v9109_v14 = vld [vmem:[%s16884_s2 + $0x2f8] sm:$0xff] }
 0xe68   : > { %v6334_v23 = vadd.f32 %v6333_v55, %v15363_v45  ;;  %v10125_v46 = vpop.f32.mrb[242].mxu1  ;;  %v9139_v55 = vcombine.low %v9106_v3, %v9108_v38  ;;  %v17332_v3 = vld [vmem:[#allocation17_spill] sm:$0xff] }
 0xe69   : > { %v6336_v48 = vpop.f32.mrb[243].mxu1  ;;  %v6345_v53 = vadd.f32 %v10125_v46, %v15363_v45  ;;  %v15382_v25 = vadd.f32 %v6342_v17, %v17325_v15  ;;  %v9142_v46 = vcombine.high %v9107_v5, %v9109_v14  ;;  %v9111_v17 = vld [vmem:[%s16884_s2 + $0x318] sm:$0xff] }
 0xe6a   : > { %v15367_v8 = vadd.f32 %v6334_v23, %v17323_v22  ;;  %v6337_v0 = vadd.f32 %v6336_v48, %v15363_v45  ;;  %v9141_v23 = vcombine.low %v9107_v5, %v9109_v14  ;;  %v17329_v48 = vld [vmem:[#allocation14_spill] sm:$0xff]  ;;  %6900 = vmatpush1.bf16.msra.mxu0 %v9139_v55 }
 0xe6b   : > { %v15385_v52 = vadd.f32 %v6345_v53, %v17326_v59  ;;  %v6464_v6 = vmul.f32 %v15382_v25, %v15382_v25  ;;  %7012 = vmatprep.subr.bf16.mxu1 %v9142_v46  ;;  %v9113_v15 = vld [vmem:[%s16884_s2 + $0x338] sm:$0xff] }
 0xe6c   : > { %v15371_v33 = vadd.f32 %v6337_v0, %v17324_v57  ;;  %6414 = vadd.xlane.f32.xlu0 %v15367_v8  ;;  %v6462_v42 = vmul.f32 %v15367_v8, %v15367_v8  ;;  %v9110_v0 = vld [vmem:[%s16884_s2 + $0x310] sm:$0xff]  ;;  %7013 = vmatpush1.bf16.msra.mxu1 %v9141_v23  ;;  %v17333_v14 = vld [vmem:[#allocation18_spill] sm:$0xff]  ;;  %v17334_v23 = vld [vmem:[#allocation4_spill] sm:$0xff] }
 0xe6d   : > { %v6465_v49 = vmul.f32 %v15385_v52, %v15385_v52  ;;  %v9112_v57 = vld [vmem:[%s16884_s2 + $0x330] sm:$0xff] }
 0xe6e   : > { %6416 = vadd.xlane.f32.xlu1 %v15371_v33  ;;  %v6463_v63 = vmul.f32 %v15371_v33, %v15371_v33  ;;  %v9143_v59 = vcombine.low %v9110_v0, %v9112_v57 }
 0xe70   : > { %6478 = vadd.xlane.f32.xlu0 %v6462_v42  ;;  %v17330_v42 = vld [vmem:[#allocation15_spill] sm:$0xff] }
 0xe72   : > { %6480 = vadd.xlane.f32.xlu1 %v6463_v63  ;;  %v9144_v63 = vcombine.high %v9110_v0, %v9112_v57 }
 0xe74   : > { %6418 = vadd.xlane.f32.xlu0 %v15382_v25  ;;  %6901 = vmatprep.subr.bf16.mxu0 %v9144_v63 }
 0xe75   : > { %6902 = vmatpush1.bf16.msra.mxu0 %v9143_v59  ;;  %v17335_v59 = vld [vmem:[#allocation3_spill] sm:$0xff] }
 0xe76   : > { %6420 = vadd.xlane.f32.xlu1 %v15385_v52  ;;  %6903 = vmatprep.subr.bf16.mxu0 %v9148_v21 }
 0xe78   : > { %6482 = vadd.xlane.f32.xlu0 %v6464_v6  ;;  %v9145_v6 = vcombine.low %v9111_v17, %v9113_v15 }
 0xe79   : > { %6904 = vmatpush1.bf16.msra.mxu0 %v9147_v62 }
 0xe7a   : > { %6484 = vadd.xlane.f32.xlu1 %v6465_v49  ;;  %v9146_v49 = vcombine.high %v9111_v17, %v9113_v15 }
 0xe7c   : > { %7014 = vmatprep.subr.bf16.mxu1 %v9146_v49 }
 0xe7d   : > { %7015 = vmatpush1.bf16.msra.mxu1 %v9145_v6 }
 0xe86   : > { %v10128_v40 = vpop.f32.mrb[244].mxu1 }
 0xe87   : > { %v6349_v30 = vpop.f32.mrb[245].mxu1  ;;  %v6358_v51 = vadd.f32 %v10128_v40, %v15363_v45  ;;  %v9149_v40 = vcombine.low %v9115_v19, %v9117_v50 }
 0xe88   : > { %v6350_v2 = vadd.f32 %v6349_v30, %v15363_v45  ;;  %v10129_v35 = vpop.f32.mrb[246].mxu1  ;;  %v9150_v30 = vcombine.high %v9115_v19, %v9117_v50  ;;  %v17337_v50 = vld [vmem:[#allocation47_spill] sm:$0xff] }
 0xe89   : > { %v6352_v44 = vpop.f32.mrb[247].mxu1  ;;  %v6361_v10 = vadd.f32 %v10129_v35, %v15363_v45  ;;  %v15458_v22 = vadd.f32 %v6358_v51, %v17329_v48  ;;  %v9121_v35 = vld [vmem:[%s16884_s2 + $0x3b8] sm:$0xff] }
 0xe8a   : > { %v15419_v47 = vadd.f32 %v6350_v2, %v17327_v1  ;;  %v6353_v58 = vadd.f32 %v6352_v44, %v15363_v45  ;;  %7016 = vmatprep.subr.bf16.mxu1 %v9150_v30  ;;  %v9152_v2 = vcombine.high %v9118_v11, %v9120_v9  ;;  %v9153_v18 = vcombine.low %v9119_v32, %v9121_v35  ;;  %v9123_v1 = vld [vmem:[%s16884_s2 + $0x3d8] sm:$0xff] }
 0xe8b   : > { %v15470_v53 = vadd.f32 %v6361_v10, %v17330_v42  ;;  %v6468_v41 = vmul.f32 %v15458_v22, %v15458_v22  ;;  %7017 = vmatpush1.bf16.msra.mxu1 %v9149_v40  ;;  %v9154_v44 = vcombine.high %v9119_v32, %v9121_v35  ;;  %v9157_v34 = vcombine.low %v9123_v1, %v9125_v20  ;;  %v17338_v40 = vld [vmem:[#allocation37_spill] sm:$0xff] }
 0xe8c   : > { %v15432_v60 = vadd.f32 %v6353_v58, %v17328_v36  ;;  %6422 = vadd.xlane.f32.xlu0 %v15419_v47  ;;  %v6466_v27 = vmul.f32 %v15419_v47, %v15419_v47  ;;  %6905 = vmatprep.subr.bf16.mxu0 %v9152_v2  ;;  %v9156_v58 = vcombine.high %v9122_v16, %v9124_v37 }
 0xe8d   : > { %v6469_v12 = vmul.f32 %v15470_v53, %v15470_v53  ;;  %7018 = vmatprep.subr.bf16.mxu1 %v9154_v44  ;;  %6906 = vmatpush1.bf16.msra.mxu0 %v9151_v13  ;;  %v9158_v29 = vcombine.high %v9123_v1, %v9125_v20 }
 0xe8e   : > { %6424 = vadd.xlane.f32.xlu1 %v15432_v60  ;;  %v6467_v39 = vmul.f32 %v15432_v60, %v15432_v60  ;;  %6907 = vmatprep.subr.bf16.mxu0 %v9156_v58 }
 0xe8f   : > { %7019 = vmatpush1.bf16.msra.mxu1 %v9153_v18 }
 0xe90   : > { %6486 = vadd.xlane.f32.xlu0 %v6466_v27  ;;  %7020 = vmatprep.subr.bf16.mxu1 %v9158_v29 }
 0xe91   : > { %6908 = vmatpush1.bf16.msra.mxu0 %v9155_v4 }
 0xe92   : > { %6488 = vadd.xlane.f32.xlu1 %v6467_v39 }
 0xe93   : > { %7021 = vmatpush1.bf16.msra.mxu1 %v9157_v34 }
 0xe94   : > { %6426 = vadd.xlane.f32.xlu0 %v15458_v22 }
 0xe96   : > { %6428 = vadd.xlane.f32.xlu1 %v15470_v53 }
 0xe98   : > { %6490 = vadd.xlane.f32.xlu0 %v6468_v41  ;;  %v17336_v41 = vld [vmem:[#allocation5_spill] sm:$0xff] }
 0xe9a   : > { %6492 = vadd.xlane.f32.xlu1 %v6469_v12 }
 0xea6   : > { %v10132_v36 = vpop.f32.mrb[248].mxu1 }
 0xea7   : > { %v6365_v7 = vpop.f32.mrb[249].mxu1  ;;  %v6374_v5 = vadd.f32 %v10132_v36, %v15363_v45 }
 0xea8   : > { %v6366_v31 = vadd.f32 %v6365_v7, %v15363_v45  ;;  %v10133_v26 = vpop.f32.mrb[250].mxu1 }
 0xea9   : > { %v6368_v24 = vpop.f32.mrb[251].mxu1  ;;  %v6377_v39 = vadd.f32 %v10133_v26, %v15363_v45  ;;  %v15534_v55 = vadd.f32 %v6374_v5, %v17333_v14 }
 0xeaa   : > { %v15519_v51 = vadd.f32 %v6366_v31, %v17331_v28  ;;  %v6369_v27 = vadd.f32 %v6368_v24, %v15363_v45 }
 0xeab   : > { %v15537_v46 = vadd.f32 %v6377_v39, %v17334_v23  ;;  %v6472_v48 = vmul.f32 %v15534_v55, %v15534_v55 }
 0xeac   : > { %v15523_v38 = vadd.f32 %v6369_v27, %v17332_v3  ;;  %6430 = vadd.xlane.f32.xlu0 %v15519_v51  ;;  %v6470_v10 = vmul.f32 %v15519_v51, %v15519_v51 }
 0xead   : > { %v6473_v0 = vmul.f32 %v15537_v46, %v15537_v46 }
 0xeae   : > { %6432 = vadd.xlane.f32.xlu1 %v15523_v38  ;;  %v6471_v43 = vmul.f32 %v15523_v38, %v15523_v38 }
 0xeb0   : > { %6494 = vadd.xlane.f32.xlu0 %v6470_v10 }
 0xeb2   : > { %6496 = vadd.xlane.f32.xlu1 %v6471_v43 }
 0xeb4   : > { %6434 = vadd.xlane.f32.xlu0 %v15534_v55 }
 0xeb6   : > { %6436 = vadd.xlane.f32.xlu1 %v15537_v46 }
 0xeb8   : > { %6498 = vadd.xlane.f32.xlu0 %v6472_v48 }
 0xeba   : > { %6500 = vadd.xlane.f32.xlu1 %v6473_v0 }
 0xec9   : > { %v10136_v57 = vpop.f32.mrb[252].mxu1 }
 0xeca   : > { %v6381_v17 = vpop.f32.mrb[253].mxu1  ;;  %v6390_v54 = vadd.f32 %v10136_v57, %v15363_v45 }
 0xecb   : > { %v6382_v42 = vadd.f32 %v6381_v17, %v15363_v45  ;;  %v10137_v63 = vpop.f32.mrb[254].mxu1 }
 0xecc   : > { %v6384_v15 = vpop.f32.mrb[255].mxu1  ;;  %v6393_v12 = vadd.f32 %v10137_v63, %v15363_v45  ;;  %v15562_v62 = vadd.f32 %v6390_v54, %v17337_v50  ;;  %v15577_v63 = vld [vmem:[%s16887_s5 + $0x40] ss:$0 sm:$0xff] }
 0xecd   : > { %v15547_v6 = vadd.f32 %v6382_v42, %v17335_v59  ;;  %v6385_v49 = vadd.f32 %v6384_v15, %v15363_v45 }
 0xece   : > { %v15565_v30 = vadd.f32 %v6393_v12, %v17338_v40  ;;  %v6476_v11 = vmul.f32 %v15562_v62, %v15562_v62 }
 0xecf   : > { %v15551_v61 = vadd.f32 %v6385_v49, %v17336_v41  ;;  %6438 = vadd.xlane.f32.xlu0 %v15547_v6  ;;  %v6474_v19 = vmul.f32 %v15547_v6, %v15547_v6 }
 0xed0   : > { %v6477_v45 = vmul.f32 %v15565_v30, %v15565_v30 }
 0xed1   : > { %6440 = vadd.xlane.f32.xlu1 %v15551_v61  ;;  %v6475_v21 = vmul.f32 %v15551_v61, %v15551_v61 }
 0xed3   : > { %6502 = vadd.xlane.f32.xlu0 %v6474_v19  ;;  %v15584_v19 = vld [vmem:[%s16887_s5 + $0x41] ss:$0 sm:$0xff] }
 0xed5   : > { %6504 = vadd.xlane.f32.xlu1 %v6475_v21 }
 0xed7   : > { %6442 = vadd.xlane.f32.xlu0 %v15562_v62 }
 0xed9   : > { %6444 = vadd.xlane.f32.xlu1 %v15565_v30 }
 0xedb   : > { %6506 = vadd.xlane.f32.xlu0 %v6476_v11 }
 0xedd   : > { %6508 = vadd.xlane.f32.xlu1 %v6477_v45 }
 0xef9   : > { %v6415_v9 = vpop.xlane.xlu0 %6414 }
 0xefa   : > { %v6446_v32 = vmul.f32 0.0078125, %v6415_v9 }
 0xefb   : > { %v6417_v2 = vpop.xlane.xlu1 %6416 }
 0xefc   : > { %v6447_v35 = vmul.f32 0.0078125, %v6417_v2  ;;  %v6526_v18 = vmul.f32 %v6446_v32, %v6446_v32  ;;  %v6574_v17 = vsub.f32 %v15367_v8, %v6446_v32 }
 0xefd   : > { %v6479_v13 = vpop.xlane.xlu0 %6478 }
 0xefe   : > { %v6510_v44 = vmul.f32 0.0078125, %v6479_v13  ;;  %v6527_v37 = vmul.f32 %v6447_v35, %v6447_v35  ;;  %v6575_v15 = vsub.f32 %v15371_v33, %v6447_v35 }
 0xeff   : > { %v6481_v16 = vpop.xlane.xlu1 %6480 }
 0xf00   : > { %v6542_v1 = vsub.f32 %v6510_v44, %v6526_v18  ;;  %v6511_v58 = vmul.f32 0.0078125, %v6481_v16 }
 0xf01   : > { %v6419_v20 = vpop.xlane.xlu0 %6418 }
 0xf02   : > { %v6558_v4 = vmax.f32 %v6542_v1, 0.0  ;;  %v6543_v34 = vsub.f32 %v6511_v58, %v6527_v37  ;;  %v6448_v29 = vmul.f32 0.0078125, %v6419_v20 }
 0xf03   : > { %v6421_v36 = vpop.xlane.xlu1 %6420 }
 0xf04   : > { %v6590_v7 = vadd.f32 1e-12, %v6558_v4  ;;  %v6559_v31 = vmax.f32 %v6543_v34, 0.0  ;;  %v6449_v26 = vmul.f32 0.0078125, %v6421_v36  ;;  %v6528_v27 = vmul.f32 %v6448_v29, %v6448_v29 }
 0xf05   : > { %v6483_v24 = vpop.xlane.xlu0 %6482  ;;  %v6576_v33 = vsub.f32 %v15382_v25, %v6448_v29 }
 0xf06   : > { %11107 = vrsqrt.f32 %v6590_v7  ;;  %v6591_v28 = vadd.f32 1e-12, %v6559_v31  ;;  %v6512_v3 = vmul.f32 0.0078125, %v6483_v24  ;;  %v6529_v10 = vmul.f32 %v6449_v26, %v6449_v26 }
 0xf07   : > { %v6485_v5 = vpop.xlane.xlu1 %6484  ;;  %v6577_v11 = vsub.f32 %v15385_v52, %v6449_v26 }
 0xf08   : > { %11109 = vrsqrt.f32 %v6591_v28  ;;  %v6544_v39 = vsub.f32 %v6512_v3, %v6528_v27  ;;  %v6513_v43 = vmul.f32 0.0078125, %v6485_v5 }
 0xf0a   : > { %v6560_v14 = vmax.f32 %v6544_v39, 0.0  ;;  %v6545_v23 = vsub.f32 %v6513_v43, %v6529_v10 }
 0xf0c   : > { %v6592_v48 = vadd.f32 1e-12, %v6560_v14  ;;  %v6561_v0 = vmax.f32 %v6545_v23, 0.0 }
 0xf0e   : > { %11111 = vrsqrt.f32 %v6592_v48  ;;  %v6593_v57 = vadd.f32 1e-12, %v6561_v0 }
 0xf10   : > { %v11108_v42 = vpop.eup %11107  ;;  %11113 = vrsqrt.f32 %v6593_v57 }
 0xf11   : > { %v6622_v59 = vmul.f32 %v11108_v42, %v6574_v17 }
 0xf12   : > { %v11110_v49 = vpop.eup %11109 }
 0xf13   : > { %v6638_v41 = vmul.f32 %v6622_v59, %v15577_v63  ;;  %v6623_v54 = vmul.f32 %v11110_v49, %v6575_v15 }
 0xf15   : > { %v6639_v8 = vmul.f32 %v6623_v54, %v15577_v63  ;;  %v15588_v12 = vadd.f32 %v6638_v41, %v15584_v19 }
 0xf17   : > { %17339 = vst [vmem:[#allocation33_spill] sm:$0xff] %v15588_v12  ;;  %v15591_v21 = vadd.f32 %v6639_v8, %v15584_v19 }
 0xf18   : > { %v11112_v50 = vpop.eup %11111 }
 0xf19   : > { %17340 = vst [vmem:[#allocation41_spill] sm:$0xff] %v15591_v21  ;;  %v6670_v40 = vpack.c.bf16 %v15591_v21, %v15588_v12  ;;  %v6624_v45 = vmul.f32 %v11112_v50, %v6576_v33  ;;  %v6423_v9 = vpop.xlane.xlu0 %6422 }
 0xf1a   : > { %v11114_v32 = vpop.eup %11113  ;;  %v6450_v2 = vmul.f32 0.0078125, %v6423_v9 }
 0xf1b   : > { %v6640_v35 = vmul.f32 %v6624_v45, %v15577_v63  ;;  %v6625_v13 = vmul.f32 %v11114_v32, %v6577_v11  ;;  %6926 = vmatmul.mubr.bf16.vlgmr.msra.gmra.mrb[0].mxu0 %v6670_v40  ;;  %7039 = vmatmul.mubr.bf16.vlgmr.msra.gmra.mrb[0].mxu1 %v6670_v40  ;;  %v6425_v18 = vpop.xlane.xlu1 %6424 }
 0xf1c   : > { %v6451_v44 = vmul.f32 0.0078125, %v6425_v18  ;;  %6935 = vmatprep.mubr.bf16.mxu0 %v17322_v56  ;;  %7048 = vmatprep.mubr.bf16.mxu1 %v17322_v56  ;;  %v6530_v37 = vmul.f32 %v6450_v2, %v6450_v2  ;;  %v6578_v41 = vsub.f32 %v15419_v47, %v6450_v2 }
 0xf1d   : > { %v6641_v25 = vmul.f32 %v6625_v13, %v15577_v63  ;;  %v6487_v16 = vpop.xlane.xlu0 %6486  ;;  %v15602_v1 = vadd.f32 %v6640_v35, %v15584_v19 }
 0xf1e   : > { %v6514_v52 = vmul.f32 0.0078125, %v6487_v16  ;;  %v6531_v4 = vmul.f32 %v6451_v44, %v6451_v44  ;;  %v6579_v8 = vsub.f32 %v15432_v60, %v6451_v44 }
 0xf1f   : > { %17341 = vst [vmem:[#allocation36_spill] sm:$0xff] %v15602_v1  ;;  %v15605_v58 = vadd.f32 %v6641_v25, %v15584_v19  ;;  %v6489_v20 = vpop.xlane.xlu1 %6488 }
 0xf20   : > { %v6546_v34 = vsub.f32 %v6514_v52, %v6530_v37  ;;  %v6515_v29 = vmul.f32 0.0078125, %v6489_v20 }
 0xf21   : > { %17342 = vst [vmem:[#allocation32_spill] sm:$0xff] %v15605_v58  ;;  %v6671_v36 = vpack.c.bf16 %v15605_v58, %v15602_v1  ;;  %v6427_v7 = vpop.xlane.xlu0 %6426 }
 0xf22   : > { %v6562_v31 = vmax.f32 %v6546_v34, 0.0  ;;  %v6547_v26 = vsub.f32 %v6515_v29, %v6531_v4  ;;  %v6452_v24 = vmul.f32 0.0078125, %v6427_v7 }
 0xf23   : > { %6936 = vmatmul.mubr.bf16.gmra.mrb[4].mxu0 %v6671_v36  ;;  %7049 = vmatmul.mubr.bf16.gmra.mrb[4].mxu1 %v6671_v36  ;;  %v6429_v28 = vpop.xlane.xlu1 %6428 }
 0xf24   : > { %v6594_v27 = vadd.f32 1e-12, %v6562_v31  ;;  %v6563_v3 = vmax.f32 %v6547_v26, 0.0  ;;  %6945 = vmatprep.mubr.bf16.mxu0 %v17322_v56  ;;  %7058 = vmatprep.mubr.bf16.mxu1 %v17322_v56  ;;  %v6453_v5 = vmul.f32 0.0078125, %v6429_v28  ;;  %v6532_v43 = vmul.f32 %v6452_v24, %v6452_v24 }
 0xf25   : > { %v6491_v10 = vpop.xlane.xlu0 %6490  ;;  %v6580_v35 = vsub.f32 %v15458_v22, %v6452_v24 }
 0xf26   : > { %11115 = vrsqrt.f32 %v6594_v27  ;;  %v6595_v39 = vadd.f32 1e-12, %v6563_v3  ;;  %v6516_v14 = vmul.f32 0.0078125, %v6491_v10  ;;  %v6533_v48 = vmul.f32 %v6453_v5, %v6453_v5 }
 0xf27   : > { %v6493_v23 = vpop.xlane.xlu1 %6492  ;;  %v6581_v60 = vsub.f32 %v15470_v53, %v6453_v5 }
 0xf28   : > { %11117 = vrsqrt.f32 %v6595_v39  ;;  %v6548_v0 = vsub.f32 %v6516_v14, %v6532_v43  ;;  %v6517_v57 = vmul.f32 0.0078125, %v6493_v23 }
 0xf2a   : > { %v6564_v17 = vmax.f32 %v6548_v0, 0.0  ;;  %v6549_v42 = vsub.f32 %v6517_v57, %v6533_v48 }
 0xf2c   : > { %v6596_v15 = vadd.f32 1e-12, %v6564_v17  ;;  %v6565_v59 = vmax.f32 %v6549_v42, 0.0 }
 0xf2e   : > { %11119 = vrsqrt.f32 %v6596_v15  ;;  %v6597_v49 = vadd.f32 1e-12, %v6565_v59 }
 0xf30   : > { %v11116_v54 = vpop.eup %11115  ;;  %11121 = vrsqrt.f32 %v6597_v49 }
 0xf31   : > { %v6626_v33 = vmul.f32 %v11116_v54, %v6578_v41 }
 0xf32   : > { %v11118_v50 = vpop.eup %11117 }
 0xf33   : > { %v6642_v40 = vmul.f32 %v6626_v33, %v15577_v63  ;;  %v6627_v11 = vmul.f32 %v11118_v50, %v6579_v8 }
 0xf35   : > { %v6643_v45 = vmul.f32 %v6627_v11, %v15577_v63  ;;  %v15616_v9 = vadd.f32 %v6642_v40, %v15584_v19 }
 0xf37   : > { %17343 = vst [vmem:[#allocation42_spill] sm:$0xff] %v15616_v9  ;;  %v15619_v32 = vadd.f32 %v6643_v45, %v15584_v19 }
 0xf38   : > { %v11120_v47 = vpop.eup %11119 }
 0xf39   : > { %17344 = vst [vmem:[#allocation35_spill] sm:$0xff] %v15619_v32  ;;  %v6672_v2 = vpack.c.bf16 %v15619_v32, %v15616_v9  ;;  %v6628_v13 = vmul.f32 %v11120_v47, %v6580_v35  ;;  %v6431_v18 = vpop.xlane.xlu0 %6430 }
 0xf3a   : > { %v11122_v44 = vpop.eup %11121  ;;  %v6454_v25 = vmul.f32 0.0078125, %v6431_v18 }
 0xf3b   : > { %v6644_v16 = vmul.f32 %v6628_v13, %v15577_v63  ;;  %v6629_v37 = vmul.f32 %v11122_v44, %v6581_v60  ;;  %6946 = vmatmul.mubr.bf16.gmra.mrb[8].mxu0 %v6672_v2  ;;  %7059 = vmatmul.mubr.bf16.gmra.mrb[8].mxu1 %v6672_v2  ;;  %v6433_v52 = vpop.xlane.xlu1 %6432 }
 0xf3c   : > { %v6455_v20 = vmul.f32 0.0078125, %v6433_v52  ;;  %6955 = vmatprep.mubr.bf16.mxu0 %v17322_v56  ;;  %7068 = vmatprep.mubr.bf16.mxu1 %v17322_v56  ;;  %v6534_v34 = vmul.f32 %v6454_v25, %v6454_v25  ;;  %v6582_v40 = vsub.f32 %v15519_v51, %v6454_v25 }
 0xf3d   : > { %v6645_v22 = vmul.f32 %v6629_v37, %v15577_v63  ;;  %v6495_v4 = vpop.xlane.xlu0 %6494  ;;  %v15630_v29 = vadd.f32 %v6644_v16, %v15584_v19 }
 0xf3e   : > { %v6518_v53 = vmul.f32 0.0078125, %v6495_v4  ;;  %v6535_v31 = vmul.f32 %v6455_v20, %v6455_v20  ;;  %v6583_v45 = vsub.f32 %v15523_v38, %v6455_v20 }
 0xf3f   : > { %17345 = vst [vmem:[#allocation34_spill] sm:$0xff] %v15630_v29  ;;  %v15633_v36 = vadd.f32 %v6645_v22, %v15584_v19  ;;  %v6497_v7 = vpop.xlane.xlu1 %6496 }
 0xf40   : > { %v6550_v26 = vsub.f32 %v6518_v53, %v6534_v34  ;;  %v6519_v24 = vmul.f32 0.0078125, %v6497_v7 }
 0xf41   : > { %17346 = vst [vmem:[#allocation39_spill] sm:$0xff] %v15633_v36  ;;  %v6673_v28 = vpack.c.bf16 %v15633_v36, %v15630_v29  ;;  %v6435_v27 = vpop.xlane.xlu0 %6434 }
 0xf42   : > { %v6566_v3 = vmax.f32 %v6550_v26, 0.0  ;;  %v6551_v5 = vsub.f32 %v6519_v24, %v6535_v31  ;;  %v6456_v10 = vmul.f32 0.0078125, %v6435_v27 }
 0xf43   : > { %6956 = vmatmul.mubr.bf16.gmra.mrb[12].mxu0 %v6673_v28  ;;  %7069 = vmatmul.mubr.bf16.gmra.mrb[12].mxu1 %v6673_v28  ;;  %v6437_v39 = vpop.xlane.xlu1 %6436 }
 0xf44   : > { %v6598_v43 = vadd.f32 1e-12, %v6566_v3  ;;  %v6567_v14 = vmax.f32 %v6551_v5, 0.0  ;;  %6965 = vmatprep.mubr.bf16.mxu0 %v17322_v56  ;;  %7078 = vmatprep.mubr.bf16.mxu1 %v17322_v56  ;;  %v6457_v23 = vmul.f32 0.0078125, %v6437_v39  ;;  %v6536_v57 = vmul.f32 %v6456_v10, %v6456_v10 }
 0xf45   : > { %v6499_v48 = vpop.xlane.xlu0 %6498  ;;  %v6584_v16 = vsub.f32 %v15534_v55, %v6456_v10 }
 0xf46   : > { %11123 = vrsqrt.f32 %v6598_v43  ;;  %v6599_v0 = vadd.f32 1e-12, %v6567_v14  ;;  %v6520_v17 = vmul.f32 0.0078125, %v6499_v48  ;;  %v6537_v15 = vmul.f32 %v6457_v23, %v6457_v23 }
 0xf47   : > { %v6501_v42 = vpop.xlane.xlu1 %6500  ;;  %v6585_v38 = vsub.f32 %v15537_v46, %v6457_v23 }
 0xf48   : > { %11125 = vrsqrt.f32 %v6599_v0  ;;  %v6552_v59 = vsub.f32 %v6520_v17, %v6536_v57  ;;  %v6521_v49 = vmul.f32 0.0078125, %v6501_v42 }
 0xf4a   : > { %v6568_v41 = vmax.f32 %v6552_v59, 0.0  ;;  %v6553_v54 = vsub.f32 %v6521_v49, %v6537_v15 }
 0xf4c   : > { %v6600_v8 = vadd.f32 1e-12, %v6568_v41  ;;  %v6569_v33 = vmax.f32 %v6553_v54, 0.0 }
 0xf4e   : > { %11127 = vrsqrt.f32 %v6600_v8  ;;  %v6601_v50 = vadd.f32 1e-12, %v6569_v33 }
 0xf50   : > { %v11124_v11 = vpop.eup %11123  ;;  %11129 = vrsqrt.f32 %v6601_v50 }
 0xf51   : > { %v6630_v35 = vmul.f32 %v11124_v11, %v6582_v40 }
 0xf52   : > { %v11126_v47 = vpop.eup %11125 }
 0xf53   : > { %v6646_v2 = vmul.f32 %v6630_v35, %v15577_v63  ;;  %v6631_v60 = vmul.f32 %v11126_v47, %v6583_v45 }
 0xf55   : > { %v6647_v13 = vmul.f32 %v6631_v60, %v15577_v63  ;;  %v15644_v18 = vadd.f32 %v6646_v2, %v15584_v19 }
 0xf57   : > { %17347 = vst [vmem:[#allocation43_spill] sm:$0xff] %v15644_v18  ;;  %v15647_v44 = vadd.f32 %v6647_v13, %v15584_v19 }
 0xf58   : > { %v11128_v51 = vpop.eup %11127 }
 0xf59   : > { %17348 = vst [vmem:[#allocation40_spill] sm:$0xff] %v15647_v44  ;;  %v6674_v25 = vpack.c.bf16 %v15647_v44, %v15644_v18  ;;  %v6632_v37 = vmul.f32 %v11128_v51, %v6584_v16 }
 0xf5a   : > { %v11130_v52 = vpop.eup %11129 }
 0xf5b   : > { %v6648_v20 = vmul.f32 %v6632_v37, %v15577_v63  ;;  %v6633_v22 = vmul.f32 %v11130_v52, %v6585_v38  ;;  %6966 = vmatmul.mubr.bf16.gmra.mrb[16].mxu0 %v6674_v25  ;;  %7079 = vmatmul.mubr.bf16.gmra.mrb[16].mxu1 %v6674_v25 }
 0xf5c   : > { %v6439_v4 = vpop.xlane.xlu0 %6438  ;;  %6975 = vmatprep.mubr.bf16.mxu0 %v17322_v56  ;;  %7088 = vmatprep.mubr.bf16.mxu1 %v17322_v56 }
 0xf5d   : > { %v6649_v55 = vmul.f32 %v6633_v22, %v15577_v63  ;;  %v6458_v34 = vmul.f32 0.0078125, %v6439_v4  ;;  %v15658_v7 = vadd.f32 %v6648_v20, %v15584_v19  ;;  %v10324_v4 = vld [vmem:[%s16885_s3 + $0x1c0] sm:$0xff]  }
 0xf5e   : > { %v6441_v53 = vpop.xlane.xlu1 %6440  ;;  %9914 = vmatprep.subr.bf16.mxu1 %v10324_v4 }
 0xf5f   : > { %17349 = vst [vmem:[#allocation23_spill] sm:$0xff] %v15658_v7  ;;  %v15661_v46 = vadd.f32 %v6649_v55, %v15584_v19  ;;  %v6459_v31 = vmul.f32 0.0078125, %v6441_v53  ;;  %v6538_v28 = vmul.f32 %v6458_v34, %v6458_v34  ;;  %v6586_v2 = vsub.f32 %v15547_v6, %v6458_v34 }
 0xf60   : > { %v6503_v26 = vpop.xlane.xlu0 %6502 }
 0xf61   : > { %17350 = vst [vmem:[#allocation25_spill] sm:$0xff] %v15661_v46  ;;  %v6675_v24 = vpack.c.bf16 %v15661_v46, %v15658_v7  ;;  %v6522_v27 = vmul.f32 0.0078125, %v6503_v26  ;;  %v6539_v5 = vmul.f32 %v6459_v31, %v6459_v31  ;;  %v6587_v13 = vsub.f32 %v15551_v61, %v6459_v31  ;;  %v10323_v61 = vld [vmem:[%s16885_s3 + $0x140] sm:$0xff]  }
 0xf62   : > { %v6505_v3 = vpop.xlane.xlu1 %6504  ;;  %v10325_v31 = vld [vmem:[%s16885_s3 + $0x100] sm:$0xff]   ;;  %9850 = vmatprep.subr.bf16.mxu0 %v10323_v61 }
 0xf63   : > { %v6554_v10 = vsub.f32 %v6522_v27, %v6538_v28  ;;  %v6523_v39 = vmul.f32 0.0078125, %v6505_v3  ;;  %6976 = vmatmul.mubr.bf16.gmra.mrb[20].mxu0 %v6675_v24  ;;  %7089 = vmatmul.mubr.bf16.gmra.mrb[20].mxu1 %v6675_v24  ;;  %v10328_v27 = vld [vmem:[%s16885_s3 + $0x1c8] sm:$0xff]  }
 0xf64   : > { %v6443_v43 = vpop.xlane.xlu0 %6442  ;;  %6985 = vmatprep.mubr.bf16.mxu0 %v17322_v56  ;;  %7098 = vmatprep.mubr.bf16.mxu1 %v17322_v56 }
 0xf65   : > { %v6570_v14 = vmax.f32 %v6554_v10, 0.0  ;;  %v6555_v23 = vsub.f32 %v6523_v39, %v6539_v5  ;;  %v6460_v48 = vmul.f32 0.0078125, %v6443_v43  ;;  %9851 = vmatpush3.bf16.msra.mxu0 %v10325_v31  ;;  %v10329_v5 = vld [vmem:[%s16885_s3 + $0x108] sm:$0xff]   ;;  %v10331_v43 = vld [vmem:[%s16885_s3 + $0x150] sm:$0xff]  }
 0xf66   : > { %v6445_v0 = vpop.xlane.xlu1 %6444 }
 0xf67   : > { %v6602_v57 = vadd.f32 1e-12, %v6570_v14  ;;  %v6571_v17 = vmax.f32 %v6555_v23, 0.0  ;;  %v6461_v42 = vmul.f32 0.0078125, %v6445_v0  ;;  %v6540_v49 = vmul.f32 %v6460_v48, %v6460_v48  ;;  %v10332_v14 = vld [vmem:[%s16885_s3 + $0x1d0] sm:$0xff]   ;;  %v10336_v0 = vld [vmem:[%s16885_s3 + $0x1d8] sm:$0xff]  }
 0xf68   : > { %v6507_v15 = vpop.xlane.xlu0 %6506  ;;  %v6588_v22 = vsub.f32 %v15562_v62, %v6460_v48  ;;  %v10326_v62 = vld [vmem:[%s16885_s3 + $0x180] sm:$0xff]   ;;  %v10334_v23 = vld [vmem:[%s16885_s3 + $0x190] sm:$0xff]   ;;  %v10335_v48 = vld [vmem:[%s16885_s3 + $0x158] sm:$0xff]  }
 0xf69   : > { %11131 = vrsqrt.f32 %v6602_v57  ;;  %v6603_v59 = vadd.f32 1e-12, %v6571_v17  ;;  %v6524_v41 = vmul.f32 0.0078125, %v6507_v15  ;;  %v6541_v8 = vmul.f32 %v6461_v42, %v6461_v42  ;;  %9915 = vmatpush3.bf16.msra.mxu1 %v10326_v62  ;;  %v10337_v57 = vld [vmem:[%s16885_s3 + $0x118] sm:$0xff]   ;;  %v10340_v15 = vld [vmem:[%s16885_s3 + $0x1e0] sm:$0xff]  }
 0xf6a   : > { %v6509_v54 = vpop.xlane.xlu1 %6508  ;;  %v6589_v34 = vsub.f32 %v15565_v30, %v6461_v42  ;;  %v10327_v30 = vld [vmem:[%s16885_s3 + $0x148] sm:$0xff]   ;;  %9916 = vmatprep.subr.bf16.mxu1 %v10328_v27  ;;  %v10338_v17 = vld [vmem:[%s16885_s3 + $0x198] sm:$0xff]   ;;  %v10339_v42 = vld [vmem:[%s16885_s3 + $0x160] sm:$0xff]  }
 0xf6b   : > { %11133 = vrsqrt.f32 %v6603_v59  ;;  %v6556_v33 = vsub.f32 %v6524_v41, %v6540_v49  ;;  %v6525_v50 = vmul.f32 0.0078125, %v6509_v54  ;;  %9852 = vmatprep.subr.bf16.mxu0 %v10327_v30  ;;  %v10341_v59 = vld [vmem:[%s16885_s3 + $0x120] sm:$0xff]   ;;  %v10343_v41 = vld [vmem:[%s16885_s3 + $0x168] sm:$0xff]  }
 0xf6c   : > { %9853 = vmatpush3.bf16.msra.mxu0 %v10329_v5  ;;  %v10342_v49 = vld [vmem:[%s16885_s3 + $0x1a0] sm:$0xff]   ;;  %v10344_v54 = vld [vmem:[%s16885_s3 + $0x1e8] sm:$0xff]  }
 0xf6d   : > { %v6572_v40 = vmax.f32 %v6556_v33, 0.0  ;;  %v6557_v11 = vsub.f32 %v6525_v50, %v6541_v8  ;;  %9854 = vmatprep.subr.bf16.mxu0 %v10331_v43  ;;  %v10345_v8 = vld [vmem:[%s16885_s3 + $0x128] sm:$0xff]   ;;  %v10347_v50 = vld [vmem:[%s16885_s3 + $0x170] sm:$0xff]  }
 0xf6e   : > { %v10346_v33 = vld [vmem:[%s16885_s3 + $0x1a8] sm:$0xff]  }
 0xf6f   : > { %v6604_v45 = vadd.f32 1e-12, %v6572_v40  ;;  %v6573_v35 = vmax.f32 %v6557_v11, 0.0  ;;  %v10348_v40 = vld [vmem:[%s16885_s3 + $0x1f0] sm:$0xff]  }
 0xf70   : > { %v10349_v11 = vld [vmem:[%s16885_s3 + $0x130] sm:$0xff]  }
 0xf71   : > { %11135 = vrsqrt.f32 %v6604_v45  ;;  %v6605_v47 = vadd.f32 1e-12, %v6573_v35  ;;  %v10350_v45 = vld [vmem:[%s16885_s3 + $0x1b0] sm:$0xff]   ;;  %v10351_v35 = vld [vmem:[%s16885_s3 + $0x178] sm:$0xff]  }
 0xf73   : > { %v11132_v60 = vpop.eup %11131  ;;  %11137 = vrsqrt.f32 %v6605_v47  ;;  %v10352_v47 = vld [vmem:[%s16885_s3 + $0x1f8] sm:$0xff]  }
 0xf74   : > { %v6634_v16 = vmul.f32 %v11132_v60, %v6586_v2  ;;  %v10353_v2 = vld [vmem:[%s16885_s3 + $0x138] sm:$0xff]  }
 0xf75   : > { %v11134_v51 = vpop.eup %11133  ;;  %v10354_v60 = vld [vmem:[%s16885_s3 + $0x1b8] sm:$0xff]  }
 0xf76   : > { %v6650_v25 = vmul.f32 %v6634_v16, %v15577_v63  ;;  %v6635_v38 = vmul.f32 %v11134_v51, %v6587_v13  ;;  %v9126_v13 = vld [vmem:[%s16887_s5 + $0x26] ss:$8 sm:$0xf] }
 0xf77   : > { %v17355_v16 = vld [vmem:[#allocation20_spill] sm:$0xff] }
 0xf78   : > { %v6651_v37 = vmul.f32 %v6635_v38, %v15577_v63  ;;  %v15672_v52 = vadd.f32 %v6650_v25, %v15584_v19  ;;  %v15793_v51 = vrot.slane %v9126_v13, %v17355_v16  ;;  %v17356_v25 = vld [vmem:[#allocation22_spill] sm:$0xff] }
 0xf79   : > { %v15796_v38 = vrot.slane %v9126_v13, %v17356_v25 }
 0xf7a   : > { %17351 = vst [vmem:[#allocation38_spill] sm:$0xff] %v15672_v52  ;;  %v15675_v20 = vadd.f32 %v6651_v37, %v15584_v19  ;;  %v17357_v37 = vld [vmem:[#allocation21_spill] sm:$0xff] }
 0xf7b   : > { %v11136_v6 = vpop.eup %11135 }
 0xf7c   : > { %17352 = vst [vmem:[#allocation26_spill] sm:$0xff] %v15675_v20  ;;  %v6676_v55 = vpack.c.bf16 %v15675_v20, %v15672_v52  ;;  %v6636_v53 = vmul.f32 %v11136_v6, %v6588_v22  ;;  %v15799_v22 = vrot.slane %v9126_v13, %v17357_v37  ;;  %v17358_v6 = vld [vmem:[#allocation19_spill] sm:$0xff] }
 0xf7d   : > { %v11138_v26 = vpop.eup %11137  ;;  %v17359_v61 = vsub.s32 3, %v17358_v6 }
 0xf7e   : > { %v6652_v24 = vmul.f32 %v6636_v53, %v15577_v63  ;;  %v6637_v28 = vmul.f32 %v11138_v26, %v6589_v34  ;;  %6986 = vmatmul.mubr.bf16.gmra.mrb[24].mxu0 %v6676_v55  ;;  %7099 = vmatmul.mubr.bf16.gmra.mrb[24].mxu1 %v6676_v55 }
 0xf7f   : > { %6995 = vmatprep.mubr.bf16.mxu0 %v17322_v56  ;;  %7108 = vmatprep.mubr.bf16.mxu1 %v17322_v56  ;;  %v10330_v56 = vld [vmem:[%s16885_s3 + $0x188] sm:$0xff]   ;;  %v15803_v4 = vrot.slane %v9126_v13, %v17359_v61 }
 0xf80   : > { %v6653_v3 = vmul.f32 %v6637_v28, %v15577_v63  ;;  %v15710_v10 = vadd.f32 %v6652_v24, %v15584_v19  ;;  %9917 = vmatpush3.bf16.msra.mxu1 %v10330_v56 }
 0xf81   : > { %9918 = vmatprep.subr.bf16.mxu1 %v10332_v14 }
 0xf82   : > { %17353 = vst [vmem:[#allocation45_spill] sm:$0xff] %v15710_v10  ;;  %v15713_v39 = vadd.f32 %v6653_v3, %v15584_v19  ;;  %v10333_v19 = vld [vmem:[%s16885_s3 + $0x110] sm:$0xff]  }
 0xf83   : > { %9855 = vmatpush3.bf16.msra.mxu0 %v10333_v19 }
 0xf84   : > { %17354 = vst [vmem:[#allocation44_spill] sm:$0xff] %v15713_v39  ;;  %v6677_v63 = vpack.c.bf16 %v15713_v39, %v15710_v10  ;;  %9919 = vmatpush3.bf16.msra.mxu1 %v10334_v23  ;;  %9856 = vmatprep.subr.bf16.mxu0 %v10335_v48 }
 0xf85   : > { %9920 = vmatprep.subr.bf16.mxu1 %v10336_v0 }
 0xf86   : > { %6996 = vmatmul.mubr.bf16.gmra.mrb[28].mxu0 %v6677_v63  ;;  %7109 = vmatmul.mubr.bf16.gmra.mrb[28].mxu1 %v6677_v63 }
 0xf87   : > { %9857 = vmatpush3.bf16.msra.mxu0 %v10337_v57 }
 0xf88   : > { %9921 = vmatpush3.bf16.msra.mxu1 %v10338_v17  ;;  %9858 = vmatprep.subr.bf16.mxu0 %v10339_v42 }
 0xf89   : > { %9922 = vmatprep.subr.bf16.mxu1 %v10340_v15 }
 0xf8b   : > { %9859 = vmatpush3.bf16.msra.mxu0 %v10341_v59 }
 0xf8c   : > { %9923 = vmatpush3.bf16.msra.mxu1 %v10342_v49  ;;  %9860 = vmatprep.subr.bf16.mxu0 %v10343_v41 }
 0xf8d   : > { %9924 = vmatprep.subr.bf16.mxu1 %v10344_v54 }
 0xf8f   : > { %9861 = vmatpush3.bf16.msra.mxu0 %v10345_v8 }
 0xf90   : > { %9925 = vmatpush3.bf16.msra.mxu1 %v10346_v33  ;;  %9862 = vmatprep.subr.bf16.mxu0 %v10347_v50 }
 0xf91   : > { %9926 = vmatprep.subr.bf16.mxu1 %v10348_v40 }
 0xf93   : > { %9863 = vmatpush3.bf16.msra.mxu0 %v10349_v11 }
 0xf94   : > { %9927 = vmatpush3.bf16.msra.mxu1 %v10350_v45  ;;  %9864 = vmatprep.subr.bf16.mxu0 %v10351_v35 }
 0xf95   : > { %9928 = vmatprep.subr.bf16.mxu1 %v10352_v47 }
 0xf97   : > { %9865 = vmatpush3.bf16.msra.mxu0 %v10353_v2 }
 0xf98   : > { %9929 = vmatpush3.bf16.msra.mxu1 %v10354_v60 }
 0xfee   : > { %v6927_v55 = vpop.f32.mrb[0].mxu0  ;;  %v7040_v34 = vpop.f32.mrb[0].mxu1 }
 0xfef   : > { %v15806_v53 = vadd.f32 %v6927_v55, %v15793_v51  ;;  %v15809_v31 = vadd.f32 %v7040_v34, %v15796_v38  ;;  %v6929_v62 = vpop.f32.mrb[1].mxu0  ;;  %v7042_v26 = vpop.f32.mrb[1].mxu1 }
 0xff0   : > { %v15812_v24 = vadd.f32 %v6929_v62, %v15799_v22  ;;  %v15815_v28 = vadd.f32 %v7042_v26, %v15803_v4  ;;  %v6931_v30 = vpop.f32.mrb[2].mxu0  ;;  %v7044_v27 = vpop.f32.mrb[2].mxu1 }
 0xff1   : > { %v7119_v3 = vmul.f32 %v15806_v53, %v15806_v53  ;;  %v7121_v5 = vmul.f32 %v15809_v31, %v15809_v31  ;;  %v15822_v56 = vadd.f32 %v6931_v30, %v15793_v51  ;;  %v15825_v63 = vadd.f32 %v7044_v27, %v15796_v38  ;;  %v6933_v43 = vpop.f32.mrb[3].mxu0  ;;  %v7046_v14 = vpop.f32.mrb[3].mxu1 }
 0xff2   : > { %v7120_v19 = vmul.f32 %v15812_v24, %v15812_v24  ;;  %v7122_v23 = vmul.f32 %v15815_v28, %v15815_v28  ;;  %v15832_v48 = vadd.f32 %v6933_v43, %v15799_v22  ;;  %v15835_v0 = vadd.f32 %v7046_v14, %v15803_v4 }
 0xff3   : > { %v7183_v57 = vmul.f32 %v7119_v3, %v15806_v53  ;;  %v7185_v17 = vmul.f32 %v7121_v5, %v15809_v31  ;;  %v7123_v42 = vmul.f32 %v15822_v56, %v15822_v56  ;;  %v7125_v15 = vmul.f32 %v15825_v63, %v15825_v63 }
 0xff4   : > { %v7184_v59 = vmul.f32 %v7120_v19, %v15812_v24  ;;  %v7186_v49 = vmul.f32 %v7122_v23, %v15815_v28  ;;  %v7124_v41 = vmul.f32 %v15832_v48, %v15832_v48  ;;  %v7126_v54 = vmul.f32 %v15835_v0, %v15835_v0 }
 0xff5   : > { %v7247_v8 = vmul.f32 0.044715, %v7183_v57  ;;  %v7249_v33 = vmul.f32 0.044715, %v7185_v17  ;;  %v7187_v50 = vmul.f32 %v7123_v42, %v15822_v56  ;;  %v7189_v40 = vmul.f32 %v7125_v15, %v15825_v63 }
 0xff6   : > { %v7248_v11 = vmul.f32 0.044715, %v7184_v59  ;;  %v7250_v45 = vmul.f32 0.044715, %v7186_v49  ;;  %v7188_v35 = vmul.f32 %v7124_v41, %v15832_v48  ;;  %v7190_v47 = vmul.f32 %v7126_v54, %v15835_v0  ;;  %v6937_v2 = vpop.f32.mrb[4].mxu0  ;;  %v7050_v60 = vpop.f32.mrb[4].mxu1 }
 0xff7   : > { %v7311_v13 = vadd.f32 %v7247_v8, %v15806_v53  ;;  %v7313_v16 = vadd.f32 %v7249_v33, %v15809_v31  ;;  %v7251_v25 = vmul.f32 0.044715, %v7187_v50  ;;  %v7253_v37 = vmul.f32 0.044715, %v7189_v40  ;;  %v6939_v6 = vpop.f32.mrb[5].mxu0  ;;  %v7052_v61 = vpop.f32.mrb[5].mxu1 }
 0xff8   : > { %v7312_v55 = vadd.f32 %v7248_v11, %v15812_v24  ;;  %v7314_v34 = vadd.f32 %v7250_v45, %v15815_v28  ;;  %v7252_v62 = vmul.f32 0.044715, %v7188_v35  ;;  %v7254_v26 = vmul.f32 0.044715, %v7190_v47  ;;  %v6941_v30 = vpop.f32.mrb[6].mxu0  ;;  %v7054_v27 = vpop.f32.mrb[6].mxu1 }
 0xff9   : > { %v7375_v3 = vmul.f32 0.7978846, %v7311_v13  ;;  %v7377_v5 = vmul.f32 0.7978846, %v7313_v16  ;;  %v7315_v43 = vadd.f32 %v7251_v25, %v15822_v56  ;;  %v7317_v14 = vadd.f32 %v7253_v37, %v15825_v63  ;;  %v6943_v19 = vpop.f32.mrb[7].mxu0  ;;  %v7056_v23 = vpop.f32.mrb[7].mxu1 }
 0xffa   : > { %v7376_v57 = vmul.f32 0.7978846, %v7312_v55  ;;  %v7378_v17 = vmul.f32 0.7978846, %v7314_v34  ;;  %v7316_v42 = vadd.f32 %v7252_v62, %v15832_v48  ;;  %v7318_v15 = vadd.f32 %v7254_v26, %v15835_v0 }
 0xffb   : > { %11139 = vtanh.f32 %v7375_v3  ;;  %v7379_v59 = vmul.f32 0.7978846, %v7315_v43  ;;  %v7381_v49 = vmul.f32 0.7978846, %v7317_v14  ;;  %v15862_v41 = vadd.f32 %v6937_v2, %v15793_v51 }
 0xffc   : > { %11141 = vtanh.f32 %v7377_v5  ;;  %v7380_v54 = vmul.f32 0.7978846, %v7316_v42  ;;  %v7382_v8 = vmul.f32 0.7978846, %v7318_v15  ;;  %v15865_v33 = vadd.f32 %v7050_v60, %v15796_v38 }
 0xffd   : > { %11143 = vtanh.f32 %v7376_v57  ;;  %v7127_v50 = vmul.f32 %v15862_v41, %v15862_v41  ;;  %v15870_v40 = vadd.f32 %v6939_v6, %v15799_v22  ;;  %v15873_v11 = vadd.f32 %v7052_v61, %v15803_v4 }
 0xffe   : > { %11145 = vtanh.f32 %v7378_v17  ;;  %v7129_v45 = vmul.f32 %v15865_v33, %v15865_v33  ;;  %v15878_v35 = vadd.f32 %v6941_v30, %v15793_v51  ;;  %v15881_v47 = vadd.f32 %v7054_v27, %v15796_v38 }
 0xfff   : > { %11147 = vtanh.f32 %v7379_v59  ;;  %v7191_v2 = vmul.f32 %v7127_v50, %v15862_v41  ;;  %v7128_v60 = vmul.f32 %v15870_v40, %v15870_v40  ;;  %v7130_v13 = vmul.f32 %v15873_v11, %v15873_v11 }
0x1000   : > { %11149 = vtanh.f32 %v7381_v49  ;;  %v7193_v16 = vmul.f32 %v7129_v45, %v15865_v33  ;;  %v7131_v25 = vmul.f32 %v15878_v35, %v15878_v35  ;;  %v7133_v37 = vmul.f32 %v15881_v47, %v15881_v47 }
0x1001   : > { %11151 = vtanh.f32 %v7380_v54  ;;  %v7255_v6 = vmul.f32 0.044715, %v7191_v2  ;;  %v7192_v61 = vmul.f32 %v7128_v60, %v15870_v40  ;;  %v7194_v55 = vmul.f32 %v7130_v13, %v15873_v11 }
0x1002   : > { %11153 = vtanh.f32 %v7382_v8  ;;  %v7257_v34 = vmul.f32 0.044715, %v7193_v16  ;;  %v7195_v62 = vmul.f32 %v7131_v25, %v15878_v35  ;;  %v7197_v26 = vmul.f32 %v7133_v37, %v15881_v47 }
0x1003   : > { %v7319_v30 = vadd.f32 %v7255_v6, %v15862_v41  ;;  %v7256_v27 = vmul.f32 0.044715, %v7192_v61  ;;  %v7258_v3 = vmul.f32 0.044715, %v7194_v55  ;;  %v15899_v5 = vadd.f32 %v6943_v19, %v15799_v22 }
0x1004   : > { %v7321_v43 = vadd.f32 %v7257_v34, %v15865_v33  ;;  %v7259_v14 = vmul.f32 0.044715, %v7195_v62  ;;  %v7261_v57 = vmul.f32 0.044715, %v7197_v26  ;;  %v15903_v17 = vadd.f32 %v7056_v23, %v15803_v4 }
0x1005   : > { %v11140_v42 = vpop.eup %11139  ;;  %v7383_v15 = vmul.f32 0.7978846, %v7319_v30  ;;  %v7320_v59 = vadd.f32 %v7256_v27, %v15870_v40  ;;  %v7322_v49 = vadd.f32 %v7258_v3, %v15873_v11  ;;  %v7132_v54 = vmul.f32 %v15899_v5, %v15899_v5 }
0x1006   : > { %v11142_v8 = vpop.eup %11141  ;;  %v7503_v50 = vadd.f32 1.0, %v11140_v42  ;;  %v7385_v19 = vmul.f32 0.7978846, %v7321_v43  ;;  %v7323_v45 = vadd.f32 %v7259_v14, %v15878_v35  ;;  %v7325_v2 = vadd.f32 %v7261_v57, %v15881_v47 }
0x1007   : > { %v11144_v60 = vpop.eup %11143  ;;  %v7505_v13 = vadd.f32 1.0, %v11142_v8  ;;  %11155 = vtanh.f32 %v7383_v15  ;;  %v7384_v23 = vmul.f32 0.7978846, %v7320_v59  ;;  %v7386_v16 = vmul.f32 0.7978846, %v7322_v49 }
0x1008   : > { %v11146_v25 = vpop.eup %11145  ;;  %v7567_v37 = vmul.f32 0.5, %v7503_v50  ;;  %11157 = vtanh.f32 %v7385_v19  ;;  %v7387_v6 = vmul.f32 0.7978846, %v7323_v45  ;;  %v7389_v61 = vmul.f32 0.7978846, %v7325_v2 }
0x1009   : > { %v11148_v55 = vpop.eup %11147  ;;  %v7569_v34 = vmul.f32 0.5, %v7505_v13  ;;  %11159 = vtanh.f32 %v7384_v23  ;;  %v7196_v62 = vmul.f32 %v7132_v54, %v15899_v5  ;;  %v7134_v26 = vmul.f32 %v15903_v17, %v15903_v17 }
0x100a   : > { %v11150_v30 = vpop.eup %11149  ;;  %v15915_v27 = vmul.f32 %v7567_v37, %v15806_v53  ;;  %v7507_v3 = vadd.f32 1.0, %v11148_v55  ;;  %11161 = vtanh.f32 %v7386_v16  ;;  %v7504_v43 = vadd.f32 1.0, %v11144_v60 }
0x100b   : > { %v11152_v14 = vpop.eup %11151  ;;  %v15918_v57 = vmul.f32 %v7569_v34, %v15809_v31  ;;  %v7509_v42 = vadd.f32 1.0, %v11150_v30  ;;  %11163 = vtanh.f32 %v7387_v6  ;;  %v7260_v15 = vmul.f32 0.044715, %v7196_v62 }
0x100c   : > { %v11154_v59 = vpop.eup %11153  ;;  %v7571_v49 = vmul.f32 0.5, %v7507_v3  ;;  %11165 = vtanh.f32 %v7389_v61  ;;  %v7198_v54 = vmul.f32 %v7134_v26, %v15903_v17  ;;  %v7508_v8 = vadd.f32 1.0, %v11152_v14 }
0x100d   : > { %v7573_v50 = vmul.f32 0.5, %v7509_v42  ;;  %v7324_v53 = vadd.f32 %v7260_v15, %v15899_v5  ;;  %v15922_v19 = vmul.f32 0.5, %v7504_v43  ;;  %v15924_v45 = vadd.f32 1.0, %v11146_v25 }
0x100e   : > { %v15927_v2 = vmul.f32 %v7571_v49, %v15822_v56  ;;  %v7262_v31 = vmul.f32 0.044715, %v7198_v54  ;;  %v6947_v60 = vpop.f32.mrb[8].mxu0  ;;  %v7060_v13 = vpop.f32.mrb[8].mxu1  ;;  %v15929_v23 = vmul.f32 0.5, %v7508_v8  ;;  %v15931_v16 = vadd.f32 1.0, %v11154_v59 }
0x100f   : > { %v15934_v37 = vmul.f32 %v7573_v50, %v15825_v63  ;;  %v7388_v6 = vmul.f32 0.7978846, %v7324_v53  ;;  %v15937_v61 = vadd.f32 %v6947_v60, %v15793_v51  ;;  %v15940_v25 = vadd.f32 %v7060_v13, %v15796_v38  ;;  %v6949_v55 = vpop.f32.mrb[9].mxu0  ;;  %v7062_v56 = vpop.f32.mrb[9].mxu1 }
0x1010   : > { %v7326_v62 = vadd.f32 %v7262_v31, %v15903_v17  ;;  %v15946_v26 = vadd.f32 %v6949_v55, %v15799_v22  ;;  %v15949_v63 = vadd.f32 %v7062_v56, %v15803_v4  ;;  %v6951_v30 = vpop.f32.mrb[10].mxu0  ;;  %v7064_v3 = vpop.f32.mrb[10].mxu1 }
0x1011   : > { %v11156_v43 = vpop.eup %11155  ;;  %11167 = vtanh.f32 %v7388_v6  ;;  %v7135_v42 = vmul.f32 %v15937_v61, %v15937_v61  ;;  %v7137_v15 = vmul.f32 %v15940_v25, %v15940_v25  ;;  %v6953_v59 = vpop.f32.mrb[11].mxu0  ;;  %v15966_v56 = vadd.f32 %v6951_v30, %v15793_v51 }
0x1012   : > { %v7066_v49 = vpop.f32.mrb[11].mxu1  ;;  %v11158_v54 = vpop.eup %11157  ;;  %v7511_v8 = vadd.f32 1.0, %v11156_v43  ;;  %v7390_v50 = vmul.f32 0.7978846, %v7326_v62  ;;  %v7136_v53 = vmul.f32 %v15946_v26, %v15946_v26  ;;  %v7138_v31 = vmul.f32 %v15949_v63, %v15949_v63 }
0x1013   : > { %v15961_v60 = vpop.eup %11159  ;;  %v7513_v13 = vadd.f32 1.0, %v11158_v54  ;;  %v7199_v6 = vmul.f32 %v7135_v42, %v15937_v61  ;;  %v7201_v55 = vmul.f32 %v7137_v15, %v15940_v25  ;;  %v7139_v42 = vmul.f32 %v15966_v56, %v15966_v56 }
0x1014   : > { %v15968_v14 = vpop.eup %11161  ;;  %v7575_v43 = vmul.f32 0.5, %v7511_v8  ;;  %11169 = vtanh.f32 %v7390_v50  ;;  %v7200_v62 = vmul.f32 %v7136_v53, %v15946_v26  ;;  %v7202_v34 = vmul.f32 %v7138_v31, %v15949_v63 }
0x1015   : > { %v11164_v39 = vpop.eup %11163  ;;  %v7577_v10 = vmul.f32 0.5, %v7513_v13  ;;  %v7263_v20 = vmul.f32 0.044715, %v7199_v6  ;;  %v7265_v52 = vmul.f32 0.044715, %v7201_v55 }
0x1016   : > { %v11166_v54 = vpop.eup %11165  ;;  %v15975_v15 = vmul.f32 %v7575_v43, %v15862_v41  ;;  %v7515_v30 = vadd.f32 1.0, %v11164_v39  ;;  %v7264_v46 = vmul.f32 0.044715, %v7200_v62  ;;  %v7266_v7 = vmul.f32 0.044715, %v7202_v34  ;;  %v6957_v8 = vpop.f32.mrb[12].mxu0 }
0x1017   : > { %v15978_v50 = vmul.f32 %v7577_v10, %v15865_v33  ;;  %v7517_v53 = vadd.f32 1.0, %v11166_v54  ;;  %v7327_v31 = vadd.f32 %v7263_v20, %v15937_v61  ;;  %v7329_v13 = vadd.f32 %v7265_v52, %v15940_v25  ;;  %v7070_v6 = vpop.f32.mrb[12].mxu1  ;;  %v6959_v55 = vpop.f32.mrb[13].mxu0 }
0x1018   : > { %v7579_v44 = vmul.f32 0.5, %v7515_v30  ;;  %v7328_v18 = vadd.f32 %v7264_v46, %v15946_v26  ;;  %v7330_v41 = vadd.f32 %v7266_v7, %v15949_v63  ;;  %v7203_v39 = vmul.f32 %v7139_v42, %v15966_v56  ;;  %v7072_v43 = vpop.f32.mrb[13].mxu1  ;;  %v15985_v34 = vpop.f32.mrb[14].mxu0 }
0x1019   : > { %v7581_v62 = vmul.f32 0.5, %v7517_v53  ;;  %v7391_v10 = vmul.f32 0.7978846, %v7327_v31  ;;  %v7393_v33 = vmul.f32 0.7978846, %v7329_v13  ;;  %v15988_v54 = vadd.f32 %v7064_v3, %v15796_v38  ;;  %v15990_v20 = vpop.f32.mrb[14].mxu1 }
0x101a   : > { %v15993_v52 = vmul.f32 %v7579_v44, %v15878_v35  ;;  %v7392_v30 = vmul.f32 0.7978846, %v7328_v18  ;;  %v7394_v46 = vmul.f32 0.7978846, %v7330_v41  ;;  %v7267_v36 = vmul.f32 0.044715, %v7203_v39 }
0x101b   : > { %v15995_v7 = vpop.eup %11167  ;;  %v15998_v42 = vmul.f32 %v7581_v62, %v15881_v47  ;;  %11171 = vtanh.f32 %v7391_v10  ;;  %v7141_v53 = vmul.f32 %v15988_v54, %v15988_v54  ;;  %v16003_v3 = vadd.f32 %v6953_v59, %v15799_v22  ;;  %v16005_v31 = vpop.f32.mrb[15].mxu0 }
0x101c   : > { %v16007_v13 = vpop.f32.mrb[15].mxu1  ;;  %11173 = vtanh.f32 %v7393_v33  ;;  %v7331_v44 = vadd.f32 %v7267_v36, %v15966_v56  ;;  %v16013_v35 = vadd.f32 %v7066_v49, %v15803_v4  ;;  %v7632_v36 = vmul.f32 %v15922_v19, %v15812_v24 }
0x101d   : > { %11175 = vtanh.f32 %v7392_v30  ;;  %v7205_v59 = vmul.f32 %v7141_v53, %v15988_v54  ;;  %v7140_v41 = vmul.f32 %v16003_v3, %v16003_v3  ;;  %v7636_v30 = vmul.f32 %v15929_v23, %v15832_v48 }
0x101e   : > { %v16020_v39 = vpop.eup %11169  ;;  %11177 = vtanh.f32 %v7394_v46  ;;  %v7395_v62 = vmul.f32 0.7978846, %v7331_v44  ;;  %v7142_v10 = vmul.f32 %v16013_v35, %v16013_v35  ;;  %v7570_v53 = vmul.f32 0.5, %v15924_v45 }
0x101f   : > { %v7269_v49 = vmul.f32 0.044715, %v7205_v59  ;;  %v7204_v33 = vmul.f32 %v7140_v41, %v16003_v3  ;;  %v7574_v46 = vmul.f32 0.5, %v15931_v16  ;;  %v16033_v44 = vadd.f32 %v6957_v8, %v15793_v51 }
0x1020   : > { %11179 = vtanh.f32 %v7395_v62  ;;  %v7206_v47 = vmul.f32 %v7142_v10, %v16013_v35  ;;  %v7696_v24 = vpack.c.bf16 %v7636_v30, %v7632_v36  ;;  %v7634_v19 = vmul.f32 %v7570_v53, %v15815_v28 }
0x1021   : > { %v7333_v18 = vadd.f32 %v7269_v49, %v15988_v54  ;;  %v7268_v29 = vmul.f32 0.044715, %v7204_v33  ;;  %v7638_v41 = vmul.f32 %v7574_v46, %v15835_v0  ;;  %v7143_v48 = vmul.f32 %v16033_v44, %v16033_v44 }
0x1022   : > { %v7270_v59 = vmul.f32 0.044715, %v7206_v47  ;;  %v16041_v45 = vadd.f32 %v7070_v6, %v15796_v38  ;;  %8017 = vmatprep.mubr.bf16.mxu0 %v7696_v24  ;;  %v16045_v8 = vadd.f32 %v6959_v55, %v15799_v22  ;;  %v16048_v62 = vadd.f32 %v7072_v43, %v15803_v4 }
0x1023   : > { %v7397_v23 = vmul.f32 0.7978846, %v7333_v18  ;;  %v7332_v16 = vadd.f32 %v7268_v29, %v16003_v3  ;;  %v7698_v47 = vpack.c.bf16 %v7638_v41, %v7634_v19  ;;  %v17360_v0 = vpack.c.bf16 %v15927_v2, %v15915_v27 }
0x1024   : > { %v7334_v28 = vadd.f32 %v7270_v59, %v16013_v35  ;;  %v7207_v6 = vmul.f32 %v7143_v48, %v16033_v44  ;;  %v7145_v18 = vmul.f32 %v16041_v45, %v16041_v45  ;;  %v7144_v55 = vmul.f32 %v16045_v8, %v16045_v8 }
0x1025   : > { %8018 = vmatmul.mubr.bf16.vlgmr.msra.gmra.mrb[32].mxu0 %v17360_v0  ;;  %v11172_v29 = vpop.eup %11171  ;;  %11181 = vtanh.f32 %v7397_v23  ;;  %v7396_v10 = vmul.f32 0.7978846, %v7332_v16  ;;  %v7146_v43 = vmul.f32 %v16048_v62, %v16048_v62  ;;  %8114 = vmatprep.mubr.bf16.mxu1 %v7698_v47  ;;  %v17361_v46 = vpack.c.bf16 %v15934_v37, %v15918_v57 }
0x1026   : > { %v11174_v36 = vpop.eup %11173  ;;  %v7519_v49 = vadd.f32 1.0, %v11172_v29  ;;  %v7398_v33 = vmul.f32 0.7978846, %v7334_v28  ;;  %v7271_v27 = vmul.f32 0.044715, %v7207_v6  ;;  %v7209_v2 = vmul.f32 %v7145_v18, %v16041_v45 }
0x1027   : > { %v16062_v30 = vpop.eup %11175  ;;  %v7521_v53 = vadd.f32 1.0, %v11174_v36  ;;  %11183 = vtanh.f32 %v7396_v10  ;;  %8115 = vmatmul.mubr.bf16.vlgmr.msra.gmra.mrb[32].mxu1 %v17361_v46  ;;  %v7208_v24 = vmul.f32 %v7144_v55, %v16045_v8  ;;  %v7210_v19 = vmul.f32 %v7146_v43, %v16048_v62 }
0x1028   : > { %v16069_v59 = vpop.eup %11177  ;;  %v7583_v41 = vmul.f32 0.5, %v7519_v49  ;;  %11185 = vtanh.f32 %v7398_v33  ;;  %v7335_v48 = vadd.f32 %v7271_v27, %v16033_v44  ;;  %v7273_v23 = vmul.f32 0.044715, %v7209_v2 }
0x1029   : > { %v7585_v16 = vmul.f32 0.5, %v7521_v53  ;;  %v7272_v28 = vmul.f32 0.044715, %v7208_v24  ;;  %v7274_v47 = vmul.f32 0.044715, %v7210_v19  ;;  %v16074_v0 = vadd.f32 %v15985_v34, %v15793_v51 }
0x102a   : > { %v11180_v57 = vpop.eup %11179  ;;  %v16077_v37 = vmul.f32 %v7583_v41, %v15937_v61  ;;  %v7399_v6 = vmul.f32 0.7978846, %v7335_v48  ;;  %v7337_v18 = vadd.f32 %v7273_v23, %v16041_v45  ;;  %v16082_v29 = vadd.f32 %v15990_v20, %v15796_v38 }
0x102b   : > { %v16085_v10 = vmul.f32 %v7585_v16, %v15940_v25  ;;  %v7523_v55 = vadd.f32 1.0, %v11180_v57  ;;  %v7336_v43 = vadd.f32 %v7272_v28, %v16045_v8  ;;  %v7338_v34 = vadd.f32 %v7274_v47, %v16048_v62 }
0x102c   : > { %11187 = vtanh.f32 %v7399_v6  ;;  %v7401_v36 = vmul.f32 0.7978846, %v7337_v18  ;;  %v7147_v61 = vmul.f32 %v16074_v0, %v16074_v0  ;;  %v7149_v49 = vmul.f32 %v16082_v29, %v16082_v29 }
0x102d   : > { %v7587_v33 = vmul.f32 0.5, %v7523_v55  ;;  %v7400_v27 = vmul.f32 0.7978846, %v7336_v43  ;;  %v7402_v20 = vmul.f32 0.7978846, %v7338_v34  ;;  %v16095_v25 = vadd.f32 %v16005_v31, %v15799_v22 }
0x102e   : > { %11189 = vtanh.f32 %v7401_v36  ;;  %v7211_v2 = vmul.f32 %v7147_v61, %v16074_v0  ;;  %v7213_v53 = vmul.f32 %v7149_v49, %v16082_v29  ;;  %v16101_v46 = vadd.f32 %v16007_v13, %v15803_v4  ;;  %v6967_v24 = vpop.f32.mrb[16].mxu0  ;;  %v16103_v19 = vpop.f32.mrb[16].mxu1 }
0x102f   : > { %v11182_v41 = vpop.eup %11181  ;;  %v16106_v48 = vmul.f32 %v7587_v33, %v15966_v56  ;;  %11191 = vtanh.f32 %v7400_v27  ;;  %v7148_v31 = vmul.f32 %v16095_v25, %v16095_v25  ;;  %v7512_v23 = vadd.f32 1.0, %v15961_v60  ;;  %v16111_v16 = vpop.f32.mrb[17].mxu0 }
0x1030   : > { %17362 = vst [vmem:[#allocation24_spill] sm:$0xff] %v16101_v46  ;;  %v16113_v28 = vpop.f32.mrb[17].mxu1  ;;  %v7525_v47 = vadd.f32 1.0, %v11182_v41  ;;  %11193 = vtanh.f32 %v7402_v20  ;;  %v7275_v13 = vmul.f32 0.044715, %v7211_v2  ;;  %v16115_v6 = vpop.f32.mrb[18].mxu0  ;;  %v7150_v60 = vmul.f32 %v16101_v46, %v16101_v46 }
0x1031   : > { %v7277_v57 = vmul.f32 0.044715, %v7213_v53  ;;  %v16117_v18 = vpop.eup %11183  ;;  %v7212_v55 = vmul.f32 %v7148_v31, %v16095_v25  ;;  %v7516_v43 = vadd.f32 1.0, %v15995_v7  ;;  %v16125_v34 = vpop.f32.mrb[18].mxu1  ;;  %v7576_v20 = vmul.f32 0.5, %v7512_v23 }
0x1032   : > { %v16127_v36 = vpop.f32.mrb[19].mxu0  ;;  %v16129_v61 = vpop.eup %11185  ;;  %v7589_v49 = vmul.f32 0.5, %v7525_v47  ;;  %v7339_v33 = vadd.f32 %v7275_v13, %v16074_v0  ;;  %v7214_v41 = vmul.f32 %v7150_v60, %v16101_v46  ;;  %v7514_v7 = vadd.f32 1.0, %v15968_v14 }
0x1033   : > { %v7341_v27 = vadd.f32 %v7277_v57, %v16082_v29  ;;  %v16133_v2 = vpop.f32.mrb[19].mxu1  ;;  %v7276_v53 = vmul.f32 0.044715, %v7212_v55  ;;  %v7580_v31 = vmul.f32 0.5, %v7516_v43  ;;  %v7640_v47 = vmul.f32 %v7576_v20, %v15870_v40 }
0x1034   : > { %v16138_v56 = vmul.f32 %v7589_v49, %v15988_v54  ;;  %v7403_v32 = vmul.f32 0.7978846, %v7339_v33  ;;  %v7278_v58 = vmul.f32 0.044715, %v7214_v41  ;;  %v7518_v57 = vadd.f32 1.0, %v16020_v39 }
0x1035   : > { %v7405_v9 = vmul.f32 0.7978846, %v7341_v27  ;;  %v7340_v13 = vadd.f32 %v7276_v53, %v16095_v25  ;;  %v7644_v23 = vmul.f32 %v7580_v31, %v15899_v5  ;;  %v7578_v14 = vmul.f32 0.5, %v7514_v7 }
0x1036   : > { %v11188_v55 = vpop.eup %11187  ;;  %11195 = vtanh.f32 %v7403_v32  ;;  %v16147_v54 = vadd.f32 %v6967_v24, %v15793_v51  ;;  %v16149_v43 = vpop.f32.mrb[20].mxu0  ;;  %v7342_v5 = vadd.f32 %v7278_v58, %v16101_v46  ;;  %v7582_v32 = vmul.f32 0.5, %v7518_v57 }
0x1037   : > { %v16151_v49 = vpop.f32.mrb[20].mxu1  ;;  %v7527_v40 = vadd.f32 1.0, %v11188_v55  ;;  %11197 = vtanh.f32 %v7405_v9  ;;  %v7404_v33 = vmul.f32 0.7978846, %v7340_v13  ;;  %v16154_v27 = vpop.f32.mrb[21].mxu0  ;;  %v7700_v53 = vpack.c.bf16 %v7644_v23, %v7640_v47 }
0x1038   : > { %v16156_v39 = vpop.f32.mrb[21].mxu1  ;;  %v11190_v20 = vpop.eup %11189  ;;  %v7642_v41 = vmul.f32 %v7578_v14, %v15873_v11  ;;  %v7151_v24 = vmul.f32 %v16147_v54, %v16147_v54  ;;  %v7406_v55 = vmul.f32 0.7978846, %v7342_v5  ;;  %v7646_v11 = vmul.f32 %v7582_v32, %v15903_v17 }
0x1039   : > { %v16161_v31 = vpop.f32.mrb[22].mxu0  ;;  %v16163_v7 = vpop.f32.mrb[22].mxu1  ;;  %v7591_v13 = vmul.f32 0.5, %v7527_v40  ;;  %v7529_v58 = vadd.f32 1.0, %v11190_v20  ;;  %11199 = vtanh.f32 %v7404_v33  ;;  %8025 = vmatprep.mubr.bf16.mxu0 %v7700_v53  ;;  %v16177_v57 = vadd.f32 %v16103_v19, %v15796_v38 }
0x103a   : > { %v16165_v9 = vpop.eup %11191  ;;  %v16167_v60 = vpop.f32.mrb[23].mxu0  ;;  %v7215_v23 = vmul.f32 %v7151_v24, %v16147_v54  ;;  %v16181_v14 = vadd.f32 %v16111_v16, %v15799_v22  ;;  %11201 = vtanh.f32 %v7406_v55  ;;  %v17363_v5 = vpack.c.bf16 %v15993_v52, %v15975_v15 }
0x103b   : > { %v16169_v1 = vpop.f32.mrb[23].mxu1  ;;  %v16171_v47 = vpop.eup %11193  ;;  %v16184_v40 = vmul.f32 %v7591_v13, %v16033_v44  ;;  %v7593_v33 = vmul.f32 0.5, %v7529_v58  ;;  %v16191_v17 = vadd.f32 %v16113_v28, %v15803_v4  ;;  %v7702_v20 = vpack.c.bf16 %v7646_v11, %v7642_v41 }
0x103c   : > { %8026 = vmatmul.mubr.bf16.gmra.mrb[36].mxu0 %v17363_v5  ;;  %v7279_v19 = vmul.f32 0.044715, %v7215_v23  ;;  %v7153_v53 = vmul.f32 %v16177_v57, %v16177_v57  ;;  %v7152_v16 = vmul.f32 %v16181_v14, %v16181_v14  ;;  %v16204_v15 = vadd.f32 %v16115_v6, %v15793_v51 }
0x103d   : > { %v16198_v44 = vmul.f32 %v7593_v33, %v16041_v45  ;;  %v7154_v32 = vmul.f32 %v16191_v17, %v16191_v17  ;;  %v16208_v52 = vadd.f32 %v16125_v34, %v15796_v38  ;;  %8122 = vmatprep.mubr.bf16.mxu1 %v7702_v20  ;;  %v16215_v45 = vadd.f32 %v16127_v36, %v15799_v22 }
0x103e   : > { %v7343_v28 = vadd.f32 %v7279_v19, %v16147_v54  ;;  %v7217_v41 = vmul.f32 %v7153_v53, %v16177_v57  ;;  %v7216_v24 = vmul.f32 %v7152_v16, %v16181_v14  ;;  %v17364_v13 = vpack.c.bf16 %v15998_v42, %v15978_v50 }
0x103f   : > { %v7218_v6 = vmul.f32 %v7154_v32, %v16191_v17  ;;  %v7155_v34 = vmul.f32 %v16204_v15, %v16204_v15  ;;  %v7157_v58 = vmul.f32 %v16208_v52, %v16208_v52  ;;  %v16227_v55 = vadd.f32 %v16133_v2, %v15803_v4 }
0x1040   : > { %8123 = vmatmul.mubr.bf16.gmra.mrb[36].mxu1 %v17364_v13  ;;  %v11196_v11 = vpop.eup %11195  ;;  %v7407_v23 = vmul.f32 0.7978846, %v7343_v28  ;;  %v7281_v36 = vmul.f32 0.044715, %v7217_v41  ;;  %v7280_v33 = vmul.f32 0.044715, %v7216_v24  ;;  %v7156_v50 = vmul.f32 %v16215_v45, %v16215_v45 }
0x1041   : > { %v11198_v42 = vpop.eup %11197  ;;  %v7531_v5 = vadd.f32 1.0, %v11196_v11  ;;  %v7282_v20 = vmul.f32 0.044715, %v7218_v6  ;;  %v7219_v19 = vmul.f32 %v7155_v34, %v16204_v15  ;;  %v7221_v53 = vmul.f32 %v7157_v58, %v16208_v52 }
0x1042   : > { %v7533_v16 = vadd.f32 1.0, %v11198_v42  ;;  %11203 = vtanh.f32 %v7407_v23  ;;  %v7345_v32 = vadd.f32 %v7281_v36, %v16177_v57  ;;  %v7344_v2 = vadd.f32 %v7280_v33, %v16181_v14 }
0x1043   : > { %v16235_v13 = vpop.eup %11199  ;;  %v7595_v28 = vmul.f32 0.5, %v7531_v5  ;;  %v7346_v41 = vadd.f32 %v7282_v20, %v16191_v17  ;;  %v7283_v24 = vmul.f32 0.044715, %v7219_v19  ;;  %v7285_v21 = vmul.f32 0.044715, %v7221_v53 }
0x1044   : > { %v7597_v12 = vmul.f32 0.5, %v7533_v16  ;;  %v7409_v11 = vmul.f32 0.7978846, %v7345_v32  ;;  %v7408_v6 = vmul.f32 0.7978846, %v7344_v2  ;;  %v7220_v34 = vmul.f32 %v7156_v50, %v16215_v45  ;;  %v16239_v46 = vpop.eup %11201 }
0x1045   : > { %v16242_v58 = vmul.f32 %v7595_v28, %v16074_v0  ;;  %v7410_v23 = vmul.f32 0.7978846, %v7346_v41  ;;  %v7347_v36 = vadd.f32 %v7283_v24, %v16204_v15  ;;  %v7349_v33 = vadd.f32 %v7285_v21, %v16208_v52 }
0x1046   : > { %v16247_v42 = vmul.f32 %v7597_v12, %v16082_v29  ;;  %11205 = vtanh.f32 %v7409_v11  ;;  %v7284_v5 = vmul.f32 0.044715, %v7220_v34  ;;  %v7158_v20 = vmul.f32 %v16227_v55, %v16227_v55 }
0x1047   : > { %11207 = vtanh.f32 %v7408_v6  ;;  %v7411_v19 = vmul.f32 0.7978846, %v7347_v36  ;;  %v7413_v0 = vmul.f32 0.7978846, %v7349_v33  ;;  %v7520_v29 = vadd.f32 1.0, %v16062_v30 }
0x1048   : > { %11209 = vtanh.f32 %v7410_v23  ;;  %v7348_v21 = vadd.f32 %v7284_v5, %v16215_v45  ;;  %v7222_v12 = vmul.f32 %v7158_v20, %v16227_v55  ;;  %v7524_v16 = vadd.f32 1.0, %v16117_v18 }
0x1049   : > { %11211 = vtanh.f32 %v7411_v19  ;;  %v7522_v32 = vadd.f32 1.0, %v16069_v59  ;;  %v7526_v41 = vadd.f32 1.0, %v16129_v61  ;;  %v7584_v24 = vmul.f32 0.5, %v7520_v29 }
0x104a   : > { %11213 = vtanh.f32 %v7413_v0  ;;  %v7412_v2 = vmul.f32 0.7978846, %v7348_v21  ;;  %v7286_v28 = vmul.f32 0.044715, %v7222_v12  ;;  %v7588_v11 = vmul.f32 0.5, %v7524_v16 }
0x104b   : > { %v7586_v6 = vmul.f32 0.5, %v7522_v32  ;;  %v16263_v34 = vadd.f32 %v16149_v43, %v15793_v51  ;;  %v7590_v36 = vmul.f32 0.5, %v7526_v41  ;;  %v16268_v59 = vadd.f32 %v16151_v49, %v15796_v38 }
0x104c   : > { %v11204_v23 = vpop.eup %11203  ;;  %11215 = vtanh.f32 %v7412_v2  ;;  %v7350_v30 = vadd.f32 %v7286_v28, %v16227_v55  ;;  %v7648_v33 = vmul.f32 %v7584_v24, %v15946_v26  ;;  %v7652_v61 = vmul.f32 %v7588_v11, %v16003_v3 }
0x104d   : > { %v7535_v18 = vadd.f32 1.0, %v11204_v23  ;;  %v7650_v5 = vmul.f32 %v7586_v6, %v15949_v63  ;;  %v7654_v43 = vmul.f32 %v7590_v36, %v16013_v35  ;;  %v7159_v19 = vmul.f32 %v16263_v34, %v16263_v34 }
0x104e   : > { %v7414_v20 = vmul.f32 0.7978846, %v7350_v30  ;;  %v7161_v0 = vmul.f32 %v16268_v59, %v16268_v59  ;;  %v7704_v12 = vpack.c.bf16 %v7652_v61, %v7648_v33  ;;  %v16280_v49 = vadd.f32 %v16154_v27, %v15799_v22 }
0x104f   : > { %v7599_v21 = vmul.f32 0.5, %v7535_v18  ;;  %v16284_v26 = vadd.f32 %v16156_v39, %v15803_v4  ;;  %v7706_v3 = vpack.c.bf16 %v7654_v43, %v7650_v5  ;;  %v7223_v35 = vmul.f32 %v7159_v19, %v16263_v34 }
0x1050   : > { %v11206_v63 = vpop.eup %11205  ;;  %11217 = vtanh.f32 %v7414_v20  ;;  %v7225_v29 = vmul.f32 %v7161_v0, %v16268_v59  ;;  %8033 = vmatprep.mubr.bf16.mxu0 %v7704_v12  ;;  %v7160_v27 = vmul.f32 %v16280_v49, %v16280_v49  ;;  %v17365_v11 = vpack.c.bf16 %v16106_v48, %v16077_v37 }
0x1051   : > { %v16288_v16 = vpop.eup %11207  ;;  %v16291_v32 = vmul.f32 %v7599_v21, %v16147_v54  ;;  %v7537_v2 = vadd.f32 1.0, %v11206_v63  ;;  %v7162_v39 = vmul.f32 %v16284_v26, %v16284_v26  ;;  %v16297_v28 = vpop.f32.mrb[24].mxu0  ;;  %8130 = vmatprep.mubr.bf16.mxu1 %v7706_v3  ;;  %v7287_v54 = vmul.f32 0.044715, %v7223_v35 }
0x1052   : > { %v16299_v41 = vpop.f32.mrb[24].mxu1  ;;  %v16301_v24 = vpop.eup %11209  ;;  %8034 = vmatmul.mubr.bf16.gmra.mrb[40].mxu0 %v17365_v11  ;;  %v7289_v6 = vmul.f32 0.044715, %v7225_v29  ;;  %v16308_v23 = vadd.f32 %v16161_v31, %v15793_v51  ;;  %v16312_v30 = vadd.f32 %v16163_v7, %v15796_v38  ;;  %v17366_v37 = vpack.c.bf16 %v16138_v56, %v16085_v10 }
0x1053   : > { %v16314_v36 = vpop.f32.mrb[25].mxu0  ;;  %v16316_v18 = vpop.f32.mrb[25].mxu1  ;;  %v7601_v61 = vmul.f32 0.5, %v7537_v2  ;;  %v7224_v48 = vmul.f32 %v7160_v27, %v16280_v49  ;;  %v7226_v5 = vmul.f32 %v7162_v39, %v16284_v26  ;;  %v16325_v31 = vadd.f32 %v16167_v60, %v15799_v22 }
0x1054   : > { %v11212_v33 = vpop.eup %11211  ;;  %8131 = vmatmul.mubr.bf16.gmra.mrb[40].mxu1 %v17366_v37  ;;  %v16327_v7 = vpop.f32.mrb[26].mxu0  ;;  %v7351_v0 = vadd.f32 %v7287_v54, %v16263_v34  ;;  %v7353_v21 = vadd.f32 %v7289_v6, %v16268_v59  ;;  %v7163_v10 = vmul.f32 %v16308_v23, %v16308_v23  ;;  %v7165_v37 = vmul.f32 %v16312_v30, %v16312_v30 }
0x1055   : > { %v16329_v20 = vpop.f32.mrb[26].mxu1  ;;  %v11214_v43 = vpop.eup %11213  ;;  %v7539_v19 = vadd.f32 1.0, %v11212_v33  ;;  %v16340_v60 = vmul.f32 %v7601_v61, %v16177_v57  ;;  %v7288_v3 = vmul.f32 0.044715, %v7224_v48  ;;  %v7290_v35 = vmul.f32 0.044715, %v7226_v5 }
0x1056   : > { %v16335_v56 = vpop.f32.mrb[27].mxu0  ;;  %v16337_v12 = vpop.f32.mrb[27].mxu1  ;;  %v7541_v63 = vadd.f32 1.0, %v11214_v43  ;;  %v7415_v27 = vmul.f32 0.7978846, %v7351_v0  ;;  %v7227_v11 = vmul.f32 %v7163_v10, %v16308_v23  ;;  %v7164_v48 = vmul.f32 %v16325_v31, %v16325_v31 }
0x1057   : > { %v16342_v29 = vpop.eup %11215  ;;  %v7603_v2 = vmul.f32 0.5, %v7539_v19  ;;  %v7417_v39 = vmul.f32 0.7978846, %v7353_v21  ;;  %v7352_v6 = vadd.f32 %v7288_v3, %v16280_v49  ;;  %v7354_v33 = vadd.f32 %v7290_v35, %v16284_v26 }
0x1058   : > { %v7605_v54 = vmul.f32 0.5, %v7541_v63  ;;  %11219 = vtanh.f32 %v7415_v27  ;;  %v7291_v61 = vmul.f32 0.044715, %v7227_v11  ;;  %v7229_v3 = vmul.f32 %v7165_v37, %v16312_v30 }
0x1059   : > { %v16350_v57 = vmul.f32 %v7603_v2, %v16204_v15  ;;  %11221 = vtanh.f32 %v7417_v39  ;;  %v7416_v43 = vmul.f32 0.7978846, %v7352_v6  ;;  %v7418_v19 = vmul.f32 0.7978846, %v7354_v33  ;;  %v16357_v0 = vpop.f32.mrb[28].mxu0  ;;  %v16359_v21 = vpop.f32.mrb[28].mxu1 }
0x105a   : > { %v16355_v5 = vmul.f32 %v7605_v54, %v16208_v52  ;;  %v16361_v10 = vpop.eup %11217  ;;  %v7355_v63 = vadd.f32 %v7291_v61, %v16308_v23  ;;  %v7228_v35 = vmul.f32 %v7164_v48, %v16325_v31  ;;  %v16368_v52 = vpop.f32.mrb[29].mxu0  ;;  %v16376_v39 = vadd.f32 %v16169_v1, %v15803_v4 }
0x105b   : > { %v16370_v2 = vpop.f32.mrb[29].mxu1  ;;  %11223 = vtanh.f32 %v7416_v43  ;;  %v7528_v11 = vadd.f32 1.0, %v16165_v9  ;;  %v16379_v54 = vpop.f32.mrb[30].mxu0  ;;  %v7293_v37 = vmul.f32 0.044715, %v7229_v3  ;;  %v7532_v27 = vadd.f32 1.0, %v16235_v13 }
0x105c   : > { %v16381_v6 = vpop.f32.mrb[30].mxu1  ;;  %11225 = vtanh.f32 %v7418_v19  ;;  %v7419_v33 = vmul.f32 0.7978846, %v7355_v63  ;;  %v7292_v61 = vmul.f32 0.044715, %v7228_v35  ;;  %v7166_v48 = vmul.f32 %v16376_v39, %v16376_v39  ;;  %v16387_v1 = vpop.f32.mrb[31].mxu0 }
0x105d   : > { %17367 = vst [vmem:[#allocation6_spill] sm:$0xff] %v16381_v6  ;;  %v7592_v43 = vmul.f32 0.5, %v7528_v11  ;;  %v7530_v15 = vadd.f32 1.0, %v16171_v47  ;;  %17368 = vst [vmem:[#allocation7_spill] sm:$0xff] %v16387_v1  ;;  %v16389_v53 = vpop.f32.mrb[31].mxu1  ;;  %v7357_v9 = vadd.f32 %v7293_v37, %v16312_v30  ;;  %v7534_v63 = vadd.f32 1.0, %v16239_v46 }
0x105e   : > { %11227 = vtanh.f32 %v7419_v33  ;;  %v7356_v19 = vadd.f32 %v7292_v61, %v16325_v31  ;;  %v7230_v3 = vmul.f32 %v7166_v48, %v16376_v39  ;;  %v7596_v35 = vmul.f32 0.5, %v7532_v27 }
0x105f   : > { %v7656_v50 = vmul.f32 %v7592_v43, %v16045_v8  ;;  %v7594_v13 = vmul.f32 0.5, %v7530_v15  ;;  %v7421_v11 = vmul.f32 0.7978846, %v7357_v9  ;;  %v7598_v47 = vmul.f32 0.5, %v7534_v63  ;;  %v17369_v8 = vld [vmem:[#allocation24_spill] sm:$0xff] }
0x1060   : > { %v7420_v6 = vmul.f32 0.7978846, %v7356_v19  ;;  %v16398_v1 = vadd.f32 %v16297_v28, %v15793_v51  ;;  %v7294_v33 = vmul.f32 0.044715, %v7230_v3  ;;  %v7660_v37 = vmul.f32 %v7596_v35, %v16095_v25 }
0x1061   : > { %v7658_v61 = vmul.f32 %v7594_v13, %v16048_v62  ;;  %v16404_v46 = vadd.f32 %v16299_v41, %v15796_v38  ;;  %11229 = vtanh.f32 %v7421_v11  ;;  %v7662_v15 = vmul.f32 %v7598_v47, %v17369_v8 }
0x1062   : > { %v11220_v27 = vpop.eup %11219  ;;  %v7167_v48 = vmul.f32 %v16398_v1, %v16398_v1  ;;  %v7536_v43 = vadd.f32 1.0, %v16288_v16  ;;  %11231 = vtanh.f32 %v7420_v6  ;;  %v7358_v25 = vadd.f32 %v7294_v33, %v16376_v39 }
0x1063   : > { %v11222_v28 = vpop.eup %11221  ;;  %v7543_v9 = vadd.f32 1.0, %v11220_v27  ;;  %v7708_v19 = vpack.c.bf16 %v7660_v37, %v7656_v50  ;;  %v7710_v63 = vpack.c.bf16 %v7662_v15, %v7658_v61  ;;  %v7169_v3 = vmul.f32 %v16404_v46, %v16404_v46 }
0x1064   : > { %v7545_v62 = vadd.f32 1.0, %v11222_v28  ;;  %v7231_v41 = vmul.f32 %v7167_v48, %v16398_v1  ;;  %v7422_v11 = vmul.f32 0.7978846, %v7358_v25  ;;  %v7540_v16 = vadd.f32 1.0, %v16342_v29 }
0x1065   : > { %v16414_v35 = vpop.eup %11223  ;;  %v7607_v13 = vmul.f32 0.5, %v7543_v9  ;;  %8041 = vmatprep.mubr.bf16.mxu0 %v7708_v19  ;;  %v7600_v47 = vmul.f32 0.5, %v7536_v43  ;;  %8138 = vmatprep.mubr.bf16.mxu1 %v7710_v63  ;;  %v17370_v50 = vpack.c.bf16 %v16242_v58, %v16184_v40  ;;  %v7233_v37 = vmul.f32 %v7169_v3, %v16404_v46 }
0x1066   : > { %v16417_v27 = vpop.eup %11225  ;;  %v7609_v6 = vmul.f32 0.5, %v7545_v62  ;;  %v7295_v33 = vmul.f32 0.044715, %v7231_v41  ;;  %v7538_v61 = vadd.f32 1.0, %v16301_v24  ;;  %11233 = vtanh.f32 %v7422_v11 }
0x1067   : > { %8042 = vmatmul.mubr.bf16.gmra.mrb[44].mxu0 %v17370_v50  ;;  %v16425_v8 = vmul.f32 %v7607_v13, %v16263_v34  ;;  %v17371_v29 = vpack.c.bf16 %v16247_v42, %v16198_v44  ;;  %v7604_v15 = vmul.f32 0.5, %v7540_v16  ;;  %v7664_v48 = vmul.f32 %v7600_v47, %v16181_v14 }
0x1068   : > { %v11228_v43 = vpop.eup %11227  ;;  %v16432_v40 = vmul.f32 %v7609_v6, %v16268_v59  ;;  %v7359_v58 = vadd.f32 %v7295_v33, %v16398_v1  ;;  %v7297_v28 = vmul.f32 0.044715, %v7233_v37  ;;  %v7542_v24 = vadd.f32 1.0, %v16361_v10 }
0x1069   : > { %8139 = vmatmul.mubr.bf16.gmra.mrb[44].mxu1 %v17371_v29  ;;  %v7547_v9 = vadd.f32 1.0, %v11228_v43  ;;  %v7668_v34 = vmul.f32 %v7604_v15, %v16215_v45  ;;  %v7602_v25 = vmul.f32 0.5, %v7538_v61  ;;  %v16439_v44 = vadd.f32 %v16314_v36, %v15799_v22 }
0x106a   : > { %v7423_v42 = vmul.f32 0.7978846, %v7359_v58  ;;  %v7361_v14 = vadd.f32 %v7297_v28, %v16404_v46  ;;  %v7606_v19 = vmul.f32 0.5, %v7542_v24  ;;  %v16444_v59 = vadd.f32 %v16316_v18, %v15803_v4 }
0x106b   : > { %v7611_v62 = vmul.f32 0.5, %v7547_v9  ;;  %v7712_v63 = vpack.c.bf16 %v7668_v34, %v7664_v48  ;;  %v7666_v10 = vmul.f32 %v7602_v25, %v16191_v17  ;;  %v7168_v45 = vmul.f32 %v16439_v44, %v16439_v44  ;;  %v11230_v41 = vpop.eup %11229 }
0x106c   : > { %11235 = vtanh.f32 %v7423_v42  ;;  %v7425_v3 = vmul.f32 0.7978846, %v7361_v14  ;;  %v7670_v36 = vmul.f32 %v7606_v19, %v16227_v55  ;;  %v7170_v13 = vmul.f32 %v16444_v59, %v16444_v59  ;;  %v16452_v11 = vpop.eup %11231 }
0x106d   : > { %v16455_v18 = vmul.f32 %v7611_v62, %v16308_v23  ;;  %v7549_v16 = vadd.f32 1.0, %v11230_v41  ;;  %8049 = vmatprep.mubr.bf16.mxu0 %v7712_v63  ;;  %v7232_v17 = vmul.f32 %v7168_v45, %v16439_v44  ;;  %v16460_v47 = vadd.f32 %v16327_v7, %v15793_v51 }
0x106e   : > { %11237 = vtanh.f32 %v7425_v3  ;;  %v7714_v6 = vpack.c.bf16 %v7670_v36, %v7666_v10  ;;  %v7234_v55 = vmul.f32 %v7170_v13, %v16444_v59  ;;  %v17372_v50 = vpack.c.bf16 %v16350_v57, %v16291_v32 }
0x106f   : > { %v16468_v23 = vadd.f32 %v16329_v20, %v15796_v38  ;;  %v7715_v33 = vpack.c.bf16 %v16455_v18, %v16425_v8  ;;  %v7613_v37 = vmul.f32 0.5, %v7549_v16  ;;  %v7296_v61 = vmul.f32 0.044715, %v7232_v17 }
0x1070   : > { %8050 = vmatmul.mubr.bf16.gmra.mrb[48].mxu0 %v17372_v50  ;;  %v7171_v7 = vmul.f32 %v16460_v47, %v16460_v47  ;;  %8146 = vmatprep.mubr.bf16.mxu1 %v7714_v6  ;;  %v7298_v29 = vmul.f32 0.044715, %v7234_v55  ;;  %v16478_v32 = vadd.f32 %v16335_v56, %v15799_v22  ;;  %v16482_v20 = vadd.f32 %v16337_v12, %v15803_v4  ;;  %v11234_v57 = vpop.eup %11233 }
0x1071   : > { %v7173_v15 = vmul.f32 %v16468_v23, %v16468_v23  ;;  %v16485_v48 = vmul.f32 %v7613_v37, %v16312_v30  ;;  %v7360_v43 = vadd.f32 %v7296_v61, %v16439_v44  ;;  %v17373_v58 = vpack.c.bf16 %v16355_v5, %v16340_v60 }
0x1072   : > { %v7235_v28 = vmul.f32 %v7171_v7, %v16460_v47  ;;  %v16494_v56 = vadd.f32 %v16357_v0, %v15793_v51  ;;  %v7362_v24 = vadd.f32 %v7298_v29, %v16444_v59  ;;  %v7172_v30 = vmul.f32 %v16478_v32, %v16478_v32 }
0x1073   : > { %8147 = vmatmul.mubr.bf16.gmra.mrb[48].mxu1 %v17373_v58  ;;  %v7237_v12 = vmul.f32 %v7173_v15, %v16468_v23  ;;  %v7174_v9 = vmul.f32 %v16482_v20, %v16482_v20  ;;  %v7717_v60 = vpack.c.bf16 %v16485_v48, %v16432_v40  ;;  %v7424_v5 = vmul.f32 0.7978846, %v7360_v43 }
0x1074   : > { %v7299_v34 = vmul.f32 0.044715, %v7235_v28  ;;  %v7175_v25 = vmul.f32 %v16494_v56, %v16494_v56  ;;  %v7236_v42 = vmul.f32 %v7172_v30, %v16478_v32  ;;  %v7426_v19 = vmul.f32 0.7978846, %v7362_v24 }
0x1075   : > { %v7301_v0 = vmul.f32 0.044715, %v7237_v12  ;;  %v7238_v14 = vmul.f32 %v7174_v9, %v16482_v20  ;;  %v16512_v10 = vadd.f32 %v16359_v21, %v15796_v38  ;;  %11239 = vtanh.f32 %v7424_v5 }
0x1076   : > { %v7363_v62 = vadd.f32 %v7299_v34, %v16460_v47  ;;  %v7239_v63 = vmul.f32 %v7175_v25, %v16494_v56  ;;  %v11236_v45 = vpop.eup %11235  ;;  %v7300_v3 = vmul.f32 0.044715, %v7236_v42  ;;  %v7544_v21 = vadd.f32 1.0, %v16414_v35 }
0x1077   : > { %v7365_v41 = vadd.f32 %v7301_v0, %v16468_v23  ;;  %v7302_v36 = vmul.f32 0.044715, %v7238_v14  ;;  %v7551_v13 = vadd.f32 1.0, %v11236_v45  ;;  %v7177_v6 = vmul.f32 %v16512_v10, %v16512_v10 }
0x1078   : > { %v7427_v16 = vmul.f32 0.7978846, %v7363_v62  ;;  %v7303_v17 = vmul.f32 0.044715, %v7239_v63  ;;  %v11238_v55 = vpop.eup %11237  ;;  %v7364_v37 = vadd.f32 %v7300_v3, %v16478_v32  ;;  %v7548_v30 = vadd.f32 1.0, %v16452_v11 }
0x1079   : > { %v7429_v50 = vmul.f32 0.7978846, %v7365_v41  ;;  %v7366_v61 = vadd.f32 %v7302_v36, %v16482_v20  ;;  %v7615_v7 = vmul.f32 0.5, %v7551_v13  ;;  %v7553_v29 = vadd.f32 1.0, %v11238_v55 }
0x107a   : > { %11241 = vtanh.f32 %v7427_v16  ;;  %v7367_v15 = vadd.f32 %v7303_v17, %v16494_v56  ;;  %v7428_v43 = vmul.f32 0.7978846, %v7364_v37  ;;  %v7241_v28 = vmul.f32 %v7177_v6, %v16512_v10 }
0x107b   : > { %11243 = vtanh.f32 %v7429_v50  ;;  %v7430_v58 = vmul.f32 0.7978846, %v7366_v61  ;;  %v16523_v24 = vmul.f32 %v7615_v7, %v16398_v1  ;;  %v7608_v35 = vmul.f32 0.5, %v7544_v21 }
0x107c   : > { %11245 = vtanh.f32 %v7426_v19  ;;  %v7431_v12 = vmul.f32 0.7978846, %v7367_v15  ;;  %v7305_v9 = vmul.f32 0.044715, %v7241_v28  ;;  %v7546_v5 = vadd.f32 1.0, %v16417_v27 }
0x107d   : > { %11247 = vtanh.f32 %v7428_v43  ;;  %v7617_v34 = vmul.f32 0.5, %v7553_v29  ;;  %v7612_v25 = vmul.f32 0.5, %v7548_v30  ;;  %v7550_v0 = vadd.f32 1.0, %v11234_v57 }
0x107e   : > { %11249 = vtanh.f32 %v7430_v58  ;;  %v7369_v42 = vadd.f32 %v7305_v9, %v16512_v10  ;;  %v7672_v14 = vmul.f32 %v7608_v35, %v16280_v49  ;;  %v7610_v1 = vmul.f32 0.5, %v7546_v5  ;;  %v17374_v49 = vld [vmem:[#allocation6_spill] sm:$0xff] }
0x107f   : > { %11251 = vtanh.f32 %v7431_v12  ;;  %v7676_v19 = vmul.f32 %v7612_v25, %v16325_v31  ;;  %v7614_v62 = vmul.f32 0.5, %v7550_v0  ;;  %v16532_v11 = vadd.f32 %v16368_v52, %v15799_v22  ;;  %v11240_v63 = vpop.eup %11239 }
0x1080   : > { %v16536_v27 = vadd.f32 %v16370_v2, %v15803_v4  ;;  %v7433_v45 = vmul.f32 0.7978846, %v7369_v42  ;;  %v7674_v57 = vmul.f32 %v7610_v1, %v16284_v26  ;;  %v16541_v41 = vadd.f32 %v16379_v54, %v15793_v51  ;;  %v17375_v54 = vld [vmem:[#allocation7_spill] sm:$0xff] }
0x1081   : > { %v16545_v31 = vadd.f32 %v17374_v49, %v15796_v38  ;;  %v7716_v3 = vpack.c.bf16 %v7676_v19, %v7672_v14  ;;  %v7678_v52 = vmul.f32 %v7614_v62, %v16376_v39  ;;  %v7176_v36 = vmul.f32 %v16532_v11, %v16532_v11 }
0x1082   : > { %v7178_v2 = vmul.f32 %v16536_v27, %v16536_v27  ;;  %11253 = vtanh.f32 %v7433_v45  ;;  %v7179_v26 = vmul.f32 %v16541_v41, %v16541_v41  ;;  %v16558_v38 = vadd.f32 %v17375_v54, %v15799_v22 }
0x1083   : > { %v7181_v51 = vmul.f32 %v16545_v31, %v16545_v31  ;;  %8057 = vmatprep.mubr.bf16.mxu0 %v7716_v3  ;;  %v7718_v39 = vpack.c.bf16 %v7678_v52, %v7674_v57  ;;  %v7240_v16 = vmul.f32 %v7176_v36, %v16532_v11  ;;  %v16564_v6 = vadd.f32 %v16389_v53, %v15803_v4 }
0x1084   : > { %v11242_v13 = vpop.eup %11241  ;;  %v7242_v17 = vmul.f32 %v7178_v2, %v16536_v27  ;;  %8058 = vmatmul.mubr.bf16.gmra.mrb[52].mxu0 %v7715_v33  ;;  %v7243_v22 = vmul.f32 %v7179_v26, %v16541_v41  ;;  %v7180_v61 = vmul.f32 %v16558_v38, %v16558_v38  ;;  %v7552_v52 = vadd.f32 1.0, %v11240_v63 }
0x1085   : > { %v11244_v55 = vpop.eup %11243  ;;  %v7555_v50 = vadd.f32 1.0, %v11242_v13  ;;  %v7245_v37 = vmul.f32 %v7181_v51, %v16545_v31  ;;  %8154 = vmatprep.mubr.bf16.mxu1 %v7718_v39  ;;  %v7304_v29 = vmul.f32 0.044715, %v7240_v16  ;;  %v7182_v4 = vmul.f32 %v16564_v6, %v16564_v6 }
0x1086   : > { %v11246_v21 = vpop.eup %11245  ;;  %v7557_v7 = vadd.f32 1.0, %v11244_v55  ;;  %v7306_v15 = vmul.f32 0.044715, %v7242_v17  ;;  %8155 = vmatmul.mubr.bf16.gmra.mrb[52].mxu1 %v7717_v60  ;;  %v7307_v8 = vmul.f32 0.044715, %v7243_v22  ;;  %v7244_v33 = vmul.f32 %v7180_v61, %v16558_v38 }
0x1087   : > { %v11248_v53 = vpop.eup %11247  ;;  %v7619_v43 = vmul.f32 0.5, %v7555_v50  ;;  %v7309_v18 = vmul.f32 0.044715, %v7245_v37  ;;  %v7368_v12 = vadd.f32 %v7304_v29, %v16532_v11  ;;  %v7246_v9 = vmul.f32 %v7182_v4, %v16564_v6 }
0x1088   : > { %v11250_v58 = vpop.eup %11249  ;;  %v7621_v28 = vmul.f32 0.5, %v7557_v7  ;;  %v7370_v30 = vadd.f32 %v7306_v15, %v16536_v27  ;;  %v7371_v25 = vadd.f32 %v7307_v8, %v16541_v41  ;;  %v7308_v48 = vmul.f32 0.044715, %v7244_v33 }
0x1089   : > { %v11252_v35 = vpop.eup %11251  ;;  %v7683_v5 = vmul.f32 %v7619_v43, %v16460_v47  ;;  %v7373_v40 = vadd.f32 %v7309_v18, %v16545_v31  ;;  %v7681_v60 = vmul.f32 %v7617_v34, %v16404_v46  ;;  %v7432_v42 = vmul.f32 0.7978846, %v7368_v12 }
0x108a   : > { %v7685_v0 = vmul.f32 %v7621_v28, %v16468_v23  ;;  %v7434_v14 = vmul.f32 0.7978846, %v7370_v30  ;;  %v7435_v19 = vmul.f32 0.7978846, %v7371_v25  ;;  %v7372_v45 = vadd.f32 %v7308_v48, %v16558_v38 }
0x108b   : > { %v7719_v1 = vpack.c.bf16 %v7683_v5, %v16523_v24  ;;  %v7437_v62 = vmul.f32 0.7978846, %v7373_v40  ;;  %11255 = vtanh.f32 %v7432_v42  ;;  %v7310_v47 = vmul.f32 0.044715, %v7246_v9 }
0x108c   : > { %v7721_v57 = vpack.c.bf16 %v7685_v0, %v7681_v60  ;;  %v11254_v49 = vpop.eup %11253  ;;  %11257 = vtanh.f32 %v7434_v14  ;;  %v7436_v3 = vmul.f32 0.7978846, %v7372_v45  ;;  %v7556_v36 = vadd.f32 1.0, %v11248_v53 }
0x108d   : > { %11259 = vtanh.f32 %v7435_v19  ;;  %v7374_v46 = vadd.f32 %v7310_v47, %v16564_v6  ;;  %v7616_v23 = vmul.f32 0.5, %v7552_v52  ;;  %v7554_v2 = vadd.f32 1.0, %v11246_v21 }
0x108e   : > { %11261 = vtanh.f32 %v7437_v62  ;;  %v7620_v34 = vmul.f32 0.5, %v7556_v36  ;;  %v7558_v26 = vadd.f32 1.0, %v11250_v58  ;;  %v7559_v63 = vadd.f32 1.0, %v11252_v35 }
0x108f   : > { %11263 = vtanh.f32 %v7436_v3  ;;  %v7438_v24 = vmul.f32 0.7978846, %v7374_v46  ;;  %v7680_v51 = vmul.f32 %v7616_v23, %v16439_v44  ;;  %v7618_v13 = vmul.f32 0.5, %v7554_v2  ;;  %v17376_v23 = vld [vmem:[#allocation33_spill] sm:$0xff] }
0x1090   : > { %v7684_v54 = vmul.f32 %v7620_v34, %v16478_v32  ;;  %v7622_v39 = vmul.f32 0.5, %v7558_v26  ;;  %v7561_v22 = vadd.f32 1.0, %v11254_v49  ;;  %v7623_v44 = vmul.f32 0.5, %v7559_v63  ;;  %v17377_v2 = vld [vmem:[#allocation41_spill] sm:$0xff] }
0x1091   : > { %11265 = vtanh.f32 %v7438_v24  ;;  %v7682_v17 = vmul.f32 %v7618_v13, %v16444_v59 }
0x1092   : > { %v7720_v16 = vpack.c.bf16 %v7684_v54, %v7680_v51  ;;  %v7686_v55 = vmul.f32 %v7622_v39, %v16482_v20  ;;  %v7625_v53 = vmul.f32 0.5, %v7561_v22  ;;  %v7687_v33 = vmul.f32 %v7623_v44, %v16494_v56 }
0x1094   : > { %8065 = vmatprep.mubr.bf16.mxu0 %v7720_v16  ;;  %v7722_v37 = vpack.c.bf16 %v7686_v55, %v7682_v17  ;;  %v7689_v35 = vmul.f32 %v7625_v53, %v16512_v10  ;;  %v17379_v53 = vld [vmem:[#allocation32_spill] sm:$0xff] }
0x1095   : > { %v11256_v50 = vpop.eup %11255  ;;  %8066 = vmatmul.mubr.bf16.gmra.mrb[56].mxu0 %v7719_v1 }
0x1096   : > { %v11258_v61 = vpop.eup %11257  ;;  %v7560_v21 = vadd.f32 1.0, %v11256_v50  ;;  %8162 = vmatprep.mubr.bf16.mxu1 %v7722_v37 }
0x1097   : > { %v11260_v7 = vpop.eup %11259  ;;  %8163 = vmatmul.mubr.bf16.gmra.mrb[56].mxu1 %v7721_v57  ;;  %v7562_v15 = vadd.f32 1.0, %v11258_v61 }
0x1098   : > { %v11262_v32 = vpop.eup %11261  ;;  %v7563_v29 = vadd.f32 1.0, %v11260_v7  ;;  %v7624_v20 = vmul.f32 0.5, %v7560_v21 }
0x1099   : > { %v11264_v4 = vpop.eup %11263  ;;  %v7565_v43 = vadd.f32 1.0, %v11262_v32  ;;  %v7626_v9 = vmul.f32 0.5, %v7562_v15  ;;  %v17378_v15 = vld [vmem:[#allocation36_spill] sm:$0xff] }
0x109a   : > { %v7627_v59 = vmul.f32 0.5, %v7563_v29  ;;  %v7564_v8 = vadd.f32 1.0, %v11264_v4  ;;  %v7688_v40 = vmul.f32 %v7624_v20, %v16532_v11 }
0x109b   : > { %v11266_v18 = vpop.eup %11265  ;;  %v7629_v58 = vmul.f32 0.5, %v7565_v43  ;;  %v7690_v56 = vmul.f32 %v7626_v9, %v16536_v27 }
0x109c   : > { %v7691_v28 = vmul.f32 %v7627_v59, %v16541_v41  ;;  %v7628_v12 = vmul.f32 0.5, %v7564_v8  ;;  %v7566_v30 = vadd.f32 1.0, %v11266_v18 }
0x109d   : > { %v7693_v5 = vmul.f32 %v7629_v58, %v16545_v31  ;;  %v16605_v31 = vld [vmem:[%s16887_s5 + $0x27] ss:$0 sm:$0xff] }
0x109e   : > { %v7723_v25 = vpack.c.bf16 %v7691_v28, %v7687_v33  ;;  %v7692_v48 = vmul.f32 %v7628_v12, %v16558_v38  ;;  %v7630_v60 = vmul.f32 0.5, %v7566_v30 }
0x109f   : > { %v7725_v0 = vpack.c.bf16 %v7693_v5, %v7689_v35 }
0x10a0   : > { %v7724_v42 = vpack.c.bf16 %v7692_v48, %v7688_v40  ;;  %v7694_v14 = vmul.f32 %v7630_v60, %v16564_v6  ;;  %v10355_v60 = vld [vmem:[%s16886_s4] ss:$8 sps:$4 sm:$0xff]  }
0x10a1   : > { %10138 = vmatprep.subr.bf16.mxu0 %v10355_v60 }
0x10a2   : > { %8073 = vmatprep.mubr.bf16.mxu0 %v7724_v42  ;;  %v7726_v41 = vpack.c.bf16 %v7694_v14, %v7690_v56  ;;  %v17380_v14 = vld [vmem:[#allocation42_spill] sm:$0xff]  ;;  %10139 = vmatpush3.bf16.msra.mxu0 %v10355_v60 }
0x10a3   : > { %8074 = vmatmul.mubr.bf16.gmra.mrb[60].mxu0 %v7723_v25 }
0x10a4   : > { %8170 = vmatprep.mubr.bf16.mxu1 %v7726_v41 }
0x10a5   : > { %8171 = vmatmul.mubr.bf16.gmra.mrb[60].mxu1 %v7725_v0 }
0x10f8   : > { %v9866_v10 = vpop.f32.mrb[32].mxu0 }
0x10f9   : > { %v9867_v11 = vpop.f32.mrb[33].mxu0 }
0x10fa   : > { %v9868_v38 = vadd.f32 %v9867_v11, %v9866_v10  ;;  %v9869_v1 = vpop.f32.mrb[34].mxu0  ;;  %v9930_v19 = vpop.f32.mrb[32].mxu1  ;;  %v17381_v10 = vld [vmem:[#allocation35_spill] sm:$0xff] }
0x10fb   : > { %v9870_v62 = vpop.f32.mrb[35].mxu0  ;;  %v9931_v45 = vpop.f32.mrb[33].mxu1 }
0x10fc   : > { %v8020_v27 = vadd.f32 %v9868_v38, %v16605_v31  ;;  %v9871_v6 = vadd.f32 %v9870_v62, %v9869_v1  ;;  %v9932_v57 = vadd.f32 %v9931_v45, %v9930_v19  ;;  %v9933_v47 = vpop.f32.mrb[34].mxu1  ;;  %v10356_v19 = vld [vmem:[%s16886_s4 + $0x10] ss:$8 sps:$4 sm:$0xff]  }
0x10fd   : > { %v9934_v3 = vpop.f32.mrb[35].mxu1  ;;  %10140 = vmatprep.subr.bf16.mxu0 %v10356_v19 }
0x10fe   : > { %v8023_v49 = vadd.f32 %v9871_v6, %v16605_v31  ;;  %v8117_v52 = vadd.f32 %v9932_v57, %v8020_v27  ;;  %v9935_v36 = vadd.f32 %v9934_v3, %v9933_v47  ;;  %10141 = vmatpush3.bf16.msra.mxu0 %v10356_v19  ;;  %v10357_v6 = vld [vmem:[%s16886_s4 + $0x20] ss:$8 sps:$4 sm:$0xff]  }
0x10ff   : > { %10142 = vmatprep.subr.bf16.mxu0 %v10357_v6 }
0x1100   : > { %v8120_v46 = vadd.f32 %v9935_v36, %v8023_v49  ;;  %v16610_v34 = vadd.f32 %v8117_v52, %v17376_v23 }
0x1102   : > { %8197 = vadd.xlane.f32.xlu0 %v16610_v34  ;;  %v16614_v24 = vadd.f32 %v8120_v46, %v17377_v2  ;;  %v8245_v26 = vmul.f32 %v16610_v34, %v16610_v34  ;;  %10143 = vmatpush3.bf16.msra.mxu0 %v10357_v6 }
0x1104   : > { %8199 = vadd.xlane.f32.xlu1 %v16614_v24  ;;  %v8246_v51 = vmul.f32 %v16614_v24, %v16614_v24 }
0x1106   : > { %8261 = vadd.xlane.f32.xlu0 %v8245_v26 }
0x1108   : > { %8263 = vadd.xlane.f32.xlu1 %v8246_v51  ;;  %v10358_v51 = vld [vmem:[%s16886_s4 + $0x30] ss:$8 sps:$4 sm:$0xff]  }
0x1109   : > { %10144 = vmatprep.subr.bf16.mxu0 %v10358_v51 }
0x110a   : > { %10145 = vmatpush3.bf16.msra.mxu0 %v10358_v51 }
0x110f   : > { %v9872_v54 = vpop.f32.mrb[36].mxu0 }
0x1110   : > { %v9873_v13 = vpop.f32.mrb[37].mxu0 }
0x1111   : > { %v9874_v39 = vadd.f32 %v9873_v13, %v9872_v54  ;;  %v9875_v16 = vpop.f32.mrb[38].mxu0 }
0x1112   : > { %v9876_v63 = vpop.f32.mrb[39].mxu0 }
0x1113   : > { %v9936_v17 = vpop.f32.mrb[36].mxu1  ;;  %v8028_v55 = vadd.f32 %v9874_v39, %v16605_v31  ;;  %v9877_v50 = vadd.f32 %v9876_v63, %v9875_v16  ;;  %v17382_v16 = vld [vmem:[#allocation34_spill] sm:$0xff] }
0x1114   : > { %v9937_v22 = vpop.f32.mrb[37].mxu1 }
0x1115   : > { %v9938_v37 = vadd.f32 %v9937_v22, %v9936_v17  ;;  %v9939_v61 = vpop.f32.mrb[38].mxu1  ;;  %v8031_v21 = vadd.f32 %v9877_v50, %v16605_v31  ;;  %v10359_v50 = vld [vmem:[%s16886_s4 + $0x40] ss:$8 sps:$4 sm:$0xff]  }
0x1116   : > { %v9940_v7 = vpop.f32.mrb[39].mxu1  ;;  %v17383_v22 = vld [vmem:[#allocation39_spill] sm:$0xff]  ;;  %10146 = vmatprep.subr.bf16.mxu0 %v10359_v50 }
0x1117   : > { %v8125_v44 = vadd.f32 %v9938_v37, %v8028_v55  ;;  %v9941_v32 = vadd.f32 %v9940_v7, %v9939_v61  ;;  %10147 = vmatpush3.bf16.msra.mxu0 %v10359_v50 }
0x1119   : > { %v8128_v29 = vadd.f32 %v9941_v32, %v8031_v21  ;;  %v16624_v4 = vadd.f32 %v8125_v44, %v17378_v15 }
0x111b   : > { %8201 = vadd.xlane.f32.xlu0 %v16624_v4  ;;  %v16628_v43 = vadd.f32 %v8128_v29, %v17379_v53  ;;  %v8247_v59 = vmul.f32 %v16624_v4, %v16624_v4 }
0x111d   : > { %8203 = vadd.xlane.f32.xlu1 %v16628_v43  ;;  %v8248_v8 = vmul.f32 %v16628_v43, %v16628_v43 }
0x111f   : > { %8265 = vadd.xlane.f32.xlu0 %v8247_v59 }
0x1121   : > { %8267 = vadd.xlane.f32.xlu1 %v8248_v8 }
0x1125   : > { %v9878_v20 = vpop.f32.mrb[40].mxu0 }
0x1126   : > { %v9879_v33 = vpop.f32.mrb[41].mxu0 }
0x1127   : > { %v9942_v18 = vpop.f32.mrb[40].mxu1  ;;  %v9880_v58 = vadd.f32 %v9879_v33, %v9878_v20  ;;  %v9881_v12 = vpop.f32.mrb[42].mxu0  ;;  %v10360_v20 = vld [vmem:[%s16886_s4 + $0x50] ss:$8 sps:$4 sm:$0xff]  }
0x1128   : > { %v9943_v28 = vpop.f32.mrb[41].mxu1  ;;  %v9882_v35 = vpop.f32.mrb[43].mxu0  ;;  %10148 = vmatprep.subr.bf16.mxu0 %v10360_v20 }
0x1129   : > { %v9944_v30 = vadd.f32 %v9943_v28, %v9942_v18  ;;  %v9945_v9 = vpop.f32.mrb[42].mxu1  ;;  %v8036_v5 = vadd.f32 %v9880_v58, %v16605_v31  ;;  %v9883_v25 = vadd.f32 %v9882_v35, %v9881_v12  ;;  %v10361_v28 = vld [vmem:[%s16886_s4 + $0x60] ss:$8 sps:$4 sm:$0xff]   ;;  %10149 = vmatpush3.bf16.msra.mxu0 %v10360_v20  ;;  %v17389_v20 = vld [vmem:[#allocation26_spill] sm:$0xff] }
0x112a   : > { %v9946_v40 = vpop.f32.mrb[43].mxu1  ;;  %v17384_v35 = vld [vmem:[#allocation43_spill] sm:$0xff]  ;;  %10150 = vmatprep.subr.bf16.mxu0 %v10361_v28 }
0x112b   : > { %v9947_v48 = vadd.f32 %v9946_v40, %v9945_v9  ;;  %v8133_v0 = vadd.f32 %v9944_v30, %v8036_v5  ;;  %v8039_v42 = vadd.f32 %v9883_v25, %v16605_v31  ;;  %v10362_v25 = vld [vmem:[%s16886_s4 + $0x70] ss:$8 sps:$4 sm:$0xff]   ;;  %v17385_v40 = vld [vmem:[#allocation40_spill] sm:$0xff] }
0x112d   : > { %v8136_v56 = vadd.f32 %v9947_v48, %v8039_v42  ;;  %v16641_v41 = vadd.f32 %v8133_v0, %v17380_v14  ;;  %10151 = vmatpush3.bf16.msra.mxu0 %v10361_v28 }
0x112e   : > { %10152 = vmatprep.subr.bf16.mxu0 %v10362_v25 }
0x112f   : > { %8205 = vadd.xlane.f32.xlu0 %v16641_v41  ;;  %v16645_v11 = vadd.f32 %v8136_v56, %v17381_v10  ;;  %v8249_v38 = vmul.f32 %v16641_v41, %v16641_v41 }
0x1131   : > { %8207 = vadd.xlane.f32.xlu1 %v16645_v11  ;;  %v8250_v1 = vmul.f32 %v16645_v11, %v16645_v11  ;;  %10153 = vmatpush3.bf16.msra.mxu0 %v10362_v25 }
0x1133   : > { %8269 = vadd.xlane.f32.xlu0 %v8249_v38 }
0x1135   : > { %8271 = vadd.xlane.f32.xlu1 %v8250_v1 }
0x113a   : > { %v9884_v62 = vpop.f32.mrb[44].mxu0 }
0x113b   : > { %v9885_v45 = vpop.f32.mrb[45].mxu0 }
0x113c   : > { %v9948_v27 = vpop.f32.mrb[44].mxu1  ;;  %v9886_v57 = vadd.f32 %v9885_v45, %v9884_v62  ;;  %v9887_v49 = vpop.f32.mrb[46].mxu0 }
0x113d   : > { %v9949_v47 = vpop.f32.mrb[45].mxu1  ;;  %v9888_v36 = vpop.f32.mrb[47].mxu0 }
0x113e   : > { %v9950_v3 = vadd.f32 %v9949_v47, %v9948_v27  ;;  %v9951_v52 = vpop.f32.mrb[46].mxu1  ;;  %v8044_v46 = vadd.f32 %v9886_v57, %v16605_v31  ;;  %v9889_v23 = vadd.f32 %v9888_v36, %v9887_v49  ;;  %v17386_v36 = vld [vmem:[#allocation23_spill] sm:$0xff] }
0x113f   : > { %v9952_v2 = vpop.f32.mrb[47].mxu1 }
0x1140   : > { %v9953_v26 = vadd.f32 %v9952_v2, %v9951_v52  ;;  %v8141_v54 = vadd.f32 %v9950_v3, %v8044_v46  ;;  %v8047_v13 = vadd.f32 %v9889_v23, %v16605_v31  ;;  %v17387_v23 = vld [vmem:[#allocation25_spill] sm:$0xff] }
0x1142   : > { %v8144_v39 = vadd.f32 %v9953_v26, %v8047_v13  ;;  %v16664_v63 = vadd.f32 %v8141_v54, %v17382_v16 }
0x1143   : > { %v9890_v17 = vpop.f32.mrb[48].mxu0 }
0x1144   : > { %v9891_v55 = vpop.f32.mrb[49].mxu0  ;;  %8209 = vadd.xlane.f32.xlu0 %v16664_v63  ;;  %v16671_v37 = vadd.f32 %v8144_v39, %v17383_v22  ;;  %v8251_v32 = vmul.f32 %v16664_v63, %v16664_v63 }
0x1145   : > { %v9892_v61 = vadd.f32 %v9891_v55, %v9890_v17  ;;  %v9893_v21 = vpop.f32.mrb[50].mxu0 }
0x1146   : > { %v9954_v7 = vpop.f32.mrb[48].mxu1  ;;  %v9894_v44 = vpop.f32.mrb[51].mxu0  ;;  %8211 = vadd.xlane.f32.xlu1 %v16671_v37  ;;  %v8252_v18 = vmul.f32 %v16671_v37, %v16671_v37 }
0x1147   : > { %v8052_v29 = vadd.f32 %v9892_v61, %v16605_v31  ;;  %v9955_v15 = vpop.f32.mrb[49].mxu1  ;;  %v9895_v53 = vadd.f32 %v9894_v44, %v9893_v21 }
0x1148   : > { %v9956_v59 = vadd.f32 %v9955_v15, %v9954_v7  ;;  %v9957_v8 = vpop.f32.mrb[50].mxu1  ;;  %8273 = vadd.xlane.f32.xlu0 %v8251_v32 }
0x1149   : > { %v8055_v33 = vadd.f32 %v9895_v53, %v16605_v31  ;;  %v9958_v58 = vpop.f32.mrb[51].mxu1 }
0x114a   : > { %v8149_v12 = vadd.f32 %v9956_v59, %v8052_v29  ;;  %v9959_v30 = vadd.f32 %v9958_v58, %v9957_v8  ;;  %8275 = vadd.xlane.f32.xlu1 %v8252_v18  ;;  %v17388_v59 = vld [vmem:[#allocation38_spill] sm:$0xff] }
0x114c   : > { %v8152_v9 = vadd.f32 %v9959_v30, %v8055_v33  ;;  %v16687_v5 = vadd.f32 %v8149_v12, %v17384_v35 }
0x114e   : > { %8213 = vadd.xlane.f32.xlu0 %v16687_v5  ;;  %v16694_v48 = vadd.f32 %v8152_v9, %v17385_v40  ;;  %v8253_v60 = vmul.f32 %v16687_v5, %v16687_v5 }
0x1150   : > { %8215 = vadd.xlane.f32.xlu1 %v16694_v48  ;;  %v8254_v0 = vmul.f32 %v16694_v48, %v16694_v48 }
0x1152   : > { %8277 = vadd.xlane.f32.xlu0 %v8253_v60 }
0x1154   : > { %8279 = vadd.xlane.f32.xlu1 %v8254_v0 }
0x1157   : > { %v9896_v42 = vpop.f32.mrb[52].mxu0 }
0x1158   : > { %v9897_v56 = vpop.f32.mrb[53].mxu0 }
0x1159   : > { %v9960_v14 = vpop.f32.mrb[52].mxu1  ;;  %v9898_v10 = vadd.f32 %v9897_v56, %v9896_v42  ;;  %v9899_v38 = vpop.f32.mrb[54].mxu0 }
0x115a   : > { %v9961_v1 = vpop.f32.mrb[53].mxu1  ;;  %v9900_v19 = vpop.f32.mrb[55].mxu0 }
0x115b   : > { %v8060_v62 = vadd.f32 %v9898_v10, %v16605_v31  ;;  %v9962_v27 = vadd.f32 %v9961_v1, %v9960_v14  ;;  %v9963_v45 = vpop.f32.mrb[54].mxu1  ;;  %v9901_v6 = vadd.f32 %v9900_v19, %v9899_v38 }
0x115c   : > { %v9964_v57 = vpop.f32.mrb[55].mxu1 }
0x115d   : > { %v8157_v47 = vadd.f32 %v9962_v27, %v8060_v62  ;;  %v8063_v49 = vadd.f32 %v9901_v6, %v16605_v31  ;;  %v9965_v3 = vadd.f32 %v9964_v57, %v9963_v45  ;;  %v17390_v62 = vld [vmem:[#allocation45_spill] sm:$0xff]  ;;  %v17391_v45 = vld [vmem:[#allocation44_spill] sm:$0xff] }
0x115f   : > { %v8160_v52 = vadd.f32 %v9965_v3, %v8063_v49  ;;  %v16704_v46 = vadd.f32 %v8157_v47, %v17386_v36 }
0x1161   : > { %8217 = vadd.xlane.f32.xlu0 %v16704_v46  ;;  %v16708_v2 = vadd.f32 %v8160_v52, %v17387_v23  ;;  %v8255_v26 = vmul.f32 %v16704_v46, %v16704_v46 }
0x1163   : > { %8219 = vadd.xlane.f32.xlu1 %v16708_v2  ;;  %v8256_v51 = vmul.f32 %v16708_v2, %v16708_v2 }
0x1165   : > { %8281 = vadd.xlane.f32.xlu0 %v8255_v26 }
0x1167   : > { %8283 = vadd.xlane.f32.xlu1 %v8256_v51 }
0x1168   : > { %v9902_v54 = vpop.f32.mrb[56].mxu0 }
0x1169   : > { %v9903_v13 = vpop.f32.mrb[57].mxu0 }
0x116a   : > { %v9904_v39 = vadd.f32 %v9903_v13, %v9902_v54  ;;  %v9905_v16 = vpop.f32.mrb[58].mxu0  ;;  %v9966_v17 = vpop.f32.mrb[56].mxu1 }
0x116b   : > { %v9906_v55 = vpop.f32.mrb[59].mxu0  ;;  %v9967_v22 = vpop.f32.mrb[57].mxu1 }
0x116c   : > { %v8068_v50 = vadd.f32 %v9904_v39, %v16605_v31  ;;  %v9907_v61 = vadd.f32 %v9906_v55, %v9905_v16  ;;  %v9968_v21 = vadd.f32 %v9967_v22, %v9966_v17  ;;  %v9969_v7 = vpop.f32.mrb[58].mxu1 }
0x116d   : > { %v9970_v32 = vpop.f32.mrb[59].mxu1 }
0x116e   : > { %v8071_v44 = vadd.f32 %v9907_v61, %v16605_v31  ;;  %v8165_v29 = vadd.f32 %v9968_v21, %v8068_v50  ;;  %v9971_v15 = vadd.f32 %v9970_v32, %v9969_v7  ;;  %v16747_v7 = vld [vmem:[%s16887_s5 + $0x42] ss:$0 sm:$0xff] }
0x1170   : > { %v8168_v53 = vadd.f32 %v9971_v15, %v8071_v44  ;;  %v16718_v8 = vadd.f32 %v8165_v29, %v17388_v59 }
0x1172   : > { %8221 = vadd.xlane.f32.xlu0 %v16718_v8  ;;  %v16722_v18 = vadd.f32 %v8168_v53, %v17389_v20  ;;  %v8257_v33 = vmul.f32 %v16718_v8, %v16718_v8 }
0x1174   : > { %8223 = vadd.xlane.f32.xlu1 %v16722_v18  ;;  %v8258_v12 = vmul.f32 %v16722_v18, %v16722_v18 }
0x1176   : > { %v9908_v58 = vpop.f32.mrb[60].mxu0  ;;  %8285 = vadd.xlane.f32.xlu0 %v8257_v33 }
0x1177   : > { %v9909_v28 = vpop.f32.mrb[61].mxu0 }
0x1178   : > { %v9972_v30 = vpop.f32.mrb[60].mxu1  ;;  %v9910_v9 = vadd.f32 %v9909_v28, %v9908_v58  ;;  %v9911_v35 = vpop.f32.mrb[62].mxu0  ;;  %8287 = vadd.xlane.f32.xlu1 %v8258_v12 }
0x1179   : > { %v9973_v25 = vpop.f32.mrb[61].mxu1  ;;  %v9912_v40 = vpop.f32.mrb[63].mxu0 }
0x117a   : > { %v8076_v60 = vadd.f32 %v9910_v9, %v16605_v31  ;;  %v9974_v0 = vadd.f32 %v9973_v25, %v9972_v30  ;;  %v9975_v42 = vpop.f32.mrb[62].mxu1  ;;  %v9913_v56 = vadd.f32 %v9912_v40, %v9911_v35 }
0x117b   : > { %v9976_v14 = vpop.f32.mrb[63].mxu1 }
0x117c   : > { %v8173_v10 = vadd.f32 %v9974_v0, %v8076_v60  ;;  %v8079_v38 = vadd.f32 %v9913_v56, %v16605_v31  ;;  %v9977_v1 = vadd.f32 %v9976_v14, %v9975_v42  ;;  %v10363_v56 = vld [vmem:[%s16886_s4 + $0x4] ss:$8 sps:$4 sm:$0xff]   ;;  %v10364_v14 = vld [vmem:[%s16886_s4 + $0x14] ss:$8 sps:$4 sm:$0xff]  }
0x117d   : > { %10170 = vmatprep.subr.bf16.mxu1 %v10363_v56 }
0x117e   : > { %v8176_v19 = vadd.f32 %v9977_v1, %v8079_v38  ;;  %v16732_v27 = vadd.f32 %v8173_v10, %v17390_v62  ;;  %10171 = vmatpush3.bf16.msra.mxu1 %v10363_v56  ;;  %v10365_v62 = vld [vmem:[%s16886_s4 + $0x24] ss:$8 sps:$4 sm:$0xff]  }
0x117f   : > { %10172 = vmatprep.subr.bf16.mxu1 %v10364_v14 }
0x1180   : > { %8225 = vadd.xlane.f32.xlu0 %v16732_v27  ;;  %v16736_v6 = vadd.f32 %v8176_v19, %v17391_v45  ;;  %v8259_v57 = vmul.f32 %v16732_v27, %v16732_v27 }
0x1182   : > { %8227 = vadd.xlane.f32.xlu1 %v16736_v6  ;;  %v8260_v47 = vmul.f32 %v16736_v6, %v16736_v6  ;;  %10173 = vmatpush3.bf16.msra.mxu1 %v10364_v14 }
0x1183   : > { %10174 = vmatprep.subr.bf16.mxu1 %v10365_v62 }
0x1184   : > { %8289 = vadd.xlane.f32.xlu0 %v8259_v57 }
0x1186   : > { %8291 = vadd.xlane.f32.xlu1 %v8260_v47  ;;  %10175 = vmatpush3.bf16.msra.mxu1 %v10365_v62 }
0x118f   : > { %v8198_v31 = vpop.xlane.xlu0 %8197 }
0x1190   : > { %v8229_v49 = vmul.f32 0.0078125, %v8198_v31 }
0x1191   : > { %v8200_v3 = vpop.xlane.xlu1 %8199 }
0x1192   : > { %v8230_v52 = vmul.f32 0.0078125, %v8200_v3  ;;  %v8309_v23 = vmul.f32 %v8229_v49, %v8229_v49  ;;  %v8357_v61 = vsub.f32 %v16610_v34, %v8229_v49  ;;  %v16754_v34 = vld [vmem:[%s16887_s5 + $0x43] ss:$0 sm:$0xff] }
0x1193   : > { %v8262_v36 = vpop.xlane.xlu0 %8261 }
0x1194   : > { %v8293_v26 = vmul.f32 0.0078125, %v8262_v36  ;;  %v8310_v54 = vmul.f32 %v8230_v52, %v8230_v52  ;;  %v8358_v44 = vsub.f32 %v16614_v24, %v8230_v52 }
0x1195   : > { %v8264_v51 = vpop.xlane.xlu1 %8263 }
0x1196   : > { %v8325_v13 = vsub.f32 %v8293_v26, %v8309_v23  ;;  %v8294_v39 = vmul.f32 0.0078125, %v8264_v51 }
0x1198   : > { %v8341_v16 = vmax.f32 %v8325_v13, 0.0  ;;  %v8326_v17 = vsub.f32 %v8294_v39, %v8310_v54 }
0x119a   : > { %v8373_v55 = vadd.f32 1e-12, %v8341_v16  ;;  %v8342_v50 = vmax.f32 %v8326_v17, 0.0 }
0x119c   : > { %11267 = vrsqrt.f32 %v8373_v55  ;;  %v8374_v22 = vadd.f32 1e-12, %v8342_v50 }
0x119e   : > { %11269 = vrsqrt.f32 %v8374_v22 }
0x11a6   : > { %v11268_v21 = vpop.eup %11267 }
0x11a7   : > { %v8405_v29 = vmul.f32 %v11268_v21, %v8357_v61 }
0x11a8   : > { %v8202_v32 = vpop.xlane.xlu0 %8201  ;;  %v11270_v15 = vpop.eup %11269 }
0x11a9   : > { %v8231_v53 = vmul.f32 0.0078125, %v8202_v32  ;;  %v8406_v20 = vmul.f32 %v11270_v15, %v8358_v44  ;;  %v8421_v33 = vmul.f32 %v8405_v29, %v16747_v7 }
0x11aa   : > { %v8204_v59 = vpop.xlane.xlu1 %8203 }
0x11ab   : > { %v8232_v58 = vmul.f32 0.0078125, %v8204_v59  ;;  %v8422_v12 = vmul.f32 %v8406_v20, %v16747_v7  ;;  %v8311_v30 = vmul.f32 %v8231_v53, %v8231_v53  ;;  %v8437_v35 = vadd.f32 %v8421_v33, %v16754_v34 }
0x11ac   : > { %v8266_v28 = vpop.xlane.xlu0 %8265  ;;  %v8359_v47 = vsub.f32 %v16624_v4, %v8231_v53 }
0x11ad   : > { %v8295_v9 = vmul.f32 0.0078125, %v8266_v28  ;;  %v8438_v25 = vadd.f32 %v8422_v12, %v16754_v34  ;;  %v8312_v40 = vmul.f32 %v8232_v58, %v8232_v58  ;;  %v8360_v52 = vsub.f32 %v16628_v43, %v8232_v58 }
0x11ae   : > { %v8268_v24 = vpop.xlane.xlu1 %8267 }
0x11af   : > { %v8327_v60 = vsub.f32 %v8295_v9, %v8311_v30  ;;  %v8296_v0 = vmul.f32 0.0078125, %v8268_v24  ;;  %v8453_v42 = vpack.c.bf16 %v8438_v25, %v8437_v35 }
0x11b1   : > { %v8343_v10 = vmax.f32 %v8327_v60, 0.0  ;;  %v8328_v38 = vsub.f32 %v8296_v0, %v8312_v40  ;;  %10154 = vmatprep.mubr.bf16.mxu0 %v8453_v42 }
0x11b3   : > { %v8375_v1 = vadd.f32 1e-12, %v8343_v10  ;;  %v8344_v19 = vmax.f32 %v8328_v38, 0.0 }
0x11b5   : > { %11271 = vrsqrt.f32 %v8375_v1  ;;  %v8376_v45 = vadd.f32 1e-12, %v8344_v19 }
0x11b7   : > { %11273 = vrsqrt.f32 %v8376_v45 }
0x11bc   : > { %v8206_v57 = vpop.xlane.xlu0 %8205 }
0x11bd   : > { %v8233_v49 = vmul.f32 0.0078125, %v8206_v57 }
0x11be   : > { %v8208_v3 = vpop.xlane.xlu1 %8207 }
0x11bf   : > { %v11272_v31 = vpop.eup %11271  ;;  %v8234_v23 = vmul.f32 0.0078125, %v8208_v3  ;;  %v8313_v39 = vmul.f32 %v8233_v49, %v8233_v49  ;;  %v8361_v58 = vsub.f32 %v16641_v41, %v8233_v49 }
0x11c0   : > { %v8407_v36 = vmul.f32 %v11272_v31, %v8359_v47  ;;  %v8270_v51 = vpop.xlane.xlu0 %8269 }
0x11c1   : > { %v11274_v26 = vpop.eup %11273  ;;  %v8297_v16 = vmul.f32 0.0078125, %v8270_v51  ;;  %v8314_v50 = vmul.f32 %v8234_v23, %v8234_v23  ;;  %v8362_v30 = vsub.f32 %v16645_v11, %v8234_v23 }
0x11c2   : > { %v8423_v54 = vmul.f32 %v8407_v36, %v16747_v7  ;;  %v8408_v13 = vmul.f32 %v11274_v26, %v8360_v52  ;;  %v8272_v17 = vpop.xlane.xlu1 %8271 }
0x11c3   : > { %v8298_v22 = vmul.f32 0.0078125, %v8272_v17  ;;  %v8329_v4 = vsub.f32 %v8297_v16, %v8313_v39 }
0x11c4   : > { %v8424_v55 = vmul.f32 %v8408_v13, %v16747_v7  ;;  %v8439_v61 = vadd.f32 %v8423_v54, %v16754_v34 }
0x11c5   : > { %v8330_v43 = vsub.f32 %v8298_v22, %v8314_v50  ;;  %v8345_v44 = vmax.f32 %v8329_v4, 0.0 }
0x11c6   : > { %v8440_v21 = vadd.f32 %v8424_v55, %v16754_v34 }
0x11c7   : > { %v8346_v29 = vmax.f32 %v8330_v43, 0.0  ;;  %v8377_v15 = vadd.f32 1e-12, %v8345_v44 }
0x11c8   : > { %v8454_v32 = vpack.c.bf16 %v8440_v21, %v8439_v61 }
0x11c9   : > { %v8378_v53 = vadd.f32 1e-12, %v8346_v29  ;;  %11275 = vrsqrt.f32 %v8377_v15 }
0x11ca   : > { %10155 = vmatmul.mubr.bf16.vlgmr.msra.gmra.mrb[64].mxu0 %v8454_v32 }
0x11cb   : > { %11277 = vrsqrt.f32 %v8378_v53 }
0x11d1   : > { %v8210_v59 = vpop.xlane.xlu0 %8209 }
0x11d2   : > { %v8235_v20 = vmul.f32 0.0078125, %v8210_v59 }
0x11d3   : > { %v8212_v33 = vpop.xlane.xlu1 %8211  ;;  %v11276_v12 = vpop.eup %11275 }
0x11d4   : > { %v8236_v28 = vmul.f32 0.0078125, %v8212_v33  ;;  %v8315_v35 = vmul.f32 %v8235_v20, %v8235_v20  ;;  %v8409_v40 = vmul.f32 %v11276_v12, %v8361_v58  ;;  %v8363_v22 = vsub.f32 %v16664_v63, %v8235_v20 }
0x11d5   : > { %v8274_v9 = vpop.xlane.xlu0 %8273  ;;  %v11278_v24 = vpop.eup %11277 }
0x11d6   : > { %v8299_v25 = vmul.f32 0.0078125, %v8274_v9  ;;  %v8410_v0 = vmul.f32 %v11278_v24, %v8362_v30  ;;  %v8316_v42 = vmul.f32 %v8236_v28, %v8236_v28  ;;  %v8425_v10 = vmul.f32 %v8409_v40, %v16747_v7 }
0x11d7   : > { %v8276_v60 = vpop.xlane.xlu1 %8275  ;;  %v8364_v21 = vsub.f32 %v16671_v37, %v8236_v28 }
0x11d8   : > { %v8331_v56 = vsub.f32 %v8299_v25, %v8315_v35  ;;  %v8300_v14 = vmul.f32 0.0078125, %v8276_v60  ;;  %v8426_v38 = vmul.f32 %v8410_v0, %v16747_v7  ;;  %v8441_v11 = vadd.f32 %v8425_v10, %v16754_v34 }
0x11da   : > { %v8347_v1 = vmax.f32 %v8331_v56, 0.0  ;;  %v8332_v41 = vsub.f32 %v8300_v14, %v8316_v42  ;;  %v8442_v45 = vadd.f32 %v8426_v38, %v16754_v34 }
0x11db   : > { %v8214_v19 = vpop.xlane.xlu0 %8213 }
0x11dc   : > { %v8237_v62 = vmul.f32 0.0078125, %v8214_v19  ;;  %v8379_v57 = vadd.f32 1e-12, %v8347_v1  ;;  %v8348_v47 = vmax.f32 %v8332_v41, 0.0  ;;  %v8455_v3 = vpack.c.bf16 %v8442_v45, %v8441_v11 }
0x11dd   : > { %v8216_v31 = vpop.xlane.xlu1 %8215 }
0x11de   : > { %v8238_v49 = vmul.f32 0.0078125, %v8216_v31  ;;  %11279 = vrsqrt.f32 %v8379_v57  ;;  %v8380_v52 = vadd.f32 1e-12, %v8348_v47  ;;  %v8317_v23 = vmul.f32 %v8237_v62, %v8237_v62  ;;  %10158 = vmatprep.mubr.bf16.mxu0 %v8455_v3 }
0x11df   : > { %v8278_v36 = vpop.xlane.xlu0 %8277  ;;  %v8365_v63 = vsub.f32 %v16687_v5, %v8237_v62 }
0x11e0   : > { %v8301_v26 = vmul.f32 0.0078125, %v8278_v36  ;;  %11281 = vrsqrt.f32 %v8380_v52  ;;  %v8318_v54 = vmul.f32 %v8238_v49, %v8238_v49  ;;  %v8366_v37 = vsub.f32 %v16694_v48, %v8238_v49 }
0x11e1   : > { %v8280_v51 = vpop.xlane.xlu1 %8279 }
0x11e2   : > { %v8333_v13 = vsub.f32 %v8301_v26, %v8317_v23  ;;  %v8302_v39 = vmul.f32 0.0078125, %v8280_v51 }
0x11e4   : > { %v8349_v16 = vmax.f32 %v8333_v13, 0.0  ;;  %v8334_v17 = vsub.f32 %v8302_v39, %v8318_v54 }
0x11e6   : > { %v8381_v55 = vadd.f32 1e-12, %v8349_v16  ;;  %v8350_v50 = vmax.f32 %v8334_v17, 0.0 }
0x11e8   : > { %11283 = vrsqrt.f32 %v8381_v55  ;;  %v8382_v4 = vadd.f32 1e-12, %v8350_v50  ;;  %v11280_v61 = vpop.eup %11279 }
0x11e9   : > { %v8411_v43 = vmul.f32 %v11280_v61, %v8363_v22 }
0x11ea   : > { %11285 = vrsqrt.f32 %v8382_v4  ;;  %v11282_v44 = vpop.eup %11281 }
0x11eb   : > { %v8427_v32 = vmul.f32 %v8411_v43, %v16747_v7  ;;  %v8412_v29 = vmul.f32 %v11282_v44, %v8364_v21 }
0x11ed   : > { %v8428_v15 = vmul.f32 %v8412_v29, %v16747_v7  ;;  %v8443_v53 = vadd.f32 %v8427_v32, %v16754_v34 }
0x11ee   : > { %v8218_v33 = vpop.xlane.xlu0 %8217 }
0x11ef   : > { %v8444_v59 = vadd.f32 %v8428_v15, %v16754_v34  ;;  %v8239_v20 = vmul.f32 0.0078125, %v8218_v33 }
0x11f0   : > { %v8220_v30 = vpop.xlane.xlu1 %8219 }
0x11f1   : > { %v8456_v12 = vpack.c.bf16 %v8444_v59, %v8443_v53  ;;  %v8240_v28 = vmul.f32 0.0078125, %v8220_v30  ;;  %v8319_v25 = vmul.f32 %v8239_v20, %v8239_v20  ;;  %v8367_v3 = vsub.f32 %v16704_v46, %v8239_v20 }
0x11f2   : > { %v11284_v58 = vpop.eup %11283  ;;  %v8282_v35 = vpop.xlane.xlu0 %8281 }
0x11f3   : > { %v8413_v9 = vmul.f32 %v11284_v58, %v8365_v63  ;;  %10159 = vmatmul.mubr.bf16.gmra.mrb[68].mxu0 %v8456_v12  ;;  %v8303_v40 = vmul.f32 0.0078125, %v8282_v35  ;;  %v8320_v56 = vmul.f32 %v8240_v28, %v8240_v28  ;;  %v8368_v51 = vsub.f32 %v16708_v2, %v8240_v28 }
0x11f4   : > { %v11286_v24 = vpop.eup %11285  ;;  %v8284_v0 = vpop.xlane.xlu1 %8283 }
0x11f5   : > { %v8414_v60 = vmul.f32 %v11286_v24, %v8366_v37  ;;  %v8429_v42 = vmul.f32 %v8413_v9, %v16747_v7  ;;  %v8335_v14 = vsub.f32 %v8303_v40, %v8319_v25  ;;  %v8304_v5 = vmul.f32 0.0078125, %v8284_v0 }
0x11f7   : > { %v8430_v10 = vmul.f32 %v8414_v60, %v16747_v7  ;;  %v8351_v38 = vmax.f32 %v8335_v14, 0.0  ;;  %v8336_v1 = vsub.f32 %v8304_v5, %v8320_v56  ;;  %v8445_v48 = vadd.f32 %v8429_v42, %v16754_v34 }
0x11f9   : > { %v8446_v41 = vadd.f32 %v8430_v10, %v16754_v34  ;;  %v8383_v19 = vadd.f32 1e-12, %v8351_v38  ;;  %v8352_v62 = vmax.f32 %v8336_v1, 0.0 }
0x11fb   : > { %v8457_v11 = vpack.c.bf16 %v8446_v41, %v8445_v48  ;;  %11287 = vrsqrt.f32 %v8383_v19  ;;  %v8384_v45 = vadd.f32 1e-12, %v8352_v62 }
0x11fd   : > { %10162 = vmatprep.mubr.bf16.mxu0 %v8457_v11  ;;  %11289 = vrsqrt.f32 %v8384_v45 }
0x11ff   : > { %v8222_v57 = vpop.xlane.xlu0 %8221 }
0x1200   : > { %v8241_v47 = vmul.f32 0.0078125, %v8222_v57 }
0x1201   : > { %v8224_v31 = vpop.xlane.xlu1 %8223 }
0x1202   : > { %v8242_v49 = vmul.f32 0.0078125, %v8224_v31  ;;  %v8321_v23 = vmul.f32 %v8241_v47, %v8241_v47  ;;  %v8369_v9 = vsub.f32 %v16718_v8, %v8241_v47 }
0x1203   : > { %v8286_v52 = vpop.xlane.xlu0 %8285 }
0x1204   : > { %v8305_v26 = vmul.f32 0.0078125, %v8286_v52  ;;  %v8322_v16 = vmul.f32 %v8242_v49, %v8242_v49  ;;  %v8370_v40 = vsub.f32 %v16722_v18, %v8242_v49  ;;  %v10366_v18 = vld [vmem:[%s16886_s4 + $0x34] ss:$8 sps:$4 sm:$0xff]   ;;  %v10367_v49 = vld [vmem:[%s16886_s4 + $0x44] ss:$8 sps:$4 sm:$0xff]  }
0x1205   : > { %v11288_v36 = vpop.eup %11287  ;;  %v8288_v13 = vpop.xlane.xlu1 %8287  ;;  %10176 = vmatprep.subr.bf16.mxu1 %v10366_v18 }
0x1206   : > { %v8415_v54 = vmul.f32 %v11288_v36, %v8367_v3  ;;  %v8337_v17 = vsub.f32 %v8305_v26, %v8321_v23  ;;  %v8306_v55 = vmul.f32 0.0078125, %v8288_v13  ;;  %10177 = vmatpush3.bf16.msra.mxu1 %v10366_v18  ;;  %v10369_v36 = vld [vmem:[%s16886_s4 + $0x64] ss:$8 sps:$4 sm:$0xff]  }
0x1207   : > { %v11290_v39 = vpop.eup %11289  ;;  %10178 = vmatprep.subr.bf16.mxu1 %v10367_v49 }
0x1208   : > { %v8431_v50 = vmul.f32 %v8415_v54, %v16747_v7  ;;  %v8416_v22 = vmul.f32 %v11290_v39, %v8368_v51  ;;  %v8353_v4 = vmax.f32 %v8337_v17, 0.0  ;;  %v8338_v61 = vsub.f32 %v8306_v55, %v8322_v16 }
0x120a   : > { %v8432_v21 = vmul.f32 %v8416_v22, %v16747_v7  ;;  %v8385_v46 = vadd.f32 1e-12, %v8353_v4  ;;  %v8354_v43 = vmax.f32 %v8338_v61, 0.0  ;;  %v8447_v44 = vadd.f32 %v8431_v50, %v16754_v34  ;;  %10179 = vmatpush3.bf16.msra.mxu1 %v10367_v49  ;;  %v8663_v49 = vld [vmem:[%s16887_s5 + $0x3] ss:$0 sm:$0xff] }
0x120c   : > { %v8448_v32 = vadd.f32 %v8432_v21, %v16754_v34  ;;  %11291 = vrsqrt.f32 %v8385_v46  ;;  %v8386_v2 = vadd.f32 1e-12, %v8354_v43 }
0x120d   : > { %v8226_v29 = vpop.xlane.xlu0 %8225 }
0x120e   : > { %v8458_v15 = vpack.c.bf16 %v8448_v32, %v8447_v44  ;;  %v8243_v53 = vmul.f32 0.0078125, %v8226_v29  ;;  %11293 = vrsqrt.f32 %v8386_v2 }
0x120f   : > { %v8228_v59 = vpop.xlane.xlu1 %8227 }
0x1210   : > { %10163 = vmatmul.mubr.bf16.gmra.mrb[72].mxu0 %v8458_v15  ;;  %v8244_v33 = vmul.f32 0.0078125, %v8228_v59  ;;  %v8323_v20 = vmul.f32 %v8243_v53, %v8243_v53  ;;  %v8371_v41 = vsub.f32 %v16732_v27, %v8243_v53  ;;  %v10368_v27 = vld [vmem:[%s16886_s4 + $0x54] ss:$8 sps:$4 sm:$0xff]  }
0x1211   : > { %v8290_v63 = vpop.xlane.xlu0 %8289  ;;  %10180 = vmatprep.subr.bf16.mxu1 %v10368_v27 }
0x1212   : > { %v8307_v58 = vmul.f32 0.0078125, %v8290_v63  ;;  %v8324_v30 = vmul.f32 %v8244_v33, %v8244_v33  ;;  %v8372_v62 = vsub.f32 %v16736_v6, %v8244_v33  ;;  %10181 = vmatpush3.bf16.msra.mxu1 %v10368_v27 }
0x1213   : > { %v8292_v12 = vpop.xlane.xlu1 %8291  ;;  %10182 = vmatprep.subr.bf16.mxu1 %v10369_v36 }
0x1214   : > { %v8339_v37 = vsub.f32 %v8307_v58, %v8323_v20  ;;  %v8308_v28 = vmul.f32 0.0078125, %v8292_v12 }
0x1216   : > { %v8355_v24 = vmax.f32 %v8339_v37, 0.0  ;;  %v8340_v35 = vsub.f32 %v8308_v28, %v8324_v30  ;;  %v11292_v25 = vpop.eup %11291  ;;  %10183 = vmatpush3.bf16.msra.mxu1 %v10369_v36 }
0x1217   : > { %v8417_v42 = vmul.f32 %v11292_v25, %v8369_v9 }
0x1218   : > { %v8387_v60 = vadd.f32 1e-12, %v8355_v24  ;;  %v8356_v0 = vmax.f32 %v8340_v35, 0.0  ;;  %v11294_v56 = vpop.eup %11293 }
0x1219   : > { %v8418_v5 = vmul.f32 %v11294_v56, %v8370_v40  ;;  %v8433_v10 = vmul.f32 %v8417_v42, %v16747_v7 }
0x121a   : > { %11295 = vrsqrt.f32 %v8387_v60  ;;  %v8388_v14 = vadd.f32 1e-12, %v8356_v0 }
0x121b   : > { %v8434_v38 = vmul.f32 %v8418_v5, %v16747_v7  ;;  %v8449_v1 = vadd.f32 %v8433_v10, %v16754_v34 }
0x121c   : > { %11297 = vrsqrt.f32 %v8388_v14 }
0x121d   : > { %v8450_v8 = vadd.f32 %v8434_v38, %v16754_v34 }
0x121f   : > { %v8459_v48 = vpack.c.bf16 %v8450_v8, %v8449_v1 }
0x1221   : > { %10166 = vmatprep.mubr.bf16.mxu0 %v8459_v48 }
0x1224   : > { %v11296_v19 = vpop.eup %11295 }
0x1225   : > { %v8419_v11 = vmul.f32 %v11296_v19, %v8371_v41 }
0x1226   : > { %v11298_v45 = vpop.eup %11297 }
0x1227   : > { %v8435_v57 = vmul.f32 %v8419_v11, %v16747_v7  ;;  %v8420_v47 = vmul.f32 %v11298_v45, %v8372_v62 }
0x1229   : > { %v8436_v31 = vmul.f32 %v8420_v47, %v16747_v7  ;;  %v8451_v3 = vadd.f32 %v8435_v57, %v16754_v34  ;;  %v10370_v7 = vld [vmem:[%s16886_s4 + $0x74] ss:$8 sps:$4 sm:$0xff]  }
0x122a   : > { %10184 = vmatprep.subr.bf16.mxu1 %v10370_v7 }
0x122b   : > { %v8452_v52 = vadd.f32 %v8436_v31, %v16754_v34  ;;  %10185 = vmatpush3.bf16.msra.mxu1 %v10370_v7  ;;  %v16828_v34 = vld [vmem:[%s16887_s5 + $0x2] ss:$0 sm:$0xff] }
0x122d   : > { %v8460_v6 = vpack.c.bf16 %v8452_v52, %v8451_v3 }
0x122f   : > { %10167 = vmatmul.mubr.bf16.gmra.mrb[76].mxu0 %v8460_v6 }
0x129d   : > { %v10156_v23 = vpop.f32.mrb[64].mxu0 }
0x129e   : > { %v8569_v26 = vadd.f32 %v10156_v23, %v16828_v34  ;;  %v8560_v51 = vpop.f32.mrb[65].mxu0 }
0x129f   : > { %v8561_v54 = vadd.f32 %v8560_v51, %v16828_v34  ;;  %v10157_v13 = vpop.f32.mrb[66].mxu0 }
0x12a0   : > { %11299 = vtanh.f32 %v8569_v26  ;;  %v8572_v39 = vadd.f32 %v10157_v13, %v16828_v34  ;;  %v8563_v16 = vpop.f32.mrb[67].mxu0 }
0x12a1   : > { %11301 = vtanh.f32 %v8561_v54  ;;  %v8564_v17 = vadd.f32 %v8563_v16, %v16828_v34 }
0x12a2   : > { %11303 = vtanh.f32 %v8572_v39 }
0x12a3   : > { %11305 = vtanh.f32 %v8564_v17 }
0x12aa   : > { %v11300_v55 = vpop.eup %11299 }
0x12ab   : > { %v11302_v50 = vpop.eup %11301 }
0x12ac   : > { %v11304_v22 = vpop.eup %11303 }
0x12ad   : > { %v11306_v4 = vpop.eup %11305  ;;  %v8640_v61 = vpack.c.bf16 %v11304_v22, %v11300_v55 }
0x12ae   : > { %v8639_v21 = vpack.c.bf16 %v11306_v4, %v11302_v50 }
0x12b0   : > { %10186 = vmatprep.mubr.bf16.mxu1 %v8639_v21 }
0x12b1   : > { %10187 = vmatmul.mubr.bf16.vlgmr.msra.gmra.mrb[64].mxu1 %v8640_v61 }
0x12c6   : > { %v10160_v46 = vpop.f32.mrb[68].mxu0 }
0x12c7   : > { %v8585_v43 = vadd.f32 %v10160_v46, %v16828_v34  ;;  %v8576_v44 = vpop.f32.mrb[69].mxu0 }
0x12c8   : > { %v8577_v32 = vadd.f32 %v8576_v44, %v16828_v34  ;;  %v10161_v2 = vpop.f32.mrb[70].mxu0 }
0x12c9   : > { %11307 = vtanh.f32 %v8585_v43  ;;  %v8588_v29 = vadd.f32 %v10161_v2, %v16828_v34  ;;  %v8579_v15 = vpop.f32.mrb[71].mxu0 }
0x12ca   : > { %11309 = vtanh.f32 %v8577_v32  ;;  %v8580_v53 = vadd.f32 %v8579_v15, %v16828_v34 }
0x12cb   : > { %11311 = vtanh.f32 %v8588_v29 }
0x12cc   : > { %11313 = vtanh.f32 %v8580_v53 }
0x12d3   : > { %v11308_v59 = vpop.eup %11307 }
0x12d4   : > { %v11310_v33 = vpop.eup %11309 }
0x12d5   : > { %v11312_v63 = vpop.eup %11311 }
0x12d6   : > { %v11314_v20 = vpop.eup %11313  ;;  %v8642_v58 = vpack.c.bf16 %v11312_v63, %v11308_v59 }
0x12d7   : > { %v8641_v12 = vpack.c.bf16 %v11314_v20, %v11310_v33 }
0x12d9   : > { %10190 = vmatprep.mubr.bf16.mxu1 %v8641_v12 }
0x12da   : > { %10191 = vmatmul.mubr.bf16.gmra.mrb[68].mxu1 %v8642_v58 }
0x12e3   : > { %v10164_v30 = vpop.f32.mrb[72].mxu0 }
0x12e4   : > { %v8601_v37 = vadd.f32 %v10164_v30, %v16828_v34  ;;  %v8592_v28 = vpop.f32.mrb[73].mxu0 }
0x12e5   : > { %v8593_v9 = vadd.f32 %v8592_v28, %v16828_v34  ;;  %v10165_v24 = vpop.f32.mrb[74].mxu0 }
0x12e6   : > { %11315 = vtanh.f32 %v8601_v37  ;;  %v8604_v35 = vadd.f32 %v10165_v24, %v16828_v34  ;;  %v8595_v25 = vpop.f32.mrb[75].mxu0 }
0x12e7   : > { %11317 = vtanh.f32 %v8593_v9  ;;  %v8596_v40 = vadd.f32 %v8595_v25, %v16828_v34 }
0x12e8   : > { %11319 = vtanh.f32 %v8604_v35 }
0x12e9   : > { %11321 = vtanh.f32 %v8596_v40 }
0x12f0   : > { %v11316_v60 = vpop.eup %11315 }
0x12f1   : > { %v11318_v0 = vpop.eup %11317 }
0x12f2   : > { %v11320_v42 = vpop.eup %11319 }
0x12f3   : > { %v11322_v56 = vpop.eup %11321  ;;  %v8644_v14 = vpack.c.bf16 %v11320_v42, %v11316_v60 }
0x12f4   : > { %v8643_v5 = vpack.c.bf16 %v11322_v56, %v11318_v0 }
0x12f6   : > { %10194 = vmatprep.mubr.bf16.mxu1 %v8643_v5 }
0x12f7   : > { %10195 = vmatmul.mubr.bf16.gmra.mrb[72].mxu1 %v8644_v14 }
0x1302   : > { %v10168_v10 = vpop.f32.mrb[76].mxu0 }
0x1303   : > { %v8617_v38 = vadd.f32 %v10168_v10, %v16828_v34  ;;  %v8608_v1 = vpop.f32.mrb[77].mxu0 }
0x1304   : > { %v8609_v8 = vadd.f32 %v8608_v1, %v16828_v34  ;;  %v10169_v18 = vpop.f32.mrb[78].mxu0 }
0x1305   : > { %11323 = vtanh.f32 %v8617_v38  ;;  %v8620_v48 = vadd.f32 %v10169_v18, %v16828_v34  ;;  %v8611_v41 = vpop.f32.mrb[79].mxu0 }
0x1306   : > { %11325 = vtanh.f32 %v8609_v8  ;;  %v8612_v19 = vadd.f32 %v8611_v41, %v16828_v34 }
0x1307   : > { %11327 = vtanh.f32 %v8620_v48 }
0x1308   : > { %11329 = vtanh.f32 %v8612_v19 }
0x130f   : > { %v11324_v62 = vpop.eup %11323 }
0x1310   : > { %v11326_v11 = vpop.eup %11325 }
0x1311   : > { %v11328_v45 = vpop.eup %11327 }
0x1312   : > { %v11330_v57 = vpop.eup %11329  ;;  %v8646_v47 = vpack.c.bf16 %v11328_v45, %v11324_v62 }
0x1313   : > { %v8645_v31 = vpack.c.bf16 %v11330_v57, %v11326_v11 }
0x1315   : > { %10198 = vmatprep.mubr.bf16.mxu1 %v8645_v31 }
0x1316   : > { %10199 = vmatmul.mubr.bf16.gmra.mrb[76].mxu1 %v8646_v47 }
0x1384   : > { %v10188_v3 = vpop.f32.mrb[64].mxu1 }
0x1385   : > { %v8755_v52 = vadd.f32 %v10188_v3, %v8663_v49  ;;  %v8746_v27 = vpop.f32.mrb[65].mxu1 }
0x1386   : > { %v8747_v6 = vadd.f32 %v8746_v27, %v8663_v49  ;;  %v10189_v36 = vpop.f32.mrb[66].mxu1 }
0x1387   : > { %8811 = vst [vmem:[%s16854_s11 + $0x10] sm:$0xff] %v8755_v52  ;;  %v8758_v7 = vadd.f32 %v10189_v36, %v8663_v49  ;;  %v8749_v34 = vpop.f32.mrb[67].mxu1 }
0x1388   : > { %8809 = vst [vmem:[%s16854_s11] sm:$0xff] %v8747_v6  ;;  %v8750_v23 = vadd.f32 %v8749_v34, %v8663_v49 }
0x1389   : > { %8812 = vst [vmem:[%s16854_s11 + $0x18] sm:$0xff] %v8758_v7 }
0x138a   : > { %8810 = vst [vmem:[%s16854_s11 + $0x8] sm:$0xff] %v8750_v23 }
0x13ad   : > { %v10192_v26 = vpop.f32.mrb[68].mxu1 }
0x13ae   : > { %v8771_v51 = vadd.f32 %v10192_v26, %v8663_v49  ;;  %v8762_v54 = vpop.f32.mrb[69].mxu1 }
0x13af   : > { %v8763_v13 = vadd.f32 %v8762_v54, %v8663_v49  ;;  %v10193_v39 = vpop.f32.mrb[70].mxu1 }
0x13b0   : > { %8815 = vst [vmem:[%s16854_s11 + $0x30] sm:$0xff] %v8771_v51  ;;  %v8774_v16 = vadd.f32 %v10193_v39, %v8663_v49  ;;  %v8765_v17 = vpop.f32.mrb[71].mxu1 }
0x13b1   : > { %8813 = vst [vmem:[%s16854_s11 + $0x20] sm:$0xff] %v8763_v13  ;;  %v8766_v55 = vadd.f32 %v8765_v17, %v8663_v49 }
0x13b2   : > { %8816 = vst [vmem:[%s16854_s11 + $0x38] sm:$0xff] %v8774_v16 }
0x13b3   : > { %8814 = vst [vmem:[%s16854_s11 + $0x28] sm:$0xff] %v8766_v55 }
0x13ca   : > { %v10196_v50 = vpop.f32.mrb[72].mxu1 }
0x13cb   : > { %v8787_v22 = vadd.f32 %v10196_v50, %v8663_v49  ;;  %v8778_v4 = vpop.f32.mrb[73].mxu1 }
0x13cc   : > { %v8779_v61 = vadd.f32 %v8778_v4, %v8663_v49  ;;  %v10197_v21 = vpop.f32.mrb[74].mxu1 }
0x13cd   : > { %8819 = vst [vmem:[%s16854_s11 + $0x50] sm:$0xff] %v8787_v22  ;;  %v8790_v46 = vadd.f32 %v10197_v21, %v8663_v49  ;;  %v8781_v43 = vpop.f32.mrb[75].mxu1 }
0x13ce   : > { %8817 = vst [vmem:[%s16854_s11 + $0x40] sm:$0xff] %v8779_v61  ;;  %v8782_v44 = vadd.f32 %v8781_v43, %v8663_v49 }
0x13cf   : > { %8820 = vst [vmem:[%s16854_s11 + $0x58] sm:$0xff] %v8790_v46 }
0x13d0   : > { %8818 = vst [vmem:[%s16854_s11 + $0x48] sm:$0xff] %v8782_v44 }
0x13e9   : > { %v10200_v32 = vpop.f32.mrb[76].mxu1 }
0x13ea   : > { %v8803_v2 = vadd.f32 %v10200_v32, %v8663_v49  ;;  %v8794_v29 = vpop.f32.mrb[77].mxu1 }
0x13eb   : > { %v8795_v15 = vadd.f32 %v8794_v29, %v8663_v49  ;;  %v10201_v53 = vpop.f32.mrb[78].mxu1 }
0x13ec   : > { %8823 = vst [vmem:[%s16854_s11 + $0x70] sm:$0xff] %v8803_v2  ;;  %v8806_v59 = vadd.f32 %v10201_v53, %v8663_v49  ;;  %v8797_v33 = vpop.f32.mrb[79].mxu1 }
0x13ed   : > { %8821 = vst [vmem:[%s16854_s11 + $0x60] sm:$0xff] %v8795_v15  ;;  %v8798_v63 = vadd.f32 %v8797_v33, %v8663_v49 }
0x13ee   : > { %8824 = vst [vmem:[%s16854_s11 + $0x78] sm:$0xff] %v8806_v59 }
0x13ef   : > { %8822 = vst [vmem:[%s16854_s11 + $0x68] sm:$0xff] %v8798_v63 }
0x13f0 PF: > { %p13_p9 = scmp.ge.s32.totalorder %s11424_s25, 4   ;;  %s17392_s21 = smov %s11365_s22 }
0x13f1   : > { %s17393_s22 = smov %s11433_s29  ;;  %s17394_s23 = smov %s11424_s25 }
0x13f2   :  { %15 = sbr.rel (!%p13_p9) target bundleno = 2 (0x2), region = 126 }

</bundles_post_ra>
